<compile_context>
chip_gen: v7x
topology: tpu7x:2x2x1
jax: 0.10.0
libtpu: 0.0.40
codegen_flags: <defaults>
</compile_context>

<pallas_src>
import functools

import jax
import jax.numpy as jnp
from jax.experimental import pallas as pl
from jax.experimental.pallas import tpu as pltpu


# ----------------------------------------------------------------------------
# Fused conv(valid, stride 1) + bias + ReLU + 2x2/stride-2 max-pool kernel.
#
# The wrapper feeds a "kw-unrolled" input
#     xu[n, h*Wop + wo, dw*Cin + ci] = x[n, h, wo + dw, ci]
# so the rows needed by conv-output rows [2*Tp*j, 2*Tp*(j+1)) for vertical tap
# dh are the contiguous, sublane-aligned slice
#     xu[n, (2*Tp*j + dh)*Wop : ... + 2*Tp*Wop, :].
# The kernel accumulates the kh taps on the MXU (K = kw*Cin per tap), adds the
# bias, applies ReLU into a VMEM scratch, and max-pools 2x2 directly from that
# scratch with strided reads before storing the pooled block (cropped to the
# true Cout so downstream HBM stays small).
# ----------------------------------------------------------------------------
def _conv_pool_kernel(xu_ref, w_ref, b_ref, out_ref, acc_ref, *,
                      kh, Wop, Tp, Wo2, Cout):
    j = pl.program_id(1)
    R = 2 * Tp * Wop                      # conv rows x padded width per block
    base = 2 * Tp * j                     # first conv output row of this block

    def tap(dh):
        start = pl.multiple_of((base + dh) * Wop, 8)
        a = xu_ref[0, pl.ds(start, R), :]                    # (R, kw*Cin) bf16
        return jnp.dot(a, w_ref[dh], preferred_element_type=jnp.float32)

    acc = tap(0)
    for dh in range(1, kh):               # static, unrolled kh-tap accumulation
        acc = acc + tap(dh)

    # bias + ReLU, parked in VMEM scratch so the pool can do strided reads.
    acc_ref[...] = jnp.maximum(acc + b_ref[...], 0.0)

    # fused 2x2 / stride-2 max-pool + crop of padded wo columns / channels.
    W2 = Wop // 2
    for p in range(Tp):                    # static, <= 9 iterations
        r0 = (2 * p) * Wop
        r1 = (2 * p + 1) * Wop
        q00 = acc_ref[pl.ds(r0, W2, stride=2), :]       # ho even, wo even
        q01 = acc_ref[pl.ds(r0 + 1, W2, stride=2), :]   # ho even, wo odd
        q10 = acc_ref[pl.ds(r1, W2, stride=2), :]       # ho odd,  wo even
        q11 = acc_ref[pl.ds(r1 + 1, W2, stride=2), :]   # ho odd,  wo odd
        pooled = jnp.maximum(jnp.maximum(q00, q01), jnp.maximum(q10, q11))
        out_ref[0, p, :, :] = pooled[:Wo2, :Cout].astype(out_ref.dtype)


def conv_relu_pool(x, w_taps, bias, *, kh, kw, cout, tile_pooled_rows):
    """x: (N,H,W,Cin) f32, w_taps: (kh, kw*Cin, 128) bf16, bias: (1,128) f32.

    Returns maxpool2x2(relu(conv_valid(x) + bias)) as (N, Ho//2, Wo//2, cout).
    """
    N, H, W, Cin = x.shape
    Ho, Wo = H - kh + 1, W - kw + 1
    Wop = ((Wo + 7) // 8) * 8             # pad conv width to a sublane multiple
    need_w = Wop + kw - 1
    if need_w > W:
        x = jnp.pad(x, ((0, 0), (0, 0), (0, need_w - W), (0, 0)))

    # kw-unroll (small layout glue, ~kw x a tiny input; no 25x im2col in HBM).
    cols = [x[:, :, dw:dw + Wop, :] for dw in range(kw)]
    xu = jnp.stack(cols, axis=3).reshape(N, H * Wop, kw * Cin)
    xu = xu.astype(jnp.bfloat16)

    Hp, Wo2 = Ho // 2, Wo // 2
    Tp = tile_pooled_rows
    assert Ho % 2 == 0 and Wo % 2 == 0 and Hp % Tp == 0

    kernel = functools.partial(_conv_pool_kernel, kh=kh, Wop=Wop, Tp=Tp,
                               Wo2=Wo2, Cout=cout)
    return pl.pallas_call(
        kernel,
        out_shape=jax.ShapeDtypeStruct((N, Hp, Wo2, cout), jnp.float32),
        grid_spec=pltpu.PrefetchScalarGridSpec(
            num_scalar_prefetch=0,
            grid=(N, Hp // Tp),
            in_specs=[
                # whole per-sample slab; constant over j -> stays VMEM-resident
                pl.BlockSpec((1, H * Wop, kw * Cin), lambda n, j: (n, 0, 0)),
                pl.BlockSpec((kh, kw * Cin, 128), lambda n, j: (0, 0, 0)),
                pl.BlockSpec((1, 128), lambda n, j: (0, 0)),
            ],
            out_specs=pl.BlockSpec((1, Tp, Wo2, cout),
                                   lambda n, j: (n, j, 0, 0)),
            scratch_shapes=[pltpu.VMEM((2 * Tp * Wop, 128), jnp.float32)],
        ),
        compiler_params=pltpu.CompilerParams(
            dimension_semantics=("parallel", "parallel")),
    )(xu, w_taps, bias)


# ----------------------------------------------------------------------------
# Fused MLP head: relu(x@W1+b1) -> relu(.@W2+b2) -> .@W3+b3
# fc1's K=20736 contraction is tiled over the grid so the bf16 fc1 weight
# streams block-by-block and overlaps with the MXU (scratch accumulator).
# ----------------------------------------------------------------------------
def _mlp_head_kernel(x_ref, w1_ref, b1_ref, w2_ref, b2_ref, w3_ref, b3_ref,
                     out_ref, acc_ref):
    k = pl.program_id(0)

    @pl.when(k == 0)
    def _init():
        acc_ref[...] = jnp.zeros_like(acc_ref)

    acc_ref[...] += jnp.dot(x_ref[...].astype(jnp.bfloat16), w1_ref[...],
                            preferred_element_type=jnp.float32)

    @pl.when(k == pl.num_programs(0) - 1)
    def _finalize():
        h1 = jnp.maximum(acc_ref[...] + b1_ref[...], 0.0)
        h2 = jnp.dot(h1.astype(jnp.bfloat16), w2_ref[...],
                     preferred_element_type=jnp.float32) + b2_ref[...]
        h2 = jnp.maximum(h2, 0.0)
        out = jnp.dot(h2.astype(jnp.bfloat16), w3_ref[...],
                      preferred_element_type=jnp.float32) + b3_ref[...]
        out_ref[...] = out.astype(out_ref.dtype)


def mlp_head(x, w1, b1, w2, b2, w3, b3, *, k_blocks=9):
    M, K = x.shape
    H1, H2, NOUT = w1.shape[1], w2.shape[1], w3.shape[1]
    assert K % k_blocks == 0
    kt = K // k_blocks
    assert kt % 128 == 0                   # lane-aligned K tiles
    return pl.pallas_call(
        _mlp_head_kernel,
        out_shape=jax.ShapeDtypeStruct((M, NOUT), jnp.float32),
        grid_spec=pltpu.PrefetchScalarGridSpec(
            num_scalar_prefetch=0,
            grid=(k_blocks,),
            in_specs=[
                pl.BlockSpec((M, kt), lambda k: (0, k)),      # activation tile
                pl.BlockSpec((kt, H1), lambda k: (k, 0)),     # fc1 weight tile
                pl.BlockSpec((1, H1), lambda k: (0, 0)),
                pl.BlockSpec((H1, H2), lambda k: (0, 0)),     # resident fc2/fc3
                pl.BlockSpec((1, H2), lambda k: (0, 0)),
                pl.BlockSpec((H2, NOUT), lambda k: (0, 0)),
                pl.BlockSpec((1, NOUT), lambda k: (0, 0)),
            ],
            out_specs=pl.BlockSpec((M, NOUT), lambda k: (0, 0)),
            scratch_shapes=[pltpu.VMEM((M, H1), jnp.float32)],
        ),
        compiler_params=pltpu.CompilerParams(
            dimension_semantics=("arbitrary",)),
    )(x, w1, b1, w2, b2, w3, b3)


# ----------------------------------------------------------------------------
# Forward pass (matches the PyTorch module's semantics)
# ----------------------------------------------------------------------------
def cnn_forward(x_nchw, p):
    # NCHW (PyTorch) -> NHWC (channels on TPU lanes); one small XLA transpose.
    x = jnp.transpose(x_nchw, (0, 2, 3, 1)).astype(jnp.float32)    # (N,84,84,4)
    x = conv_relu_pool(x, p["w1"], p["b1"], kh=5, kw=5, cout=32,
                       tile_pooled_rows=8)                         # (N,40,40,32)
    x = conv_relu_pool(x, p["w2"], p["b2"], kh=5, kw=5, cout=64,
                       tile_pooled_rows=9)                         # (N,18,18,64)
    # Flatten in NHWC order; fc1 rows were permuted to match at prep time, so
    # no runtime NHWC->NCHW transpose is needed.
    x = x.reshape(x.shape[0], -1)                                  # (N, 20736)
    out = mlp_head(x, p["fw1"], p["fb1"], p["fw2"], p["fb2"],
                   p["fw3"], p["fb3"])                             # (N, 4)
    # torch: x.squeeze(0)  (no-op unless batch == 1)
    return out[0] if out.shape[0] == 1 else out


# ----------------------------------------------------------------------------
# One-time (offline) parameter re-layout: torch layouts -> kernel layouts
# ----------------------------------------------------------------------------
def _prep_conv(w_oihw, b):
    """(Cout,Cin,KH,KW) torch conv weight -> (KH, KW*Cin, 128) bf16, (1,128) f32."""
    co, ci, kh, kw = w_oihw.shape
    w_taps = jnp.transpose(w_oihw, (2, 3, 1, 0)).reshape(kh, kw * ci, co)
    w_taps = jnp.pad(w_taps, ((0, 0), (0, 0), (0, 128 - co))).astype(jnp.bfloat16)
    bias = jnp.pad(b.reshape(1, co), ((0, 0), (0, 128 - co))).astype(jnp.float32)
    return w_taps, bias


def prepare_params(tp):
    w1, b1 = _prep_conv(tp["conv1_w"], tp["conv1_b"])
    w2, b2 = _prep_conv(tp["conv2_w"], tp["conv2_b"])

    # fc1: torch stores (out=120, in=20736) with the input flattened in NCHW
    # (c,h,w) order; our kernels produce NHWC, so permute the input axis to
    # (h,w,c) order once here, transpose to (in,out), pad out 120 -> 128.
    fw1 = tp["fc1_w"].reshape(120, 64, 18, 18).transpose(2, 3, 1, 0)
    fw1 = fw1.reshape(18 * 18 * 64, 120)
    fw1 = jnp.pad(fw1, ((0, 0), (0, 8))).astype(jnp.bfloat16)        # (20736,128)
    fb1 = jnp.pad(tp["fc1_b"].reshape(1, 120), ((0, 0), (0, 8))).astype(jnp.float32)

    fw2 = jnp.pad(tp["fc2_w"].T, ((0, 8), (0, 44))).astype(jnp.bfloat16)   # (128,128)
    fb2 = jnp.pad(tp["fc2_b"].reshape(1, 84), ((0, 0), (0, 44))).astype(jnp.float32)

    fw3 = jnp.pad(tp["fc3_w"].T, ((0, 44), (0, 0))).astype(jnp.bfloat16)   # (128,4)
    fb3 = tp["fc3_b"].reshape(1, 4).astype(jnp.float32)

    return {"w1": w1, "b1": b1, "w2": w2, "b2": b2,
            "fw1": fw1, "fb1": fb1, "fw2": fw2, "fb2": fb2,
            "fw3": fw3, "fb3": fb3}


# ----------------------------------------------------------------------------
# Deterministic parameter init (same shapes/layout as the nn.Module)
# ----------------------------------------------------------------------------
def init_params(key):
    ks = jax.random.split(key, 10)

    def u(k, shape, fan_in):
        bound = 1.0 / float(fan_in) ** 0.5
        return jax.random.uniform(k, shape, jnp.float32, -bound, bound)

    return {
        "conv1_w": u(ks[0], (32, 4, 5, 5), 4 * 25),        # Conv2d(4, 32, 5)
        "conv1_b": u(ks[1], (32,), 4 * 25),
        "conv2_w": u(ks[2], (64, 32, 5, 5), 32 * 25),      # Conv2d(32, 64, 5)
        "conv2_b": u(ks[3], (64,), 32 * 25),
        "fc1_w": u(ks[4], (120, 64 * 18 * 18), 64 * 18 * 18),
        "fc1_b": u(ks[5], (120,), 64 * 18 * 18),
        "fc2_w": u(ks[6], (84, 120), 120),
        "fc2_b": u(ks[7], (84,), 120),
        "fc3_w": u(ks[8], (4, 84), 84),
        "fc3_b": u(ks[9], (4,), 84),
    }


if __name__ == "__main__":
    key = jax.random.PRNGKey(0)
    kx, kp = jax.random.split(key)
    # 84x84 spatial is what fc1 = Linear(64*18*18, 120) implies; batch = 2.
    x = jax.random.normal(kx, (2, 4, 84, 84), jnp.float32)   # NCHW like PyTorch
    params = prepare_params(init_params(kp))

    fwd = jax.jit(cnn_forward)
    out = jax.block_until_ready(fwd(x, params))
    assert out.shape == (2, 4) and out.dtype == jnp.float32
    print("KERNEL_OK")
</pallas_src>

<mosaic_0001>
module attributes {stable_mosaic.version = 11 : i64} {
  func.func @_conv_pool_kernel(%arg0: i32, %arg1: i32, %arg2: memref<1x6720x20xbf16, #tpu.memory_space<vmem>>, %arg3: memref<5x20x128xbf16, #tpu.memory_space<vmem>>, %arg4: memref<1x128xf32, #tpu.memory_space<vmem>>, %arg5: memref<1x8x40x32xf32, #tpu.memory_space<vmem>>, %arg6: memref<1280x128xf32, #tpu.memory_space<vmem>>) attributes {dimension_semantics = [#tpu.dimension_semantics<parallel>, #tpu.dimension_semantics<parallel>], iteration_bounds = array<i64: 2, 5>, scalar_prefetch = 0 : i64, scratch_operands = 1 : i64, tpu.core_type = #tpu.core_type<tc>, window_params = [{transform_indices = @transform_0, window_bounds = array<i64: 1, 6720, 20>}, {pipeline_mode = #tpu.pipeline_mode<synchronous>, transform_indices = @transform_1, window_bounds = array<i64: 5, 20, 128>}, {pipeline_mode = #tpu.pipeline_mode<synchronous>, transform_indices = @transform_2, window_bounds = array<i64: 1, 128>}, {transform_indices = @transform_3, window_bounds = array<i64: 1, 8, 40, 32>}]} {
    %c16_i32 = arith.constant 16 : i32
    %0 = arith.muli %c16_i32, %arg1 : i32
    %c0_i32 = arith.constant 0 : i32
    %1 = arith.addi %0, %c0_i32 : i32
    %c80_i32 = arith.constant 80 : i32
    %2 = arith.muli %1, %c80_i32 : i32
    %3 = tpu.assume_multiple %2, 8 : i32
    %c0 = arith.constant 0 : index
    %4 = arith.index_cast %3 : i32 to index
    %c0_0 = arith.constant 0 : index
    %5 = vector.load %arg2[%c0, %4, %c0_0] : memref<1x6720x20xbf16, #tpu.memory_space<vmem>>, vector<1x1280x20xbf16>
    %6 = vector.shape_cast %5 : vector<1x1280x20xbf16> to vector<1280x20xbf16>
    %c0_1 = arith.constant 0 : index
    %c0_2 = arith.constant 0 : index
    %c0_3 = arith.constant 0 : index
    %7 = vector.load %arg3[%c0_1, %c0_2, %c0_3] : memref<5x20x128xbf16, #tpu.memory_space<vmem>>, vector<1x20x128xbf16>
    %8 = vector.shape_cast %7 : vector<1x20x128xbf16> to vector<20x128xbf16>
    %cst = arith.constant dense<0.000000e+00> : vector<1280x128xf32>
    %9 = tpu.matmul %6, %8, %cst {dimension_numbers = #tpu.dot_dimension_numbers<[1], [0], [0], [1], [0, 0, 1, 1], [], []>} : vector<1280x20xbf16>, vector<20x128xbf16>, vector<1280x128xf32> -> vector<1280x128xf32>
    %c1_i32 = arith.constant 1 : i32
    %10 = arith.addi %0, %c1_i32 : i32
    %c80_i32_4 = arith.constant 80 : i32
    %11 = arith.muli %10, %c80_i32_4 : i32
    %12 = tpu.assume_multiple %11, 8 : i32
    %c0_5 = arith.constant 0 : index
    %13 = arith.index_cast %12 : i32 to index
    %c0_6 = arith.constant 0 : index
    %14 = vector.load %arg2[%c0_5, %13, %c0_6] : memref<1x6720x20xbf16, #tpu.memory_space<vmem>>, vector<1x1280x20xbf16>
    %15 = vector.shape_cast %14 : vector<1x1280x20xbf16> to vector<1280x20xbf16>
    %c1 = arith.constant 1 : index
    %c0_7 = arith.constant 0 : index
    %c0_8 = arith.constant 0 : index
    %16 = vector.load %arg3[%c1, %c0_7, %c0_8] : memref<5x20x128xbf16, #tpu.memory_space<vmem>>, vector<1x20x128xbf16>
    %17 = vector.shape_cast %16 : vector<1x20x128xbf16> to vector<20x128xbf16>
    %cst_9 = arith.constant dense<0.000000e+00> : vector<1280x128xf32>
    %18 = tpu.matmul %15, %17, %cst_9 {dimension_numbers = #tpu.dot_dimension_numbers<[1], [0], [0], [1], [0, 0, 1, 1], [], []>} : vector<1280x20xbf16>, vector<20x128xbf16>, vector<1280x128xf32> -> vector<1280x128xf32>
    %19 = arith.addf %9, %18 : vector<1280x128xf32>
    %c2_i32 = arith.constant 2 : i32
    %20 = arith.addi %0, %c2_i32 : i32
    %c80_i32_10 = arith.constant 80 : i32
    %21 = arith.muli %20, %c80_i32_10 : i32
    %22 = tpu.assume_multiple %21, 8 : i32
    %c0_11 = arith.constant 0 : index
    %23 = arith.index_cast %22 : i32 to index
    %c0_12 = arith.constant 0 : index
    %24 = vector.load %arg2[%c0_11, %23, %c0_12] : memref<1x6720x20xbf16, #tpu.memory_space<vmem>>, vector<1x1280x20xbf16>
    %25 = vector.shape_cast %24 : vector<1x1280x20xbf16> to vector<1280x20xbf16>
    %c2 = arith.constant 2 : index
    %c0_13 = arith.constant 0 : index
    %c0_14 = arith.constant 0 : index
    %26 = vector.load %arg3[%c2, %c0_13, %c0_14] : memref<5x20x128xbf16, #tpu.memory_space<vmem>>, vector<1x20x128xbf16>
    %27 = vector.shape_cast %26 : vector<1x20x128xbf16> to vector<20x128xbf16>
    %cst_15 = arith.constant dense<0.000000e+00> : vector<1280x128xf32>
    %28 = tpu.matmul %25, %27, %cst_15 {dimension_numbers = #tpu.dot_dimension_numbers<[1], [0], [0], [1], [0, 0, 1, 1], [], []>} : vector<1280x20xbf16>, vector<20x128xbf16>, vector<1280x128xf32> -> vector<1280x128xf32>
    %29 = arith.addf %19, %28 : vector<1280x128xf32>
    %c3_i32 = arith.constant 3 : i32
    %30 = arith.addi %0, %c3_i32 : i32
    %c80_i32_16 = arith.constant 80 : i32
    %31 = arith.muli %30, %c80_i32_16 : i32
    %32 = tpu.assume_multiple %31, 8 : i32
    %c0_17 = arith.constant 0 : index
    %33 = arith.index_cast %32 : i32 to index
    %c0_18 = arith.constant 0 : index
    %34 = vector.load %arg2[%c0_17, %33, %c0_18] : memref<1x6720x20xbf16, #tpu.memory_space<vmem>>, vector<1x1280x20xbf16>
    %35 = vector.shape_cast %34 : vector<1x1280x20xbf16> to vector<1280x20xbf16>
    %c3 = arith.constant 3 : index
    %c0_19 = arith.constant 0 : index
    %c0_20 = arith.constant 0 : index
    %36 = vector.load %arg3[%c3, %c0_19, %c0_20] : memref<5x20x128xbf16, #tpu.memory_space<vmem>>, vector<1x20x128xbf16>
    %37 = vector.shape_cast %36 : vector<1x20x128xbf16> to vector<20x128xbf16>
    %cst_21 = arith.constant dense<0.000000e+00> : vector<1280x128xf32>
    %38 = tpu.matmul %35, %37, %cst_21 {dimension_numbers = #tpu.dot_dimension_numbers<[1], [0], [0], [1], [0, 0, 1, 1], [], []>} : vector<1280x20xbf16>, vector<20x128xbf16>, vector<1280x128xf32> -> vector<1280x128xf32>
    %39 = arith.addf %29, %38 : vector<1280x128xf32>
    %c4_i32 = arith.constant 4 : i32
    %40 = arith.addi %0, %c4_i32 : i32
    %c80_i32_22 = arith.constant 80 : i32
    %41 = arith.muli %40, %c80_i32_22 : i32
    %42 = tpu.assume_multiple %41, 8 : i32
    %c0_23 = arith.constant 0 : index
    %43 = arith.index_cast %42 : i32 to index
    %c0_24 = arith.constant 0 : index
    %44 = vector.load %arg2[%c0_23, %43, %c0_24] : memref<1x6720x20xbf16, #tpu.memory_space<vmem>>, vector<1x1280x20xbf16>
    %45 = vector.shape_cast %44 : vector<1x1280x20xbf16> to vector<1280x20xbf16>
    %c4 = arith.constant 4 : index
    %c0_25 = arith.constant 0 : index
    %c0_26 = arith.constant 0 : index
    %46 = vector.load %arg3[%c4, %c0_25, %c0_26] : memref<5x20x128xbf16, #tpu.memory_space<vmem>>, vector<1x20x128xbf16>
    %47 = vector.shape_cast %46 : vector<1x20x128xbf16> to vector<20x128xbf16>
    %cst_27 = arith.constant dense<0.000000e+00> : vector<1280x128xf32>
    %48 = tpu.matmul %45, %47, %cst_27 {dimension_numbers = #tpu.dot_dimension_numbers<[1], [0], [0], [1], [0, 0, 1, 1], [], []>} : vector<1280x20xbf16>, vector<20x128xbf16>, vector<1280x128xf32> -> vector<1280x128xf32>
    %49 = arith.addf %39, %48 : vector<1280x128xf32>
    %c0_28 = arith.constant 0 : index
    %c0_29 = arith.constant 0 : index
    %50 = vector.load %arg4[%c0_28, %c0_29] : memref<1x128xf32, #tpu.memory_space<vmem>>, vector<1x128xf32>
    %51 = vector.broadcast %50 : vector<1x128xf32> to vector<1280x128xf32>
    %52 = arith.addf %49, %51 : vector<1280x128xf32>
    %cst_30 = arith.constant 0.000000e+00 : f32
    %53 = vector.broadcast %cst_30 : f32 to vector<1280x128xf32>
    %54 = arith.maximumf %52, %53 : vector<1280x128xf32>
    %c0_31 = arith.constant 0 : index
    %c0_32 = arith.constant 0 : index
    %55 = vector.load %arg6[%c0_31, %c0_32] : memref<1280x128xf32, #tpu.memory_space<vmem>>, vector<1280x128xf32>
    tpu.vector_store %arg6[%c0_31, %c0_32], %54 {strides = array<i32>} : memref<1280x128xf32, #tpu.memory_space<vmem>>, vector<1280x128xf32>,
    %c0_33 = arith.constant 0 : index
    %c0_34 = arith.constant 0 : index
    %56 = tpu.strided_load %arg6[%c0_33, %c0_34] {strides = array<i32: 2, 1>} : memref<1280x128xf32, #tpu.memory_space<vmem>>, vector<40x128xf32>
    %c1_35 = arith.constant 1 : index
    %c0_36 = arith.constant 0 : index
    %57 = tpu.strided_load %arg6[%c1_35, %c0_36] {strides = array<i32: 2, 1>} : memref<1280x128xf32, #tpu.memory_space<vmem>>, vector<40x128xf32>
    %c80 = arith.constant 80 : index
    %c0_37 = arith.constant 0 : index
    %58 = tpu.strided_load %arg6[%c80, %c0_37] {strides = array<i32: 2, 1>} : memref<1280x128xf32, #tpu.memory_space<vmem>>, vector<40x128xf32>
    %c81 = arith.constant 81 : index
    %c0_38 = arith.constant 0 : index
    %59 = tpu.strided_load %arg6[%c81, %c0_38] {strides = array<i32: 2, 1>} : memref<1280x128xf32, #tpu.memory_space<vmem>>, vector<40x128xf32>
    %60 = arith.maximumf %56, %57 : vector<40x128xf32>
    %61 = arith.maximumf %58, %59 : vector<40x128xf32>
    %62 = arith.maximumf %60, %61 : vector<40x128xf32>
    %63 = vector.extract_strided_slice %62 {offsets = [0, 0], sizes = [40, 32], strides = [1, 1]} : vector<40x128xf32> to vector<40x32xf32>
    %c0_39 = arith.constant 0 : index
    %c0_40 = arith.constant 0 : index
    %c0_41 = arith.constant 0 : index
    %c0_42 = arith.constant 0 : index
    %64 = vector.load %arg5[%c0_39, %c0_40, %c0_41, %c0_42] : memref<1x8x40x32xf32, #tpu.memory_space<vmem>>, vector<1x1x40x32xf32>
    %65 = vector.shape_cast %64 : vector<1x1x40x32xf32> to vector<40x32xf32>
    %66 = vector.shape_cast %63 : vector<40x32xf32> to vector<1x1x40x32xf32>
    tpu.vector_store %arg5[%c0_39, %c0_40, %c0_41, %c0_42], %66 {strides = array<i32>} : memref<1x8x40x32xf32, #tpu.memory_space<vmem>>, vector<1x1x40x32xf32>,
    %c160 = arith.constant 160 : index
    %c0_43 = arith.constant 0 : index
    %67 = tpu.strided_load %arg6[%c160, %c0_43] {strides = array<i32: 2, 1>} : memref<1280x128xf32, #tpu.memory_space<vmem>>, vector<40x128xf32>
    %c161 = arith.constant 161 : index
    %c0_44 = arith.constant 0 : index
    %68 = tpu.strided_load %arg6[%c161, %c0_44] {strides = array<i32: 2, 1>} : memref<1280x128xf32, #tpu.memory_space<vmem>>, vector<40x128xf32>
    %c240 = arith.constant 240 : index
    %c0_45 = arith.constant 0 : index
    %69 = tpu.strided_load %arg6[%c240, %c0_45] {strides = array<i32: 2, 1>} : memref<1280x128xf32, #tpu.memory_space<vmem>>, vector<40x128xf32>
    %c241 = arith.constant 241 : index
    %c0_46 = arith.constant 0 : index
    %70 = tpu.strided_load %arg6[%c241, %c0_46] {strides = array<i32: 2, 1>} : memref<1280x128xf32, #tpu.memory_space<vmem>>, vector<40x128xf32>
    %71 = arith.maximumf %67, %68 : vector<40x128xf32>
    %72 = arith.maximumf %69, %70 : vector<40x128xf32>
    %73 = arith.maximumf %71, %72 : vector<40x128xf32>
    %74 = vector.extract_strided_slice %73 {offsets = [0, 0], sizes = [40, 32], strides = [1, 1]} : vector<40x128xf32> to vector<40x32xf32>
    %c0_47 = arith.constant 0 : index
    %c1_48 = arith.constant 1 : index
    %c0_49 = arith.constant 0 : index
    %c0_50 = arith.constant 0 : index
    %75 = vector.load %arg5[%c0_47, %c1_48, %c0_49, %c0_50] : memref<1x8x40x32xf32, #tpu.memory_space<vmem>>, vector<1x1x40x32xf32>
    %76 = vector.shape_cast %75 : vector<1x1x40x32xf32> to vector<40x32xf32>
    %77 = vector.shape_cast %74 : vector<40x32xf32> to vector<1x1x40x32xf32>
    tpu.vector_store %arg5[%c0_47, %c1_48, %c0_49, %c0_50], %77 {strides = array<i32>} : memref<1x8x40x32xf32, #tpu.memory_space<vmem>>, vector<1x1x40x32xf32>,
    %c320 = arith.constant 320 : index
    %c0_51 = arith.constant 0 : index
    %78 = tpu.strided_load %arg6[%c320, %c0_51] {strides = array<i32: 2, 1>} : memref<1280x128xf32, #tpu.memory_space<vmem>>, vector<40x128xf32>
    %c321 = arith.constant 321 : index
    %c0_52 = arith.constant 0 : index
    %79 = tpu.strided_load %arg6[%c321, %c0_52] {strides = array<i32: 2, 1>} : memref<1280x128xf32, #tpu.memory_space<vmem>>, vector<40x128xf32>
    %c400 = arith.constant 400 : index
    %c0_53 = arith.constant 0 : index
    %80 = tpu.strided_load %arg6[%c400, %c0_53] {strides = array<i32: 2, 1>} : memref<1280x128xf32, #tpu.memory_space<vmem>>, vector<40x128xf32>
    %c401 = arith.constant 401 : index
    %c0_54 = arith.constant 0 : index
    %81 = tpu.strided_load %arg6[%c401, %c0_54] {strides = array<i32: 2, 1>} : memref<1280x128xf32, #tpu.memory_space<vmem>>, vector<40x128xf32>
    %82 = arith.maximumf %78, %79 : vector<40x128xf32>
    %83 = arith.maximumf %80, %81 : vector<40x128xf32>
    %84 = arith.maximumf %82, %83 : vector<40x128xf32>
    %85 = vector.extract_strided_slice %84 {offsets = [0, 0], sizes = [40, 32], strides = [1, 1]} : vector<40x128xf32> to vector<40x32xf32>
    %c0_55 = arith.constant 0 : index
    %c2_56 = arith.constant 2 : index
    %c0_57 = arith.constant 0 : index
    %c0_58 = arith.constant 0 : index
    %86 = vector.load %arg5[%c0_55, %c2_56, %c0_57, %c0_58] : memref<1x8x40x32xf32, #tpu.memory_space<vmem>>, vector<1x1x40x32xf32>
    %87 = vector.shape_cast %86 : vector<1x1x40x32xf32> to vector<40x32xf32>
    %88 = vector.shape_cast %85 : vector<40x32xf32> to vector<1x1x40x32xf32>
    tpu.vector_store %arg5[%c0_55, %c2_56, %c0_57, %c0_58], %88 {strides = array<i32>} : memref<1x8x40x32xf32, #tpu.memory_space<vmem>>, vector<1x1x40x32xf32>,
    %c480 = arith.constant 480 : index
    %c0_59 = arith.constant 0 : index
    %89 = tpu.strided_load %arg6[%c480, %c0_59] {strides = array<i32: 2, 1>} : memref<1280x128xf32, #tpu.memory_space<vmem>>, vector<40x128xf32>
    %c481 = arith.constant 481 : index
    %c0_60 = arith.constant 0 : index
    %90 = tpu.strided_load %arg6[%c481, %c0_60] {strides = array<i32: 2, 1>} : memref<1280x128xf32, #tpu.memory_space<vmem>>, vector<40x128xf32>
    %c560 = arith.constant 560 : index
    %c0_61 = arith.constant 0 : index
    %91 = tpu.strided_load %arg6[%c560, %c0_61] {strides = array<i32: 2, 1>} : memref<1280x128xf32, #tpu.memory_space<vmem>>, vector<40x128xf32>
    %c561 = arith.constant 561 : index
    %c0_62 = arith.constant 0 : index
    %92 = tpu.strided_load %arg6[%c561, %c0_62] {strides = array<i32: 2, 1>} : memref<1280x128xf32, #tpu.memory_space<vmem>>, vector<40x128xf32>
    %93 = arith.maximumf %89, %90 : vector<40x128xf32>
    %94 = arith.maximumf %91, %92 : vector<40x128xf32>
    %95 = arith.maximumf %93, %94 : vector<40x128xf32>
    %96 = vector.extract_strided_slice %95 {offsets = [0, 0], sizes = [40, 32], strides = [1, 1]} : vector<40x128xf32> to vector<40x32xf32>
    %c0_63 = arith.constant 0 : index
    %c3_64 = arith.constant 3 : index
    %c0_65 = arith.constant 0 : index
    %c0_66 = arith.constant 0 : index
    %97 = vector.load %arg5[%c0_63, %c3_64, %c0_65, %c0_66] : memref<1x8x40x32xf32, #tpu.memory_space<vmem>>, vector<1x1x40x32xf32>
    %98 = vector.shape_cast %97 : vector<1x1x40x32xf32> to vector<40x32xf32>
    %99 = vector.shape_cast %96 : vector<40x32xf32> to vector<1x1x40x32xf32>
    tpu.vector_store %arg5[%c0_63, %c3_64, %c0_65, %c0_66], %99 {strides = array<i32>} : memref<1x8x40x32xf32, #tpu.memory_space<vmem>>, vector<1x1x40x32xf32>,
    %c640 = arith.constant 640 : index
    %c0_67 = arith.constant 0 : index
    %100 = tpu.strided_load %arg6[%c640, %c0_67] {strides = array<i32: 2, 1>} : memref<1280x128xf32, #tpu.memory_space<vmem>>, vector<40x128xf32>
    %c641 = arith.constant 641 : index
    %c0_68 = arith.constant 0 : index
    %101 = tpu.strided_load %arg6[%c641, %c0_68] {strides = array<i32: 2, 1>} : memref<1280x128xf32, #tpu.memory_space<vmem>>, vector<40x128xf32>
    %c720 = arith.constant 720 : index
    %c0_69 = arith.constant 0 : index
    %102 = tpu.strided_load %arg6[%c720, %c0_69] {strides = array<i32: 2, 1>} : memref<1280x128xf32, #tpu.memory_space<vmem>>, vector<40x128xf32>
    %c721 = arith.constant 721 : index
    %c0_70 = arith.constant 0 : index
    %103 = tpu.strided_load %arg6[%c721, %c0_70] {strides = array<i32: 2, 1>} : memref<1280x128xf32, #tpu.memory_space<vmem>>, vector<40x128xf32>
    %104 = arith.maximumf %100, %101 : vector<40x128xf32>
    %105 = arith.maximumf %102, %103 : vector<40x128xf32>
    %106 = arith.maximumf %104, %105 : vector<40x128xf32>
    %107 = vector.extract_strided_slice %106 {offsets = [0, 0], sizes = [40, 32], strides = [1, 1]} : vector<40x128xf32> to vector<40x32xf32>
    %c0_71 = arith.constant 0 : index
    %c4_72 = arith.constant 4 : index
    %c0_73 = arith.constant 0 : index
    %c0_74 = arith.constant 0 : index
    %108 = vector.load %arg5[%c0_71, %c4_72, %c0_73, %c0_74] : memref<1x8x40x32xf32, #tpu.memory_space<vmem>>, vector<1x1x40x32xf32>
    %109 = vector.shape_cast %108 : vector<1x1x40x32xf32> to vector<40x32xf32>
    %110 = vector.shape_cast %107 : vector<40x32xf32> to vector<1x1x40x32xf32>
    tpu.vector_store %arg5[%c0_71, %c4_72, %c0_73, %c0_74], %110 {strides = array<i32>} : memref<1x8x40x32xf32, #tpu.memory_space<vmem>>, vector<1x1x40x32xf32>,
    %c800 = arith.constant 800 : index
    %c0_75 = arith.constant 0 : index
    %111 = tpu.strided_load %arg6[%c800, %c0_75] {strides = array<i32: 2, 1>} : memref<1280x128xf32, #tpu.memory_space<vmem>>, vector<40x128xf32>
    %c801 = arith.constant 801 : index
    %c0_76 = arith.constant 0 : index
    %112 = tpu.strided_load %arg6[%c801, %c0_76] {strides = array<i32: 2, 1>} : memref<1280x128xf32, #tpu.memory_space<vmem>>, vector<40x128xf32>
    %c880 = arith.constant 880 : index
    %c0_77 = arith.constant 0 : index
    %113 = tpu.strided_load %arg6[%c880, %c0_77] {strides = array<i32: 2, 1>} : memref<1280x128xf32, #tpu.memory_space<vmem>>, vector<40x128xf32>
    %c881 = arith.constant 881 : index
    %c0_78 = arith.constant 0 : index
    %114 = tpu.strided_load %arg6[%c881, %c0_78] {strides = array<i32: 2, 1>} : memref<1280x128xf32, #tpu.memory_space<vmem>>, vector<40x128xf32>
    %115 = arith.maximumf %111, %112 : vector<40x128xf32>
    %116 = arith.maximumf %113, %114 : vector<40x128xf32>
    %117 = arith.maximumf %115, %116 : vector<40x128xf32>
    %118 = vector.extract_strided_slice %117 {offsets = [0, 0], sizes = [40, 32], strides = [1, 1]} : vector<40x128xf32> to vector<40x32xf32>
    %c0_79 = arith.constant 0 : index
    %c5 = arith.constant 5 : index
    %c0_80 = arith.constant 0 : index
    %c0_81 = arith.constant 0 : index
    %119 = vector.load %arg5[%c0_79, %c5, %c0_80, %c0_81] : memref<1x8x40x32xf32, #tpu.memory_space<vmem>>, vector<1x1x40x32xf32>
    %120 = vector.shape_cast %119 : vector<1x1x40x32xf32> to vector<40x32xf32>
    %121 = vector.shape_cast %118 : vector<40x32xf32> to vector<1x1x40x32xf32>
    tpu.vector_store %arg5[%c0_79, %c5, %c0_80, %c0_81], %121 {strides = array<i32>} : memref<1x8x40x32xf32, #tpu.memory_space<vmem>>, vector<1x1x40x32xf32>,
    %c960 = arith.constant 960 : index
    %c0_82 = arith.constant 0 : index
    %122 = tpu.strided_load %arg6[%c960, %c0_82] {strides = array<i32: 2, 1>} : memref<1280x128xf32, #tpu.memory_space<vmem>>, vector<40x128xf32>
    %c961 = arith.constant 961 : index
    %c0_83 = arith.constant 0 : index
    %123 = tpu.strided_load %arg6[%c961, %c0_83] {strides = array<i32: 2, 1>} : memref<1280x128xf32, #tpu.memory_space<vmem>>, vector<40x128xf32>
    %c1040 = arith.constant 1040 : index
    %c0_84 = arith.constant 0 : index
    %124 = tpu.strided_load %arg6[%c1040, %c0_84] {strides = array<i32: 2, 1>} : memref<1280x128xf32, #tpu.memory_space<vmem>>, vector<40x128xf32>
    %c1041 = arith.constant 1041 : index
    %c0_85 = arith.constant 0 : index
    %125 = tpu.strided_load %arg6[%c1041, %c0_85] {strides = array<i32: 2, 1>} : memref<1280x128xf32, #tpu.memory_space<vmem>>, vector<40x128xf32>
    %126 = arith.maximumf %122, %123 : vector<40x128xf32>
    %127 = arith.maximumf %124, %125 : vector<40x128xf32>
    %128 = arith.maximumf %126, %127 : vector<40x128xf32>
    %129 = vector.extract_strided_slice %128 {offsets = [0, 0], sizes = [40, 32], strides = [1, 1]} : vector<40x128xf32> to vector<40x32xf32>
    %c0_86 = arith.constant 0 : index
    %c6 = arith.constant 6 : index
    %c0_87 = arith.constant 0 : index
    %c0_88 = arith.constant 0 : index
    %130 = vector.load %arg5[%c0_86, %c6, %c0_87, %c0_88] : memref<1x8x40x32xf32, #tpu.memory_space<vmem>>, vector<1x1x40x32xf32>
    %131 = vector.shape_cast %130 : vector<1x1x40x32xf32> to vector<40x32xf32>
    %132 = vector.shape_cast %129 : vector<40x32xf32> to vector<1x1x40x32xf32>
    tpu.vector_store %arg5[%c0_86, %c6, %c0_87, %c0_88], %132 {strides = array<i32>} : memref<1x8x40x32xf32, #tpu.memory_space<vmem>>, vector<1x1x40x32xf32>,
    %c1120 = arith.constant 1120 : index
    %c0_89 = arith.constant 0 : index
    %133 = tpu.strided_load %arg6[%c1120, %c0_89] {strides = array<i32: 2, 1>} : memref<1280x128xf32, #tpu.memory_space<vmem>>, vector<40x128xf32>
    %c1121 = arith.constant 1121 : index
    %c0_90 = arith.constant 0 : index
    %134 = tpu.strided_load %arg6[%c1121, %c0_90] {strides = array<i32: 2, 1>} : memref<1280x128xf32, #tpu.memory_space<vmem>>, vector<40x128xf32>
    %c1200 = arith.constant 1200 : index
    %c0_91 = arith.constant 0 : index
    %135 = tpu.strided_load %arg6[%c1200, %c0_91] {strides = array<i32: 2, 1>} : memref<1280x128xf32, #tpu.memory_space<vmem>>, vector<40x128xf32>
    %c1201 = arith.constant 1201 : index
    %c0_92 = arith.constant 0 : index
    %136 = tpu.strided_load %arg6[%c1201, %c0_92] {strides = array<i32: 2, 1>} : memref<1280x128xf32, #tpu.memory_space<vmem>>, vector<40x128xf32>
    %137 = arith.maximumf %133, %134 : vector<40x128xf32>
    %138 = arith.maximumf %135, %136 : vector<40x128xf32>
    %139 = arith.maximumf %137, %138 : vector<40x128xf32>
    %140 = vector.extract_strided_slice %139 {offsets = [0, 0], sizes = [40, 32], strides = [1, 1]} : vector<40x128xf32> to vector<40x32xf32>
    %c0_93 = arith.constant 0 : index
    %c7 = arith.constant 7 : index
    %c0_94 = arith.constant 0 : index
    %c0_95 = arith.constant 0 : index
    %141 = vector.load %arg5[%c0_93, %c7, %c0_94, %c0_95] : memref<1x8x40x32xf32, #tpu.memory_space<vmem>>, vector<1x1x40x32xf32>
    %142 = vector.shape_cast %141 : vector<1x1x40x32xf32> to vector<40x32xf32>
    %143 = vector.shape_cast %140 : vector<40x32xf32> to vector<1x1x40x32xf32>
    tpu.vector_store %arg5[%c0_93, %c7, %c0_94, %c0_95], %143 {strides = array<i32>} : memref<1x8x40x32xf32, #tpu.memory_space<vmem>>, vector<1x1x40x32xf32>,
    return
  }
  func.func @transform_0(%arg0: i32, %arg1: i32) -> (i32, i32, i32) {
    %c0_i32 = arith.constant 0 : i32
    %c0_i32_0 = arith.constant 0 : i32
    %c0_i32_1 = arith.constant 0 : i32
    return %arg0, %c0_i32, %c0_i32_0 : i32, i32, i32
  }
  func.func @transform_1(%arg0: i32, %arg1: i32) -> (i32, i32, i32) {
    %c0_i32 = arith.constant 0 : i32
    %c0_i32_0 = arith.constant 0 : i32
    %c0_i32_1 = arith.constant 0 : i32
    %c0_i32_2 = arith.constant 0 : i32
    return %c0_i32, %c0_i32_0, %c0_i32_1 : i32, i32, i32
  }
  func.func @transform_2(%arg0: i32, %arg1: i32) -> (i32, i32) {
    %c0_i32 = arith.constant 0 : i32
    %c0_i32_0 = arith.constant 0 : i32
    %c0_i32_1 = arith.constant 0 : i32
    return %c0_i32, %c0_i32_0 : i32, i32
  }
  func.func @transform_3(%arg0: i32, %arg1: i32) -> (i32, i32, i32, i32) {
    %c0_i32 = arith.constant 0 : i32
    %c0_i32_0 = arith.constant 0 : i32
    %c0_i32_1 = arith.constant 0 : i32
    return %arg0, %arg1, %c0_i32, %c0_i32_0 : i32, i32, i32, i32
  }
}

module attributes {stable_mosaic.version = 11 : i64} {
  func.func @_conv_pool_kernel(%arg0: i32, %arg1: i32, %arg2: memref<1x1600x160xbf16, #tpu.memory_space<vmem>>, %arg3: memref<5x160x128xbf16, #tpu.memory_space<vmem>>, %arg4: memref<1x128xf32, #tpu.memory_space<vmem>>, %arg5: memref<1x9x18x64xf32, #tpu.memory_space<vmem>>, %arg6: memref<720x128xf32, #tpu.memory_space<vmem>>) attributes {dimension_semantics = [#tpu.dimension_semantics<parallel>, #tpu.dimension_semantics<parallel>], iteration_bounds = array<i64: 2, 2>, scalar_prefetch = 0 : i64, scratch_operands = 1 : i64, tpu.core_type = #tpu.core_type<tc>, window_params = [{transform_indices = @transform_0, window_bounds = array<i64: 1, 1600, 160>}, {pipeline_mode = #tpu.pipeline_mode<synchronous>, transform_indices = @transform_1, window_bounds = array<i64: 5, 160, 128>}, {pipeline_mode = #tpu.pipeline_mode<synchronous>, transform_indices = @transform_2, window_bounds = array<i64: 1, 128>}, {transform_indices = @transform_3, window_bounds = array<i64: 1, 9, 18, 64>}]} {
    %c18_i32 = arith.constant 18 : i32
    %0 = arith.muli %c18_i32, %arg1 : i32
    %c0_i32 = arith.constant 0 : i32
    %1 = arith.addi %0, %c0_i32 : i32
    %c40_i32 = arith.constant 40 : i32
    %2 = arith.muli %1, %c40_i32 : i32
    %3 = tpu.assume_multiple %2, 8 : i32
    %c0 = arith.constant 0 : index
    %4 = arith.index_cast %3 : i32 to index
    %c0_0 = arith.constant 0 : index
    %5 = vector.load %arg2[%c0, %4, %c0_0] : memref<1x1600x160xbf16, #tpu.memory_space<vmem>>, vector<1x720x160xbf16>
    %6 = vector.shape_cast %5 : vector<1x720x160xbf16> to vector<720x160xbf16>
    %c0_1 = arith.constant 0 : index
    %c0_2 = arith.constant 0 : index
    %c0_3 = arith.constant 0 : index
    %7 = vector.load %arg3[%c0_1, %c0_2, %c0_3] : memref<5x160x128xbf16, #tpu.memory_space<vmem>>, vector<1x160x128xbf16>
    %8 = vector.shape_cast %7 : vector<1x160x128xbf16> to vector<160x128xbf16>
    %cst = arith.constant dense<0.000000e+00> : vector<720x128xf32>
    %9 = tpu.matmul %6, %8, %cst {dimension_numbers = #tpu.dot_dimension_numbers<[1], [0], [0], [1], [0, 0, 1, 1], [], []>} : vector<720x160xbf16>, vector<160x128xbf16>, vector<720x128xf32> -> vector<720x128xf32>
    %c1_i32 = arith.constant 1 : i32
    %10 = arith.addi %0, %c1_i32 : i32
    %c40_i32_4 = arith.constant 40 : i32
    %11 = arith.muli %10, %c40_i32_4 : i32
    %12 = tpu.assume_multiple %11, 8 : i32
    %c0_5 = arith.constant 0 : index
    %13 = arith.index_cast %12 : i32 to index
    %c0_6 = arith.constant 0 : index
    %14 = vector.load %arg2[%c0_5, %13, %c0_6] : memref<1x1600x160xbf16, #tpu.memory_space<vmem>>, vector<1x720x160xbf16>
    %15 = vector.shape_cast %14 : vector<1x720x160xbf16> to vector<720x160xbf16>
    %c1 = arith.constant 1 : index
    %c0_7 = arith.constant 0 : index
    %c0_8 = arith.constant 0 : index
    %16 = vector.load %arg3[%c1, %c0_7, %c0_8] : memref<5x160x128xbf16, #tpu.memory_space<vmem>>, vector<1x160x128xbf16>
    %17 = vector.shape_cast %16 : vector<1x160x128xbf16> to vector<160x128xbf16>
    %cst_9 = arith.constant dense<0.000000e+00> : vector<720x128xf32>
    %18 = tpu.matmul %15, %17, %cst_9 {dimension_numbers = #tpu.dot_dimension_numbers<[1], [0], [0], [1], [0, 0, 1, 1], [], []>} : vector<720x160xbf16>, vector<160x128xbf16>, vector<720x128xf32> -> vector<720x128xf32>
    %19 = arith.addf %9, %18 : vector<720x128xf32>
    %c2_i32 = arith.constant 2 : i32
    %20 = arith.addi %0, %c2_i32 : i32
    %c40_i32_10 = arith.constant 40 : i32
    %21 = arith.muli %20, %c40_i32_10 : i32
    %22 = tpu.assume_multiple %21, 8 : i32
    %c0_11 = arith.constant 0 : index
    %23 = arith.index_cast %22 : i32 to index
    %c0_12 = arith.constant 0 : index
    %24 = vector.load %arg2[%c0_11, %23, %c0_12] : memref<1x1600x160xbf16, #tpu.memory_space<vmem>>, vector<1x720x160xbf16>
    %25 = vector.shape_cast %24 : vector<1x720x160xbf16> to vector<720x160xbf16>
    %c2 = arith.constant 2 : index
    %c0_13 = arith.constant 0 : index
    %c0_14 = arith.constant 0 : index
    %26 = vector.load %arg3[%c2, %c0_13, %c0_14] : memref<5x160x128xbf16, #tpu.memory_space<vmem>>, vector<1x160x128xbf16>
    %27 = vector.shape_cast %26 : vector<1x160x128xbf16> to vector<160x128xbf16>
    %cst_15 = arith.constant dense<0.000000e+00> : vector<720x128xf32>
    %28 = tpu.matmul %25, %27, %cst_15 {dimension_numbers = #tpu.dot_dimension_numbers<[1], [0], [0], [1], [0, 0, 1, 1], [], []>} : vector<720x160xbf16>, vector<160x128xbf16>, vector<720x128xf32> -> vector<720x128xf32>
    %29 = arith.addf %19, %28 : vector<720x128xf32>
    %c3_i32 = arith.constant 3 : i32
    %30 = arith.addi %0, %c3_i32 : i32
    %c40_i32_16 = arith.constant 40 : i32
    %31 = arith.muli %30, %c40_i32_16 : i32
    %32 = tpu.assume_multiple %31, 8 : i32
    %c0_17 = arith.constant 0 : index
    %33 = arith.index_cast %32 : i32 to index
    %c0_18 = arith.constant 0 : index
    %34 = vector.load %arg2[%c0_17, %33, %c0_18] : memref<1x1600x160xbf16, #tpu.memory_space<vmem>>, vector<1x720x160xbf16>
    %35 = vector.shape_cast %34 : vector<1x720x160xbf16> to vector<720x160xbf16>
    %c3 = arith.constant 3 : index
    %c0_19 = arith.constant 0 : index
    %c0_20 = arith.constant 0 : index
    %36 = vector.load %arg3[%c3, %c0_19, %c0_20] : memref<5x160x128xbf16, #tpu.memory_space<vmem>>, vector<1x160x128xbf16>
    %37 = vector.shape_cast %36 : vector<1x160x128xbf16> to vector<160x128xbf16>
    %cst_21 = arith.constant dense<0.000000e+00> : vector<720x128xf32>
    %38 = tpu.matmul %35, %37, %cst_21 {dimension_numbers = #tpu.dot_dimension_numbers<[1], [0], [0], [1], [0, 0, 1, 1], [], []>} : vector<720x160xbf16>, vector<160x128xbf16>, vector<720x128xf32> -> vector<720x128xf32>
    %39 = arith.addf %29, %38 : vector<720x128xf32>
    %c4_i32 = arith.constant 4 : i32
    %40 = arith.addi %0, %c4_i32 : i32
    %c40_i32_22 = arith.constant 40 : i32
    %41 = arith.muli %40, %c40_i32_22 : i32
    %42 = tpu.assume_multiple %41, 8 : i32
    %c0_23 = arith.constant 0 : index
    %43 = arith.index_cast %42 : i32 to index
    %c0_24 = arith.constant 0 : index
    %44 = vector.load %arg2[%c0_23, %43, %c0_24] : memref<1x1600x160xbf16, #tpu.memory_space<vmem>>, vector<1x720x160xbf16>
    %45 = vector.shape_cast %44 : vector<1x720x160xbf16> to vector<720x160xbf16>
    %c4 = arith.constant 4 : index
    %c0_25 = arith.constant 0 : index
    %c0_26 = arith.constant 0 : index
    %46 = vector.load %arg3[%c4, %c0_25, %c0_26] : memref<5x160x128xbf16, #tpu.memory_space<vmem>>, vector<1x160x128xbf16>
    %47 = vector.shape_cast %46 : vector<1x160x128xbf16> to vector<160x128xbf16>
    %cst_27 = arith.constant dense<0.000000e+00> : vector<720x128xf32>
    %48 = tpu.matmul %45, %47, %cst_27 {dimension_numbers = #tpu.dot_dimension_numbers<[1], [0], [0], [1], [0, 0, 1, 1], [], []>} : vector<720x160xbf16>, vector<160x128xbf16>, vector<720x128xf32> -> vector<720x128xf32>
    %49 = arith.addf %39, %48 : vector<720x128xf32>
    %c0_28 = arith.constant 0 : index
    %c0_29 = arith.constant 0 : index
    %50 = vector.load %arg4[%c0_28, %c0_29] : memref<1x128xf32, #tpu.memory_space<vmem>>, vector<1x128xf32>
    %51 = vector.broadcast %50 : vector<1x128xf32> to vector<720x128xf32>
    %52 = arith.addf %49, %51 : vector<720x128xf32>
    %cst_30 = arith.constant 0.000000e+00 : f32
    %53 = vector.broadcast %cst_30 : f32 to vector<720x128xf32>
    %54 = arith.maximumf %52, %53 : vector<720x128xf32>
    %c0_31 = arith.constant 0 : index
    %c0_32 = arith.constant 0 : index
    %55 = vector.load %arg6[%c0_31, %c0_32] : memref<720x128xf32, #tpu.memory_space<vmem>>, vector<720x128xf32>
    tpu.vector_store %arg6[%c0_31, %c0_32], %54 {strides = array<i32>} : memref<720x128xf32, #tpu.memory_space<vmem>>, vector<720x128xf32>,
    %c0_33 = arith.constant 0 : index
    %c0_34 = arith.constant 0 : index
    %56 = tpu.strided_load %arg6[%c0_33, %c0_34] {strides = array<i32: 2, 1>} : memref<720x128xf32, #tpu.memory_space<vmem>>, vector<20x128xf32>
    %c1_35 = arith.constant 1 : index
    %c0_36 = arith.constant 0 : index
    %57 = tpu.strided_load %arg6[%c1_35, %c0_36] {strides = array<i32: 2, 1>} : memref<720x128xf32, #tpu.memory_space<vmem>>, vector<20x128xf32>
    %c40 = arith.constant 40 : index
    %c0_37 = arith.constant 0 : index
    %58 = tpu.strided_load %arg6[%c40, %c0_37] {strides = array<i32: 2, 1>} : memref<720x128xf32, #tpu.memory_space<vmem>>, vector<20x128xf32>
    %c41 = arith.constant 41 : index
    %c0_38 = arith.constant 0 : index
    %59 = tpu.strided_load %arg6[%c41, %c0_38] {strides = array<i32: 2, 1>} : memref<720x128xf32, #tpu.memory_space<vmem>>, vector<20x128xf32>
    %60 = arith.maximumf %56, %57 : vector<20x128xf32>
    %61 = arith.maximumf %58, %59 : vector<20x128xf32>
    %62 = arith.maximumf %60, %61 : vector<20x128xf32>
    %63 = vector.extract_strided_slice %62 {offsets = [0, 0], sizes = [18, 64], strides = [1, 1]} : vector<20x128xf32> to vector<18x64xf32>
    %c0_39 = arith.constant 0 : index
    %c0_40 = arith.constant 0 : index
    %c0_41 = arith.constant 0 : index
    %c0_42 = arith.constant 0 : index
    %64 = vector.load %arg5[%c0_39, %c0_40, %c0_41, %c0_42] : memref<1x9x18x64xf32, #tpu.memory_space<vmem>>, vector<1x1x18x64xf32>
    %65 = vector.shape_cast %64 : vector<1x1x18x64xf32> to vector<18x64xf32>
    %66 = vector.shape_cast %63 : vector<18x64xf32> to vector<1x1x18x64xf32>
    tpu.vector_store %arg5[%c0_39, %c0_40, %c0_41, %c0_42], %66 {strides = array<i32>} : memref<1x9x18x64xf32, #tpu.memory_space<vmem>>, vector<1x1x18x64xf32>,
    %c80 = arith.constant 80 : index
    %c0_43 = arith.constant 0 : index
    %67 = tpu.strided_load %arg6[%c80, %c0_43] {strides = array<i32: 2, 1>} : memref<720x128xf32, #tpu.memory_space<vmem>>, vector<20x128xf32>
    %c81 = arith.constant 81 : index
    %c0_44 = arith.constant 0 : index
    %68 = tpu.strided_load %arg6[%c81, %c0_44] {strides = array<i32: 2, 1>} : memref<720x128xf32, #tpu.memory_space<vmem>>, vector<20x128xf32>
    %c120 = arith.constant 120 : index
    %c0_45 = arith.constant 0 : index
    %69 = tpu.strided_load %arg6[%c120, %c0_45] {strides = array<i32: 2, 1>} : memref<720x128xf32, #tpu.memory_space<vmem>>, vector<20x128xf32>
    %c121 = arith.constant 121 : index
    %c0_46 = arith.constant 0 : index
    %70 = tpu.strided_load %arg6[%c121, %c0_46] {strides = array<i32: 2, 1>} : memref<720x128xf32, #tpu.memory_space<vmem>>, vector<20x128xf32>
    %71 = arith.maximumf %67, %68 : vector<20x128xf32>
    %72 = arith.maximumf %69, %70 : vector<20x128xf32>
    %73 = arith.maximumf %71, %72 : vector<20x128xf32>
    %74 = vector.extract_strided_slice %73 {offsets = [0, 0], sizes = [18, 64], strides = [1, 1]} : vector<20x128xf32> to vector<18x64xf32>
    %c0_47 = arith.constant 0 : index
    %c1_48 = arith.constant 1 : index
    %c0_49 = arith.constant 0 : index
    %c0_50 = arith.constant 0 : index
    %75 = vector.load %arg5[%c0_47, %c1_48, %c0_49, %c0_50] : memref<1x9x18x64xf32, #tpu.memory_space<vmem>>, vector<1x1x18x64xf32>
    %76 = vector.shape_cast %75 : vector<1x1x18x64xf32> to vector<18x64xf32>
    %77 = vector.shape_cast %74 : vector<18x64xf32> to vector<1x1x18x64xf32>
    tpu.vector_store %arg5[%c0_47, %c1_48, %c0_49, %c0_50], %77 {strides = array<i32>} : memref<1x9x18x64xf32, #tpu.memory_space<vmem>>, vector<1x1x18x64xf32>,
    %c160 = arith.constant 160 : index
    %c0_51 = arith.constant 0 : index
    %78 = tpu.strided_load %arg6[%c160, %c0_51] {strides = array<i32: 2, 1>} : memref<720x128xf32, #tpu.memory_space<vmem>>, vector<20x128xf32>
    %c161 = arith.constant 161 : index
    %c0_52 = arith.constant 0 : index
    %79 = tpu.strided_load %arg6[%c161, %c0_52] {strides = array<i32: 2, 1>} : memref<720x128xf32, #tpu.memory_space<vmem>>, vector<20x128xf32>
    %c200 = arith.constant 200 : index
    %c0_53 = arith.constant 0 : index
    %80 = tpu.strided_load %arg6[%c200, %c0_53] {strides = array<i32: 2, 1>} : memref<720x128xf32, #tpu.memory_space<vmem>>, vector<20x128xf32>
    %c201 = arith.constant 201 : index
    %c0_54 = arith.constant 0 : index
    %81 = tpu.strided_load %arg6[%c201, %c0_54] {strides = array<i32: 2, 1>} : memref<720x128xf32, #tpu.memory_space<vmem>>, vector<20x128xf32>
    %82 = arith.maximumf %78, %79 : vector<20x128xf32>
    %83 = arith.maximumf %80, %81 : vector<20x128xf32>
    %84 = arith.maximumf %82, %83 : vector<20x128xf32>
    %85 = vector.extract_strided_slice %84 {offsets = [0, 0], sizes = [18, 64], strides = [1, 1]} : vector<20x128xf32> to vector<18x64xf32>
    %c0_55 = arith.constant 0 : index
    %c2_56 = arith.constant 2 : index
    %c0_57 = arith.constant 0 : index
    %c0_58 = arith.constant 0 : index
    %86 = vector.load %arg5[%c0_55, %c2_56, %c0_57, %c0_58] : memref<1x9x18x64xf32, #tpu.memory_space<vmem>>, vector<1x1x18x64xf32>
    %87 = vector.shape_cast %86 : vector<1x1x18x64xf32> to vector<18x64xf32>
    %88 = vector.shape_cast %85 : vector<18x64xf32> to vector<1x1x18x64xf32>
    tpu.vector_store %arg5[%c0_55, %c2_56, %c0_57, %c0_58], %88 {strides = array<i32>} : memref<1x9x18x64xf32, #tpu.memory_space<vmem>>, vector<1x1x18x64xf32>,
    %c240 = arith.constant 240 : index
    %c0_59 = arith.constant 0 : index
    %89 = tpu.strided_load %arg6[%c240, %c0_59] {strides = array<i32: 2, 1>} : memref<720x128xf32, #tpu.memory_space<vmem>>, vector<20x128xf32>
    %c241 = arith.constant 241 : index
    %c0_60 = arith.constant 0 : index
    %90 = tpu.strided_load %arg6[%c241, %c0_60] {strides = array<i32: 2, 1>} : memref<720x128xf32, #tpu.memory_space<vmem>>, vector<20x128xf32>
    %c280 = arith.constant 280 : index
    %c0_61 = arith.constant 0 : index
    %91 = tpu.strided_load %arg6[%c280, %c0_61] {strides = array<i32: 2, 1>} : memref<720x128xf32, #tpu.memory_space<vmem>>, vector<20x128xf32>
    %c281 = arith.constant 281 : index
    %c0_62 = arith.constant 0 : index
    %92 = tpu.strided_load %arg6[%c281, %c0_62] {strides = array<i32: 2, 1>} : memref<720x128xf32, #tpu.memory_space<vmem>>, vector<20x128xf32>
    %93 = arith.maximumf %89, %90 : vector<20x128xf32>
    %94 = arith.maximumf %91, %92 : vector<20x128xf32>
    %95 = arith.maximumf %93, %94 : vector<20x128xf32>
    %96 = vector.extract_strided_slice %95 {offsets = [0, 0], sizes = [18, 64], strides = [1, 1]} : vector<20x128xf32> to vector<18x64xf32>
    %c0_63 = arith.constant 0 : index
    %c3_64 = arith.constant 3 : index
    %c0_65 = arith.constant 0 : index
    %c0_66 = arith.constant 0 : index
    %97 = vector.load %arg5[%c0_63, %c3_64, %c0_65, %c0_66] : memref<1x9x18x64xf32, #tpu.memory_space<vmem>>, vector<1x1x18x64xf32>
    %98 = vector.shape_cast %97 : vector<1x1x18x64xf32> to vector<18x64xf32>
    %99 = vector.shape_cast %96 : vector<18x64xf32> to vector<1x1x18x64xf32>
    tpu.vector_store %arg5[%c0_63, %c3_64, %c0_65, %c0_66], %99 {strides = array<i32>} : memref<1x9x18x64xf32, #tpu.memory_space<vmem>>, vector<1x1x18x64xf32>,
    %c320 = arith.constant 320 : index
    %c0_67 = arith.constant 0 : index
    %100 = tpu.strided_load %arg6[%c320, %c0_67] {strides = array<i32: 2, 1>} : memref<720x128xf32, #tpu.memory_space<vmem>>, vector<20x128xf32>
    %c321 = arith.constant 321 : index
    %c0_68 = arith.constant 0 : index
    %101 = tpu.strided_load %arg6[%c321, %c0_68] {strides = array<i32: 2, 1>} : memref<720x128xf32, #tpu.memory_space<vmem>>, vector<20x128xf32>
    %c360 = arith.constant 360 : index
    %c0_69 = arith.constant 0 : index
    %102 = tpu.strided_load %arg6[%c360, %c0_69] {strides = array<i32: 2, 1>} : memref<720x128xf32, #tpu.memory_space<vmem>>, vector<20x128xf32>
    %c361 = arith.constant 361 : index
    %c0_70 = arith.constant 0 : index
    %103 = tpu.strided_load %arg6[%c361, %c0_70] {strides = array<i32: 2, 1>} : memref<720x128xf32, #tpu.memory_space<vmem>>, vector<20x128xf32>
    %104 = arith.maximumf %100, %101 : vector<20x128xf32>
    %105 = arith.maximumf %102, %103 : vector<20x128xf32>
    %106 = arith.maximumf %104, %105 : vector<20x128xf32>
    %107 = vector.extract_strided_slice %106 {offsets = [0, 0], sizes = [18, 64], strides = [1, 1]} : vector<20x128xf32> to vector<18x64xf32>
    %c0_71 = arith.constant 0 : index
    %c4_72 = arith.constant 4 : index
    %c0_73 = arith.constant 0 : index
    %c0_74 = arith.constant 0 : index
    %108 = vector.load %arg5[%c0_71, %c4_72, %c0_73, %c0_74] : memref<1x9x18x64xf32, #tpu.memory_space<vmem>>, vector<1x1x18x64xf32>
    %109 = vector.shape_cast %108 : vector<1x1x18x64xf32> to vector<18x64xf32>
    %110 = vector.shape_cast %107 : vector<18x64xf32> to vector<1x1x18x64xf32>
    tpu.vector_store %arg5[%c0_71, %c4_72, %c0_73, %c0_74], %110 {strides = array<i32>} : memref<1x9x18x64xf32, #tpu.memory_space<vmem>>, vector<1x1x18x64xf32>,
    %c400 = arith.constant 400 : index
    %c0_75 = arith.constant 0 : index
    %111 = tpu.strided_load %arg6[%c400, %c0_75] {strides = array<i32: 2, 1>} : memref<720x128xf32, #tpu.memory_space<vmem>>, vector<20x128xf32>
    %c401 = arith.constant 401 : index
    %c0_76 = arith.constant 0 : index
    %112 = tpu.strided_load %arg6[%c401, %c0_76] {strides = array<i32: 2, 1>} : memref<720x128xf32, #tpu.memory_space<vmem>>, vector<20x128xf32>
    %c440 = arith.constant 440 : index
    %c0_77 = arith.constant 0 : index
    %113 = tpu.strided_load %arg6[%c440, %c0_77] {strides = array<i32: 2, 1>} : memref<720x128xf32, #tpu.memory_space<vmem>>, vector<20x128xf32>
    %c441 = arith.constant 441 : index
    %c0_78 = arith.constant 0 : index
    %114 = tpu.strided_load %arg6[%c441, %c0_78] {strides = array<i32: 2, 1>} : memref<720x128xf32, #tpu.memory_space<vmem>>, vector<20x128xf32>
    %115 = arith.maximumf %111, %112 : vector<20x128xf32>
    %116 = arith.maximumf %113, %114 : vector<20x128xf32>
    %117 = arith.maximumf %115, %116 : vector<20x128xf32>
    %118 = vector.extract_strided_slice %117 {offsets = [0, 0], sizes = [18, 64], strides = [1, 1]} : vector<20x128xf32> to vector<18x64xf32>
    %c0_79 = arith.constant 0 : index
    %c5 = arith.constant 5 : index
    %c0_80 = arith.constant 0 : index
    %c0_81 = arith.constant 0 : index
    %119 = vector.load %arg5[%c0_79, %c5, %c0_80, %c0_81] : memref<1x9x18x64xf32, #tpu.memory_space<vmem>>, vector<1x1x18x64xf32>
    %120 = vector.shape_cast %119 : vector<1x1x18x64xf32> to vector<18x64xf32>
    %121 = vector.shape_cast %118 : vector<18x64xf32> to vector<1x1x18x64xf32>
    tpu.vector_store %arg5[%c0_79, %c5, %c0_80, %c0_81], %121 {strides = array<i32>} : memref<1x9x18x64xf32, #tpu.memory_space<vmem>>, vector<1x1x18x64xf32>,
    %c480 = arith.constant 480 : index
    %c0_82 = arith.constant 0 : index
    %122 = tpu.strided_load %arg6[%c480, %c0_82] {strides = array<i32: 2, 1>} : memref<720x128xf32, #tpu.memory_space<vmem>>, vector<20x128xf32>
    %c481 = arith.constant 481 : index
    %c0_83 = arith.constant 0 : index
    %123 = tpu.strided_load %arg6[%c481, %c0_83] {strides = array<i32: 2, 1>} : memref<720x128xf32, #tpu.memory_space<vmem>>, vector<20x128xf32>
    %c520 = arith.constant 520 : index
    %c0_84 = arith.constant 0 : index
    %124 = tpu.strided_load %arg6[%c520, %c0_84] {strides = array<i32: 2, 1>} : memref<720x128xf32, #tpu.memory_space<vmem>>, vector<20x128xf32>
    %c521 = arith.constant 521 : index
    %c0_85 = arith.constant 0 : index
    %125 = tpu.strided_load %arg6[%c521, %c0_85] {strides = array<i32: 2, 1>} : memref<720x128xf32, #tpu.memory_space<vmem>>, vector<20x128xf32>
    %126 = arith.maximumf %122, %123 : vector<20x128xf32>
    %127 = arith.maximumf %124, %125 : vector<20x128xf32>
    %128 = arith.maximumf %126, %127 : vector<20x128xf32>
    %129 = vector.extract_strided_slice %128 {offsets = [0, 0], sizes = [18, 64], strides = [1, 1]} : vector<20x128xf32> to vector<18x64xf32>
    %c0_86 = arith.constant 0 : index
    %c6 = arith.constant 6 : index
    %c0_87 = arith.constant 0 : index
    %c0_88 = arith.constant 0 : index
    %130 = vector.load %arg5[%c0_86, %c6, %c0_87, %c0_88] : memref<1x9x18x64xf32, #tpu.memory_space<vmem>>, vector<1x1x18x64xf32>
    %131 = vector.shape_cast %130 : vector<1x1x18x64xf32> to vector<18x64xf32>
    %132 = vector.shape_cast %129 : vector<18x64xf32> to vector<1x1x18x64xf32>
    tpu.vector_store %arg5[%c0_86, %c6, %c0_87, %c0_88], %132 {strides = array<i32>} : memref<1x9x18x64xf32, #tpu.memory_space<vmem>>, vector<1x1x18x64xf32>,
    %c560 = arith.constant 560 : index
    %c0_89 = arith.constant 0 : index
    %133 = tpu.strided_load %arg6[%c560, %c0_89] {strides = array<i32: 2, 1>} : memref<720x128xf32, #tpu.memory_space<vmem>>, vector<20x128xf32>
    %c561 = arith.constant 561 : index
    %c0_90 = arith.constant 0 : index
    %134 = tpu.strided_load %arg6[%c561, %c0_90] {strides = array<i32: 2, 1>} : memref<720x128xf32, #tpu.memory_space<vmem>>, vector<20x128xf32>
    %c600 = arith.constant 600 : index
    %c0_91 = arith.constant 0 : index
    %135 = tpu.strided_load %arg6[%c600, %c0_91] {strides = array<i32: 2, 1>} : memref<720x128xf32, #tpu.memory_space<vmem>>, vector<20x128xf32>
    %c601 = arith.constant 601 : index
    %c0_92 = arith.constant 0 : index
    %136 = tpu.strided_load %arg6[%c601, %c0_92] {strides = array<i32: 2, 1>} : memref<720x128xf32, #tpu.memory_space<vmem>>, vector<20x128xf32>
    %137 = arith.maximumf %133, %134 : vector<20x128xf32>
    %138 = arith.maximumf %135, %136 : vector<20x128xf32>
    %139 = arith.maximumf %137, %138 : vector<20x128xf32>
    %140 = vector.extract_strided_slice %139 {offsets = [0, 0], sizes = [18, 64], strides = [1, 1]} : vector<20x128xf32> to vector<18x64xf32>
    %c0_93 = arith.constant 0 : index
    %c7 = arith.constant 7 : index
    %c0_94 = arith.constant 0 : index
    %c0_95 = arith.constant 0 : index
    %141 = vector.load %arg5[%c0_93, %c7, %c0_94, %c0_95] : memref<1x9x18x64xf32, #tpu.memory_space<vmem>>, vector<1x1x18x64xf32>
    %142 = vector.shape_cast %141 : vector<1x1x18x64xf32> to vector<18x64xf32>
    %143 = vector.shape_cast %140 : vector<18x64xf32> to vector<1x1x18x64xf32>
    tpu.vector_store %arg5[%c0_93, %c7, %c0_94, %c0_95], %143 {strides = array<i32>} : memref<1x9x18x64xf32, #tpu.memory_space<vmem>>, vector<1x1x18x64xf32>,
    %c640 = arith.constant 640 : index
    %c0_96 = arith.constant 0 : index
    %144 = tpu.strided_load %arg6[%c640, %c0_96] {strides = array<i32: 2, 1>} : memref<720x128xf32, #tpu.memory_space<vmem>>, vector<20x128xf32>
    %c641 = arith.constant 641 : index
    %c0_97 = arith.constant 0 : index
    %145 = tpu.strided_load %arg6[%c641, %c0_97] {strides = array<i32: 2, 1>} : memref<720x128xf32, #tpu.memory_space<vmem>>, vector<20x128xf32>
    %c680 = arith.constant 680 : index
    %c0_98 = arith.constant 0 : index
    %146 = tpu.strided_load %arg6[%c680, %c0_98] {strides = array<i32: 2, 1>} : memref<720x128xf32, #tpu.memory_space<vmem>>, vector<20x128xf32>
    %c681 = arith.constant 681 : index
    %c0_99 = arith.constant 0 : index
    %147 = tpu.strided_load %arg6[%c681, %c0_99] {strides = array<i32: 2, 1>} : memref<720x128xf32, #tpu.memory_space<vmem>>, vector<20x128xf32>
    %148 = arith.maximumf %144, %145 : vector<20x128xf32>
    %149 = arith.maximumf %146, %147 : vector<20x128xf32>
    %150 = arith.maximumf %148, %149 : vector<20x128xf32>
    %151 = vector.extract_strided_slice %150 {offsets = [0, 0], sizes = [18, 64], strides = [1, 1]} : vector<20x128xf32> to vector<18x64xf32>
    %c0_100 = arith.constant 0 : index
    %c8 = arith.constant 8 : index
    %c0_101 = arith.constant 0 : index
    %c0_102 = arith.constant 0 : index
    %152 = vector.load %arg5[%c0_100, %c8, %c0_101, %c0_102] : memref<1x9x18x64xf32, #tpu.memory_space<vmem>>, vector<1x1x18x64xf32>
    %153 = vector.shape_cast %152 : vector<1x1x18x64xf32> to vector<18x64xf32>
    %154 = vector.shape_cast %151 : vector<18x64xf32> to vector<1x1x18x64xf32>
    tpu.vector_store %arg5[%c0_100, %c8, %c0_101, %c0_102], %154 {strides = array<i32>} : memref<1x9x18x64xf32, #tpu.memory_space<vmem>>, vector<1x1x18x64xf32>,
    return
  }
  func.func @transform_0(%arg0: i32, %arg1: i32) -> (i32, i32, i32) {
    %c0_i32 = arith.constant 0 : i32
    %c0_i32_0 = arith.constant 0 : i32
    %c0_i32_1 = arith.constant 0 : i32
    return %arg0, %c0_i32, %c0_i32_0 : i32, i32, i32
  }
  func.func @transform_1(%arg0: i32, %arg1: i32) -> (i32, i32, i32) {
    %c0_i32 = arith.constant 0 : i32
    %c0_i32_0 = arith.constant 0 : i32
    %c0_i32_1 = arith.constant 0 : i32
    %c0_i32_2 = arith.constant 0 : i32
    return %c0_i32, %c0_i32_0, %c0_i32_1 : i32, i32, i32
  }
  func.func @transform_2(%arg0: i32, %arg1: i32) -> (i32, i32) {
    %c0_i32 = arith.constant 0 : i32
    %c0_i32_0 = arith.constant 0 : i32
    %c0_i32_1 = arith.constant 0 : i32
    return %c0_i32, %c0_i32_0 : i32, i32
  }
  func.func @transform_3(%arg0: i32, %arg1: i32) -> (i32, i32, i32, i32) {
    %c0_i32 = arith.constant 0 : i32
    %c0_i32_0 = arith.constant 0 : i32
    %c0_i32_1 = arith.constant 0 : i32
    return %arg0, %arg1, %c0_i32, %c0_i32_0 : i32, i32, i32, i32
  }
}

module attributes {stable_mosaic.version = 11 : i64} {
  func.func @_mlp_head_kernel(%arg0: i32, %arg1: memref<2x2304xf32, #tpu.memory_space<vmem>>, %arg2: memref<2304x128xbf16, #tpu.memory_space<vmem>>, %arg3: memref<1x128xf32, #tpu.memory_space<vmem>>, %arg4: memref<128x128xbf16, #tpu.memory_space<vmem>>, %arg5: memref<1x128xf32, #tpu.memory_space<vmem>>, %arg6: memref<128x4xbf16, #tpu.memory_space<vmem>>, %arg7: memref<1x4xf32, #tpu.memory_space<vmem>>, %arg8: memref<2x4xf32, #tpu.memory_space<vmem>>, %arg9: memref<2x128xf32, #tpu.memory_space<vmem>>) attributes {dimension_semantics = [#tpu.dimension_semantics<arbitrary>], iteration_bounds = array<i64: 9>, scalar_prefetch = 0 : i64, scratch_operands = 1 : i64, tpu.core_type = #tpu.core_type<tc>, window_params = [{transform_indices = @transform_0, window_bounds = array<i64: 2, 2304>}, {transform_indices = @transform_1, window_bounds = array<i64: 2304, 128>}, {pipeline_mode = #tpu.pipeline_mode<synchronous>, transform_indices = @transform_2, window_bounds = array<i64: 1, 128>}, {pipeline_mode = #tpu.pipeline_mode<synchronous>, transform_indices = @transform_3, window_bounds = array<i64: 128, 128>}, {pipeline_mode = #tpu.pipeline_mode<synchronous>, transform_indices = @transform_4, window_bounds = array<i64: 1, 128>}, {pipeline_mode = #tpu.pipeline_mode<synchronous>, transform_indices = @transform_5, window_bounds = array<i64: 128, 4>}, {pipeline_mode = #tpu.pipeline_mode<synchronous>, transform_indices = @transform_6, window_bounds = array<i64: 1, 4>}, {pipeline_mode = #tpu.pipeline_mode<synchronous>, transform_indices = @transform_7, window_bounds = array<i64: 2, 4>}]} {
    %c0_i32 = arith.constant 0 : i32
    %0 = arith.cmpi eq, %arg0, %c0_i32 : i32
    %1 = arith.extui %0 : i1 to i32
    %c0_i32_0 = arith.constant 0 : i32
    %2 = arith.cmpi ne, %1, %c0_i32_0 : i32
    scf.if %2 {
      %cst_9 = arith.constant 0.000000e+00 : f32
      %13 = vector.broadcast %cst_9 : f32 to vector<2x128xf32>
      %c0_10 = arith.constant 0 : index
      %c0_11 = arith.constant 0 : index
      %14 = vector.load %arg9[%c0_10, %c0_11] : memref<2x128xf32, #tpu.memory_space<vmem>>, vector<2x128xf32>
      tpu.vector_store %arg9[%c0_10, %c0_11], %13 {strides = array<i32>} : memref<2x128xf32, #tpu.memory_space<vmem>>, vector<2x128xf32>,
    } else {
    }
    %c0 = arith.constant 0 : index
    %c0_1 = arith.constant 0 : index
    %3 = vector.load %arg9[%c0, %c0_1] : memref<2x128xf32, #tpu.memory_space<vmem>>, vector<2x128xf32>
    %c0_2 = arith.constant 0 : index
    %c0_3 = arith.constant 0 : index
    %4 = vector.load %arg1[%c0_2, %c0_3] : memref<2x2304xf32, #tpu.memory_space<vmem>>, vector<2x2304xf32>
    %5 = arith.truncf %4 : vector<2x2304xf32> to vector<2x2304xbf16>
    %c0_4 = arith.constant 0 : index
    %c0_5 = arith.constant 0 : index
    %6 = vector.load %arg2[%c0_4, %c0_5] : memref<2304x128xbf16, #tpu.memory_space<vmem>>, vector<2304x128xbf16>
    %cst = arith.constant dense<0.000000e+00> : vector<2x128xf32>
    %7 = tpu.matmul %5, %6, %cst {dimension_numbers = #tpu.dot_dimension_numbers<[1], [0], [0], [1], [0, 0, 1, 1], [], []>} : vector<2x2304xbf16>, vector<2304x128xbf16>, vector<2x128xf32> -> vector<2x128xf32>
    %8 = arith.addf %3, %7 : vector<2x128xf32>
    %c0_6 = arith.constant 0 : index
    %c0_7 = arith.constant 0 : index
    %9 = vector.load %arg9[%c0_6, %c0_7] : memref<2x128xf32, #tpu.memory_space<vmem>>, vector<2x128xf32>
    tpu.vector_store %arg9[%c0_6, %c0_7], %8 {strides = array<i32>} : memref<2x128xf32, #tpu.memory_space<vmem>>, vector<2x128xf32>,
    %c8_i32 = arith.constant 8 : i32
    %10 = arith.cmpi eq, %arg0, %c8_i32 : i32
    %11 = arith.extui %10 : i1 to i32
    %c0_i32_8 = arith.constant 0 : i32
    %12 = arith.cmpi ne, %11, %c0_i32_8 : i32
    scf.if %12 {
      %c0_9 = arith.constant 0 : index
      %c0_10 = arith.constant 0 : index
      %13 = vector.load %arg9[%c0_9, %c0_10] : memref<2x128xf32, #tpu.memory_space<vmem>>, vector<2x128xf32>
      %c0_11 = arith.constant 0 : index
      %c0_12 = arith.constant 0 : index
      %14 = vector.load %arg3[%c0_11, %c0_12] : memref<1x128xf32, #tpu.memory_space<vmem>>, vector<1x128xf32>
      %15 = vector.broadcast %14 : vector<1x128xf32> to vector<2x128xf32>
      %16 = arith.addf %13, %15 : vector<2x128xf32>
      %cst_13 = arith.constant 0.000000e+00 : f32
      %17 = vector.broadcast %cst_13 : f32 to vector<2x128xf32>
      %18 = arith.maximumf %16, %17 : vector<2x128xf32>
      %19 = arith.truncf %18 : vector<2x128xf32> to vector<2x128xbf16>
      %c0_14 = arith.constant 0 : index
      %c0_15 = arith.constant 0 : index
      %20 = vector.load %arg4[%c0_14, %c0_15] : memref<128x128xbf16, #tpu.memory_space<vmem>>, vector<128x128xbf16>
      %cst_16 = arith.constant dense<0.000000e+00> : vector<2x128xf32>
      %21 = tpu.matmul %19, %20, %cst_16 {dimension_numbers = #tpu.dot_dimension_numbers<[1], [0], [0], [1], [0, 0, 1, 1], [], []>} : vector<2x128xbf16>, vector<128x128xbf16>, vector<2x128xf32> -> vector<2x128xf32>
      %c0_17 = arith.constant 0 : index
      %c0_18 = arith.constant 0 : index
      %22 = vector.load %arg5[%c0_17, %c0_18] : memref<1x128xf32, #tpu.memory_space<vmem>>, vector<1x128xf32>
      %23 = vector.broadcast %22 : vector<1x128xf32> to vector<2x128xf32>
      %24 = arith.addf %21, %23 : vector<2x128xf32>
      %cst_19 = arith.constant 0.000000e+00 : f32
      %25 = vector.broadcast %cst_19 : f32 to vector<2x128xf32>
      %26 = arith.maximumf %24, %25 : vector<2x128xf32>
      %27 = arith.truncf %26 : vector<2x128xf32> to vector<2x128xbf16>
      %c0_20 = arith.constant 0 : index
      %c0_21 = arith.constant 0 : index
      %28 = vector.load %arg6[%c0_20, %c0_21] : memref<128x4xbf16, #tpu.memory_space<vmem>>, vector<128x4xbf16>
      %cst_22 = arith.constant dense<0.000000e+00> : vector<2x4xf32>
      %29 = tpu.matmul %27, %28, %cst_22 {dimension_numbers = #tpu.dot_dimension_numbers<[1], [0], [0], [1], [0, 0, 1, 1], [], []>} : vector<2x128xbf16>, vector<128x4xbf16>, vector<2x4xf32> -> vector<2x4xf32>
      %c0_23 = arith.constant 0 : index
      %c0_24 = arith.constant 0 : index
      %30 = vector.load %arg7[%c0_23, %c0_24] : memref<1x4xf32, #tpu.memory_space<vmem>>, vector<1x4xf32>
      %31 = vector.broadcast %30 : vector<1x4xf32> to vector<2x4xf32>
      %32 = arith.addf %29, %31 : vector<2x4xf32>
      %c0_25 = arith.constant 0 : index
      %c0_26 = arith.constant 0 : index
      %33 = vector.load %arg8[%c0_25, %c0_26] : memref<2x4xf32, #tpu.memory_space<vmem>>, vector<2x4xf32>
      tpu.vector_store %arg8[%c0_25, %c0_26], %32 {strides = array<i32>} : memref<2x4xf32, #tpu.memory_space<vmem>>, vector<2x4xf32>,
    } else {
    }
    return
  }
  func.func @transform_0(%arg0: i32) -> (i32, i32) {
    %c0_i32 = arith.constant 0 : i32
    %c0_i32_0 = arith.constant 0 : i32
    return %c0_i32, %arg0 : i32, i32
  }
  func.func @transform_1(%arg0: i32) -> (i32, i32) {
    %c0_i32 = arith.constant 0 : i32
    %c0_i32_0 = arith.constant 0 : i32
    return %arg0, %c0_i32 : i32, i32
  }
  func.func @transform_2(%arg0: i32) -> (i32, i32) {
    %c0_i32 = arith.constant 0 : i32
    %c0_i32_0 = arith.constant 0 : i32
    %c0_i32_1 = arith.constant 0 : i32
    return %c0_i32, %c0_i32_0 : i32, i32
  }
  func.func @transform_3(%arg0: i32) -> (i32, i32) {
    %c0_i32 = arith.constant 0 : i32
    %c0_i32_0 = arith.constant 0 : i32
    %c0_i32_1 = arith.constant 0 : i32
    return %c0_i32, %c0_i32_0 : i32, i32
  }
  func.func @transform_4(%arg0: i32) -> (i32, i32) {
    %c0_i32 = arith.constant 0 : i32
    %c0_i32_0 = arith.constant 0 : i32
    %c0_i32_1 = arith.constant 0 : i32
    return %c0_i32, %c0_i32_0 : i32, i32
  }
  func.func @transform_5(%arg0: i32) -> (i32, i32) {
    %c0_i32 = arith.constant 0 : i32
    %c0_i32_0 = arith.constant 0 : i32
    %c0_i32_1 = arith.constant 0 : i32
    return %c0_i32, %c0_i32_0 : i32, i32
  }
  func.func @transform_6(%arg0: i32) -> (i32, i32) {
    %c0_i32 = arith.constant 0 : i32
    %c0_i32_0 = arith.constant 0 : i32
    %c0_i32_1 = arith.constant 0 : i32
    return %c0_i32, %c0_i32_0 : i32, i32
  }
  func.func @transform_7(%arg0: i32) -> (i32, i32) {
    %c0_i32 = arith.constant 0 : i32
    %c0_i32_0 = arith.constant 0 : i32
    %c0_i32_1 = arith.constant 0 : i32
    return %c0_i32, %c0_i32_0 : i32, i32
  }
}

</mosaic_0001>

<bundles_post_ra>
// kernel: cnn_forward.3
= control target key start
LH: loop header
LB: loop body
LE: loop exit
PB: predicated region body
PF: predicated region fallthrough
CT: control target
= control target key end

     0   :  { %s12498_s12 = smov 0   ;;  %s12500_s13 = smov 0   ;;  %s13950_s0 = inlined_call_operand.vmem [shape: bf16[2,6720,20], index: 0, kind: input, shape index: {}]   ;;  %s13951_s1 = inlined_call_operand.vmem [shape: bf16[5,20,128], index: 1, kind: input, shape index: {}]   ;;  %s13952_s2 = inlined_call_operand.vmem [shape: f32[1,128], index: 2, kind: input, shape index: {}]   ;;  %s13953_s3 = inlined_call_operand.vmem [shape: f32[2,40,40,32], index: 3, kind: output, shape index: {}]  }
   0x1   :  { %s12502_s14 = smov 0   ;;  %s12504_s15 = smov 0  }
   0x2   :  { %s12506_s16 = smov 0  }
   0x3 LB: > { %s22_s17 = sadd.s32 1, %s12468_s14  ;;  %s25_s18 = sadd.s32 1, %s12472_s15  ;;  %s12476_s16 = sphi %s12506_s16, %s13_s16   ;;  %s12472_s15 = sphi %s12504_s15, %s14020_s15   ;;  %s12468_s14 = sphi %s12502_s14, %s14019_s14   ;;  %s12464_s13 = sphi %s12500_s13, %s14018_s13   ;;  %s12460_s12 = sphi %s12498_s12, %s14017_s12  }
   0x4   : > { %p23_p0 = scmp.ge.s32.totalorder %s22_s17, 5  ;;  %p9231_p1 = scmp.ge.s32.totalorder %s12476_s16, 1 }
   0x5   : > { %p151_p2 = scmp.lt.s32.totalorder %s12476_s16, 11 }
   0x6   : > { %s14022_s17 = smov (%p23_p0, %s22_s17), 0  ;;  %s14024_s18 = smov (!%p23_p0, %s25_s18), %s12472_s15 }
   0x7   : > { %p152_p3 = pnand %p9231_p1, %p151_p2  ;;  %p27_p4 = scmp.ge.s32.totalorder %s14024_s18, 2 }
   0x9   : > { %s14026_s18 = smov (%p27_p4, %s14024_s18), 0  ;;  %155 = sbr.rel (%p152_p3) target bundleno = 1055 (0x41f), region = 32 }
  0x10   : > { %v12024_v0 = vld [vmem:[%s13951_s1 + $0xc] sm:$0xff]   ;;  %vm1186_vm0 = vcmask 1041408   ;;  %v12536_v1 = vld [vmem:[%s13951_s1 + $0x18] sm:$0xff]   ;;  %p180_p5 = scmp.lt.s32.totalorder %s12464_s13, 1  ;;  %s12542_s25 = sshll.u32 %s12460_s12, 4  ;;  %v12029_v5 = vld [vmem:[%s13951_s1] sm:$0xff]  }
  0x11   : > { %10511 = vmatprep.subr.bf16.mxu1 %v12024_v0  ;;  %v12026_v2 = vld [vmem:[%s13951_s1 + $0x14] ss:$0 sps:$4 sm:$0x33]   ;;  %10839 = vmatprep.subr.bf16.mxu0 %v12536_v1  ;;  %v12027_v3 = vld [vmem:[%s13951_s1 + $0x20] ss:$0 sps:$4 sm:$0x33]  }
  0x12   : > { %10512 = vmatpush3.bf16.msra.mxu1 %v12024_v0  ;;  %s14028_s13 = smov (!%p180_p5, %s12464_s13), 1  ;;  %10840 = vmatpush3.bf16.msra.mxu0 %v12536_v1  ;;  %v1188_v4 = vsel %vm1186_vm0, %v12026_v2, 0  ;;  %s366_s28 = sadd.s32 1, %s12542_s25  ;;  %v12559_v6 = vsel %vm1186_vm0, %v12027_v3, 0  ;;  %v12031_v7 = vld [vmem:[%s13951_s1 + $0x24] sm:$0xff]   ;;  %vm945_vm1 = vcmask 162816  }
  0x13   : > { %11975 = vmatprep.subr.msk.bf16.mxu1 %vm1186_vm0, %v12026_v2  ;;  %11977 = vmatprep.subr.msk.bf16.mxu0 %vm1186_vm0, %v12027_v3  ;;  %s11981_s4 = smul.u32 3360, %s14028_s13  ;;  %s3188_s5 = sadd.s32 2, %s12542_s25  ;;  %v12072_v10 = vld [vmem:[%s13951_s1 + $0x2c] ss:$0 sps:$4 sm:$0x33]   ;;  %v12681_v57 = vld [vmem:[%s13951_s1 + $0x30] sm:$0xff]  }
  0x14   : > { %s367_s8 = smul.u32 80, %s366_s28  ;;  %v5663_v16 = vsel %vm1186_vm0, %v12072_v10, 0  ;;  %s4843_s29 = sadd.s32 3, %s12542_s25  ;;  %v12112_v56 = vld [vmem:[%s13951_s1 + $0x8] ss:$0 sps:$4 sm:$0x33]  }
  0x15   : > { %s12569_s11 = scalar_lea.vmem %s13950_s0, %s11981_s4  ;;  %s3189_s19 = smul.u32 80, %s3188_s5  ;;  %v2513_v58 = vsel %vm1186_vm0, %v12112_v56, 0  ;;  %vm8694_vm2 = vcmask 261120  }
  0x16   : > { %10514 = vmatpush3.bf16.msra.mxu1 %v1188_v4  ;;  %10842 = vmatpush3.bf16.msra.mxu0 %v12559_v6  ;;  %s368_s20 = sshra.s32 %s367_s8, 3  ;;  %s4844_s30 = smul.u32 80, %s4843_s29 }
  0x17   : > { %10675 = vmatprep.subr.bf16.mxu1 %v12029_v5  ;;  %s9237_s21 = sshll.u32 %s368_s20, 2  ;;  %s3190_s22 = sshra.s32 %s3189_s19, 3  ;;  %11003 = vmatprep.subr.bf16.mxu0 %v12031_v7 }
  0x18   : > { %s12573_s23 = scalar_lea.vmem %s12569_s11, %s9237_s21  ;;  %s9565_s24 = sshll.u32 %s3190_s22, 2 }
  0x19   : > { %v12028_v8 = vld [vmem:[%s12573_s23] sm:$0xff]   ;;  %s12577_s26 = scalar_lea.vmem %s12569_s11, %s9565_s24  ;;  %v12032_v11 = vld [vmem:[%s12573_s23 + $0x8] sm:$0xff]   ;;  %v12034_v13 = vld [vmem:[%s12573_s23 + $0x10] sm:$0xff]   ;;  %s4845_s4 = sshra.s32 %s4844_s30, 3 }
  0x1a   : > { %v12030_v9 = vld [vmem:[%s12577_s26] sm:$0xff]   ;;  %10515 = vmatprep.mubr.msk.bf16.mxu1 %vm945_vm1, %v12028_v8  ;;  %v12033_v12 = vld [vmem:[%s12577_s26 + $0x8] sm:$0xff]   ;;  %v12035_v14 = vld [vmem:[%s12577_s26 + $0x10] sm:$0xff]   ;;  %s9731_s5 = sshll.u32 %s4845_s4, 2  ;;  %s198_s19 = smul.u32 1280, %s12460_s12 }
  0x1b   : > { %10843 = vmatprep.mubr.msk.bf16.mxu0 %vm945_vm1, %v12030_v9  ;;  %10516 = vmatmul.mubr.msk.bf16.vlgmr.msra.gmra.mrb[0].mxu1 %vm945_vm1, %v12032_v11  ;;  %v12036_v15 = vld [vmem:[%s12573_s23 + $0x18] sm:$0xff]   ;;  %v12038_v18 = vld [vmem:[%s12573_s23 + $0x20] sm:$0xff]   ;;  %v12040_v20 = vld [vmem:[%s12573_s23 + $0x28] sm:$0xff]   ;;  %s12672_s6 = scalar_lea.vmem %s12569_s11, %s9731_s5  ;;  %s6498_s4 = sadd.s32 4, %s12542_s25 }
  0x1c   : > { %10676 = vmatpush3.bf16.msra.mxu1 %v12029_v5  ;;  %10844 = vmatmul.mubr.msk.bf16.vlgmr.msra.gmra.mrb[0].mxu0 %vm945_vm1, %v12033_v12  ;;  %v12037_v17 = vld [vmem:[%s12577_s26 + $0x18] sm:$0xff]   ;;  %v12039_v19 = vld [vmem:[%s12577_s26 + $0x20] sm:$0xff]   ;;  %v12041_v21 = vld [vmem:[%s12577_s26 + $0x28] sm:$0xff]   ;;  %s199_s22 = sshra.s32 %s198_s19, 3  ;;  %s6499_s5 = smul.u32 80, %s6498_s4 }
  0x1d   : > { %11004 = vmatpush3.bf16.msra.mxu0 %v12031_v7  ;;  %10519 = vmatprep.mubr.msk.bf16.mxu1 %vm945_vm1, %v12034_v13  ;;  %v12042_v22 = vld [vmem:[%s12573_s23 + $0x30] sm:$0xff]   ;;  %v12044_v24 = vld [vmem:[%s12573_s23 + $0x38] sm:$0xff]   ;;  %v12046_v26 = vld [vmem:[%s12573_s23 + $0x40] sm:$0xff]   ;;  %s9236_s24 = sshll.u32 %s199_s22, 2 }
  0x1e   : > { %10847 = vmatprep.mubr.msk.bf16.mxu0 %vm945_vm1, %v12035_v14  ;;  %11979 = vmatprep.subr.msk.bf16.mxu0 %vm1186_vm0, %v12072_v10  ;;  %v12043_v23 = vld [vmem:[%s12577_s26 + $0x30] sm:$0xff]   ;;  %v12045_v25 = vld [vmem:[%s12577_s26 + $0x38] sm:$0xff]   ;;  %v12047_v27 = vld [vmem:[%s12577_s26 + $0x40] sm:$0xff]   ;;  %s12805_s27 = scalar_lea.vmem %s12569_s11, %s9236_s24  ;;  %s6500_s7 = sshra.s32 %s6499_s5, 3 }
  0x1f   : > { %v12048_v28 = vld [vmem:[%s12573_s23 + $0x48] sm:$0xff]   ;;  %v12050_v30 = vld [vmem:[%s12573_s23 + $0x50] sm:$0xff]   ;;  %v12052_v32 = vld [vmem:[%s12573_s23 + $0x58] sm:$0xff]   ;;  %11976 = vmatprep.subr.msk.bf16.mxu1 %vm1186_vm0, %v12112_v56  ;;  %s9897_s8 = sshll.u32 %s6500_s7, 2 }
  0x20   : > { %v12049_v29 = vld [vmem:[%s12577_s26 + $0x48] sm:$0xff]   ;;  %v12051_v31 = vld [vmem:[%s12577_s26 + $0x50] sm:$0xff]   ;;  %v12053_v33 = vld [vmem:[%s12577_s26 + $0x58] sm:$0xff]   ;;  %10678 = vmatpush3.bf16.msra.mxu1 %v2513_v58  ;;  %s12978_s9 = scalar_lea.vmem %s12569_s11, %s9897_s8 }
  0x21   : > { %11006 = vmatpush3.bf16.msra.mxu0 %v5663_v16  ;;  %v12054_v34 = vld [vmem:[%s12573_s23 + $0x60] sm:$0xff]   ;;  %v12056_v36 = vld [vmem:[%s12573_s23 + $0x68] sm:$0xff]   ;;  %v12058_v38 = vld [vmem:[%s12573_s23 + $0x70] sm:$0xff]   ;;  %11331 = vmatprep.subr.bf16.mxu1 %v12536_v1 }
  0x22   : > { %v12055_v35 = vld [vmem:[%s12577_s26 + $0x60] sm:$0xff]   ;;  %v12057_v37 = vld [vmem:[%s12577_s26 + $0x68] sm:$0xff]   ;;  %v12059_v39 = vld [vmem:[%s12577_s26 + $0x70] sm:$0xff]   ;;  %11167 = vmatprep.subr.bf16.mxu0 %v12681_v57 }
  0x23   : > { %10520 = vmatmul.mubr.msk.bf16.gmra.mrb[4].mxu1 %vm945_vm1, %v12036_v15  ;;  %v12060_v40 = vld [vmem:[%s12573_s23 + $0x78] sm:$0xff]   ;;  %v12062_v42 = vld [vmem:[%s12573_s23 + $0x80] sm:$0xff]   ;;  %v12064_v44 = vld [vmem:[%s12573_s23 + $0x88] sm:$0xff]  }
  0x24   : > { %10848 = vmatmul.mubr.msk.bf16.gmra.mrb[4].mxu0 %vm945_vm1, %v12037_v17  ;;  %10523 = vmatprep.mubr.msk.bf16.mxu1 %vm945_vm1, %v12038_v18  ;;  %v12061_v41 = vld [vmem:[%s12577_s26 + $0x78] sm:$0xff]   ;;  %v12063_v43 = vld [vmem:[%s12577_s26 + $0x80] sm:$0xff]   ;;  %v12065_v45 = vld [vmem:[%s12577_s26 + $0x88] sm:$0xff]  }
  0x25   : > { %10851 = vmatprep.mubr.msk.bf16.mxu0 %vm945_vm1, %v12039_v19  ;;  %v12066_v46 = vld [vmem:[%s12573_s23 + $0x90] sm:$0xff]   ;;  %v12068_v48 = vld [vmem:[%s12573_s23 + $0x98] sm:$0xff]   ;;  %v12070_v50 = vld [vmem:[%s12573_s23 + $0xa0] sm:$0xff]  }
  0x26   : > { %v12067_v47 = vld [vmem:[%s12577_s26 + $0x90] sm:$0xff]   ;;  %v12069_v49 = vld [vmem:[%s12577_s26 + $0x98] sm:$0xff]   ;;  %v12071_v51 = vld [vmem:[%s12577_s26 + $0xa0] sm:$0xff]  }
  0x27   : > { %v12073_v52 = vld [vmem:[%s12573_s23 + $0xa8] sm:$0xff]   ;;  %v12075_v54 = vld [vmem:[%s12573_s23 + $0xb0] sm:$0xff]   ;;  %v12077_v59 = vld [vmem:[%s12573_s23 + $0xb8] sm:$0xff]  }
  0x28   : > { %v12074_v53 = vld [vmem:[%s12577_s26 + $0xa8] sm:$0xff]   ;;  %v12076_v55 = vld [vmem:[%s12577_s26 + $0xb0] sm:$0xff]   ;;  %v12078_v60 = vld [vmem:[%s12577_s26 + $0xb8] sm:$0xff]  }
  0x29   : > { %v12079_v61 = vld [vmem:[%s12573_s23 + $0xc0] sm:$0xff]   ;;  %v12081_v63 = vld [vmem:[%s12573_s23 + $0xc8] sm:$0xff]   ;;  %v12083_v1 = vld [vmem:[%s12573_s23 + $0xd0] sm:$0xff]  }
  0x2a   : > { %v12080_v62 = vld [vmem:[%s12577_s26 + $0xc0] sm:$0xff]   ;;  %v12082_v0 = vld [vmem:[%s12577_s26 + $0xc8] sm:$0xff]   ;;  %v12084_v2 = vld [vmem:[%s12577_s26 + $0xd0] sm:$0xff]  }
  0x2b   : > { %10524 = vmatmul.mubr.msk.bf16.gmra.mrb[8].mxu1 %vm945_vm1, %v12040_v20  ;;  %v12085_v3 = vld [vmem:[%s12573_s23 + $0xd8] sm:$0xff]   ;;  %v12087_v5 = vld [vmem:[%s12573_s23 + $0xe0] sm:$0xff]   ;;  %v12089_v8 = vld [vmem:[%s12573_s23 + $0xe8] sm:$0xff]  }
  0x2c   : > { %10852 = vmatmul.mubr.msk.bf16.gmra.mrb[8].mxu0 %vm945_vm1, %v12041_v21  ;;  %10527 = vmatprep.mubr.msk.bf16.mxu1 %vm945_vm1, %v12042_v22  ;;  %v12086_v4 = vld [vmem:[%s12577_s26 + $0xd8] sm:$0xff]   ;;  %v12088_v7 = vld [vmem:[%s12577_s26 + $0xe0] sm:$0xff]   ;;  %v12090_v9 = vld [vmem:[%s12577_s26 + $0xe8] sm:$0xff]  }
  0x2d   : > { %10855 = vmatprep.mubr.msk.bf16.mxu0 %vm945_vm1, %v12043_v23  ;;  %v12091_v10 = vld [vmem:[%s12573_s23 + $0xf0] sm:$0xff]   ;;  %v12093_v12 = vld [vmem:[%s12573_s23 + $0xf8] sm:$0xff]   ;;  %v12095_v14 = vld [vmem:[%s12573_s23 + $0x100] sm:$0xff]  }
  0x2e   : > { %v12092_v11 = vld [vmem:[%s12577_s26 + $0xf0] sm:$0xff]   ;;  %v12094_v13 = vld [vmem:[%s12577_s26 + $0xf8] sm:$0xff]   ;;  %v12096_v15 = vld [vmem:[%s12577_s26 + $0x100] sm:$0xff]  }
  0x2f   : > { %v12097_v16 = vld [vmem:[%s12573_s23 + $0x108] sm:$0xff]   ;;  %v12099_v18 = vld [vmem:[%s12573_s23 + $0x110] sm:$0xff]   ;;  %v12101_v20 = vld [vmem:[%s12573_s23 + $0x118] sm:$0xff]  }
  0x30   : > { %v12098_v17 = vld [vmem:[%s12577_s26 + $0x108] sm:$0xff]   ;;  %v12100_v19 = vld [vmem:[%s12577_s26 + $0x110] sm:$0xff]   ;;  %v12102_v21 = vld [vmem:[%s12577_s26 + $0x118] sm:$0xff]  }
  0x31   : > { %v12103_v22 = vld [vmem:[%s12573_s23 + $0x120] sm:$0xff]   ;;  %v12139_v58 = vld [vmem:[%s12573_s23 + $0x1a8] sm:$0xff]  }
  0x32   : > { %v12104_v23 = vld [vmem:[%s12577_s26 + $0x120] sm:$0xff]  }
  0x33   : > { %10528 = vmatmul.mubr.msk.bf16.gmra.mrb[12].mxu1 %vm945_vm1, %v12044_v24  ;;  %v12105_v24 = vld [vmem:[%s12573_s23 + $0x128] sm:$0xff]   ;;  %v12137_v56 = vld [vmem:[%s12573_s23 + $0x1a0] sm:$0xff]  }
  0x34   : > { %10856 = vmatmul.mubr.msk.bf16.gmra.mrb[12].mxu0 %vm945_vm1, %v12045_v25  ;;  %10531 = vmatprep.mubr.msk.bf16.mxu1 %vm945_vm1, %v12046_v26  ;;  %v12106_v25 = vld [vmem:[%s12577_s26 + $0x128] sm:$0xff]   ;;  %v12107_v26 = vld [vmem:[%s12573_s23 + $0x130] sm:$0xff]  }
  0x35   : > { %10859 = vmatprep.mubr.msk.bf16.mxu0 %vm945_vm1, %v12047_v27  ;;  %v12108_v27 = vld [vmem:[%s12577_s26 + $0x130] sm:$0xff]  }
  0x3b   : > { %10532 = vmatmul.mubr.msk.bf16.gmra.mrb[16].mxu1 %vm945_vm1, %v12048_v28  ;;  %v12109_v28 = vld [vmem:[%s12573_s23 + $0x138] sm:$0xff]  }
  0x3c   : > { %10860 = vmatmul.mubr.msk.bf16.gmra.mrb[16].mxu0 %vm945_vm1, %v12049_v29  ;;  %10535 = vmatprep.mubr.msk.bf16.mxu1 %vm945_vm1, %v12050_v30  ;;  %v12110_v29 = vld [vmem:[%s12577_s26 + $0x138] sm:$0xff]   ;;  %v12111_v30 = vld [vmem:[%s12573_s23 + $0x140] sm:$0xff]  }
  0x3d   : > { %10863 = vmatprep.mubr.msk.bf16.mxu0 %vm945_vm1, %v12051_v31  ;;  %v12113_v31 = vld [vmem:[%s12672_s6] sm:$0xff]  }
  0x43   : > { %10536 = vmatmul.mubr.msk.bf16.gmra.mrb[20].mxu1 %vm945_vm1, %v12052_v32  ;;  %v12115_v32 = vld [vmem:[%s12573_s23 + $0x148] sm:$0xff]  }
  0x44   : > { %10864 = vmatmul.mubr.msk.bf16.gmra.mrb[20].mxu0 %vm945_vm1, %v12053_v33  ;;  %10539 = vmatprep.mubr.msk.bf16.mxu1 %vm945_vm1, %v12054_v34  ;;  %v12116_v33 = vld [vmem:[%s12672_s6 + $0x8] sm:$0xff]   ;;  %v12117_v34 = vld [vmem:[%s12573_s23 + $0x150] sm:$0xff]  }
  0x45   : > { %10867 = vmatprep.mubr.msk.bf16.mxu0 %vm945_vm1, %v12055_v35  ;;  %v12118_v35 = vld [vmem:[%s12672_s6 + $0x10] sm:$0xff]  }
  0x4b   : > { %10540 = vmatmul.mubr.msk.bf16.gmra.mrb[24].mxu1 %vm945_vm1, %v12056_v36  ;;  %v12119_v36 = vld [vmem:[%s12573_s23 + $0x158] sm:$0xff]  }
  0x4c   : > { %10868 = vmatmul.mubr.msk.bf16.gmra.mrb[24].mxu0 %vm945_vm1, %v12057_v37  ;;  %10543 = vmatprep.mubr.msk.bf16.mxu1 %vm945_vm1, %v12058_v38  ;;  %v12120_v37 = vld [vmem:[%s12672_s6 + $0x18] sm:$0xff]   ;;  %v12121_v38 = vld [vmem:[%s12573_s23 + $0x160] sm:$0xff]  }
  0x4d   : > { %10871 = vmatprep.mubr.msk.bf16.mxu0 %vm945_vm1, %v12059_v39  ;;  %v12122_v39 = vld [vmem:[%s12672_s6 + $0x20] sm:$0xff]  }
  0x53   : > { %10544 = vmatmul.mubr.msk.bf16.gmra.mrb[28].mxu1 %vm945_vm1, %v12060_v40  ;;  %v12123_v40 = vld [vmem:[%s12573_s23 + $0x168] sm:$0xff]  }
  0x54   : > { %10872 = vmatmul.mubr.msk.bf16.gmra.mrb[28].mxu0 %vm945_vm1, %v12061_v41  ;;  %10547 = vmatprep.mubr.msk.bf16.mxu1 %vm945_vm1, %v12062_v42  ;;  %v12124_v41 = vld [vmem:[%s12672_s6 + $0x28] sm:$0xff]   ;;  %v12125_v42 = vld [vmem:[%s12573_s23 + $0x170] sm:$0xff]  }
  0x55   : > { %10875 = vmatprep.mubr.msk.bf16.mxu0 %vm945_vm1, %v12063_v43  ;;  %v12126_v43 = vld [vmem:[%s12672_s6 + $0x30] sm:$0xff]  }
  0x5b   : > { %10548 = vmatmul.mubr.msk.bf16.gmra.mrb[32].mxu1 %vm945_vm1, %v12064_v44  ;;  %v12127_v44 = vld [vmem:[%s12573_s23 + $0x178] sm:$0xff]  }
  0x5c   : > { %10876 = vmatmul.mubr.msk.bf16.gmra.mrb[32].mxu0 %vm945_vm1, %v12065_v45  ;;  %10551 = vmatprep.mubr.msk.bf16.mxu1 %vm945_vm1, %v12066_v46  ;;  %v12128_v45 = vld [vmem:[%s12672_s6 + $0x38] sm:$0xff]   ;;  %v12129_v46 = vld [vmem:[%s12573_s23 + $0x180] sm:$0xff]  }
  0x5d   : > { %10879 = vmatprep.mubr.msk.bf16.mxu0 %vm945_vm1, %v12067_v47  ;;  %v12130_v47 = vld [vmem:[%s12672_s6 + $0x40] sm:$0xff]  }
  0x63   : > { %10552 = vmatmul.mubr.msk.bf16.gmra.mrb[36].mxu1 %vm945_vm1, %v12068_v48  ;;  %v12131_v48 = vld [vmem:[%s12573_s23 + $0x188] sm:$0xff]  }
  0x64   : > { %10880 = vmatmul.mubr.msk.bf16.gmra.mrb[36].mxu0 %vm945_vm1, %v12069_v49  ;;  %10555 = vmatprep.mubr.msk.bf16.mxu1 %vm945_vm1, %v12070_v50  ;;  %v12195_v49 = vld [vmem:[%s13951_s1 + $0x38] ss:$0 sps:$4 sm:$0x33]   ;;  %v12132_v50 = vld [vmem:[%s12672_s6 + $0x48] sm:$0xff]  }
  0x65   : > { %10883 = vmatprep.mubr.msk.bf16.mxu0 %vm945_vm1, %v12071_v51  ;;  %v12133_v51 = vld [vmem:[%s12573_s23 + $0x190] sm:$0xff]  }
  0x6b   : > { %10556 = vmatmul.mubr.msk.bf16.gmra.mrb[40].mxu1 %vm945_vm1, %v12073_v52  ;;  %v12134_v52 = vld [vmem:[%s12672_s6 + $0x50] sm:$0xff]  }
  0x6c   : > { %10884 = vmatmul.mubr.msk.bf16.gmra.mrb[40].mxu0 %vm945_vm1, %v12074_v53  ;;  %10559 = vmatprep.mubr.msk.bf16.mxu1 %vm945_vm1, %v12075_v54  ;;  %v7318_v53 = vsel %vm1186_vm0, %v12195_v49, 0  ;;  %v12135_v54 = vld [vmem:[%s12573_s23 + $0x198] sm:$0xff]  }
  0x6d   : > { %10887 = vmatprep.mubr.msk.bf16.mxu0 %vm945_vm1, %v12076_v55  ;;  %v12136_v55 = vld [vmem:[%s12672_s6 + $0x58] sm:$0xff]  }
  0x73   : > { %10560 = vmatmul.mubr.msk.bf16.gmra.mrb[44].mxu1 %vm945_vm1, %v12077_v59  ;;  %v12140_v59 = vld [vmem:[%s12672_s6 + $0x68] sm:$0xff]  }
  0x74   : > { %10888 = vmatmul.mubr.msk.bf16.gmra.mrb[44].mxu0 %vm945_vm1, %v12078_v60  ;;  %10563 = vmatprep.mubr.msk.bf16.mxu1 %vm945_vm1, %v12079_v61  ;;  %v12141_v60 = vld [vmem:[%s12573_s23 + $0x1b0] sm:$0xff]  }
  0x75   : > { %10891 = vmatprep.mubr.msk.bf16.mxu0 %vm945_vm1, %v12080_v62  ;;  %v12142_v61 = vld [vmem:[%s12672_s6 + $0x70] sm:$0xff]   ;;  %v12143_v62 = vld [vmem:[%s12573_s23 + $0x1b8] sm:$0xff]  }
  0x7b   : > { %10564 = vmatmul.mubr.msk.bf16.gmra.mrb[48].mxu1 %vm945_vm1, %v12081_v63  ;;  %v12144_v63 = vld [vmem:[%s12672_s6 + $0x78] sm:$0xff]  }
  0x7c   : > { %10892 = vmatmul.mubr.msk.bf16.gmra.mrb[48].mxu0 %vm945_vm1, %v12082_v0  ;;  %10567 = vmatprep.mubr.msk.bf16.mxu1 %vm945_vm1, %v12083_v1  ;;  %v12145_v0 = vld [vmem:[%s12573_s23 + $0x1c0] sm:$0xff]  }
  0x7d   : > { %10895 = vmatprep.mubr.msk.bf16.mxu0 %vm945_vm1, %v12084_v2  ;;  %v12146_v1 = vld [vmem:[%s12672_s6 + $0x80] sm:$0xff]   ;;  %v12147_v2 = vld [vmem:[%s12573_s23 + $0x1c8] sm:$0xff]  }
  0x83   : > { %10568 = vmatmul.mubr.msk.bf16.gmra.mrb[52].mxu1 %vm945_vm1, %v12085_v3  ;;  %v12148_v3 = vld [vmem:[%s12672_s6 + $0x88] sm:$0xff]  }
  0x84   : > { %10896 = vmatmul.mubr.msk.bf16.gmra.mrb[52].mxu0 %vm945_vm1, %v12086_v4  ;;  %10571 = vmatprep.mubr.msk.bf16.mxu1 %vm945_vm1, %v12087_v5  ;;  %v12149_v4 = vld [vmem:[%s12573_s23 + $0x1d0] sm:$0xff]  }
  0x85   : > { %10899 = vmatprep.mubr.msk.bf16.mxu0 %vm945_vm1, %v12088_v7  ;;  %v12150_v5 = vld [vmem:[%s12672_s6 + $0x90] sm:$0xff]   ;;  %v12151_v7 = vld [vmem:[%s12573_s23 + $0x1d8] sm:$0xff]  }
  0x8b   : > { %10572 = vmatmul.mubr.msk.bf16.gmra.mrb[56].mxu1 %vm945_vm1, %v12089_v8  ;;  %v12152_v8 = vld [vmem:[%s12672_s6 + $0x98] sm:$0xff]  }
  0x8c   : > { %10900 = vmatmul.mubr.msk.bf16.gmra.mrb[56].mxu0 %vm945_vm1, %v12090_v9  ;;  %10575 = vmatprep.mubr.msk.bf16.mxu1 %vm945_vm1, %v12091_v10  ;;  %v12153_v9 = vld [vmem:[%s12573_s23 + $0x1e0] sm:$0xff]  }
  0x8d   : > { %10903 = vmatprep.mubr.msk.bf16.mxu0 %vm945_vm1, %v12092_v11  ;;  %v12154_v10 = vld [vmem:[%s12672_s6 + $0xa0] sm:$0xff]   ;;  %v12155_v11 = vld [vmem:[%s12573_s23 + $0x1e8] sm:$0xff]  }
  0x93   : > { %10576 = vmatmul.mubr.msk.bf16.gmra.mrb[60].mxu1 %vm945_vm1, %v12093_v12  ;;  %v12156_v12 = vld [vmem:[%s12672_s6 + $0xa8] sm:$0xff]  }
  0x94   : > { %10904 = vmatmul.mubr.msk.bf16.gmra.mrb[60].mxu0 %vm945_vm1, %v12094_v13  ;;  %10579 = vmatprep.mubr.msk.bf16.mxu1 %vm945_vm1, %v12095_v14  ;;  %v12157_v13 = vld [vmem:[%s12573_s23 + $0x1f0] sm:$0xff]  }
  0x95   : > { %10907 = vmatprep.mubr.msk.bf16.mxu0 %vm945_vm1, %v12096_v15  ;;  %v12158_v14 = vld [vmem:[%s12672_s6 + $0xb0] sm:$0xff]   ;;  %v12159_v15 = vld [vmem:[%s12573_s23 + $0x1f8] sm:$0xff]  }
  0x9b   : > { %10580 = vmatmul.mubr.msk.bf16.gmra.mrb[64].mxu1 %vm945_vm1, %v12097_v16  ;;  %v12160_v16 = vld [vmem:[%s12672_s6 + $0xb8] sm:$0xff]  }
  0x9c   : > { %10908 = vmatmul.mubr.msk.bf16.gmra.mrb[64].mxu0 %vm945_vm1, %v12098_v17  ;;  %10583 = vmatprep.mubr.msk.bf16.mxu1 %vm945_vm1, %v12099_v18  ;;  %v12161_v17 = vld [vmem:[%s12573_s23 + $0x200] sm:$0xff]  }
  0x9d   : > { %10911 = vmatprep.mubr.msk.bf16.mxu0 %vm945_vm1, %v12100_v19  ;;  %v12162_v18 = vld [vmem:[%s12672_s6 + $0xc0] sm:$0xff]   ;;  %v12163_v19 = vld [vmem:[%s12573_s23 + $0x208] sm:$0xff]  }
  0xa3   : > { %10584 = vmatmul.mubr.msk.bf16.gmra.mrb[68].mxu1 %vm945_vm1, %v12101_v20  ;;  %v12164_v20 = vld [vmem:[%s12672_s6 + $0xc8] sm:$0xff]  }
  0xa4   : > { %10912 = vmatmul.mubr.msk.bf16.gmra.mrb[68].mxu0 %vm945_vm1, %v12102_v21  ;;  %10587 = vmatprep.mubr.msk.bf16.mxu1 %vm945_vm1, %v12103_v22  ;;  %v12165_v21 = vld [vmem:[%s12573_s23 + $0x210] sm:$0xff]  }
  0xa5   : > { %10915 = vmatprep.mubr.msk.bf16.mxu0 %vm945_vm1, %v12104_v23  ;;  %v12166_v22 = vld [vmem:[%s12672_s6 + $0xd0] sm:$0xff]   ;;  %v12167_v23 = vld [vmem:[%s12573_s23 + $0x218] sm:$0xff]  }
  0xab   : > { %10588 = vmatmul.mubr.msk.bf16.gmra.mrb[72].mxu1 %vm945_vm1, %v12105_v24  ;;  %v12168_v24 = vld [vmem:[%s12672_s6 + $0xd8] sm:$0xff]  }
  0xac   : > { %10916 = vmatmul.mubr.msk.bf16.gmra.mrb[72].mxu0 %vm945_vm1, %v12106_v25  ;;  %10591 = vmatprep.mubr.msk.bf16.mxu1 %vm945_vm1, %v12107_v26  ;;  %v12169_v25 = vld [vmem:[%s12573_s23 + $0x220] sm:$0xff]  }
  0xad   : > { %10919 = vmatprep.mubr.msk.bf16.mxu0 %vm945_vm1, %v12108_v27  ;;  %v12170_v26 = vld [vmem:[%s12672_s6 + $0xe0] sm:$0xff]   ;;  %v12171_v27 = vld [vmem:[%s12573_s23 + $0x228] sm:$0xff]  }
  0xb3   : > { %10592 = vmatmul.mubr.msk.bf16.gmra.mrb[76].mxu1 %vm945_vm1, %v12109_v28  ;;  %v12172_v28 = vld [vmem:[%s12672_s6 + $0xe8] sm:$0xff]  }
  0xb4   : > { %10920 = vmatmul.mubr.msk.bf16.gmra.mrb[76].mxu0 %vm945_vm1, %v12110_v29  ;;  %10595 = vmatprep.mubr.msk.bf16.mxu1 %vm945_vm1, %v12111_v30  ;;  %v12173_v29 = vld [vmem:[%s12573_s23 + $0x230] sm:$0xff]  }
  0xb5   : > { %11007 = vmatprep.mubr.msk.bf16.mxu0 %vm945_vm1, %v12113_v31  ;;  %v12174_v30 = vld [vmem:[%s12672_s6 + $0xf0] sm:$0xff]   ;;  %v12175_v31 = vld [vmem:[%s12573_s23 + $0x238] sm:$0xff]  }
  0xbb   : > { %10596 = vmatmul.mubr.msk.bf16.gmra.mrb[80].mxu1 %vm945_vm1, %v12115_v32  ;;  %v12176_v32 = vld [vmem:[%s12672_s6 + $0xf8] sm:$0xff]  }
  0xbc   : > { %11008 = vmatmul.mubr.msk.bf16.vlgmr.msra.gmra.mrb[0].mxu0 %vm945_vm1, %v12116_v33  ;;  %10599 = vmatprep.mubr.msk.bf16.mxu1 %vm945_vm1, %v12117_v34  ;;  %v12177_v33 = vld [vmem:[%s12573_s23 + $0x240] sm:$0xff]  }
  0xbd   : > { %11168 = vmatpush3.bf16.msra.mxu0 %v12681_v57  ;;  %11011 = vmatprep.mubr.msk.bf16.mxu0 %vm945_vm1, %v12118_v35  ;;  %v12138_v57 = vld [vmem:[%s12672_s6 + $0x60] sm:$0xff]   ;;  %v12179_v35 = vld [vmem:[%s12573_s23 + $0x248] sm:$0xff]  }
  0xbe   : > { %11980 = vmatprep.subr.msk.bf16.mxu0 %vm1186_vm0, %v12195_v49  ;;  %v12178_v34 = vld [vmem:[%s12672_s6 + $0x100] sm:$0xff]  }
  0xbf   : > { %v12193_v49 = vld [vmem:[%s12805_s27] sm:$0xff]  }
  0xc1   : > { %11170 = vmatpush3.bf16.msra.mxu0 %v7318_v53  ;;  %v12198_v53 = vld [vmem:[%s12805_s27 + $0x10] sm:$0xff]  }
  0xc3   : > { %10600 = vmatmul.mubr.msk.bf16.gmra.mrb[84].mxu1 %vm945_vm1, %v12119_v36  ;;  %v12180_v36 = vld [vmem:[%s12672_s6 + $0x108] sm:$0xff]  }
  0xc4   : > { %11012 = vmatmul.mubr.msk.bf16.gmra.mrb[4].mxu0 %vm945_vm1, %v12120_v37  ;;  %10603 = vmatprep.mubr.msk.bf16.mxu1 %vm945_vm1, %v12121_v38  ;;  %v12181_v37 = vld [vmem:[%s12573_s23 + $0x250] sm:$0xff]  }
  0xc5   : > { %11015 = vmatprep.mubr.msk.bf16.mxu0 %vm945_vm1, %v12122_v39  ;;  %v12182_v38 = vld [vmem:[%s12672_s6 + $0x110] sm:$0xff]   ;;  %v12183_v39 = vld [vmem:[%s12573_s23 + $0x258] sm:$0xff]  }
  0xcb   : > { %10604 = vmatmul.mubr.msk.bf16.gmra.mrb[88].mxu1 %vm945_vm1, %v12123_v40  ;;  %v12184_v40 = vld [vmem:[%s12672_s6 + $0x118] sm:$0xff]  }
  0xcc   : > { %11016 = vmatmul.mubr.msk.bf16.gmra.mrb[8].mxu0 %vm945_vm1, %v12124_v41  ;;  %10607 = vmatprep.mubr.msk.bf16.mxu1 %vm945_vm1, %v12125_v42  ;;  %v12185_v41 = vld [vmem:[%s12573_s23 + $0x260] sm:$0xff]  }
  0xcd   : > { %11019 = vmatprep.mubr.msk.bf16.mxu0 %vm945_vm1, %v12126_v43  ;;  %v12186_v42 = vld [vmem:[%s12672_s6 + $0x120] sm:$0xff]   ;;  %v12187_v43 = vld [vmem:[%s12573_s23 + $0x268] sm:$0xff]  }
  0xd3   : > { %10608 = vmatmul.mubr.msk.bf16.gmra.mrb[92].mxu1 %vm945_vm1, %v12127_v44  ;;  %v12188_v44 = vld [vmem:[%s12672_s6 + $0x128] sm:$0xff]  }
  0xd4   : > { %11020 = vmatmul.mubr.msk.bf16.gmra.mrb[12].mxu0 %vm945_vm1, %v12128_v45  ;;  %10611 = vmatprep.mubr.msk.bf16.mxu1 %vm945_vm1, %v12129_v46  ;;  %v12189_v45 = vld [vmem:[%s12573_s23 + $0x270] sm:$0xff]  }
  0xd5   : > { %11023 = vmatprep.mubr.msk.bf16.mxu0 %vm945_vm1, %v12130_v47  ;;  %v12190_v46 = vld [vmem:[%s12672_s6 + $0x130] sm:$0xff]   ;;  %v12191_v47 = vld [vmem:[%s12573_s23 + $0x278] sm:$0xff]  }
  0xdb   : > { %10612 = vmatmul.mubr.msk.bf16.gmra.mrb[96].mxu1 %vm945_vm1, %v12131_v48  ;;  %v12192_v48 = vld [vmem:[%s12672_s6 + $0x138] sm:$0xff]  }
  0xdc   : > { %11024 = vmatmul.mubr.msk.bf16.gmra.mrb[16].mxu0 %vm945_vm1, %v12132_v50  ;;  %10615 = vmatprep.mubr.msk.bf16.mxu1 %vm945_vm1, %v12133_v51  ;;  %v12194_v50 = vld [vmem:[%s12672_s6 + $0x140] sm:$0xff]   ;;  %v12196_v51 = vld [vmem:[%s12805_s27 + $0x8] sm:$0xff]  }
  0xdd   : > { %11027 = vmatprep.mubr.msk.bf16.mxu0 %vm945_vm1, %v12134_v52  ;;  %v12197_v52 = vld [vmem:[%s12672_s6 + $0x148] sm:$0xff]  }
  0xe3   : > { %10616 = vmatmul.mubr.msk.bf16.gmra.mrb[100].mxu1 %vm945_vm1, %v12135_v54  ;;  %v12199_v54 = vld [vmem:[%s12672_s6 + $0x150] sm:$0xff]  }
  0xe4   : > { %11028 = vmatmul.mubr.msk.bf16.gmra.mrb[20].mxu0 %vm945_vm1, %v12136_v55  ;;  %10619 = vmatprep.mubr.msk.bf16.mxu1 %vm945_vm1, %v12137_v56  ;;  %v12434_v55 = vld [vmem:[%s13951_s1 + $0x18] sm:$0xff]   ;;  %v12435_v56 = vld [vmem:[%s13951_s1 + $0x20] ss:$0 sps:$4 sm:$0x33]  }
  0xe5   : > { %11031 = vmatprep.mubr.msk.bf16.mxu0 %vm945_vm1, %v12138_v57  ;;  %v12200_v57 = vld [vmem:[%s12805_s27 + $0x18] sm:$0xff]  }
  0xeb   : > { %10620 = vmatmul.mubr.msk.bf16.gmra.mrb[104].mxu1 %vm945_vm1, %v12139_v58  ;;  %v12201_v58 = vld [vmem:[%s12672_s6 + $0x158] sm:$0xff]  }
  0xec   : > { %11032 = vmatmul.mubr.msk.bf16.gmra.mrb[24].mxu0 %vm945_vm1, %v12140_v59  ;;  %10623 = vmatprep.mubr.msk.bf16.mxu1 %vm945_vm1, %v12141_v60  ;;  %v12202_v59 = vld [vmem:[%s12805_s27 + $0x20] sm:$0xff]  }
  0xed   : > { %11035 = vmatprep.mubr.msk.bf16.mxu0 %vm945_vm1, %v12142_v61  ;;  %v12203_v60 = vld [vmem:[%s12672_s6 + $0x160] sm:$0xff]   ;;  %v12204_v61 = vld [vmem:[%s12805_s27 + $0x28] sm:$0xff]  }
  0xf3   : > { %10624 = vmatmul.mubr.msk.bf16.gmra.mrb[108].mxu1 %vm945_vm1, %v12143_v62  ;;  %v12205_v62 = vld [vmem:[%s12672_s6 + $0x168] sm:$0xff]  }
  0xf4   : > { %11036 = vmatmul.mubr.msk.bf16.gmra.mrb[28].mxu0 %vm945_vm1, %v12144_v63  ;;  %10627 = vmatprep.mubr.msk.bf16.mxu1 %vm945_vm1, %v12145_v0  ;;  %v12206_v63 = vld [vmem:[%s12805_s27 + $0x30] sm:$0xff]  }
  0xf5   : > { %11039 = vmatprep.mubr.msk.bf16.mxu0 %vm945_vm1, %v12146_v1  ;;  %v12207_v0 = vld [vmem:[%s12672_s6 + $0x170] sm:$0xff]   ;;  %v12209_v1 = vld [vmem:[%s12672_s6 + $0x178] sm:$0xff]  }
  0xfb   : > { %10628 = vmatmul.mubr.msk.bf16.gmra.mrb[112].mxu1 %vm945_vm1, %v12147_v2  ;;  %v12210_v2 = vld [vmem:[%s12805_s27 + $0x40] sm:$0xff]  }
  0xfc   : > { %11040 = vmatmul.mubr.msk.bf16.gmra.mrb[32].mxu0 %vm945_vm1, %v12148_v3  ;;  %10631 = vmatprep.mubr.msk.bf16.mxu1 %vm945_vm1, %v12149_v4  ;;  %v12211_v3 = vld [vmem:[%s12672_s6 + $0x180] sm:$0xff]   ;;  %v12212_v4 = vld [vmem:[%s12805_s27 + $0x48] sm:$0xff]  }
  0xfd   : > { %11043 = vmatprep.mubr.msk.bf16.mxu0 %vm945_vm1, %v12150_v5  ;;  %v12213_v5 = vld [vmem:[%s12672_s6 + $0x188] sm:$0xff]  }
 0x103   : > { %10632 = vmatmul.mubr.msk.bf16.gmra.mrb[116].mxu1 %vm945_vm1, %v12151_v7  ;;  %v12214_v7 = vld [vmem:[%s12805_s27 + $0x50] sm:$0xff]  }
 0x104   : > { %11044 = vmatmul.mubr.msk.bf16.gmra.mrb[36].mxu0 %vm945_vm1, %v12152_v8  ;;  %10635 = vmatprep.mubr.msk.bf16.mxu1 %vm945_vm1, %v12153_v9  ;;  %v12215_v8 = vld [vmem:[%s12672_s6 + $0x190] sm:$0xff]   ;;  %v12216_v9 = vld [vmem:[%s12805_s27 + $0x58] sm:$0xff]  }
 0x105   : > { %11047 = vmatprep.mubr.msk.bf16.mxu0 %vm945_vm1, %v12154_v10  ;;  %v12217_v10 = vld [vmem:[%s12672_s6 + $0x198] sm:$0xff]  }
 0x10b   : > { %10636 = vmatmul.mubr.msk.bf16.gmra.mrb[120].mxu1 %vm945_vm1, %v12155_v11  ;;  %v12218_v11 = vld [vmem:[%s12805_s27 + $0x60] sm:$0xff]  }
 0x10c   : > { %11048 = vmatmul.mubr.msk.bf16.gmra.mrb[40].mxu0 %vm945_vm1, %v12156_v12  ;;  %10639 = vmatprep.mubr.msk.bf16.mxu1 %vm945_vm1, %v12157_v13  ;;  %v12219_v12 = vld [vmem:[%s12672_s6 + $0x1a0] sm:$0xff]   ;;  %v12220_v13 = vld [vmem:[%s12805_s27 + $0x68] sm:$0xff]  }
 0x10d   : > { %11051 = vmatprep.mubr.msk.bf16.mxu0 %vm945_vm1, %v12158_v14  ;;  %v12221_v14 = vld [vmem:[%s12672_s6 + $0x1a8] sm:$0xff]  }
 0x113   : > { %10640 = vmatmul.mubr.msk.bf16.gmra.mrb[124].mxu1 %vm945_vm1, %v12159_v15  ;;  %v12222_v15 = vld [vmem:[%s12805_s27 + $0x70] sm:$0xff]  }
 0x114   : > { %11052 = vmatmul.mubr.msk.bf16.gmra.mrb[44].mxu0 %vm945_vm1, %v12160_v16  ;;  %10643 = vmatprep.mubr.msk.bf16.mxu1 %vm945_vm1, %v12161_v17  ;;  %v12223_v16 = vld [vmem:[%s12672_s6 + $0x1b0] sm:$0xff]   ;;  %v12224_v17 = vld [vmem:[%s12805_s27 + $0x78] sm:$0xff]  }
 0x115   : > { %11055 = vmatprep.mubr.msk.bf16.mxu0 %vm945_vm1, %v12162_v18  ;;  %v12225_v18 = vld [vmem:[%s12672_s6 + $0x1b8] sm:$0xff]  }
 0x11b   : > { %10644 = vmatmul.mubr.msk.bf16.gmra.mrb[128].mxu1 %vm945_vm1, %v12163_v19  ;;  %v12226_v19 = vld [vmem:[%s12805_s27 + $0x80] sm:$0xff]  }
 0x11c   : > { %11056 = vmatmul.mubr.msk.bf16.gmra.mrb[48].mxu0 %vm945_vm1, %v12164_v20  ;;  %10647 = vmatprep.mubr.msk.bf16.mxu1 %vm945_vm1, %v12165_v21  ;;  %v12227_v20 = vld [vmem:[%s12672_s6 + $0x1c0] sm:$0xff]   ;;  %v12228_v21 = vld [vmem:[%s12805_s27 + $0x88] sm:$0xff]  }
 0x11d   : > { %11059 = vmatprep.mubr.msk.bf16.mxu0 %vm945_vm1, %v12166_v22  ;;  %v12229_v22 = vld [vmem:[%s12672_s6 + $0x1c8] sm:$0xff]  }
 0x123   : > { %10648 = vmatmul.mubr.msk.bf16.gmra.mrb[132].mxu1 %vm945_vm1, %v12167_v23  ;;  %v12230_v23 = vld [vmem:[%s12805_s27 + $0x90] sm:$0xff]  }
 0x124   : > { %11060 = vmatmul.mubr.msk.bf16.gmra.mrb[52].mxu0 %vm945_vm1, %v12168_v24  ;;  %10651 = vmatprep.mubr.msk.bf16.mxu1 %vm945_vm1, %v12169_v25  ;;  %v12231_v24 = vld [vmem:[%s12672_s6 + $0x1d0] sm:$0xff]   ;;  %v12232_v25 = vld [vmem:[%s12805_s27 + $0x98] sm:$0xff]  }
 0x125   : > { %11063 = vmatprep.mubr.msk.bf16.mxu0 %vm945_vm1, %v12170_v26  ;;  %v12233_v26 = vld [vmem:[%s12672_s6 + $0x1d8] sm:$0xff]  }
 0x12b   : > { %10652 = vmatmul.mubr.msk.bf16.gmra.mrb[136].mxu1 %vm945_vm1, %v12171_v27  ;;  %v12234_v27 = vld [vmem:[%s12805_s27 + $0xa0] sm:$0xff]  }
 0x12c   : > { %11064 = vmatmul.mubr.msk.bf16.gmra.mrb[56].mxu0 %vm945_vm1, %v12172_v28  ;;  %10655 = vmatprep.mubr.msk.bf16.mxu1 %vm945_vm1, %v12173_v29  ;;  %v12235_v28 = vld [vmem:[%s12672_s6 + $0x1e0] sm:$0xff]   ;;  %v12236_v29 = vld [vmem:[%s12805_s27 + $0xa8] sm:$0xff]  }
 0x12d   : > { %11067 = vmatprep.mubr.msk.bf16.mxu0 %vm945_vm1, %v12174_v30  ;;  %v12237_v30 = vld [vmem:[%s12672_s6 + $0x1e8] sm:$0xff]  }
 0x133   : > { %10656 = vmatmul.mubr.msk.bf16.gmra.mrb[140].mxu1 %vm945_vm1, %v12175_v31  ;;  %v12238_v31 = vld [vmem:[%s12805_s27 + $0xb0] sm:$0xff]  }
 0x134   : > { %11068 = vmatmul.mubr.msk.bf16.gmra.mrb[60].mxu0 %vm945_vm1, %v12176_v32  ;;  %10659 = vmatprep.mubr.msk.bf16.mxu1 %vm945_vm1, %v12177_v33  ;;  %v12239_v32 = vld [vmem:[%s12672_s6 + $0x1f0] sm:$0xff]   ;;  %v12240_v33 = vld [vmem:[%s12805_s27 + $0xb8] sm:$0xff]  }
 0x135   : > { %11071 = vmatprep.mubr.msk.bf16.mxu0 %vm945_vm1, %v12178_v34  ;;  %v12241_v34 = vld [vmem:[%s12672_s6 + $0x1f8] sm:$0xff]  }
 0x13b   : > { %10660 = vmatmul.mubr.msk.bf16.gmra.mrb[144].mxu1 %vm945_vm1, %v12179_v35  ;;  %v12242_v35 = vld [vmem:[%s12805_s27 + $0xc0] sm:$0xff]  }
 0x13c   : > { %11072 = vmatmul.mubr.msk.bf16.gmra.mrb[64].mxu0 %vm945_vm1, %v12180_v36  ;;  %10663 = vmatprep.mubr.msk.bf16.mxu1 %vm945_vm1, %v12181_v37  ;;  %v12243_v36 = vld [vmem:[%s12672_s6 + $0x200] sm:$0xff]   ;;  %v12244_v37 = vld [vmem:[%s12805_s27 + $0xc8] sm:$0xff]  }
 0x13d   : > { %11075 = vmatprep.mubr.msk.bf16.mxu0 %vm945_vm1, %v12182_v38  ;;  %v12245_v38 = vld [vmem:[%s12672_s6 + $0x208] sm:$0xff]  }
 0x143   : > { %10664 = vmatmul.mubr.msk.bf16.gmra.mrb[148].mxu1 %vm945_vm1, %v12183_v39  ;;  %v12246_v39 = vld [vmem:[%s12805_s27 + $0xd0] sm:$0xff]  }
 0x144   : > { %11076 = vmatmul.mubr.msk.bf16.gmra.mrb[68].mxu0 %vm945_vm1, %v12184_v40  ;;  %10667 = vmatprep.mubr.msk.bf16.mxu1 %vm945_vm1, %v12185_v41  ;;  %v12247_v40 = vld [vmem:[%s12672_s6 + $0x210] sm:$0xff]   ;;  %v12248_v41 = vld [vmem:[%s12805_s27 + $0xd8] sm:$0xff]  }
 0x145   : > { %11079 = vmatprep.mubr.msk.bf16.mxu0 %vm945_vm1, %v12186_v42  ;;  %v12249_v42 = vld [vmem:[%s12672_s6 + $0x218] sm:$0xff]  }
 0x14b   : > { %10668 = vmatmul.mubr.msk.bf16.gmra.mrb[152].mxu1 %vm945_vm1, %v12187_v43  ;;  %v12250_v43 = vld [vmem:[%s12805_s27 + $0xe0] sm:$0xff]  }
 0x14c   : > { %11080 = vmatmul.mubr.msk.bf16.gmra.mrb[72].mxu0 %vm945_vm1, %v12188_v44  ;;  %10671 = vmatprep.mubr.msk.bf16.mxu1 %vm945_vm1, %v12189_v45  ;;  %v12251_v44 = vld [vmem:[%s12672_s6 + $0x220] sm:$0xff]   ;;  %v12252_v45 = vld [vmem:[%s12805_s27 + $0xe8] sm:$0xff]  }
 0x14d   : > { %11083 = vmatprep.mubr.msk.bf16.mxu0 %vm945_vm1, %v12190_v46  ;;  %v12253_v46 = vld [vmem:[%s12672_s6 + $0x228] sm:$0xff]  }
 0x153   : > { %10672 = vmatmul.mubr.msk.bf16.gmra.mrb[156].mxu1 %vm945_vm1, %v12191_v47  ;;  %v12254_v47 = vld [vmem:[%s12805_s27 + $0xf0] sm:$0xff]  }
 0x154   : > { %11084 = vmatmul.mubr.msk.bf16.gmra.mrb[76].mxu0 %vm945_vm1, %v12192_v48  ;;  %10679 = vmatprep.mubr.msk.bf16.mxu1 %vm945_vm1, %v12193_v49  ;;  %v12255_v48 = vld [vmem:[%s12672_s6 + $0x230] sm:$0xff]   ;;  %v12256_v49 = vld [vmem:[%s12805_s27 + $0xf8] sm:$0xff]  }
 0x155   : > { %11087 = vmatprep.mubr.msk.bf16.mxu0 %vm945_vm1, %v12194_v50  ;;  %v12257_v50 = vld [vmem:[%s12672_s6 + $0x238] sm:$0xff]  }
 0x15b   : > { %10680 = vmatmul.mubr.msk.bf16.vlgmr.msra.gmra.mrb[0].mxu1 %vm945_vm1, %v12196_v51  ;;  %v12258_v51 = vld [vmem:[%s12805_s27 + $0x100] sm:$0xff]  }
 0x15c   : > { %11333 = vmatpush3.bf16.msra.mxu1 %v12434_v55  ;;  %11088 = vmatmul.mubr.msk.bf16.gmra.mrb[80].mxu0 %vm945_vm1, %v12197_v52  ;;  %v12259_v52 = vld [vmem:[%s12672_s6 + $0x240] sm:$0xff]   ;;  %v12262_v55 = vld [vmem:[%s12805_s27 + $0x110] sm:$0xff]  }
 0x15d   : > { %10683 = vmatprep.mubr.msk.bf16.mxu1 %vm945_vm1, %v12198_v53  ;;  %11091 = vmatprep.mubr.msk.bf16.mxu0 %vm945_vm1, %v12199_v54  ;;  %v12260_v53 = vld [vmem:[%s12805_s27 + $0x108] sm:$0xff]  }
 0x15e   : > { %11978 = vmatprep.subr.msk.bf16.mxu1 %vm1186_vm0, %v12435_v56  ;;  %v12261_v54 = vld [vmem:[%s12672_s6 + $0x248] sm:$0xff]   ;;  %v12263_v56 = vld [vmem:[%s12672_s6 + $0x250] sm:$0xff]  }
 0x160   : > { %11334 = vmatpush3.bf16.msra.mxu1 %v12559_v6  ;;  %v12208_v6 = vld [vmem:[%s12805_s27 + $0x38] sm:$0xff]  }
 0x163   : > { %10684 = vmatmul.mubr.msk.bf16.gmra.mrb[4].mxu1 %vm945_vm1, %v12200_v57  ;;  %v12264_v57 = vld [vmem:[%s12805_s27 + $0x118] sm:$0xff]  }
 0x164   : > { %11092 = vmatmul.mubr.msk.bf16.gmra.mrb[84].mxu0 %vm945_vm1, %v12201_v58  ;;  %10687 = vmatprep.mubr.msk.bf16.mxu1 %vm945_vm1, %v12202_v59  ;;  %v12265_v58 = vld [vmem:[%s12672_s6 + $0x258] sm:$0xff]   ;;  %v12266_v59 = vld [vmem:[%s12805_s27 + $0x120] sm:$0xff]  }
 0x165   : > { %11095 = vmatprep.mubr.msk.bf16.mxu0 %vm945_vm1, %v12203_v60  ;;  %v12267_v60 = vld [vmem:[%s12672_s6 + $0x260] sm:$0xff]  }
 0x16b   : > { %10688 = vmatmul.mubr.msk.bf16.gmra.mrb[8].mxu1 %vm945_vm1, %v12204_v61  ;;  %v12268_v61 = vld [vmem:[%s12805_s27 + $0x128] sm:$0xff]  }
 0x16c   : > { %11096 = vmatmul.mubr.msk.bf16.gmra.mrb[88].mxu0 %vm945_vm1, %v12205_v62  ;;  %10691 = vmatprep.mubr.msk.bf16.mxu1 %vm945_vm1, %v12206_v63  ;;  %v12269_v62 = vld [vmem:[%s12672_s6 + $0x268] sm:$0xff]   ;;  %v12270_v63 = vld [vmem:[%s12805_s27 + $0x130] sm:$0xff]  }
 0x16d   : > { %11099 = vmatprep.mubr.msk.bf16.mxu0 %vm945_vm1, %v12207_v0  ;;  %v12271_v0 = vld [vmem:[%s12672_s6 + $0x270] sm:$0xff]  }
 0x173   : > { %10692 = vmatmul.mubr.msk.bf16.gmra.mrb[12].mxu1 %vm945_vm1, %v12208_v6  ;;  %v12272_v6 = vld [vmem:[%s12805_s27 + $0x138] sm:$0xff]  }
 0x174   : > { %11100 = vmatmul.mubr.msk.bf16.gmra.mrb[92].mxu0 %vm945_vm1, %v12209_v1  ;;  %10695 = vmatprep.mubr.msk.bf16.mxu1 %vm945_vm1, %v12210_v2  ;;  %v12273_v1 = vld [vmem:[%s12672_s6 + $0x278] sm:$0xff]   ;;  %v12274_v2 = vld [vmem:[%s12805_s27 + $0x140] sm:$0xff]   ;;  %s9233_s6 = sshll.u32 %s12460_s12, 3  ;;  %s11983_s12 = smul.u32 200, %s14028_s13 }
 0x175   : > { %11103 = vmatprep.mubr.msk.bf16.mxu0 %vm945_vm1, %v12211_v3  ;;  %v12275_v3 = vld [vmem:[%s12978_s9] sm:$0xff]   ;;  %p13519_p6 = scmp.lt.s32.totalorder %s9233_s6, 39 }
 0x177   : > { %s14030_s6 = smov (!%p13519_p6, %s9233_s6), 39 }
 0x178   : > { %s11982_s19 = smul.u32 5, %s14030_s6 }
 0x17a   : > { %s13553_s13 = sadd.s32 %s11983_s12, %s11982_s19 }
 0x17b   : > { %10696 = vmatmul.mubr.msk.bf16.gmra.mrb[16].mxu1 %vm945_vm1, %v12212_v4  ;;  %v12276_v4 = vld [vmem:[%s12805_s27 + $0x148] sm:$0xff]   ;;  %s9234_s20 = sshll.u32 %s13553_s13, 3 }
 0x17c   : > { %11104 = vmatmul.mubr.msk.bf16.gmra.mrb[96].mxu0 %vm945_vm1, %v12213_v5  ;;  %10699 = vmatprep.mubr.msk.bf16.mxu1 %vm945_vm1, %v12214_v7  ;;  %v12277_v5 = vld [vmem:[%s12978_s9 + $0x8] sm:$0xff]   ;;  %v12278_v7 = vld [vmem:[%s12805_s27 + $0x150] sm:$0xff]   ;;  %s13571_s24 = scalar_lea.vmem %s13953_s3, %s9234_s20 }
 0x17d   : > { %11107 = vmatprep.mubr.msk.bf16.mxu0 %vm945_vm1, %v12215_v8  ;;  %v12279_v8 = vld [vmem:[%s12978_s9 + $0x10] sm:$0xff]  }
 0x183   : > { %10700 = vmatmul.mubr.msk.bf16.gmra.mrb[20].mxu1 %vm945_vm1, %v12216_v9  ;;  %v12280_v9 = vld [vmem:[%s12805_s27 + $0x158] sm:$0xff]  }
 0x184   : > { %11108 = vmatmul.mubr.msk.bf16.gmra.mrb[100].mxu0 %vm945_vm1, %v12217_v10  ;;  %10703 = vmatprep.mubr.msk.bf16.mxu1 %vm945_vm1, %v12218_v11  ;;  %v12281_v10 = vld [vmem:[%s12978_s9 + $0x18] sm:$0xff]   ;;  %v12282_v11 = vld [vmem:[%s12805_s27 + $0x160] sm:$0xff]  }
 0x185   : > { %11111 = vmatprep.mubr.msk.bf16.mxu0 %vm945_vm1, %v12219_v12  ;;  %v12283_v12 = vld [vmem:[%s12978_s9 + $0x20] sm:$0xff]  }
 0x18b   : > { %10704 = vmatmul.mubr.msk.bf16.gmra.mrb[24].mxu1 %vm945_vm1, %v12220_v13  ;;  %v12284_v13 = vld [vmem:[%s12805_s27 + $0x168] sm:$0xff]  }
 0x18c   : > { %11112 = vmatmul.mubr.msk.bf16.gmra.mrb[104].mxu0 %vm945_vm1, %v12221_v14  ;;  %10707 = vmatprep.mubr.msk.bf16.mxu1 %vm945_vm1, %v12222_v15  ;;  %v12285_v14 = vld [vmem:[%s12978_s9 + $0x28] sm:$0xff]   ;;  %v12286_v15 = vld [vmem:[%s12805_s27 + $0x170] sm:$0xff]  }
 0x18d   : > { %11115 = vmatprep.mubr.msk.bf16.mxu0 %vm945_vm1, %v12223_v16  ;;  %v12287_v16 = vld [vmem:[%s12978_s9 + $0x30] sm:$0xff]  }
 0x193   : > { %10708 = vmatmul.mubr.msk.bf16.gmra.mrb[28].mxu1 %vm945_vm1, %v12224_v17  ;;  %v12288_v17 = vld [vmem:[%s12805_s27 + $0x178] sm:$0xff]  }
 0x194   : > { %11116 = vmatmul.mubr.msk.bf16.gmra.mrb[108].mxu0 %vm945_vm1, %v12225_v18  ;;  %10711 = vmatprep.mubr.msk.bf16.mxu1 %vm945_vm1, %v12226_v19  ;;  %v12289_v18 = vld [vmem:[%s12978_s9 + $0x38] sm:$0xff]   ;;  %v12290_v19 = vld [vmem:[%s12805_s27 + $0x180] sm:$0xff]  }
 0x195   : > { %11119 = vmatprep.mubr.msk.bf16.mxu0 %vm945_vm1, %v12227_v20  ;;  %v12291_v20 = vld [vmem:[%s12978_s9 + $0x40] sm:$0xff]  }
 0x19b   : > { %10712 = vmatmul.mubr.msk.bf16.gmra.mrb[32].mxu1 %vm945_vm1, %v12228_v21  ;;  %v12292_v21 = vld [vmem:[%s12805_s27 + $0x188] sm:$0xff]  }
 0x19c   : > { %11120 = vmatmul.mubr.msk.bf16.gmra.mrb[112].mxu0 %vm945_vm1, %v12229_v22  ;;  %10715 = vmatprep.mubr.msk.bf16.mxu1 %vm945_vm1, %v12230_v23  ;;  %v12293_v22 = vld [vmem:[%s12978_s9 + $0x48] sm:$0xff]   ;;  %v12294_v23 = vld [vmem:[%s12805_s27 + $0x190] sm:$0xff]  }
 0x19d   : > { %11123 = vmatprep.mubr.msk.bf16.mxu0 %vm945_vm1, %v12231_v24  ;;  %v12295_v24 = vld [vmem:[%s12978_s9 + $0x50] sm:$0xff]  }
 0x1a3   : > { %10716 = vmatmul.mubr.msk.bf16.gmra.mrb[36].mxu1 %vm945_vm1, %v12232_v25  ;;  %v12296_v25 = vld [vmem:[%s12805_s27 + $0x198] sm:$0xff]  }
 0x1a4   : > { %11124 = vmatmul.mubr.msk.bf16.gmra.mrb[116].mxu0 %vm945_vm1, %v12233_v26  ;;  %10719 = vmatprep.mubr.msk.bf16.mxu1 %vm945_vm1, %v12234_v27  ;;  %v12297_v26 = vld [vmem:[%s12978_s9 + $0x58] sm:$0xff]   ;;  %v12298_v27 = vld [vmem:[%s12805_s27 + $0x1a0] sm:$0xff]  }
 0x1a5   : > { %11127 = vmatprep.mubr.msk.bf16.mxu0 %vm945_vm1, %v12235_v28  ;;  %v12299_v28 = vld [vmem:[%s12978_s9 + $0x60] sm:$0xff]  }
 0x1ab   : > { %10720 = vmatmul.mubr.msk.bf16.gmra.mrb[40].mxu1 %vm945_vm1, %v12236_v29  ;;  %v12300_v29 = vld [vmem:[%s12805_s27 + $0x1a8] sm:$0xff]  }
 0x1ac   : > { %11128 = vmatmul.mubr.msk.bf16.gmra.mrb[120].mxu0 %vm945_vm1, %v12237_v30  ;;  %10723 = vmatprep.mubr.msk.bf16.mxu1 %vm945_vm1, %v12238_v31  ;;  %v12301_v30 = vld [vmem:[%s12978_s9 + $0x68] sm:$0xff]   ;;  %v12302_v31 = vld [vmem:[%s12805_s27 + $0x1b0] sm:$0xff]  }
 0x1ad   : > { %11131 = vmatprep.mubr.msk.bf16.mxu0 %vm945_vm1, %v12239_v32  ;;  %v12303_v32 = vld [vmem:[%s12978_s9 + $0x70] sm:$0xff]  }
 0x1b3   : > { %10724 = vmatmul.mubr.msk.bf16.gmra.mrb[44].mxu1 %vm945_vm1, %v12240_v33 }
 0x1b4   : > { %11132 = vmatmul.mubr.msk.bf16.gmra.mrb[124].mxu0 %vm945_vm1, %v12241_v34  ;;  %10727 = vmatprep.mubr.msk.bf16.mxu1 %vm945_vm1, %v12242_v35  ;;  %v12304_v35 = vld [vmem:[%s12805_s27 + $0x1b8] sm:$0xff]  }
 0x1b5   : > { %11135 = vmatprep.mubr.msk.bf16.mxu0 %vm945_vm1, %v12243_v36 }
 0x1bb   : > { %10728 = vmatmul.mubr.msk.bf16.gmra.mrb[48].mxu1 %vm945_vm1, %v12244_v37  ;;  %v12305_v37 = vld [vmem:[%s12978_s9 + $0x78] sm:$0xff]  }
 0x1bc   : > { %11136 = vmatmul.mubr.msk.bf16.gmra.mrb[128].mxu0 %vm945_vm1, %v12245_v38  ;;  %10731 = vmatprep.mubr.msk.bf16.mxu1 %vm945_vm1, %v12246_v39  ;;  %v12306_v38 = vld [vmem:[%s12805_s27 + $0x1c0] sm:$0xff]  }
 0x1bd   : > { %11139 = vmatprep.mubr.msk.bf16.mxu0 %vm945_vm1, %v12247_v40  ;;  %v12307_v40 = vld [vmem:[%s12978_s9 + $0x80] sm:$0xff]  }
 0x1c3   : > { %10732 = vmatmul.mubr.msk.bf16.gmra.mrb[52].mxu1 %vm945_vm1, %v12248_v41 }
 0x1c4   : > { %11140 = vmatmul.mubr.msk.bf16.gmra.mrb[132].mxu0 %vm945_vm1, %v12249_v42  ;;  %10735 = vmatprep.mubr.msk.bf16.mxu1 %vm945_vm1, %v12250_v43  ;;  %v12308_v43 = vld [vmem:[%s12805_s27 + $0x1c8] sm:$0xff]  }
 0x1c5   : > { %11143 = vmatprep.mubr.msk.bf16.mxu0 %vm945_vm1, %v12251_v44 }
 0x1cb   : > { %10736 = vmatmul.mubr.msk.bf16.gmra.mrb[56].mxu1 %vm945_vm1, %v12252_v45  ;;  %v12309_v45 = vld [vmem:[%s12978_s9 + $0x88] sm:$0xff]  }
 0x1cc   : > { %11144 = vmatmul.mubr.msk.bf16.gmra.mrb[136].mxu0 %vm945_vm1, %v12253_v46  ;;  %10739 = vmatprep.mubr.msk.bf16.mxu1 %vm945_vm1, %v12254_v47  ;;  %v12310_v46 = vld [vmem:[%s12805_s27 + $0x1d0] sm:$0xff]  }
 0x1cd   : > { %11147 = vmatprep.mubr.msk.bf16.mxu0 %vm945_vm1, %v12255_v48  ;;  %v12311_v48 = vld [vmem:[%s12978_s9 + $0x90] sm:$0xff]  }
 0x1d3   : > { %10740 = vmatmul.mubr.msk.bf16.gmra.mrb[60].mxu1 %vm945_vm1, %v12256_v49 }
 0x1d4   : > { %11148 = vmatmul.mubr.msk.bf16.gmra.mrb[140].mxu0 %vm945_vm1, %v12257_v50  ;;  %10743 = vmatprep.mubr.msk.bf16.mxu1 %vm945_vm1, %v12258_v51  ;;  %v12312_v51 = vld [vmem:[%s12805_s27 + $0x1d8] sm:$0xff]  }
 0x1d5   : > { %11151 = vmatprep.mubr.msk.bf16.mxu0 %vm945_vm1, %v12259_v52 }
 0x1db   : > { %10744 = vmatmul.mubr.msk.bf16.gmra.mrb[64].mxu1 %vm945_vm1, %v12260_v53  ;;  %v12313_v53 = vld [vmem:[%s12978_s9 + $0x98] sm:$0xff]  }
 0x1dc   : > { %11152 = vmatmul.mubr.msk.bf16.gmra.mrb[144].mxu0 %vm945_vm1, %v12261_v54  ;;  %10747 = vmatprep.mubr.msk.bf16.mxu1 %vm945_vm1, %v12262_v55  ;;  %v12314_v54 = vld [vmem:[%s12805_s27 + $0x1e0] sm:$0xff]  }
 0x1dd   : > { %11155 = vmatprep.mubr.msk.bf16.mxu0 %vm945_vm1, %v12263_v56  ;;  %v12315_v56 = vld [vmem:[%s12978_s9 + $0xa0] sm:$0xff]  }
 0x1e3   : > { %10748 = vmatmul.mubr.msk.bf16.gmra.mrb[68].mxu1 %vm945_vm1, %v12264_v57 }
 0x1e4   : > { %11156 = vmatmul.mubr.msk.bf16.gmra.mrb[148].mxu0 %vm945_vm1, %v12265_v58  ;;  %10751 = vmatprep.mubr.msk.bf16.mxu1 %vm945_vm1, %v12266_v59  ;;  %v12316_v59 = vld [vmem:[%s12805_s27 + $0x1e8] sm:$0xff]  }
 0x1e5   : > { %11159 = vmatprep.mubr.msk.bf16.mxu0 %vm945_vm1, %v12267_v60 }
 0x1eb   : > { %10752 = vmatmul.mubr.msk.bf16.gmra.mrb[72].mxu1 %vm945_vm1, %v12268_v61  ;;  %v12317_v61 = vld [vmem:[%s12978_s9 + $0xa8] sm:$0xff]  }
 0x1ec   : > { %11160 = vmatmul.mubr.msk.bf16.gmra.mrb[152].mxu0 %vm945_vm1, %v12269_v62  ;;  %10755 = vmatprep.mubr.msk.bf16.mxu1 %vm945_vm1, %v12270_v63  ;;  %v12318_v62 = vld [vmem:[%s12805_s27 + $0x1f0] sm:$0xff]  }
 0x1ed   : > { %11163 = vmatprep.mubr.msk.bf16.mxu0 %vm945_vm1, %v12271_v0  ;;  %v12319_v0 = vld [vmem:[%s12978_s9 + $0xb0] sm:$0xff]  }
 0x1f3   : > { %10756 = vmatmul.mubr.msk.bf16.gmra.mrb[76].mxu1 %vm945_vm1, %v12272_v6 }
 0x1f4   : > { %11164 = vmatmul.mubr.msk.bf16.gmra.mrb[156].mxu0 %vm945_vm1, %v12273_v1  ;;  %10759 = vmatprep.mubr.msk.bf16.mxu1 %vm945_vm1, %v12274_v2  ;;  %v12320_v2 = vld [vmem:[%s12805_s27 + $0x1f8] sm:$0xff]  }
 0x1f5   : > { %11171 = vmatprep.mubr.msk.bf16.mxu0 %vm945_vm1, %v12275_v3 }
 0x1fb   : > { %10760 = vmatmul.mubr.msk.bf16.gmra.mrb[80].mxu1 %vm945_vm1, %v12276_v4  ;;  %v12321_v4 = vld [vmem:[%s12978_s9 + $0xb8] sm:$0xff]  }
 0x1fc   : > { %11172 = vmatmul.mubr.msk.bf16.vlgmr.msra.gmra.mrb[0].mxu0 %vm945_vm1, %v12277_v5  ;;  %10763 = vmatprep.mubr.msk.bf16.mxu1 %vm945_vm1, %v12278_v7  ;;  %v12322_v5 = vld [vmem:[%s12805_s27 + $0x200] sm:$0xff]  }
 0x1fd   : > { %11175 = vmatprep.mubr.msk.bf16.mxu0 %vm945_vm1, %v12279_v8  ;;  %v12323_v8 = vld [vmem:[%s12978_s9 + $0xc0] sm:$0xff]  }
 0x203   : > { %10764 = vmatmul.mubr.msk.bf16.gmra.mrb[84].mxu1 %vm945_vm1, %v12280_v9 }
 0x204   : > { %11176 = vmatmul.mubr.msk.bf16.gmra.mrb[4].mxu0 %vm945_vm1, %v12281_v10  ;;  %10767 = vmatprep.mubr.msk.bf16.mxu1 %vm945_vm1, %v12282_v11  ;;  %v12324_v11 = vld [vmem:[%s12805_s27 + $0x208] sm:$0xff]  }
 0x205   : > { %11179 = vmatprep.mubr.msk.bf16.mxu0 %vm945_vm1, %v12283_v12 }
 0x20b   : > { %10768 = vmatmul.mubr.msk.bf16.gmra.mrb[88].mxu1 %vm945_vm1, %v12284_v13  ;;  %v12325_v13 = vld [vmem:[%s12978_s9 + $0xc8] sm:$0xff]  }
 0x20c   : > { %11180 = vmatmul.mubr.msk.bf16.gmra.mrb[8].mxu0 %vm945_vm1, %v12285_v14  ;;  %10771 = vmatprep.mubr.msk.bf16.mxu1 %vm945_vm1, %v12286_v15  ;;  %v12326_v14 = vld [vmem:[%s12805_s27 + $0x210] sm:$0xff]  }
 0x20d   : > { %11183 = vmatprep.mubr.msk.bf16.mxu0 %vm945_vm1, %v12287_v16  ;;  %v12327_v16 = vld [vmem:[%s12978_s9 + $0xd0] sm:$0xff]  }
 0x213   : > { %10772 = vmatmul.mubr.msk.bf16.gmra.mrb[92].mxu1 %vm945_vm1, %v12288_v17 }
 0x214   : > { %11184 = vmatmul.mubr.msk.bf16.gmra.mrb[12].mxu0 %vm945_vm1, %v12289_v18  ;;  %10775 = vmatprep.mubr.msk.bf16.mxu1 %vm945_vm1, %v12290_v19  ;;  %v12328_v19 = vld [vmem:[%s12805_s27 + $0x218] sm:$0xff]  }
 0x215   : > { %11187 = vmatprep.mubr.msk.bf16.mxu0 %vm945_vm1, %v12291_v20 }
 0x21b   : > { %10776 = vmatmul.mubr.msk.bf16.gmra.mrb[96].mxu1 %vm945_vm1, %v12292_v21  ;;  %v12329_v21 = vld [vmem:[%s12978_s9 + $0xd8] sm:$0xff]  }
 0x21c   : > { %11188 = vmatmul.mubr.msk.bf16.gmra.mrb[16].mxu0 %vm945_vm1, %v12293_v22  ;;  %10779 = vmatprep.mubr.msk.bf16.mxu1 %vm945_vm1, %v12294_v23  ;;  %v12330_v22 = vld [vmem:[%s12805_s27 + $0x220] sm:$0xff]  }
 0x21d   : > { %11191 = vmatprep.mubr.msk.bf16.mxu0 %vm945_vm1, %v12295_v24  ;;  %v12331_v24 = vld [vmem:[%s12978_s9 + $0xe0] sm:$0xff]  }
 0x223   : > { %10780 = vmatmul.mubr.msk.bf16.gmra.mrb[100].mxu1 %vm945_vm1, %v12296_v25 }
 0x224   : > { %11192 = vmatmul.mubr.msk.bf16.gmra.mrb[20].mxu0 %vm945_vm1, %v12297_v26  ;;  %10783 = vmatprep.mubr.msk.bf16.mxu1 %vm945_vm1, %v12298_v27  ;;  %v12332_v27 = vld [vmem:[%s12805_s27 + $0x228] sm:$0xff]  }
 0x225   : > { %11195 = vmatprep.mubr.msk.bf16.mxu0 %vm945_vm1, %v12299_v28 }
 0x22b   : > { %10784 = vmatmul.mubr.msk.bf16.gmra.mrb[104].mxu1 %vm945_vm1, %v12300_v29  ;;  %v12333_v29 = vld [vmem:[%s12978_s9 + $0xe8] sm:$0xff]  }
 0x22c   : > { %11196 = vmatmul.mubr.msk.bf16.gmra.mrb[24].mxu0 %vm945_vm1, %v12301_v30  ;;  %10787 = vmatprep.mubr.msk.bf16.mxu1 %vm945_vm1, %v12302_v31  ;;  %v12334_v30 = vld [vmem:[%s12805_s27 + $0x230] sm:$0xff]  }
 0x22d   : > { %11199 = vmatprep.mubr.msk.bf16.mxu0 %vm945_vm1, %v12303_v32  ;;  %v12335_v32 = vld [vmem:[%s12978_s9 + $0xf0] sm:$0xff]  }
 0x22e   : > { %v13161_v33 = vpop.f32.mrb[0].mxu1 }
 0x22f   : > { %v13163_v34 = vpop.f32.mrb[1].mxu1 }
 0x230   : > { %v13166_v36 = vpop.f32.mrb[2].mxu1 }
 0x231   : > { %v13170_v39 = vpop.f32.mrb[3].mxu1 }
 0x233   : > { %10788 = vmatmul.mubr.msk.bf16.gmra.mrb[108].mxu1 %vm945_vm1, %v12304_v35 }
 0x234   : > { %11200 = vmatmul.mubr.msk.bf16.gmra.mrb[28].mxu0 %vm945_vm1, %v12305_v37  ;;  %10791 = vmatprep.mubr.msk.bf16.mxu1 %vm945_vm1, %v12306_v38  ;;  %v12336_v38 = vld [vmem:[%s12805_s27 + $0x238] sm:$0xff]  }
 0x235   : > { %11203 = vmatprep.mubr.msk.bf16.mxu0 %vm945_vm1, %v12307_v40 }
 0x236   : > { %v13177_v41 = vpop.f32.mrb[4].mxu1 }
 0x237   : > { %v13179_v42 = vpop.f32.mrb[5].mxu1 }
 0x238   : > { %v13182_v44 = vpop.f32.mrb[6].mxu1 }
 0x239   : > { %v13186_v47 = vpop.f32.mrb[7].mxu1 }
 0x23b   : > { %10792 = vmatmul.mubr.msk.bf16.gmra.mrb[112].mxu1 %vm945_vm1, %v12308_v43  ;;  %v12337_v43 = vld [vmem:[%s12978_s9 + $0xf8] sm:$0xff]  }
 0x23c   : > { %11204 = vmatmul.mubr.msk.bf16.gmra.mrb[32].mxu0 %vm945_vm1, %v12309_v45  ;;  %10795 = vmatprep.mubr.msk.bf16.mxu1 %vm945_vm1, %v12310_v46  ;;  %v12338_v45 = vld [vmem:[%s12805_s27 + $0x240] sm:$0xff]  }
 0x23d   : > { %11207 = vmatprep.mubr.msk.bf16.mxu0 %vm945_vm1, %v12311_v48  ;;  %v12339_v48 = vld [vmem:[%s12978_s9 + $0x100] sm:$0xff]  }
 0x23e   : > { %v13193_v49 = vpop.f32.mrb[8].mxu1 }
 0x23f   : > { %v13195_v50 = vpop.f32.mrb[9].mxu1 }
 0x240   : > { %v13198_v52 = vpop.f32.mrb[10].mxu1 }
 0x241   : > { %v13202_v55 = vpop.f32.mrb[11].mxu1 }
 0x243   : > { %10796 = vmatmul.mubr.msk.bf16.gmra.mrb[116].mxu1 %vm945_vm1, %v12312_v51 }
 0x244   : > { %11208 = vmatmul.mubr.msk.bf16.gmra.mrb[36].mxu0 %vm945_vm1, %v12313_v53  ;;  %10799 = vmatprep.mubr.msk.bf16.mxu1 %vm945_vm1, %v12314_v54  ;;  %v12340_v54 = vld [vmem:[%s12805_s27 + $0x248] sm:$0xff]  }
 0x245   : > { %11211 = vmatprep.mubr.msk.bf16.mxu0 %vm945_vm1, %v12315_v56 }
 0x246   : > { %v13209_v57 = vpop.f32.mrb[12].mxu1 }
 0x247   : > { %v13211_v58 = vpop.f32.mrb[13].mxu1 }
 0x248   : > { %v13214_v60 = vpop.f32.mrb[14].mxu1 }
 0x249   : > { %v13218_v63 = vpop.f32.mrb[15].mxu1 }
 0x24b   : > { %10800 = vmatmul.mubr.msk.bf16.gmra.mrb[120].mxu1 %vm945_vm1, %v12316_v59  ;;  %v12341_v59 = vld [vmem:[%s12978_s9 + $0x108] sm:$0xff]  }
 0x24c   : > { %11212 = vmatmul.mubr.msk.bf16.gmra.mrb[40].mxu0 %vm945_vm1, %v12317_v61  ;;  %10803 = vmatprep.mubr.msk.bf16.mxu1 %vm945_vm1, %v12318_v62  ;;  %v12342_v61 = vld [vmem:[%s12805_s27 + $0x250] sm:$0xff]  }
 0x24d   : > { %11215 = vmatprep.mubr.msk.bf16.mxu0 %vm945_vm1, %v12319_v0  ;;  %v12343_v0 = vld [vmem:[%s12978_s9 + $0x110] sm:$0xff]  }
 0x24e   : > { %v13225_v6 = vpop.f32.mrb[16].mxu1 }
 0x24f   : > { %v13227_v1 = vpop.f32.mrb[17].mxu1 }
 0x250   : > { %v13230_v3 = vpop.f32.mrb[18].mxu1 }
 0x251   : > { %v13234_v7 = vpop.f32.mrb[19].mxu1 }
 0x253   : > { %10804 = vmatmul.mubr.msk.bf16.gmra.mrb[124].mxu1 %vm945_vm1, %v12320_v2 }
 0x254   : > { %11216 = vmatmul.mubr.msk.bf16.gmra.mrb[44].mxu0 %vm945_vm1, %v12321_v4  ;;  %10807 = vmatprep.mubr.msk.bf16.mxu1 %vm945_vm1, %v12322_v5  ;;  %v12344_v5 = vld [vmem:[%s12805_s27 + $0x258] sm:$0xff]  }
 0x255   : > { %11219 = vmatprep.mubr.msk.bf16.mxu0 %vm945_vm1, %v12323_v8 }
 0x256   : > { %v13241_v9 = vpop.f32.mrb[20].mxu1 }
 0x257   : > { %v13243_v10 = vpop.f32.mrb[21].mxu1 }
 0x258   : > { %v13246_v12 = vpop.f32.mrb[22].mxu1 }
 0x259   : > { %v13250_v15 = vpop.f32.mrb[23].mxu1 }
 0x25b   : > { %10808 = vmatmul.mubr.msk.bf16.gmra.mrb[128].mxu1 %vm945_vm1, %v12324_v11  ;;  %v12345_v11 = vld [vmem:[%s12978_s9 + $0x118] sm:$0xff]  }
 0x25c   : > { %11220 = vmatmul.mubr.msk.bf16.gmra.mrb[48].mxu0 %vm945_vm1, %v12325_v13  ;;  %10811 = vmatprep.mubr.msk.bf16.mxu1 %vm945_vm1, %v12326_v14  ;;  %v12346_v13 = vld [vmem:[%s12805_s27 + $0x260] sm:$0xff]  }
 0x25d   : > { %11223 = vmatprep.mubr.msk.bf16.mxu0 %vm945_vm1, %v12327_v16  ;;  %v12347_v16 = vld [vmem:[%s12978_s9 + $0x120] sm:$0xff]  }
 0x25e   : > { %v13257_v17 = vpop.f32.mrb[24].mxu1 }
 0x25f   : > { %v13259_v18 = vpop.f32.mrb[25].mxu1 }
 0x260   : > { %v13262_v20 = vpop.f32.mrb[26].mxu1 }
 0x261   : > { %v13266_v23 = vpop.f32.mrb[27].mxu1 }
 0x263   : > { %10812 = vmatmul.mubr.msk.bf16.gmra.mrb[132].mxu1 %vm945_vm1, %v12328_v19 }
 0x264   : > { %11224 = vmatmul.mubr.msk.bf16.gmra.mrb[52].mxu0 %vm945_vm1, %v12329_v21  ;;  %10815 = vmatprep.mubr.msk.bf16.mxu1 %vm945_vm1, %v12330_v22  ;;  %v12348_v22 = vld [vmem:[%s12805_s27 + $0x268] sm:$0xff]  }
 0x265   : > { %11227 = vmatprep.mubr.msk.bf16.mxu0 %vm945_vm1, %v12331_v24 }
 0x266   : > { %v13273_v25 = vpop.f32.mrb[28].mxu1 }
 0x267   : > { %v13275_v26 = vpop.f32.mrb[29].mxu1 }
 0x268   : > { %v13278_v28 = vpop.f32.mrb[30].mxu1 }
 0x269   : > { %v13282_v31 = vpop.f32.mrb[31].mxu1 }
 0x26b   : > { %10816 = vmatmul.mubr.msk.bf16.gmra.mrb[136].mxu1 %vm945_vm1, %v12332_v27  ;;  %v12349_v27 = vld [vmem:[%s12978_s9 + $0x128] sm:$0xff]  }
 0x26c   : > { %11228 = vmatmul.mubr.msk.bf16.gmra.mrb[56].mxu0 %vm945_vm1, %v12333_v29  ;;  %10819 = vmatprep.mubr.msk.bf16.mxu1 %vm945_vm1, %v12334_v30  ;;  %v12350_v29 = vld [vmem:[%s12805_s27 + $0x270] sm:$0xff]  }
 0x26d   : > { %11231 = vmatprep.mubr.msk.bf16.mxu0 %vm945_vm1, %v12335_v32  ;;  %v12351_v32 = vld [vmem:[%s12978_s9 + $0x130] sm:$0xff]  }
 0x26e   : > { %v13289_v35 = vpop.f32.mrb[32].mxu1 }
 0x26f   : > { %v13291_v37 = vpop.f32.mrb[33].mxu1 }
 0x270   : > { %v13294_v40 = vpop.f32.mrb[34].mxu1 }
 0x271   : > { %v13298_v46 = vpop.f32.mrb[35].mxu1 }
 0x273   : > { %10820 = vmatmul.mubr.msk.bf16.gmra.mrb[140].mxu1 %vm945_vm1, %v12336_v38 }
 0x274   : > { %11232 = vmatmul.mubr.msk.bf16.gmra.mrb[60].mxu0 %vm945_vm1, %v12337_v43  ;;  %10823 = vmatprep.mubr.msk.bf16.mxu1 %vm945_vm1, %v12338_v45  ;;  %v12352_v45 = vld [vmem:[%s12805_s27 + $0x278] sm:$0xff]  }
 0x275   : > { %11235 = vmatprep.mubr.msk.bf16.mxu0 %vm945_vm1, %v12339_v48 }
 0x276   : > { %v13305_v51 = vpop.f32.mrb[36].mxu1 }
 0x277   : > { %v13307_v53 = vpop.f32.mrb[37].mxu1 }
 0x278   : > { %v13310_v56 = vpop.f32.mrb[38].mxu1 }
 0x279   : > { %v13314_v62 = vpop.f32.mrb[39].mxu1 }
 0x27b   : > { %10824 = vmatmul.mubr.msk.bf16.gmra.mrb[144].mxu1 %vm945_vm1, %v12340_v54  ;;  %v12353_v54 = vld [vmem:[%s12978_s9 + $0x138] sm:$0xff]  }
 0x27c   : > { %11236 = vmatmul.mubr.msk.bf16.gmra.mrb[64].mxu0 %vm945_vm1, %v12341_v59  ;;  %10827 = vmatprep.mubr.msk.bf16.mxu1 %vm945_vm1, %v12342_v61  ;;  %v12354_v59 = vld [vmem:[%s12577_s26 + $0x140] sm:$0xff]  }
 0x27d   : > { %11239 = vmatprep.mubr.msk.bf16.mxu0 %vm945_vm1, %v12343_v0  ;;  %v12355_v0 = vld [vmem:[%s12978_s9 + $0x140] sm:$0xff]  }
 0x27e   : > { %v13321_v2 = vpop.f32.mrb[40].mxu1 }
 0x27f   : > { %v13323_v4 = vpop.f32.mrb[41].mxu1 }
 0x280   : > { %v13326_v8 = vpop.f32.mrb[42].mxu1 }
 0x281   : > { %v13330_v14 = vpop.f32.mrb[43].mxu1 }
 0x283   : > { %10828 = vmatmul.mubr.msk.bf16.gmra.mrb[148].mxu1 %vm945_vm1, %v12344_v5 }
 0x284   : > { %11240 = vmatmul.mubr.msk.bf16.gmra.mrb[68].mxu0 %vm945_vm1, %v12345_v11  ;;  %10831 = vmatprep.mubr.msk.bf16.mxu1 %vm945_vm1, %v12346_v13  ;;  %v12356_v13 = vld [vmem:[%s12577_s26 + $0x148] sm:$0xff]  }
 0x285   : > { %11243 = vmatprep.mubr.msk.bf16.mxu0 %vm945_vm1, %v12347_v16 }
 0x286   : > { %v13337_v19 = vpop.f32.mrb[44].mxu1 }
 0x287   : > { %v13339_v21 = vpop.f32.mrb[45].mxu1 }
 0x288   : > { %v13342_v24 = vpop.f32.mrb[46].mxu1 }
 0x289   : > { %v13346_v30 = vpop.f32.mrb[47].mxu1 }
 0x28b   : > { %10832 = vmatmul.mubr.msk.bf16.gmra.mrb[152].mxu1 %vm945_vm1, %v12348_v22  ;;  %v12357_v22 = vld [vmem:[%s12978_s9 + $0x148] sm:$0xff]  }
 0x28c   : > { %11244 = vmatmul.mubr.msk.bf16.gmra.mrb[72].mxu0 %vm945_vm1, %v12349_v27  ;;  %10835 = vmatprep.mubr.msk.bf16.mxu1 %vm945_vm1, %v12350_v29  ;;  %v12358_v27 = vld [vmem:[%s12577_s26 + $0x150] sm:$0xff]  }
 0x28d   : > { %11247 = vmatprep.mubr.msk.bf16.mxu0 %vm945_vm1, %v12351_v32  ;;  %v12359_v32 = vld [vmem:[%s12978_s9 + $0x150] sm:$0xff]  }
 0x28e   : > { %v13353_v38 = vpop.f32.mrb[48].mxu1 }
 0x28f   : > { %v13355_v43 = vpop.f32.mrb[49].mxu1 }
 0x290   : > { %13954 = vst [vmem:[#allocation3_spill] sm:$0xff] %v13355_v43  ;;  %v13358_v48 = vpop.f32.mrb[50].mxu1 }
 0x291   : > { %13955 = vst [vmem:[#allocation4_spill] sm:$0xff] %v13358_v48  ;;  %v13362_v61 = vpop.f32.mrb[51].mxu1 }
 0x292   : > { %13956 = vst [vmem:[#allocation5_spill] sm:$0xff] %v13362_v61 }
 0x293   : > { %10836 = vmatmul.mubr.msk.bf16.gmra.mrb[156].mxu1 %vm945_vm1, %v12352_v45 }
 0x294   : > { %11248 = vmatmul.mubr.msk.bf16.gmra.mrb[76].mxu0 %vm945_vm1, %v12353_v54  ;;  %10923 = vmatprep.mubr.msk.bf16.mxu1 %vm945_vm1, %v12354_v59  ;;  %v12360_v59 = vld [vmem:[%s12577_s26 + $0x158] sm:$0xff]  }
 0x295   : > { %11251 = vmatprep.mubr.msk.bf16.mxu0 %vm945_vm1, %v12355_v0 }
 0x296   : > { %v13369_v5 = vpop.f32.mrb[52].mxu1 }
 0x297   : > { %13957 = vst [vmem:[#allocation6_spill] sm:$0xff] %v13369_v5  ;;  %v13371_v11 = vpop.f32.mrb[53].mxu1 }
 0x298   : > { %13958 = vst [vmem:[#allocation7_spill] sm:$0xff] %v13371_v11  ;;  %v13374_v16 = vpop.f32.mrb[54].mxu1  ;;  %v12386_v11 = vld [vmem:[%s12577_s26 + $0x1c0] sm:$0xff]  }
 0x299   : > { %13959 = vst [vmem:[#allocation8_spill] sm:$0xff] %v13374_v16  ;;  %v13378_v29 = vpop.f32.mrb[55].mxu1  ;;  %v12362_v16 = vld [vmem:[%s12577_s26 + $0x160] sm:$0xff]  }
 0x29a   : > { %13960 = vst [vmem:[#allocation9_spill] sm:$0xff] %v13378_v29  ;;  %v12361_v29 = vld [vmem:[%s12978_s9 + $0x158] sm:$0xff]  }
 0x29b   : > { %10924 = vmatmul.mubr.msk.bf16.vlgmr.msra.gmra.mrb[80].mxu1 %vm945_vm1, %v12356_v13 }
 0x29c   : > { %11252 = vmatmul.mubr.msk.bf16.gmra.mrb[80].mxu0 %vm945_vm1, %v12357_v22  ;;  %10927 = vmatprep.mubr.msk.bf16.mxu1 %vm945_vm1, %v12358_v27  ;;  %v12363_v22 = vld [vmem:[%s12978_s9 + $0x160] sm:$0xff]  }
 0x29d   : > { %11255 = vmatprep.mubr.msk.bf16.mxu0 %vm945_vm1, %v12359_v32 }
 0x29e   : > { %v13385_v45 = vpop.f32.mrb[56].mxu1 }
 0x29f   : > { %13961 = vst [vmem:[#allocation10_spill] sm:$0xff] %v13385_v45  ;;  %v13387_v54 = vpop.f32.mrb[57].mxu1  ;;  %v12366_v45 = vld [vmem:[%s12577_s26 + $0x170] sm:$0xff]  }
 0x2a0   : > { %13962 = vst [vmem:[#allocation11_spill] sm:$0xff] %v13387_v54  ;;  %v13390_v0 = vpop.f32.mrb[58].mxu1 }
 0x2a1   : > { %13963 = vst [vmem:[#allocation12_spill] sm:$0xff] %v13390_v0  ;;  %v13394_v13 = vpop.f32.mrb[59].mxu1  ;;  %v12364_v0 = vld [vmem:[%s12577_s26 + $0x168] sm:$0xff]  }
 0x2a2   : > { %13964 = vst [vmem:[#allocation13_spill] sm:$0xff] %v13394_v13  ;;  %v12365_v13 = vld [vmem:[%s12978_s9 + $0x168] sm:$0xff]  }
 0x2a3   : > { %10928 = vmatmul.mubr.msk.bf16.gmra.mrb[84].mxu1 %vm945_vm1, %v12360_v59 }
 0x2a4   : > { %11256 = vmatmul.mubr.msk.bf16.gmra.mrb[84].mxu0 %vm945_vm1, %v12361_v29  ;;  %10931 = vmatprep.mubr.msk.bf16.mxu1 %vm945_vm1, %v12362_v16  ;;  %v12367_v29 = vld [vmem:[%s12978_s9 + $0x170] sm:$0xff]  }
 0x2a5   : > { %11259 = vmatprep.mubr.msk.bf16.mxu0 %vm945_vm1, %v12363_v22 }
 0x2a6   : > { %v13401_v27 = vpop.f32.mrb[60].mxu1 }
 0x2a7   : > { %13965 = vst [vmem:[#allocation14_spill] sm:$0xff] %v13401_v27  ;;  %v13403_v32 = vpop.f32.mrb[61].mxu1  ;;  %v12370_v27 = vld [vmem:[%s12577_s26 + $0x180] sm:$0xff]  }
 0x2a8   : > { %13966 = vst [vmem:[#allocation15_spill] sm:$0xff] %v13403_v32  ;;  %v13406_v54 = vpop.f32.mrb[62].mxu1 }
 0x2a9   : > { %13967 = vst [vmem:[#allocation16_spill] sm:$0xff] %v13406_v54  ;;  %v13410_v59 = vpop.f32.mrb[63].mxu1  ;;  %v12368_v54 = vld [vmem:[%s12577_s26 + $0x178] sm:$0xff]  }
 0x2aa   : > { %13968 = vst [vmem:[#allocation17_spill] sm:$0xff] %v13410_v59  ;;  %v12369_v59 = vld [vmem:[%s12978_s9 + $0x178] sm:$0xff]  }
 0x2ab   : > { %10932 = vmatmul.mubr.msk.bf16.gmra.mrb[88].mxu1 %vm945_vm1, %v12364_v0 }
 0x2ac   : > { %11260 = vmatmul.mubr.msk.bf16.gmra.mrb[88].mxu0 %vm945_vm1, %v12365_v13  ;;  %10935 = vmatprep.mubr.msk.bf16.mxu1 %vm945_vm1, %v12366_v45  ;;  %v12371_v13 = vld [vmem:[%s12978_s9 + $0x180] sm:$0xff]  }
 0x2ad   : > { %11263 = vmatprep.mubr.msk.bf16.mxu0 %vm945_vm1, %v12367_v29 }
 0x2ae   : > { %v13417_v16 = vpop.f32.mrb[64].mxu1 }
 0x2af   : > { %13969 = vst [vmem:[#allocation18_spill] sm:$0xff] %v13417_v16  ;;  %v13419_v22 = vpop.f32.mrb[65].mxu1  ;;  %v12374_v16 = vld [vmem:[%s12577_s26 + $0x190] sm:$0xff]  }
 0x2b0   : > { %13970 = vst [vmem:[#allocation19_spill] sm:$0xff] %v13419_v22  ;;  %v13422_v32 = vpop.f32.mrb[66].mxu1 }
 0x2b1   : > { %13971 = vst [vmem:[#allocation20_spill] sm:$0xff] %v13422_v32  ;;  %v13426_v0 = vpop.f32.mrb[67].mxu1  ;;  %v12372_v32 = vld [vmem:[%s12577_s26 + $0x188] sm:$0xff]  }
 0x2b2   : > { %13972 = vst [vmem:[#allocation21_spill] sm:$0xff] %v13426_v0  ;;  %v12373_v0 = vld [vmem:[%s12978_s9 + $0x188] sm:$0xff]  }
 0x2b3   : > { %10936 = vmatmul.mubr.msk.bf16.gmra.mrb[92].mxu1 %vm945_vm1, %v12368_v54 }
 0x2b4   : > { %11264 = vmatmul.mubr.msk.bf16.gmra.mrb[92].mxu0 %vm945_vm1, %v12369_v59  ;;  %10939 = vmatprep.mubr.msk.bf16.mxu1 %vm945_vm1, %v12370_v27  ;;  %v12375_v59 = vld [vmem:[%s12978_s9 + $0x190] sm:$0xff]  }
 0x2b5   : > { %11267 = vmatprep.mubr.msk.bf16.mxu0 %vm945_vm1, %v12371_v13 }
 0x2b6   : > { %v13433_v45 = vpop.f32.mrb[68].mxu1 }
 0x2b7   : > { %13973 = vst [vmem:[#allocation22_spill] sm:$0xff] %v13433_v45  ;;  %v13435_v29 = vpop.f32.mrb[69].mxu1  ;;  %v12378_v45 = vld [vmem:[%s12577_s26 + $0x1a0] sm:$0xff]  }
 0x2b8   : > { %13974 = vst [vmem:[#allocation23_spill] sm:$0xff] %v13435_v29  ;;  %v13438_v22 = vpop.f32.mrb[70].mxu1 }
 0x2b9   : > { %13975 = vst [vmem:[#allocation24_spill] sm:$0xff] %v13438_v22  ;;  %v13442_v54 = vpop.f32.mrb[71].mxu1  ;;  %v12376_v22 = vld [vmem:[%s12577_s26 + $0x198] sm:$0xff]  }
 0x2ba   : > { %13976 = vst [vmem:[#allocation25_spill] sm:$0xff] %v13442_v54  ;;  %v12377_v54 = vld [vmem:[%s12978_s9 + $0x198] sm:$0xff]  }
 0x2bb   : > { %10940 = vmatmul.mubr.msk.bf16.gmra.mrb[96].mxu1 %vm945_vm1, %v12372_v32 }
 0x2bc   : > { %11268 = vmatmul.mubr.msk.bf16.gmra.mrb[96].mxu0 %vm945_vm1, %v12373_v0  ;;  %10943 = vmatprep.mubr.msk.bf16.mxu1 %vm945_vm1, %v12374_v16  ;;  %v12379_v0 = vld [vmem:[%s12978_s9 + $0x1a0] sm:$0xff]  }
 0x2bd   : > { %11271 = vmatprep.mubr.msk.bf16.mxu0 %vm945_vm1, %v12375_v59 }
 0x2be   : > { %v13449_v27 = vpop.f32.mrb[72].mxu1 }
 0x2bf   : > { %13977 = vst [vmem:[#allocation26_spill] sm:$0xff] %v13449_v27  ;;  %v13451_v13 = vpop.f32.mrb[73].mxu1  ;;  %v12382_v27 = vld [vmem:[%s12577_s26 + $0x1b0] sm:$0xff]  }
 0x2c0   : > { %13978 = vst [vmem:[#allocation27_spill] sm:$0xff] %v13451_v13  ;;  %v13454_v29 = vpop.f32.mrb[74].mxu1 }
 0x2c1   : > { %13979 = vst [vmem:[#allocation28_spill] sm:$0xff] %v13454_v29  ;;  %v13458_v32 = vpop.f32.mrb[75].mxu1  ;;  %v12380_v29 = vld [vmem:[%s12577_s26 + $0x1a8] sm:$0xff]  }
 0x2c2   : > { %13980 = vst [vmem:[#allocation29_spill] sm:$0xff] %v13458_v32  ;;  %v12381_v32 = vld [vmem:[%s12978_s9 + $0x1a8] sm:$0xff]  }
 0x2c3   : > { %10944 = vmatmul.mubr.msk.bf16.gmra.mrb[100].mxu1 %vm945_vm1, %v12376_v22 }
 0x2c4   : > { %11272 = vmatmul.mubr.msk.bf16.gmra.mrb[100].mxu0 %vm945_vm1, %v12377_v54  ;;  %10947 = vmatprep.mubr.msk.bf16.mxu1 %vm945_vm1, %v12378_v45  ;;  %v12383_v54 = vld [vmem:[%s12978_s9 + $0x1b0] sm:$0xff]  }
 0x2c5   : > { %11275 = vmatprep.mubr.msk.bf16.mxu0 %vm945_vm1, %v12379_v0  ;;  %v13484_v0 = vld [vmem:[%s13952_s2] ss:$0 sm:$0xff] }
 0x2c6   : > { %v13465_v16 = vpop.f32.mrb[76].mxu1 }
 0x2c7   : > { %13981 = vst [vmem:[#allocation30_spill] sm:$0xff] %v13465_v16  ;;  %v13467_v59 = vpop.f32.mrb[77].mxu1 }
 0x2c8   : > { %13982 = vst [vmem:[#allocation31_spill] sm:$0xff] %v13467_v59  ;;  %v13470_v13 = vpop.f32.mrb[78].mxu1 }
 0x2c9   : > { %13983 = vst [vmem:[#allocation32_spill] sm:$0xff] %v13470_v13  ;;  %v13474_v22 = vpop.f32.mrb[79].mxu1  ;;  %v12384_v13 = vld [vmem:[%s12577_s26 + $0x1b8] sm:$0xff]  }
 0x2ca   : > { %13984 = vst [vmem:[#allocation33_spill] sm:$0xff] %v13474_v22  ;;  %v12385_v22 = vld [vmem:[%s12978_s9 + $0x1b8] sm:$0xff]  }
 0x2cb   : > { %10948 = vmatmul.mubr.msk.bf16.gmra.mrb[104].mxu1 %vm945_vm1, %v12380_v29 }
 0x2cc   : > { %11276 = vmatmul.mubr.msk.bf16.gmra.mrb[104].mxu0 %vm945_vm1, %v12381_v32  ;;  %10951 = vmatprep.mubr.msk.bf16.mxu1 %vm945_vm1, %v12382_v27  ;;  %v12387_v32 = vld [vmem:[%s12978_s9 + $0x1c0] sm:$0xff]  }
 0x2cd   : > { %11279 = vmatprep.mubr.msk.bf16.mxu0 %vm945_vm1, %v12383_v54 }
 0x2cf   : > { %v11173_v45 = vpop.f32.mrb[0].mxu0 }
 0x2d0   : > { %v11335_v59 = vadd.f32 %v11173_v45, %v13161_v33  ;;  %v7354_v16 = vpop.f32.mrb[1].mxu0 }
 0x2d1   : > { %v11336_v29 = vadd.f32 %v7354_v16, %v13163_v34  ;;  %v11174_v5 = vpop.f32.mrb[2].mxu0 }
 0x2d2   : > { %v8162_v27 = vadd.f32 %v11335_v59, %v13484_v0  ;;  %v11337_v54 = vadd.f32 %v11174_v5, %v13166_v36  ;;  %v7357_v61 = vpop.f32.mrb[3].mxu0 }
 0x2d3   : > { %v8160_v48 = vadd.f32 %v11336_v29, %v13484_v0  ;;  %v11338_v43 = vadd.f32 %v7357_v61, %v13170_v39  ;;  %10952 = vmatmul.mubr.msk.bf16.gmra.mrb[108].mxu1 %vm945_vm1, %v12384_v13  ;;  %v12388_v13 = vld [vmem:[%s12577_s26 + $0x1c8] sm:$0xff]   ;;  %v12390_v29 = vld [vmem:[%s12577_s26 + $0x1d0] sm:$0xff]  }
 0x2d4   : > { %v8322_v33 = vmax.f32 %v8162_v27, 0.0  ;;  %v8163_v45 = vadd.f32 %v11337_v54, %v13484_v0  ;;  %11280 = vmatmul.mubr.msk.bf16.gmra.mrb[108].mxu0 %vm945_vm1, %v12385_v22  ;;  %10955 = vmatprep.mubr.msk.bf16.mxu1 %vm945_vm1, %v12386_v11  ;;  %v12389_v22 = vld [vmem:[%s12978_s9 + $0x1c8] sm:$0xff]   ;;  %v12391_v11 = vld [vmem:[%s12978_s9 + $0x1d0] sm:$0xff]  }
 0x2d5   : > { %v8320_v34 = vmax.f32 %v8160_v48, 0.0  ;;  %v8161_v36 = vadd.f32 %v11338_v43, %v13484_v0  ;;  %11283 = vmatprep.mubr.msk.bf16.mxu0 %vm945_vm1, %v12387_v32 }
 0x2d6   : > { %8482 = vst [vmem:[#allocation2 + $0x10] sm:$0xff] %v8322_v33  ;;  %v8323_v5 = vmax.f32 %v8163_v45, 0.0 }
 0x2d7   : > { %8480 = vst [vmem:[#allocation2] sm:$0xff] %v8320_v34  ;;  %v8321_v39 = vmax.f32 %v8161_v36, 0.0  ;;  %v11177_v61 = vpop.f32.mrb[4].mxu0 }
 0x2d8   : > { %8483 = vst [vmem:[#allocation2 + $0x18] sm:$0xff] %v8323_v5  ;;  %v11339_v16 = vadd.f32 %v11177_v61, %v13177_v41  ;;  %v7370_v59 = vpop.f32.mrb[5].mxu0 }
 0x2d9   : > { %8481 = vst [vmem:[#allocation2 + $0x8] sm:$0xff] %v8321_v39  ;;  %v11340_v48 = vadd.f32 %v7370_v59, %v13179_v42  ;;  %v11178_v43 = vpop.f32.mrb[6].mxu0  ;;  %v12392_v39 = vld [vmem:[%s12577_s26 + $0x1d8] sm:$0xff]   ;;  %v12394_v59 = vld [vmem:[%s12577_s26 + $0x1e0] sm:$0xff]  }
 0x2da   : > { %v8166_v32 = vadd.f32 %v11339_v16, %v13484_v0  ;;  %v11341_v27 = vadd.f32 %v11178_v43, %v13182_v44  ;;  %v7373_v54 = vpop.f32.mrb[7].mxu0  ;;  %v12393_v16 = vld [vmem:[%s12978_s9 + $0x1d8] sm:$0xff]  }
 0x2db   : > { %v8164_v33 = vadd.f32 %v11340_v48, %v13484_v0  ;;  %v11342_v45 = vadd.f32 %v7373_v54, %v13186_v47  ;;  %10956 = vmatmul.mubr.msk.bf16.gmra.mrb[112].mxu1 %vm945_vm1, %v12388_v13  ;;  %v12395_v48 = vld [vmem:[%s12978_s9 + $0x1e0] sm:$0xff]  }
 0x2dc   : > { %v8326_v41 = vmax.f32 %v8166_v32, 0.0  ;;  %v8167_v34 = vadd.f32 %v11341_v27, %v13484_v0  ;;  %11284 = vmatmul.mubr.msk.bf16.gmra.mrb[112].mxu0 %vm945_vm1, %v12389_v22  ;;  %10959 = vmatprep.mubr.msk.bf16.mxu1 %vm945_vm1, %v12390_v29 }
 0x2dd   : > { %v8324_v42 = vmax.f32 %v8164_v33, 0.0  ;;  %v8165_v44 = vadd.f32 %v11342_v45, %v13484_v0  ;;  %11287 = vmatprep.mubr.msk.bf16.mxu0 %vm945_vm1, %v12391_v11 }
 0x2de   : > { %8486 = vst [vmem:[#allocation2 + $0x30] sm:$0xff] %v8326_v41  ;;  %v8327_v47 = vmax.f32 %v8167_v34, 0.0  ;;  %v12396_v34 = vld [vmem:[%s12577_s26 + $0x1e8] sm:$0xff]  }
 0x2df   : > { %8484 = vst [vmem:[#allocation2 + $0x20] sm:$0xff] %v8324_v42  ;;  %v8325_v36 = vmax.f32 %v8165_v44, 0.0  ;;  %v11181_v5 = vpop.f32.mrb[8].mxu0 }
 0x2e0   : > { %8487 = vst [vmem:[#allocation2 + $0x38] sm:$0xff] %v8327_v47  ;;  %v11343_v61 = vadd.f32 %v11181_v5, %v13193_v49  ;;  %v7386_v13 = vpop.f32.mrb[9].mxu0  ;;  %v12397_v47 = vld [vmem:[%s12978_s9 + $0x1e8] sm:$0xff]  }
 0x2e1   : > { %8485 = vst [vmem:[#allocation2 + $0x28] sm:$0xff] %v8325_v36  ;;  %v11344_v22 = vadd.f32 %v7386_v13, %v13195_v50  ;;  %v11182_v29 = vpop.f32.mrb[10].mxu0  ;;  %v12398_v36 = vld [vmem:[%s12577_s26 + $0x1f0] sm:$0xff]  }
 0x2e2   : > { %v8170_v43 = vadd.f32 %v11343_v61, %v13484_v0  ;;  %v11345_v11 = vadd.f32 %v11182_v29, %v13198_v52  ;;  %v7389_v32 = vpop.f32.mrb[11].mxu0  ;;  %v12399_v61 = vld [vmem:[%s12978_s9 + $0x1f0] sm:$0xff]  }
 0x2e3   : > { %v8168_v27 = vadd.f32 %v11344_v22, %v13484_v0  ;;  %v11346_v49 = vadd.f32 %v7389_v32, %v13202_v55  ;;  %10960 = vmatmul.mubr.msk.bf16.gmra.mrb[116].mxu1 %vm945_vm1, %v12392_v39  ;;  %v12400_v32 = vld [vmem:[%s12577_s26 + $0x1f8] sm:$0xff]  }
 0x2e4   : > { %v8330_v50 = vmax.f32 %v8170_v43, 0.0  ;;  %v8171_v54 = vadd.f32 %v11345_v11, %v13484_v0  ;;  %11288 = vmatmul.mubr.msk.bf16.gmra.mrb[116].mxu0 %vm945_vm1, %v12393_v16  ;;  %10963 = vmatprep.mubr.msk.bf16.mxu1 %vm945_vm1, %v12394_v59 }
 0x2e5   : > { %v8328_v52 = vmax.f32 %v8168_v27, 0.0  ;;  %v8169_v33 = vadd.f32 %v11346_v49, %v13484_v0  ;;  %11291 = vmatprep.mubr.msk.bf16.mxu0 %vm945_vm1, %v12395_v48  ;;  %v8640_v48 = vld [vmem:[#allocation2] ss:$2 sm:$0xff] }
 0x2e6   : > { %8490 = vst [vmem:[#allocation2 + $0x50] sm:$0xff] %v8330_v50  ;;  %v8331_v55 = vmax.f32 %v8171_v54, 0.0 }
 0x2e7   : > { %8488 = vst [vmem:[#allocation2 + $0x40] sm:$0xff] %v8328_v52  ;;  %v8329_v45 = vmax.f32 %v8169_v33, 0.0  ;;  %v11185_v41 = vpop.f32.mrb[12].mxu0 }
 0x2e8   : > { %8491 = vst [vmem:[#allocation2 + $0x58] sm:$0xff] %v8331_v55  ;;  %v11347_v42 = vadd.f32 %v11185_v41, %v13209_v57  ;;  %v7402_v44 = vpop.f32.mrb[13].mxu0  ;;  %v12401_v41 = vld [vmem:[%s12978_s9 + $0x1f8] sm:$0xff]  }
 0x2e9   : > { %8489 = vst [vmem:[#allocation2 + $0x48] sm:$0xff] %v8329_v45  ;;  %v11348_v5 = vadd.f32 %v7402_v44, %v13211_v58  ;;  %v11186_v39 = vpop.f32.mrb[14].mxu0 }
 0x2ea   : > { %v8174_v13 = vadd.f32 %v11347_v42, %v13484_v0  ;;  %v11349_v16 = vadd.f32 %v11186_v39, %v13214_v60  ;;  %v7405_v59 = vpop.f32.mrb[15].mxu0  ;;  %v8650_v60 = vld [vmem:[#allocation2 + $0x1] ss:$2 sm:$0xff] }
 0x2eb   : > { %v8172_v22 = vadd.f32 %v11348_v5, %v13484_v0  ;;  %v11350_v57 = vadd.f32 %v7405_v59, %v13218_v63  ;;  %10964 = vmatmul.mubr.msk.bf16.gmra.mrb[120].mxu1 %vm945_vm1, %v12396_v34  ;;  %v8679_v52 = vmax.f32 %v8640_v48, %v8650_v60  ;;  %v12402_v34 = vld [vmem:[%s12577_s26 + $0x200] sm:$0xff]   ;;  %v12405_v60 = vld [vmem:[%s12978_s9 + $0x208] sm:$0xff]  }
 0x2ec   : > { %v8334_v29 = vmax.f32 %v8174_v13, 0.0  ;;  %v8175_v58 = vadd.f32 %v11349_v16, %v13484_v0  ;;  %11292 = vmatmul.mubr.msk.bf16.gmra.mrb[120].mxu0 %vm945_vm1, %v12397_v47  ;;  %10967 = vmatprep.mubr.msk.bf16.mxu1 %vm945_vm1, %v12398_v36  ;;  %v12403_v47 = vld [vmem:[%s12978_s9 + $0x200] sm:$0xff]  }
 0x2ed   : > { %v8332_v43 = vmax.f32 %v8172_v22, 0.0  ;;  %v8173_v11 = vadd.f32 %v11350_v57, %v13484_v0  ;;  %11295 = vmatprep.mubr.msk.bf16.mxu0 %vm945_vm1, %v12399_v61  ;;  %v8644_v59 = vld [vmem:[#allocation2 + $0x20] ss:$2 sm:$0xff]  ;;  %v8654_v22 = vld [vmem:[#allocation2 + $0x21] ss:$2 sm:$0xff] }
 0x2ee   : > { %8494 = vst [vmem:[#allocation2 + $0x70] sm:$0xff] %v8334_v29  ;;  %v8335_v63 = vmax.f32 %v8175_v58, 0.0  ;;  %v8642_v29 = vld [vmem:[#allocation2 + $0x10] ss:$2 sm:$0xff]  ;;  %v8652_v58 = vld [vmem:[#allocation2 + $0x11] ss:$2 sm:$0xff] }
 0x2ef   : > { %v8660_v27 = vld [vmem:[#allocation2 + $0x50] ss:$2 sm:$0xff]  ;;  %v8670_v49 = vld [vmem:[#allocation2 + $0x51] ss:$2 sm:$0xff]  ;;  %8492 = vst [vmem:[#allocation2 + $0x60] sm:$0xff] %v8332_v43  ;;  %v8333_v50 = vmax.f32 %v8173_v11, 0.0 }
 0x2f0   : > { %v11189_v54 = vpop.f32.mrb[16].mxu0  ;;  %v8684_v33 = vmax.f32 %v8660_v27, %v8670_v49  ;;  %8495 = vst [vmem:[#allocation2 + $0x78] sm:$0xff] %v8335_v63  ;;  %v8681_v27 = vmax.f32 %v8644_v59, %v8654_v22  ;;  %v8646_v22 = vld [vmem:[#allocation2 + $0x30] ss:$2 sm:$0xff] }
 0x2f1   : > { %v11351_v55 = vadd.f32 %v11189_v54, %v13225_v6  ;;  %v7418_v45 = vpop.f32.mrb[17].mxu0  ;;  %8493 = vst [vmem:[#allocation2 + $0x68] sm:$0xff] %v8333_v50 }
 0x2f2   : > { %v11352_v42 = vadd.f32 %v7418_v45, %v13227_v1  ;;  %v11190_v44 = vpop.f32.mrb[18].mxu0  ;;  %v8689_v36 = vmax.f32 %v8679_v52, %v8684_v33  ;;  %v8680_v45 = vmax.f32 %v8642_v29, %v8652_v58 }
 0x2f3   : > { %v8178_v5 = vadd.f32 %v11351_v55, %v13484_v0  ;;  %v11353_v6 = vadd.f32 %v11190_v44, %v13230_v3  ;;  %v7421_v39 = vpop.f32.mrb[19].mxu0  ;;  %10968 = vmatmul.mubr.msk.bf16.gmra.mrb[124].mxu1 %vm945_vm1, %v12400_v32  ;;  %v12406_v55 = vld [vmem:[%s12577_s26 + $0x210] sm:$0xff]  }
 0x2f4   : > { %v8176_v61 = vadd.f32 %v11352_v42, %v13484_v0  ;;  %v11354_v13 = vadd.f32 %v7421_v39, %v13234_v7  ;;  %8695 = vst.msk [vmem:[%s13571_s24] sm:$0xff] %vm8694_vm2, %v8689_v36  ;;  %11296 = vmatmul.mubr.msk.bf16.gmra.mrb[124].mxu0 %vm945_vm1, %v12401_v41  ;;  %10971 = vmatprep.mubr.msk.bf16.mxu1 %vm945_vm1, %v12402_v34  ;;  %v12404_v7 = vld [vmem:[%s12577_s26 + $0x208] sm:$0xff]   ;;  %v12407_v44 = vld [vmem:[%s12978_s9 + $0x210] sm:$0xff]  }
 0x2f5   : > { %v8338_v16 = vmax.f32 %v8178_v5, 0.0  ;;  %v8179_v1 = vadd.f32 %v11353_v6, %v13484_v0  ;;  %11299 = vmatprep.mubr.msk.bf16.mxu0 %vm945_vm1, %v12403_v47 }
 0x2f6   : > { %v8336_v3 = vmax.f32 %v8176_v61, 0.0  ;;  %v8177_v57 = vadd.f32 %v11354_v13, %v13484_v0 }
 0x2f7   : > { %8498 = vst [vmem:[#allocation2 + $0x90] sm:$0xff] %v8338_v16  ;;  %v8339_v48 = vmax.f32 %v8179_v1, 0.0  ;;  %v8664_v43 = vld [vmem:[#allocation2 + $0x70] ss:$2 sm:$0xff]  ;;  %v8674_v11 = vld [vmem:[#allocation2 + $0x71] ss:$2 sm:$0xff] }
 0x2f8   : > { %8496 = vst [vmem:[#allocation2 + $0x80] sm:$0xff] %v8336_v3  ;;  %v8337_v63 = vmax.f32 %v8177_v57, 0.0  ;;  %v11193_v32 = vpop.f32.mrb[20].mxu0  ;;  %v8686_v49 = vmax.f32 %v8664_v43, %v8674_v11  ;;  %v8662_v50 = vld [vmem:[#allocation2 + $0x60] ss:$2 sm:$0xff] }
 0x2f9   : > { %v8672_v54 = vld [vmem:[#allocation2 + $0x61] ss:$2 sm:$0xff]  ;;  %8499 = vst [vmem:[#allocation2 + $0x98] sm:$0xff] %v8339_v48  ;;  %v11355_v52 = vadd.f32 %v11193_v32, %v13241_v9  ;;  %v7434_v33 = vpop.f32.mrb[21].mxu0  ;;  %v8656_v3 = vld [vmem:[#allocation2 + $0x31] ss:$2 sm:$0xff] }
 0x2fa   : > { %v8685_v41 = vmax.f32 %v8662_v50, %v8672_v54  ;;  %8497 = vst [vmem:[#allocation2 + $0x88] sm:$0xff] %v8337_v63  ;;  %v11356_v34 = vadd.f32 %v7434_v33, %v13243_v10  ;;  %v11194_v42 = vpop.f32.mrb[22].mxu0  ;;  %v8691_v47 = vmax.f32 %v8681_v27, %v8686_v49  ;;  %v8658_v16 = vld [vmem:[#allocation2 + $0x41] ss:$2 sm:$0xff]  ;;  %v8682_v54 = vmax.f32 %v8646_v22, %v8656_v3 }
 0x2fb   : > { %v8182_v36 = vadd.f32 %v11355_v52, %v13484_v0  ;;  %v11357_v5 = vadd.f32 %v11194_v42, %v13246_v12  ;;  %v7437_v6 = vpop.f32.mrb[23].mxu0  ;;  %10972 = vmatmul.mubr.msk.bf16.gmra.mrb[128].mxu1 %vm945_vm1, %v12404_v7  ;;  %v8648_v12 = vld [vmem:[#allocation2 + $0x40] ss:$2 sm:$0xff]  ;;  %v12409_v7 = vld [vmem:[%s12978_s9 + $0x218] sm:$0xff]  }
 0x2fc   : > { %v8690_v39 = vmax.f32 %v8680_v45, %v8685_v41  ;;  %v8180_v9 = vadd.f32 %v11356_v34, %v13484_v0  ;;  %v11358_v61 = vadd.f32 %v7437_v6, %v13250_v15  ;;  %8697 = vst.msk [vmem:[%s13571_s24 + $0x10] sm:$0xff] %vm8694_vm2, %v8691_v47  ;;  %11300 = vmatmul.mubr.msk.bf16.gmra.mrb[128].mxu0 %vm945_vm1, %v12405_v60  ;;  %v12408_v15 = vld [vmem:[%s12577_s26 + $0x218] sm:$0xff]   ;;  %v12410_v50 = vld [vmem:[%s12577_s26 + $0x220] sm:$0xff]  }
 0x2fd   : > { %v8342_v10 = vmax.f32 %v8182_v36, 0.0  ;;  %v8183_v13 = vadd.f32 %v11357_v5, %v13484_v0  ;;  %10975 = vmatprep.mubr.msk.bf16.mxu1 %vm945_vm1, %v12406_v55  ;;  %11303 = vmatprep.mubr.msk.bf16.mxu0 %vm945_vm1, %v12407_v44  ;;  %v8683_v43 = vmax.f32 %v8648_v12, %v8658_v16  ;;  %v12411_v45 = vld [vmem:[%s12978_s9 + $0x220] sm:$0xff]   ;;  %v12413_v12 = vld [vmem:[%s12978_s9 + $0x228] sm:$0xff]   ;;  %v12414_v16 = vld [vmem:[%s12577_s26 + $0x230] sm:$0xff]  }
 0x2fe   : > { %8696 = vst.msk [vmem:[%s13571_s24 + $0x8] sm:$0xff] %vm8694_vm2, %v8690_v39  ;;  %v8340_v1 = vmax.f32 %v8180_v9, 0.0  ;;  %v8181_v59 = vadd.f32 %v11358_v61, %v13484_v0  ;;  %v12412_v61 = vld [vmem:[%s12577_s26 + $0x228] sm:$0xff]  }
 0x2ff   : > { %8502 = vst [vmem:[#allocation2 + $0xb0] sm:$0xff] %v8342_v10  ;;  %v8343_v57 = vmax.f32 %v8183_v13, 0.0  ;;  %v11197_v60 = vpop.f32.mrb[24].mxu0 }
 0x300   : > { %v8668_v29 = vld [vmem:[#allocation2 + $0x90] ss:$2 sm:$0xff]  ;;  %v8678_v58 = vld [vmem:[#allocation2 + $0x91] ss:$2 sm:$0xff]  ;;  %8500 = vst [vmem:[#allocation2 + $0xa0] sm:$0xff] %v8340_v1  ;;  %v8341_v48 = vmax.f32 %v8181_v59, 0.0  ;;  %v11359_v27 = vadd.f32 %v11197_v60, %v13257_v17 }
 0x301   : > { %v8688_v11 = vmax.f32 %v8668_v29, %v8678_v58  ;;  %v8666_v63 = vld [vmem:[#allocation2 + $0x80] ss:$2 sm:$0xff]  ;;  %v8676_v32 = vld [vmem:[#allocation2 + $0x81] ss:$2 sm:$0xff]  ;;  %8503 = vst [vmem:[#allocation2 + $0xb8] sm:$0xff] %v8343_v57  ;;  %v7450_v49 = vpop.f32.mrb[25].mxu0 }
 0x302   : > { %v8687_v52 = vmax.f32 %v8666_v63, %v8676_v32  ;;  %8501 = vst [vmem:[#allocation2 + $0xa8] sm:$0xff] %v8341_v48  ;;  %v11360_v33 = vadd.f32 %v7450_v49, %v13259_v18  ;;  %v11198_v55 = vpop.f32.mrb[26].mxu0  ;;  %v8186_v34 = vadd.f32 %v11359_v27, %v13484_v0  ;;  %v12417_v32 = vld [vmem:[%s12978_s9 + $0x238] sm:$0xff]   ;;  %v12418_v27 = vld [vmem:[%s12577_s26 + $0x240] sm:$0xff]  }
 0x303   : > { %v8693_v41 = vmax.f32 %v8683_v43, %v8688_v11  ;;  %v11361_v42 = vadd.f32 %v11198_v55, %v13262_v20  ;;  %v7453_v44 = vpop.f32.mrb[27].mxu0  ;;  %10976 = vmatmul.mubr.msk.bf16.gmra.mrb[132].mxu1 %vm945_vm1, %v12408_v15  ;;  %v12415_v15 = vld [vmem:[%s12978_s9 + $0x230] sm:$0xff]   ;;  %v12416_v43 = vld [vmem:[%s12577_s26 + $0x238] sm:$0xff]  }
 0x304   : > { %v8692_v47 = vmax.f32 %v8682_v54, %v8687_v52  ;;  %v8184_v17 = vadd.f32 %v11360_v33, %v13484_v0  ;;  %v11362_v36 = vadd.f32 %v7453_v44, %v13266_v23  ;;  %v8346_v18 = vmax.f32 %v8186_v34, 0.0  ;;  %11304 = vmatmul.mubr.msk.bf16.gmra.mrb[132].mxu0 %vm945_vm1, %v12409_v7  ;;  %10979 = vmatprep.mubr.msk.bf16.mxu1 %vm945_vm1, %v12410_v50  ;;  %v12419_v54 = vld [vmem:[%s12978_s9 + $0x240] sm:$0xff]  }
 0x305   : > { %8699 = vst.msk [vmem:[%s13571_s24 + $0x20] sm:$0xff] %vm8694_vm2, %v8693_v41  ;;  %v8187_v5 = vadd.f32 %v11361_v42, %v13484_v0  ;;  %11307 = vmatprep.mubr.msk.bf16.mxu0 %vm945_vm1, %v12411_v45 }
 0x306   : > { %8698 = vst.msk [vmem:[%s13571_s24 + $0x18] sm:$0xff] %vm8694_vm2, %v8692_v47  ;;  %v8344_v20 = vmax.f32 %v8184_v17, 0.0  ;;  %v8185_v6 = vadd.f32 %v11362_v36, %v13484_v0  ;;  %8506 = vst [vmem:[#allocation2 + $0xd0] sm:$0xff] %v8346_v18  ;;  %v12420_v47 = vld [vmem:[%s12577_s26 + $0x248] sm:$0xff]  }
 0x307   : > { %v8347_v23 = vmax.f32 %v8187_v5, 0.0  ;;  %v11201_v9 = vpop.f32.mrb[28].mxu0 }
 0x308   : > { %8504 = vst [vmem:[#allocation2 + $0xc0] sm:$0xff] %v8344_v20  ;;  %v8345_v39 = vmax.f32 %v8185_v6, 0.0  ;;  %v11363_v10 = vadd.f32 %v11201_v9, %v13273_v25  ;;  %v7466_v13 = vpop.f32.mrb[29].mxu0  ;;  %v12421_v9 = vld [vmem:[%s12978_s9 + $0x248] sm:$0xff]  }
 0x309   : > { %8507 = vst [vmem:[#allocation2 + $0xd8] sm:$0xff] %v8347_v23  ;;  %v11364_v1 = vadd.f32 %v7466_v13, %v13275_v26  ;;  %v11202_v59 = vpop.f32.mrb[30].mxu0  ;;  %v8711_v42 = vld [vmem:[#allocation2 + $0xa1] ss:$2 sm:$0xff] }
 0x30a   : > { %8505 = vst [vmem:[#allocation2 + $0xc8] sm:$0xff] %v8345_v39  ;;  %v8190_v22 = vadd.f32 %v11363_v10, %v13484_v0  ;;  %v11365_v3 = vadd.f32 %v11202_v59, %v13278_v28  ;;  %v7469_v57 = vpop.f32.mrb[31].mxu0 }
 0x30b   : > { %v8188_v7 = vadd.f32 %v11364_v1, %v13484_v0  ;;  %v11366_v29 = vadd.f32 %v7469_v57, %v13282_v31  ;;  %10980 = vmatmul.mubr.msk.bf16.gmra.mrb[136].mxu1 %vm945_vm1, %v12412_v61  ;;  %v12422_v61 = vld [vmem:[%s12577_s26 + $0x250] sm:$0xff]  }
 0x30c   : > { %v8350_v25 = vmax.f32 %v8190_v22, 0.0  ;;  %v8191_v58 = vadd.f32 %v11365_v3, %v13484_v0  ;;  %11308 = vmatmul.mubr.msk.bf16.gmra.mrb[136].mxu0 %vm945_vm1, %v12413_v12  ;;  %10983 = vmatprep.mubr.msk.bf16.mxu1 %vm945_vm1, %v12414_v16  ;;  %v12423_v12 = vld [vmem:[%s12978_s9 + $0x250] sm:$0xff]  }
 0x30d   : > { %v8348_v26 = vmax.f32 %v8188_v7, 0.0  ;;  %v8189_v28 = vadd.f32 %v11366_v29, %v13484_v0  ;;  %11311 = vmatprep.mubr.msk.bf16.mxu0 %vm945_vm1, %v12415_v15 }
 0x30e   : > { %8510 = vst [vmem:[#allocation2 + $0xf0] sm:$0xff] %v8350_v25  ;;  %v8351_v48 = vmax.f32 %v8191_v58, 0.0  ;;  %v8703_v25 = vld [vmem:[#allocation2 + $0xb0] ss:$2 sm:$0xff]  ;;  %v8713_v58 = vld [vmem:[#allocation2 + $0xb1] ss:$2 sm:$0xff] }
 0x30f   : > { %8508 = vst [vmem:[#allocation2 + $0xe0] sm:$0xff] %v8348_v26  ;;  %v8349_v31 = vmax.f32 %v8189_v28, 0.0  ;;  %v11205_v60 = vpop.f32.mrb[32].mxu0  ;;  %v12425_v28 = vld [vmem:[%s12978_s9 + $0x258] sm:$0xff]  }
 0x310   : > { %8511 = vst [vmem:[#allocation2 + $0xf8] sm:$0xff] %v8351_v48  ;;  %v11367_v11 = vadd.f32 %v11205_v60, %v13289_v35  ;;  %v7482_v63 = vpop.f32.mrb[33].mxu0 }
 0x311   : > { %8509 = vst [vmem:[#allocation2 + $0xe8] sm:$0xff] %v8349_v31  ;;  %v11368_v49 = vadd.f32 %v7482_v63, %v13291_v37  ;;  %v11206_v50 = vpop.f32.mrb[34].mxu0  ;;  %v8701_v37 = vld [vmem:[#allocation2 + $0xa0] ss:$2 sm:$0xff]  ;;  %v8715_v7 = vld [vmem:[#allocation2 + $0xc1] ss:$2 sm:$0xff] }
 0x312   : > { %v8194_v52 = vadd.f32 %v11367_v11, %v13484_v0  ;;  %v11369_v33 = vadd.f32 %v11206_v50, %v13294_v40  ;;  %v7485_v55 = vpop.f32.mrb[35].mxu0  ;;  %v8740_v20 = vmax.f32 %v8701_v37, %v8711_v42  ;;  %v8705_v57 = vld [vmem:[#allocation2 + $0xc0] ss:$2 sm:$0xff] }
 0x313   : > { %v8192_v45 = vadd.f32 %v11368_v49, %v13484_v0  ;;  %v11370_v41 = vadd.f32 %v7485_v55, %v13298_v46  ;;  %10984 = vmatmul.mubr.msk.bf16.gmra.mrb[140].mxu1 %vm945_vm1, %v12416_v43  ;;  %v8742_v11 = vmax.f32 %v8705_v57, %v8715_v7  ;;  %v12431_v57 = vld [vmem:[%s12978_s9 + $0x270] sm:$0xff]  }
 0x314   : > { %v8354_v35 = vmax.f32 %v8194_v52, 0.0  ;;  %v8195_v34 = vadd.f32 %v11369_v33, %v13484_v0  ;;  %11312 = vmatmul.mubr.msk.bf16.gmra.mrb[140].mxu0 %vm945_vm1, %v12417_v32  ;;  %10987 = vmatprep.mubr.msk.bf16.mxu1 %vm945_vm1, %v12418_v27  ;;  %v8741_v52 = vmax.f32 %v8703_v25, %v8713_v58 }
 0x315   : > { %v8352_v44 = vmax.f32 %v8192_v45, 0.0  ;;  %v8193_v40 = vadd.f32 %v11370_v41, %v13484_v0  ;;  %11315 = vmatprep.mubr.msk.bf16.mxu0 %vm945_vm1, %v12419_v54  ;;  %v12426_v54 = vld [vmem:[%s12577_s26 + $0x260] sm:$0xff]  }
 0x316   : > { %8514 = vst [vmem:[#allocation2 + $0x110] sm:$0xff] %v8354_v35  ;;  %v8355_v46 = vmax.f32 %v8195_v34, 0.0  ;;  %v12427_v41 = vld [vmem:[%s12978_s9 + $0x260] sm:$0xff]  }
 0x317   : > { %v8721_v17 = vld [vmem:[#allocation2 + $0xf0] ss:$2 sm:$0xff]  ;;  %v8731_v36 = vld [vmem:[#allocation2 + $0xf1] ss:$2 sm:$0xff]  ;;  %8512 = vst [vmem:[#allocation2 + $0x100] sm:$0xff] %v8352_v44  ;;  %v8353_v18 = vmax.f32 %v8193_v40, 0.0 }
 0x318   : > { %v11209_v5 = vpop.f32.mrb[36].mxu0  ;;  %v8745_v6 = vmax.f32 %v8721_v17, %v8731_v36  ;;  %8515 = vst [vmem:[#allocation2 + $0x118] sm:$0xff] %v8355_v46 }
 0x319   : > { %v11371_v23 = vadd.f32 %v11209_v5, %v13305_v51  ;;  %v7498_v39 = vpop.f32.mrb[37].mxu0  ;;  %8513 = vst [vmem:[#allocation2 + $0x108] sm:$0xff] %v8353_v18  ;;  %v8707_v18 = vld [vmem:[#allocation2 + $0xd0] ss:$2 sm:$0xff]  ;;  %v8717_v5 = vld [vmem:[#allocation2 + $0xd1] ss:$2 sm:$0xff] }
 0x31a   : > { %v11372_v10 = vadd.f32 %v7498_v39, %v13307_v53  ;;  %v11210_v13 = vpop.f32.mrb[38].mxu0  ;;  %v8750_v16 = vmax.f32 %v8740_v20, %v8745_v6  ;;  %v12429_v6 = vld [vmem:[%s12978_s9 + $0x268] sm:$0xff]  }
 0x31b   : > { %v8198_v1 = vadd.f32 %v11371_v23, %v13484_v0  ;;  %v11373_v59 = vadd.f32 %v11210_v13, %v13310_v56  ;;  %v7501_v15 = vpop.f32.mrb[39].mxu0  ;;  %10988 = vmatmul.mubr.msk.bf16.gmra.mrb[144].mxu1 %vm945_vm1, %v12420_v47  ;;  %v8719_v47 = vld [vmem:[#allocation2 + $0xe1] ss:$2 sm:$0xff] }
 0x31c   : > { %v8196_v22 = vadd.f32 %v11372_v10, %v13484_v0  ;;  %v11374_v3 = vadd.f32 %v7501_v15, %v13314_v62  ;;  %10064 = vst.msk [vmem:[%s13571_s24 + $0x28] sm:$0xff] %vm8694_vm2, %v8750_v16  ;;  %11316 = vmatmul.mubr.msk.bf16.gmra.mrb[144].mxu0 %vm945_vm1, %v12421_v9  ;;  %10991 = vmatprep.mubr.msk.bf16.mxu1 %vm945_vm1, %v12422_v61  ;;  %v12424_v62 = vld [vmem:[%s12577_s26 + $0x258] sm:$0xff]   ;;  %v12430_v15 = vld [vmem:[%s12577_s26 + $0x270] sm:$0xff]  }
 0x31d   : > { %v8358_v51 = vmax.f32 %v8198_v1, 0.0  ;;  %v8199_v53 = vadd.f32 %v11373_v59, %v13484_v0  ;;  %11319 = vmatprep.mubr.msk.bf16.mxu0 %vm945_vm1, %v12423_v12 }
 0x31e   : > { %v8356_v56 = vmax.f32 %v8196_v22, 0.0  ;;  %v8197_v29 = vadd.f32 %v11374_v3, %v13484_v0  ;;  %v8743_v22 = vmax.f32 %v8707_v18, %v8717_v5 }
 0x31f   : > { %8518 = vst [vmem:[#allocation2 + $0x130] sm:$0xff] %v8358_v51  ;;  %v8359_v26 = vmax.f32 %v8199_v53, 0.0  ;;  %v8725_v48 = vld [vmem:[#allocation2 + $0x110] ss:$2 sm:$0xff]  ;;  %v8735_v31 = vld [vmem:[#allocation2 + $0x111] ss:$2 sm:$0xff] }
 0x320   : > { %8516 = vst [vmem:[#allocation2 + $0x120] sm:$0xff] %v8356_v56  ;;  %v8357_v60 = vmax.f32 %v8197_v29, 0.0  ;;  %v11213_v43 = vpop.f32.mrb[40].mxu0  ;;  %v8747_v63 = vmax.f32 %v8725_v48, %v8735_v31  ;;  %v8723_v32 = vld [vmem:[#allocation2 + $0x100] ss:$2 sm:$0xff] }
 0x321   : > { %v8733_v27 = vld [vmem:[#allocation2 + $0x101] ss:$2 sm:$0xff]  ;;  %8519 = vst [vmem:[#allocation2 + $0x138] sm:$0xff] %v8359_v26  ;;  %v11375_v49 = vadd.f32 %v11213_v43, %v13321_v2  ;;  %v7514_v50 = vpop.f32.mrb[41].mxu0 }
 0x322   : > { %v8746_v33 = vmax.f32 %v8723_v32, %v8733_v27  ;;  %8517 = vst [vmem:[#allocation2 + $0x128] sm:$0xff] %v8357_v60  ;;  %v11376_v55 = vadd.f32 %v7514_v50, %v13323_v4  ;;  %v11214_v45 = vpop.f32.mrb[42].mxu0  ;;  %v8752_v35 = vmax.f32 %v8742_v11, %v8747_v63  ;;  %v12432_v60 = vld [vmem:[%s12577_s26 + $0x278] sm:$0xff]   ;;  %v13986_v32 = vld [vmem:[#allocation3_spill] sm:$0xff] }
 0x323   : > { %v8202_v34 = vadd.f32 %v11375_v49, %v13484_v0  ;;  %v11377_v37 = vadd.f32 %v11214_v45, %v13326_v8  ;;  %v7517_v42 = vpop.f32.mrb[43].mxu0  ;;  %10992 = vmatmul.mubr.msk.bf16.gmra.mrb[148].mxu1 %vm945_vm1, %v12424_v62  ;;  %v8709_v8 = vld [vmem:[#allocation2 + $0xe0] ss:$2 sm:$0xff]  ;;  %v12433_v63 = vld [vmem:[%s12978_s9 + $0x278] sm:$0xff]   ;;  %v13988_v45 = vld [vmem:[#allocation5_spill] sm:$0xff] }
 0x324   : > { %v8751_v44 = vmax.f32 %v8741_v52, %v8746_v33  ;;  %v8200_v2 = vadd.f32 %v11376_v55, %v13484_v0  ;;  %v11378_v40 = vadd.f32 %v7517_v42, %v13330_v14  ;;  %10066 = vst.msk [vmem:[%s13571_s24 + $0x38] sm:$0xff] %vm8694_vm2, %v8752_v35  ;;  %11320 = vmatmul.mubr.msk.bf16.gmra.mrb[148].mxu0 %vm945_vm1, %v12425_v28  ;;  %v12428_v14 = vld [vmem:[%s12577_s26 + $0x268] sm:$0xff]  }
 0x325   : > { %v8362_v4 = vmax.f32 %v8202_v34, 0.0  ;;  %v8203_v46 = vadd.f32 %v11377_v37, %v13484_v0  ;;  %10995 = vmatprep.mubr.msk.bf16.mxu1 %vm945_vm1, %v12426_v54  ;;  %11323 = vmatprep.mubr.msk.bf16.mxu0 %vm945_vm1, %v12427_v41  ;;  %v8744_v10 = vmax.f32 %v8709_v8, %v8719_v47  ;;  %v13987_v54 = vld [vmem:[#allocation4_spill] sm:$0xff]  ;;  %v13990_v8 = vld [vmem:[#allocation7_spill] sm:$0xff] }
 0x326   : > { %10065 = vst.msk [vmem:[%s13571_s24 + $0x30] sm:$0xff] %vm8694_vm2, %v8751_v44  ;;  %v8360_v17 = vmax.f32 %v8200_v2, 0.0  ;;  %v8201_v36 = vadd.f32 %v11378_v40, %v13484_v0  ;;  %v13989_v40 = vld [vmem:[#allocation6_spill] sm:$0xff] }
 0x327   : > { %8522 = vst [vmem:[#allocation2 + $0x150] sm:$0xff] %v8362_v4  ;;  %v8363_v20 = vmax.f32 %v8203_v46, 0.0  ;;  %v11217_v61 = vpop.f32.mrb[44].mxu0 }
 0x328   : > { %v8729_v23 = vld [vmem:[#allocation2 + $0x130] ss:$2 sm:$0xff]  ;;  %v8739_v39 = vld [vmem:[#allocation2 + $0x131] ss:$2 sm:$0xff]  ;;  %8520 = vst [vmem:[#allocation2 + $0x140] sm:$0xff] %v8360_v17  ;;  %v8361_v9 = vmax.f32 %v8201_v36, 0.0  ;;  %v11379_v1 = vadd.f32 %v11217_v61, %v13337_v19 }
 0x329   : > { %v8749_v13 = vmax.f32 %v8729_v23, %v8739_v39  ;;  %v8727_v12 = vld [vmem:[#allocation2 + $0x120] ss:$2 sm:$0xff]  ;;  %v8737_v16 = vld [vmem:[#allocation2 + $0x121] ss:$2 sm:$0xff]  ;;  %8523 = vst [vmem:[#allocation2 + $0x158] sm:$0xff] %v8363_v20  ;;  %v7530_v59 = vpop.f32.mrb[45].mxu0 }
 0x32a   : > { %v8748_v3 = vmax.f32 %v8727_v12, %v8737_v16  ;;  %8521 = vst [vmem:[#allocation2 + $0x148] sm:$0xff] %v8361_v9  ;;  %v11380_v51 = vadd.f32 %v7530_v59, %v13339_v21  ;;  %v11218_v53 = vpop.f32.mrb[46].mxu0  ;;  %v8206_v56 = vadd.f32 %v11379_v1, %v13484_v0 }
 0x32b   : > { %v8754_v7 = vmax.f32 %v8744_v10, %v8749_v13  ;;  %v11381_v29 = vadd.f32 %v11218_v53, %v13342_v24  ;;  %v7533_v62 = vpop.f32.mrb[47].mxu0  ;;  %10996 = vmatmul.mubr.msk.bf16.gmra.mrb[152].mxu1 %vm945_vm1, %v12428_v14  ;;  %v13991_v14 = vld [vmem:[#allocation8_spill] sm:$0xff]  ;;  %v13993_v53 = vld [vmem:[#allocation10_spill] sm:$0xff] }
 0x32c   : > { %v8753_v25 = vmax.f32 %v8743_v22, %v8748_v3  ;;  %v8204_v19 = vadd.f32 %v11380_v51, %v13484_v0  ;;  %v11382_v58 = vadd.f32 %v7533_v62, %v13346_v30  ;;  %v8366_v21 = vmax.f32 %v8206_v56, 0.0  ;;  %11324 = vmatmul.mubr.msk.bf16.gmra.mrb[152].mxu0 %vm945_vm1, %v12429_v6  ;;  %10999 = vmatprep.mubr.msk.bf16.mxu1 %vm945_vm1, %v12430_v15  ;;  %v13992_v6 = vld [vmem:[#allocation9_spill] sm:$0xff]  ;;  %v13994_v56 = vld [vmem:[#allocation11_spill] sm:$0xff] }
 0x32d   : > { %10068 = vst.msk [vmem:[%s13571_s24 + $0x48] sm:$0xff] %vm8694_vm2, %v8754_v7  ;;  %v8207_v26 = vadd.f32 %v11381_v29, %v13484_v0  ;;  %11327 = vmatprep.mubr.msk.bf16.mxu0 %vm945_vm1, %v12431_v57 }
 0x32e   : > { %10067 = vst.msk [vmem:[%s13571_s24 + $0x40] sm:$0xff] %vm8694_vm2, %v8753_v25  ;;  %v8364_v24 = vmax.f32 %v8204_v19, 0.0  ;;  %v8205_v28 = vadd.f32 %v11382_v58, %v13484_v0  ;;  %8526 = vst [vmem:[#allocation2 + $0x170] sm:$0xff] %v8366_v21  ;;  %v13995_v58 = vld [vmem:[#allocation12_spill] sm:$0xff] }
 0x32f   : > { %v8367_v30 = vmax.f32 %v8207_v26, 0.0  ;;  %v11221_v31 = vpop.f32.mrb[48].mxu0 }
 0x330   : > { %8524 = vst [vmem:[#allocation2 + $0x160] sm:$0xff] %v8364_v24  ;;  %v8365_v48 = vmax.f32 %v8205_v28, 0.0  ;;  %v11383_v43 = vadd.f32 %v11221_v31, %v13353_v38  ;;  %v7546_v11 = vpop.f32.mrb[49].mxu0  ;;  %v13996_v28 = vld [vmem:[#allocation13_spill] sm:$0xff] }
 0x331   : > { %8527 = vst [vmem:[#allocation2 + $0x178] sm:$0xff] %v8367_v30  ;;  %v11384_v27 = vadd.f32 %v7546_v11, %v13986_v32  ;;  %v11222_v49 = vpop.f32.mrb[50].mxu0  ;;  %v8762_v61 = vld [vmem:[#allocation2 + $0x140] ss:$2 sm:$0xff]  ;;  %v8772_v10 = vld [vmem:[#allocation2 + $0x141] ss:$2 sm:$0xff] }
 0x332   : > { %8525 = vst [vmem:[#allocation2 + $0x168] sm:$0xff] %v8365_v48  ;;  %v8210_v50 = vadd.f32 %v11383_v43, %v13484_v0  ;;  %v11385_v52 = vadd.f32 %v11222_v49, %v13987_v54  ;;  %v7549_v33 = vpop.f32.mrb[51].mxu0  ;;  %v8801_v3 = vmax.f32 %v8762_v61, %v8772_v10  ;;  %v8764_v32 = vld [vmem:[#allocation2 + $0x150] ss:$2 sm:$0xff] }
 0x333   : > { %v8208_v55 = vadd.f32 %v11384_v27, %v13484_v0  ;;  %v11386_v41 = vadd.f32 %v7549_v33, %v13988_v45  ;;  %11000 = vmatmul.mubr.msk.bf16.gmra.mrb[156].mxu1 %vm945_vm1, %v12432_v60  ;;  %v8774_v27 = vld [vmem:[#allocation2 + $0x151] ss:$2 sm:$0xff] }
 0x334   : > { %v8370_v35 = vmax.f32 %v8210_v50, 0.0  ;;  %v8211_v38 = vadd.f32 %v11385_v52, %v13484_v0  ;;  %11328 = vmatmul.mubr.msk.bf16.gmra.mrb[156].mxu0 %vm945_vm1, %v12433_v63 }
 0x335   : > { %v8368_v34 = vmax.f32 %v8208_v55, 0.0  ;;  %v8209_v37 = vadd.f32 %v11386_v41, %v13484_v0 }
 0x336   : > { %8530 = vst [vmem:[#allocation2 + $0x190] sm:$0xff] %v8370_v35  ;;  %v8371_v42 = vmax.f32 %v8211_v38, 0.0  ;;  %v13997_v38 = vld [vmem:[#allocation14_spill] sm:$0xff] }
 0x337   : > { %8528 = vst [vmem:[#allocation2 + $0x180] sm:$0xff] %v8368_v34  ;;  %v8369_v44 = vmax.f32 %v8209_v37, 0.0  ;;  %v11225_v2 = vpop.f32.mrb[52].mxu0 }
 0x338   : > { %8531 = vst [vmem:[#allocation2 + $0x198] sm:$0xff] %v8371_v42  ;;  %v11387_v4 = vadd.f32 %v11225_v2, %v13989_v40  ;;  %v7562_v46 = vpop.f32.mrb[53].mxu0  ;;  %v8802_v42 = vmax.f32 %v8764_v32, %v8774_v27 }
 0x339   : > { %8529 = vst [vmem:[#allocation2 + $0x188] sm:$0xff] %v8369_v44  ;;  %v11388_v47 = vadd.f32 %v7562_v46, %v13990_v8  ;;  %v11226_v17 = vpop.f32.mrb[54].mxu0  ;;  %v8766_v60 = vld [vmem:[#allocation2 + $0x160] ss:$2 sm:$0xff]  ;;  %v8776_v43 = vld [vmem:[#allocation2 + $0x161] ss:$2 sm:$0xff] }
 0x33a   : > { %v8214_v36 = vadd.f32 %v11387_v4, %v13484_v0  ;;  %v11389_v18 = vadd.f32 %v11226_v17, %v13991_v14  ;;  %v7565_v5 = vpop.f32.mrb[55].mxu0  ;;  %v8803_v55 = vmax.f32 %v8766_v60, %v8776_v43  ;;  %v13998_v44 = vld [vmem:[#allocation15_spill] sm:$0xff]  ;;  %v14004_v43 = vld [vmem:[#allocation21_spill] sm:$0xff] }
 0x33b   : > { %v8212_v20 = vadd.f32 %v11388_v47, %v13484_v0  ;;  %v11390_v23 = vadd.f32 %v7565_v5, %v13992_v6  ;;  %v13752_v46 = vld [vmem:[%s13952_s2] ss:$0 sm:$0xff]  ;;  %v13999_v47 = vld [vmem:[#allocation16_spill] sm:$0xff]  ;;  %v14000_v5 = vld [vmem:[#allocation17_spill] sm:$0xff] }
 0x33c   : > { %v8374_v39 = vmax.f32 %v8214_v36, 0.0  ;;  %v8215_v9 = vadd.f32 %v11389_v18, %v13484_v0 }
 0x33d   : > { %v8372_v13 = vmax.f32 %v8212_v20, 0.0  ;;  %v8213_v12 = vadd.f32 %v11390_v23, %v13484_v0 }
 0x33e   : > { %8534 = vst [vmem:[#allocation2 + $0x1b0] sm:$0xff] %v8374_v39  ;;  %v8375_v16 = vmax.f32 %v8215_v9, 0.0 }
 0x33f   : > { %v8782_v1 = vld [vmem:[#allocation2 + $0x190] ss:$2 sm:$0xff]  ;;  %v8792_v59 = vld [vmem:[#allocation2 + $0x191] ss:$2 sm:$0xff]  ;;  %8532 = vst [vmem:[#allocation2 + $0x1a0] sm:$0xff] %v8372_v13  ;;  %v8373_v15 = vmax.f32 %v8213_v12, 0.0 }
 0x340   : > { %v11229_v22 = vpop.f32.mrb[56].mxu0  ;;  %v8806_v51 = vmax.f32 %v8782_v1, %v8792_v59  ;;  %8535 = vst [vmem:[#allocation2 + $0x1b8] sm:$0xff] %v8375_v16  ;;  %v8770_v39 = vld [vmem:[#allocation2 + $0x180] ss:$2 sm:$0xff]  ;;  %v8780_v9 = vld [vmem:[#allocation2 + $0x181] ss:$2 sm:$0xff] }
 0x341   : > { %v11391_v57 = vadd.f32 %v11229_v22, %v13993_v53  ;;  %v7578_v7 = vpop.f32.mrb[57].mxu0  ;;  %8533 = vst [vmem:[#allocation2 + $0x1a8] sm:$0xff] %v8373_v15  ;;  %v8768_v13 = vld [vmem:[#allocation2 + $0x170] ss:$2 sm:$0xff]  ;;  %v8778_v12 = vld [vmem:[#allocation2 + $0x171] ss:$2 sm:$0xff] }
 0x342   : > { %v11392_v29 = vadd.f32 %v7578_v7, %v13994_v56  ;;  %v11230_v62 = vpop.f32.mrb[58].mxu0  ;;  %v8811_v25 = vmax.f32 %v8801_v3, %v8806_v51  ;;  %v8805_v3 = vmax.f32 %v8770_v39, %v8780_v9  ;;  %v14001_v7 = vld [vmem:[#allocation18_spill] sm:$0xff] }
 0x343   : > { %v8218_v19 = vadd.f32 %v11391_v57, %v13484_v0  ;;  %v11393_v21 = vadd.f32 %v11230_v62, %v13995_v58  ;;  %v7581_v26 = vpop.f32.mrb[59].mxu0  ;;  %v8804_v62 = vmax.f32 %v8768_v13, %v8778_v12 }
 0x344   : > { %v8216_v24 = vadd.f32 %v11392_v29, %v13484_v0  ;;  %v11394_v30 = vadd.f32 %v7581_v26, %v13996_v28  ;;  %10069 = vst.msk [vmem:[%s13571_s24 + $0x50] sm:$0xff] %vm8694_vm2, %v8811_v25  ;;  %v14003_v28 = vld [vmem:[#allocation20_spill] sm:$0xff] }
 0x345   : > { %v8378_v48 = vmax.f32 %v8218_v19, 0.0  ;;  %v8219_v31 = vadd.f32 %v11393_v21, %v13484_v0  ;;  %v14002_v19 = vld [vmem:[#allocation19_spill] sm:$0xff] }
 0x346   : > { %v8376_v11 = vmax.f32 %v8216_v24, 0.0  ;;  %v8217_v63 = vadd.f32 %v11394_v30, %v13484_v0 }
 0x347   : > { %8538 = vst [vmem:[#allocation2 + $0x1d0] sm:$0xff] %v8378_v48  ;;  %v8379_v49 = vmax.f32 %v8219_v31, 0.0  ;;  %v8786_v50 = vld [vmem:[#allocation2 + $0x1b0] ss:$2 sm:$0xff]  ;;  %v8796_v54 = vld [vmem:[#allocation2 + $0x1b1] ss:$2 sm:$0xff] }
 0x348   : > { %8536 = vst [vmem:[#allocation2 + $0x1c0] sm:$0xff] %v8376_v11  ;;  %v8377_v52 = vmax.f32 %v8217_v63, 0.0  ;;  %v11233_v33 = vpop.f32.mrb[60].mxu0  ;;  %v8808_v45 = vmax.f32 %v8786_v50, %v8796_v54  ;;  %v8784_v41 = vld [vmem:[#allocation2 + $0x1a0] ss:$2 sm:$0xff] }
 0x349   : > { %v8794_v35 = vld [vmem:[#allocation2 + $0x1a1] ss:$2 sm:$0xff]  ;;  %8539 = vst [vmem:[#allocation2 + $0x1d8] sm:$0xff] %v8379_v49  ;;  %v11395_v34 = vadd.f32 %v11233_v33, %v13997_v38  ;;  %v7594_v37 = vpop.f32.mrb[61].mxu0  ;;  %v14005_v33 = vld [vmem:[#allocation22_spill] sm:$0xff] }
 0x34a   : > { %v8807_v0 = vmax.f32 %v8784_v41, %v8794_v35  ;;  %8537 = vst [vmem:[#allocation2 + $0x1c8] sm:$0xff] %v8377_v52  ;;  %v11396_v2 = vadd.f32 %v7594_v37, %v13998_v44  ;;  %v11234_v40 = vpop.f32.mrb[62].mxu0  ;;  %v8813_v4 = vmax.f32 %v8803_v55, %v8808_v45  ;;  %v14006_v41 = vld [vmem:[#allocation23_spill] sm:$0xff]  ;;  %v14007_v37 = vld [vmem:[#allocation24_spill] sm:$0xff] }
 0x34b   : > { %v8222_v8 = vadd.f32 %v13752_v46, %v11395_v34  ;;  %v11397_v17 = vadd.f32 %v11234_v40, %v13999_v47  ;;  %v7597_v36 = vpop.f32.mrb[63].mxu0 }
 0x34c   : > { %v8812_v14 = vmax.f32 %v8802_v42, %v8807_v0  ;;  %v8220_v18 = vadd.f32 %v13752_v46, %v11396_v2  ;;  %v11398_v20 = vadd.f32 %v7597_v36, %v14000_v5  ;;  %10071 = vst.msk [vmem:[%s13571_s24 + $0x60] sm:$0xff] %vm8694_vm2, %v8813_v4  ;;  %v14008_v2 = vld [vmem:[#allocation25_spill] sm:$0xff]  ;;  %v14009_v5 = vld [vmem:[#allocation26_spill] sm:$0xff] }
 0x34d   : > { %v8382_v6 = vmax.f32 %v8222_v8, 0.0  ;;  %v8223_v23 = vadd.f32 %v13752_v46, %v11397_v17 }
 0x34e   : > { %10070 = vst.msk [vmem:[%s13571_s24 + $0x58] sm:$0xff] %vm8694_vm2, %v8812_v14  ;;  %v8380_v61 = vmax.f32 %v8220_v18, 0.0  ;;  %v8221_v10 = vadd.f32 %v13752_v46, %v11398_v20 }
 0x34f   : > { %8542 = vst [vmem:[#allocation2 + $0x1f0] sm:$0xff] %v8382_v6  ;;  %v8383_v16 = vmax.f32 %v8223_v23, 0.0  ;;  %v11237_v22 = vpop.f32.mrb[64].mxu0  ;;  %v14010_v23 = vld [vmem:[#allocation27_spill] sm:$0xff] }
 0x350   : > { %v8790_v1 = vld [vmem:[#allocation2 + $0x1d0] ss:$2 sm:$0xff]  ;;  %v8800_v59 = vld [vmem:[#allocation2 + $0x1d1] ss:$2 sm:$0xff]  ;;  %8540 = vst [vmem:[#allocation2 + $0x1e0] sm:$0xff] %v8380_v61  ;;  %v8381_v15 = vmax.f32 %v8221_v10, 0.0  ;;  %v11399_v56 = vadd.f32 %v11237_v22, %v14001_v7 }
 0x351   : > { %v8810_v51 = vmax.f32 %v8790_v1, %v8800_v59  ;;  %v8788_v53 = vld [vmem:[#allocation2 + $0x1c0] ss:$2 sm:$0xff]  ;;  %v8798_v57 = vld [vmem:[#allocation2 + $0x1c1] ss:$2 sm:$0xff]  ;;  %8543 = vst [vmem:[#allocation2 + $0x1f8] sm:$0xff] %v8383_v16  ;;  %v7610_v29 = vpop.f32.mrb[65].mxu0 }
 0x352   : > { %v8809_v25 = vmax.f32 %v8788_v53, %v8798_v57  ;;  %8541 = vst [vmem:[#allocation2 + $0x1e8] sm:$0xff] %v8381_v15  ;;  %v11400_v58 = vadd.f32 %v7610_v29, %v14002_v19  ;;  %v11238_v21 = vpop.f32.mrb[66].mxu0  ;;  %v8226_v24 = vadd.f32 %v13752_v46, %v11399_v56  ;;  %v14011_v10 = vld [vmem:[#allocation28_spill] sm:$0xff]  ;;  %v14012_v1 = vld [vmem:[#allocation29_spill] sm:$0xff] }
 0x353   : > { %v8815_v26 = vmax.f32 %v8805_v3, %v8810_v51  ;;  %v11401_v30 = vadd.f32 %v11238_v21, %v14003_v28  ;;  %v7613_v48 = vpop.f32.mrb[67].mxu0  ;;  %v14013_v21 = vld [vmem:[#allocation30_spill] sm:$0xff]  ;;  %v14014_v28 = vld [vmem:[#allocation31_spill] sm:$0xff] }
 0x354   : > { %v8814_v31 = vmax.f32 %v8804_v62, %v8809_v25  ;;  %v8224_v60 = vadd.f32 %v13752_v46, %v11400_v58  ;;  %v11402_v11 = vadd.f32 %v7613_v48, %v14004_v43  ;;  %v8386_v63 = vmax.f32 %v8226_v24, 0.0  ;;  %v14015_v43 = vld [vmem:[#allocation32_spill] sm:$0xff] }
 0x355   : > { %10073 = vst.msk [vmem:[%s13571_s24 + $0x70] sm:$0xff] %vm8694_vm2, %v8815_v26  ;;  %v8227_v32 = vadd.f32 %v13752_v46, %v11401_v30 }
 0x356   : > { %10072 = vst.msk [vmem:[%s13571_s24 + $0x68] sm:$0xff] %vm8694_vm2, %v8814_v31  ;;  %v8384_v27 = vmax.f32 %v8224_v60, 0.0  ;;  %v8225_v49 = vadd.f32 %v13752_v46, %v11402_v11  ;;  %8546 = vst [vmem:[#allocation2 + $0x210] sm:$0xff] %v8386_v63 }
 0x357   : > { %v8387_v50 = vmax.f32 %v8227_v32, 0.0  ;;  %v11241_v52 = vpop.f32.mrb[68].mxu0 }
 0x358   : > { %8544 = vst [vmem:[#allocation2 + $0x200] sm:$0xff] %v8384_v27  ;;  %v8385_v54 = vmax.f32 %v8225_v49, 0.0  ;;  %v11403_v55 = vadd.f32 %v11241_v52, %v14005_v33  ;;  %v7626_v45 = vpop.f32.mrb[69].mxu0  ;;  %v14016_v27 = vld [vmem:[#allocation33_spill] sm:$0xff] }
 0x359   : > { %8547 = vst [vmem:[#allocation2 + $0x218] sm:$0xff] %v8387_v50  ;;  %v11404_v35 = vadd.f32 %v7626_v45, %v14006_v41  ;;  %v11242_v38 = vpop.f32.mrb[70].mxu0  ;;  %v8823_v3 = vld [vmem:[#allocation2 + $0x1e0] ss:$2 sm:$0xff]  ;;  %v8833_v51 = vld [vmem:[#allocation2 + $0x1e1] ss:$2 sm:$0xff] }
 0x35a   : > { %8545 = vst [vmem:[#allocation2 + $0x208] sm:$0xff] %v8385_v54  ;;  %v8230_v34 = vadd.f32 %v13752_v46, %v11403_v55  ;;  %v11405_v42 = vadd.f32 %v11242_v38, %v14007_v37  ;;  %v7629_v0 = vpop.f32.mrb[71].mxu0  ;;  %v8862_v19 = vmax.f32 %v8823_v3, %v8833_v51  ;;  %v8825_v41 = vld [vmem:[#allocation2 + $0x1f0] ss:$2 sm:$0xff] }
 0x35b   : > { %v8228_v44 = vadd.f32 %v13752_v46, %v11404_v35  ;;  %v11406_v40 = vadd.f32 %v7629_v0, %v14008_v2  ;;  %v8835_v35 = vld [vmem:[#allocation2 + $0x1f1] ss:$2 sm:$0xff] }
 0x35c   : > { %v8390_v4 = vmax.f32 %v8230_v34, 0.0  ;;  %v8231_v8 = vadd.f32 %v13752_v46, %v11405_v42 }
 0x35d   : > { %v8388_v47 = vmax.f32 %v8228_v44, 0.0  ;;  %v8229_v17 = vadd.f32 %v13752_v46, %v11406_v40 }
 0x35e   : > { %8550 = vst [vmem:[#allocation2 + $0x230] sm:$0xff] %v8390_v4  ;;  %v8391_v36 = vmax.f32 %v8231_v8, 0.0 }
 0x35f   : > { %8548 = vst [vmem:[#allocation2 + $0x220] sm:$0xff] %v8388_v47  ;;  %v8389_v14 = vmax.f32 %v8229_v17, 0.0  ;;  %v11245_v18 = vpop.f32.mrb[72].mxu0 }
 0x360   : > { %8551 = vst [vmem:[#allocation2 + $0x238] sm:$0xff] %v8391_v36  ;;  %v11407_v20 = vadd.f32 %v11245_v18, %v14009_v5  ;;  %v7642_v6 = vpop.f32.mrb[73].mxu0 }
 0x361   : > { %8549 = vst [vmem:[#allocation2 + $0x228] sm:$0xff] %v8389_v14  ;;  %v11408_v39 = vadd.f32 %v7642_v6, %v14010_v23  ;;  %v11246_v9 = vpop.f32.mrb[74].mxu0  ;;  %v8827_v52 = vld [vmem:[#allocation2 + $0x200] ss:$2 sm:$0xff]  ;;  %v8837_v33 = vld [vmem:[#allocation2 + $0x201] ss:$2 sm:$0xff]  ;;  %v8863_v14 = vmax.f32 %v8825_v41, %v8835_v35 }
 0x362   : > { %v8234_v61 = vadd.f32 %v13752_v46, %v11407_v20  ;;  %v11409_v13 = vadd.f32 %v11246_v9, %v14011_v10  ;;  %v7645_v12 = vpop.f32.mrb[75].mxu0  ;;  %v8864_v2 = vmax.f32 %v8827_v52, %v8837_v33 }
 0x363   : > { %v8232_v16 = vadd.f32 %v13752_v46, %v11408_v39  ;;  %v11410_v59 = vadd.f32 %v7645_v12, %v14012_v1 }
 0x364   : > { %v8394_v15 = vmax.f32 %v8234_v61, 0.0  ;;  %v8235_v22 = vadd.f32 %v13752_v46, %v11409_v13 }
 0x365   : > { %v8392_v53 = vmax.f32 %v8232_v16, 0.0  ;;  %v8233_v57 = vadd.f32 %v13752_v46, %v11410_v59 }
 0x366   : > { %8554 = vst [vmem:[#allocation2 + $0x250] sm:$0xff] %v8394_v15  ;;  %v8395_v7 = vmax.f32 %v8235_v22, 0.0 }
 0x367   : > { %v8843_v56 = vld [vmem:[#allocation2 + $0x230] ss:$2 sm:$0xff]  ;;  %v8853_v29 = vld [vmem:[#allocation2 + $0x231] ss:$2 sm:$0xff]  ;;  %8552 = vst [vmem:[#allocation2 + $0x240] sm:$0xff] %v8392_v53  ;;  %v8393_v62 = vmax.f32 %v8233_v57, 0.0 }
 0x368   : > { %v11249_v25 = vpop.f32.mrb[76].mxu0  ;;  %v8867_v58 = vmax.f32 %v8843_v56, %v8853_v29  ;;  %8555 = vst [vmem:[#allocation2 + $0x258] sm:$0xff] %v8395_v7  ;;  %v8831_v15 = vld [vmem:[#allocation2 + $0x220] ss:$2 sm:$0xff]  ;;  %v8841_v22 = vld [vmem:[#allocation2 + $0x221] ss:$2 sm:$0xff] }
 0x369   : > { %v11411_v26 = vadd.f32 %v11249_v25, %v14013_v21  ;;  %v7658_v24 = vpop.f32.mrb[77].mxu0  ;;  %8553 = vst [vmem:[#allocation2 + $0x248] sm:$0xff] %v8393_v62  ;;  %v8829_v53 = vld [vmem:[#allocation2 + $0x210] ss:$2 sm:$0xff]  ;;  %v8839_v57 = vld [vmem:[#allocation2 + $0x211] ss:$2 sm:$0xff] }
 0x36a   : > { %v11412_v30 = vadd.f32 %v7658_v24, %v14014_v28  ;;  %v11250_v48 = vpop.f32.mrb[78].mxu0  ;;  %v8872_v31 = vmax.f32 %v8862_v19, %v8867_v58  ;;  %v8866_v58 = vmax.f32 %v8831_v15, %v8841_v22 }
 0x36b   : > { %v8238_v60 = vadd.f32 %v13752_v46, %v11411_v26  ;;  %v11413_v11 = vadd.f32 %v11250_v48, %v14015_v43  ;;  %v7661_v63 = vpop.f32.mrb[79].mxu0 }
 0x36c   : > { %v8236_v32 = vadd.f32 %v13752_v46, %v11412_v30  ;;  %v11414_v49 = vadd.f32 %v7661_v63, %v14016_v27  ;;  %10074 = vst.msk [vmem:[%s13571_s24 + $0x78] sm:$0xff] %vm8694_vm2, %v8872_v31  ;;  %v8865_v31 = vmax.f32 %v8829_v53, %v8839_v57 }
 0x36d   : > { %v8398_v50 = vmax.f32 %v8238_v60, 0.0  ;;  %v8239_v54 = vadd.f32 %v13752_v46, %v11413_v11 }
 0x36e   : > { %v8396_v55 = vmax.f32 %v8236_v32, 0.0  ;;  %v8237_v45 = vadd.f32 %v13752_v46, %v11414_v49  ;;  %v10925_v34 = vpop.f32.mrb[80].mxu1 }
 0x36f   : > { %8558 = vst [vmem:[#allocation2 + $0x270] sm:$0xff] %v8398_v50  ;;  %v8399_v38 = vmax.f32 %v8239_v54, 0.0  ;;  %v8847_v37 = vld [vmem:[#allocation2 + $0x250] ss:$2 sm:$0xff]  ;;  %v8857_v42 = vld [vmem:[#allocation2 + $0x251] ss:$2 sm:$0xff] }
 0x370   : > { %8556 = vst [vmem:[#allocation2 + $0x260] sm:$0xff] %v8396_v55  ;;  %v8397_v0 = vmax.f32 %v8237_v45, 0.0  ;;  %v11253_v44 = vpop.f32.mrb[80].mxu0  ;;  %v8869_v40 = vmax.f32 %v8847_v37, %v8857_v42  ;;  %v8845_v4 = vld [vmem:[#allocation2 + $0x240] ss:$2 sm:$0xff]  ;;  %v4364_v17 = vpop.f32.mrb[81].mxu1 }
 0x371   : > { %v8855_v8 = vld [vmem:[#allocation2 + $0x241] ss:$2 sm:$0xff]  ;;  %8559 = vst [vmem:[#allocation2 + $0x278] sm:$0xff] %v8399_v38  ;;  %v11415_v47 = vadd.f32 %v11253_v44, %v10925_v34  ;;  %v7674_v36 = vpop.f32.mrb[81].mxu0  ;;  %v10926_v20 = vpop.f32.mrb[82].mxu1 }
 0x372   : > { %v8868_v18 = vmax.f32 %v8845_v4, %v8855_v8  ;;  %8557 = vst [vmem:[#allocation2 + $0x268] sm:$0xff] %v8397_v0  ;;  %v11416_v5 = vadd.f32 %v7674_v36, %v4364_v17  ;;  %v11254_v6 = vpop.f32.mrb[82].mxu0  ;;  %v8874_v23 = vmax.f32 %v8864_v2, %v8869_v40  ;;  %v4367_v61 = vpop.f32.mrb[83].mxu1 }
 0x373   : > { %v8242_v39 = vadd.f32 %v13752_v46, %v11415_v47  ;;  %v11417_v9 = vadd.f32 %v11254_v6, %v10926_v20  ;;  %v7677_v10 = vpop.f32.mrb[83].mxu0 }
 0x374   : > { %v8873_v13 = vmax.f32 %v8863_v14, %v8868_v18  ;;  %v8240_v12 = vadd.f32 %v13752_v46, %v11416_v5  ;;  %v11418_v16 = vadd.f32 %v7677_v10, %v4367_v61  ;;  %10076 = vst.msk [vmem:[%s13571_s24 + $0x88] sm:$0xff] %vm8694_vm2, %v8874_v23 }
 0x375   : > { %v8402_v1 = vmax.f32 %v8242_v39, 0.0  ;;  %v8243_v59 = vadd.f32 %v13752_v46, %v11417_v9 }
 0x376   : > { %10075 = vst.msk [vmem:[%s13571_s24 + $0x80] sm:$0xff] %vm8694_vm2, %v8873_v13  ;;  %v8400_v3 = vmax.f32 %v8240_v12, 0.0  ;;  %v8241_v51 = vadd.f32 %v13752_v46, %v11418_v16  ;;  %v10929_v56 = vpop.f32.mrb[84].mxu1 }
 0x377   : > { %8562 = vst [vmem:[#allocation2 + $0x290] sm:$0xff] %v8402_v1  ;;  %v8403_v7 = vmax.f32 %v8243_v59, 0.0  ;;  %v11257_v19 = vpop.f32.mrb[84].mxu0  ;;  %v4380_v30 = vpop.f32.mrb[85].mxu1 }
 0x378   : > { %v8851_v29 = vld [vmem:[#allocation2 + $0x270] ss:$2 sm:$0xff]  ;;  %v8861_v62 = vld [vmem:[#allocation2 + $0x271] ss:$2 sm:$0xff]  ;;  %8560 = vst [vmem:[#allocation2 + $0x280] sm:$0xff] %v8400_v3  ;;  %v8401_v25 = vmax.f32 %v8241_v51, 0.0  ;;  %v11419_v28 = vadd.f32 %v11257_v19, %v10929_v56 }
 0x379   : > { %v8871_v21 = vmax.f32 %v8851_v29, %v8861_v62  ;;  %v8849_v26 = vld [vmem:[#allocation2 + $0x260] ss:$2 sm:$0xff]  ;;  %v8859_v24 = vld [vmem:[#allocation2 + $0x261] ss:$2 sm:$0xff]  ;;  %8563 = vst [vmem:[#allocation2 + $0x298] sm:$0xff] %v8403_v7  ;;  %v7690_v48 = vpop.f32.mrb[85].mxu0 }
 0x37a   : > { %v8870_v60 = vmax.f32 %v8849_v26, %v8859_v24  ;;  %8561 = vst [vmem:[#allocation2 + $0x288] sm:$0xff] %v8401_v25  ;;  %v11420_v43 = vadd.f32 %v7690_v48, %v4380_v30  ;;  %v10930_v11 = vpop.f32.mrb[86].mxu1  ;;  %v11258_v63 = vpop.f32.mrb[86].mxu0  ;;  %v8246_v27 = vadd.f32 %v13752_v46, %v11419_v28 }
 0x37b   : > { %v8876_v32 = vmax.f32 %v8866_v58, %v8871_v21  ;;  %v11421_v49 = vadd.f32 %v11258_v63, %v10930_v11  ;;  %v4383_v50 = vpop.f32.mrb[87].mxu1  ;;  %v7693_v54 = vpop.f32.mrb[87].mxu0 }
 0x37c   : > { %v8875_v52 = vmax.f32 %v8865_v31, %v8870_v60  ;;  %v8244_v33 = vadd.f32 %v13752_v46, %v11420_v43  ;;  %v11422_v55 = vadd.f32 %v7693_v54, %v4383_v50  ;;  %v8406_v45 = vmax.f32 %v8246_v27, 0.0 }
 0x37d   : > { %10078 = vst.msk [vmem:[%s13571_s24 + $0x98] sm:$0xff] %vm8694_vm2, %v8876_v32  ;;  %v8247_v41 = vadd.f32 %v13752_v46, %v11421_v49 }
 0x37e   : > { %10077 = vst.msk [vmem:[%s13571_s24 + $0x90] sm:$0xff] %vm8694_vm2, %v8875_v52  ;;  %v8404_v35 = vmax.f32 %v8244_v33, 0.0  ;;  %v8245_v38 = vadd.f32 %v13752_v46, %v11422_v55  ;;  %8566 = vst [vmem:[#allocation2 + $0x2b0] sm:$0xff] %v8406_v45  ;;  %v10933_v37 = vpop.f32.mrb[88].mxu1 }
 0x37f   : > { %v8407_v34 = vmax.f32 %v8247_v41, 0.0  ;;  %v11261_v0 = vpop.f32.mrb[88].mxu0  ;;  %v4396_v2 = vpop.f32.mrb[89].mxu1 }
 0x380   : > { %8564 = vst [vmem:[#allocation2 + $0x2a0] sm:$0xff] %v8404_v35  ;;  %v8405_v42 = vmax.f32 %v8245_v38, 0.0  ;;  %v11423_v44 = vadd.f32 %v11261_v0, %v10933_v37  ;;  %v7706_v40 = vpop.f32.mrb[89].mxu0  ;;  %v10934_v8 = vpop.f32.mrb[90].mxu1 }
 0x381   : > { %8567 = vst [vmem:[#allocation2 + $0x2b8] sm:$0xff] %v8407_v34  ;;  %v11424_v4 = vadd.f32 %v7706_v40, %v4396_v2  ;;  %v11262_v47 = vpop.f32.mrb[90].mxu0  ;;  %v4399_v14 = vpop.f32.mrb[91].mxu1  ;;  %v8884_v19 = vld [vmem:[#allocation2 + $0x280] ss:$2 sm:$0xff] }
 0x382   : > { %8565 = vst [vmem:[#allocation2 + $0x2a8] sm:$0xff] %v8405_v42  ;;  %v8250_v17 = vadd.f32 %v13752_v46, %v11423_v44  ;;  %v11425_v36 = vadd.f32 %v11262_v47, %v10934_v8  ;;  %v7709_v18 = vpop.f32.mrb[91].mxu0  ;;  %v8894_v58 = vld [vmem:[#allocation2 + $0x281] ss:$2 sm:$0xff]  ;;  %v8886_v40 = vld [vmem:[#allocation2 + $0x290] ss:$2 sm:$0xff] }
 0x383   : > { %v8248_v5 = vadd.f32 %v13752_v46, %v11424_v4  ;;  %v11426_v20 = vadd.f32 %v7709_v18, %v4399_v14  ;;  %v8923_v43 = vmax.f32 %v8884_v19, %v8894_v58  ;;  %v8896_v4 = vld [vmem:[#allocation2 + $0x291] ss:$2 sm:$0xff] }
 0x384   : > { %v8410_v6 = vmax.f32 %v8250_v17, 0.0  ;;  %v8251_v23 = vadd.f32 %v13752_v46, %v11425_v36 }
 0x385   : > { %v8408_v39 = vmax.f32 %v8248_v5, 0.0  ;;  %v8249_v9 = vadd.f32 %v13752_v46, %v11426_v20 }
 0x386   : > { %8570 = vst [vmem:[#allocation2 + $0x2d0] sm:$0xff] %v8410_v6  ;;  %v8411_v61 = vmax.f32 %v8251_v23, 0.0  ;;  %v10937_v10 = vpop.f32.mrb[92].mxu1 }
 0x387   : > { %8568 = vst [vmem:[#allocation2 + $0x2c0] sm:$0xff] %v8408_v39  ;;  %v8409_v13 = vmax.f32 %v8249_v9, 0.0  ;;  %v11265_v12 = vpop.f32.mrb[92].mxu0  ;;  %v4412_v1 = vpop.f32.mrb[93].mxu1 }
 0x388   : > { %8571 = vst [vmem:[#allocation2 + $0x2d8] sm:$0xff] %v8411_v61  ;;  %v11427_v16 = vadd.f32 %v11265_v12, %v10937_v10  ;;  %v7722_v59 = vpop.f32.mrb[93].mxu0  ;;  %v10938_v22 = vpop.f32.mrb[94].mxu1  ;;  %v8924_v10 = vmax.f32 %v8886_v40, %v8896_v4 }
 0x389   : > { %8569 = vst [vmem:[#allocation2 + $0x2c8] sm:$0xff] %v8409_v13  ;;  %v11428_v15 = vadd.f32 %v7722_v59, %v4412_v1  ;;  %v11266_v3 = vpop.f32.mrb[94].mxu0  ;;  %v4415_v57 = vpop.f32.mrb[95].mxu1  ;;  %v8888_v42 = vld [vmem:[#allocation2 + $0x2a0] ss:$2 sm:$0xff] }
 0x38a   : > { %v8254_v51 = vadd.f32 %v13752_v46, %v11427_v16  ;;  %v11429_v53 = vadd.f32 %v11266_v3, %v10938_v22  ;;  %v7725_v7 = vpop.f32.mrb[95].mxu0  ;;  %v8898_v0 = vld [vmem:[#allocation2 + $0x2a1] ss:$2 sm:$0xff] }
 0x38b   : > { %v8252_v56 = vadd.f32 %v13752_v46, %v11428_v15  ;;  %v11430_v29 = vadd.f32 %v7725_v7, %v4415_v57  ;;  %v8925_v5 = vmax.f32 %v8888_v42, %v8898_v0 }
 0x38c   : > { %v8414_v62 = vmax.f32 %v8254_v51, 0.0  ;;  %v8255_v25 = vadd.f32 %v13752_v46, %v11429_v53 }
 0x38d   : > { %v8412_v21 = vmax.f32 %v8252_v56, 0.0  ;;  %v8253_v26 = vadd.f32 %v13752_v46, %v11430_v29 }
 0x38e   : > { %8574 = vst [vmem:[#allocation2 + $0x2f0] sm:$0xff] %v8414_v62  ;;  %v8415_v24 = vmax.f32 %v8255_v25, 0.0  ;;  %v10941_v28 = vpop.f32.mrb[96].mxu1 }
 0x38f   : > { %v8904_v30 = vld [vmem:[#allocation2 + $0x2d0] ss:$2 sm:$0xff]  ;;  %v8914_v48 = vld [vmem:[#allocation2 + $0x2d1] ss:$2 sm:$0xff]  ;;  %8572 = vst [vmem:[#allocation2 + $0x2e0] sm:$0xff] %v8412_v21  ;;  %v8413_v31 = vmax.f32 %v8253_v26, 0.0 }
 0x390   : > { %v11269_v60 = vpop.f32.mrb[96].mxu0  ;;  %v8928_v11 = vmax.f32 %v8904_v30, %v8914_v48  ;;  %8575 = vst [vmem:[#allocation2 + $0x2f8] sm:$0xff] %v8415_v24  ;;  %v4428_v32 = vpop.f32.mrb[97].mxu1  ;;  %v8892_v62 = vld [vmem:[#allocation2 + $0x2c0] ss:$2 sm:$0xff] }
 0x391   : > { %v11431_v63 = vadd.f32 %v11269_v60, %v10941_v28  ;;  %v7738_v27 = vpop.f32.mrb[97].mxu0  ;;  %8573 = vst [vmem:[#allocation2 + $0x2e8] sm:$0xff] %v8413_v31  ;;  %v10942_v50 = vpop.f32.mrb[98].mxu1  ;;  %v8902_v25 = vld [vmem:[#allocation2 + $0x2c1] ss:$2 sm:$0xff] }
 0x392   : > { %v11432_v49 = vadd.f32 %v7738_v27, %v4428_v32  ;;  %v11270_v54 = vpop.f32.mrb[98].mxu0  ;;  %v8933_v52 = vmax.f32 %v8923_v43, %v8928_v11  ;;  %v4431_v45 = vpop.f32.mrb[99].mxu1  ;;  %v8890_v21 = vld [vmem:[#allocation2 + $0x2b0] ss:$2 sm:$0xff]  ;;  %v8900_v26 = vld [vmem:[#allocation2 + $0x2b1] ss:$2 sm:$0xff]  ;;  %v8927_v43 = vmax.f32 %v8892_v62, %v8902_v25 }
 0x393   : > { %v8258_v33 = vadd.f32 %v13752_v46, %v11431_v63  ;;  %v11433_v55 = vadd.f32 %v11270_v54, %v10942_v50  ;;  %v7741_v41 = vpop.f32.mrb[99].mxu0  ;;  %v8926_v54 = vmax.f32 %v8890_v21, %v8900_v26 }
 0x394   : > { %v8256_v35 = vadd.f32 %v13752_v46, %v11432_v49  ;;  %v11434_v38 = vadd.f32 %v7741_v41, %v4431_v45  ;;  %10079 = vst.msk [vmem:[%s13571_s24 + $0xa0] sm:$0xff] %vm8694_vm2, %v8933_v52 }
 0x395   : > { %v8418_v34 = vmax.f32 %v8258_v33, 0.0  ;;  %v8259_v37 = vadd.f32 %v13752_v46, %v11433_v55 }
 0x396   : > { %v8416_v44 = vmax.f32 %v8256_v35, 0.0  ;;  %v8257_v2 = vadd.f32 %v13752_v46, %v11434_v38  ;;  %v10945_v47 = vpop.f32.mrb[100].mxu1 }
 0x397   : > { %8578 = vst [vmem:[#allocation2 + $0x310] sm:$0xff] %v8418_v34  ;;  %v8419_v8 = vmax.f32 %v8259_v37, 0.0  ;;  %v8908_v17 = vld [vmem:[#allocation2 + $0x2f0] ss:$2 sm:$0xff]  ;;  %v8918_v36 = vld [vmem:[#allocation2 + $0x2f1] ss:$2 sm:$0xff] }
 0x398   : > { %8576 = vst [vmem:[#allocation2 + $0x300] sm:$0xff] %v8416_v44  ;;  %v8417_v14 = vmax.f32 %v8257_v2, 0.0  ;;  %v11273_v18 = vpop.f32.mrb[100].mxu0  ;;  %v8930_v20 = vmax.f32 %v8908_v17, %v8918_v36  ;;  %v8906_v6 = vld [vmem:[#allocation2 + $0x2e0] ss:$2 sm:$0xff]  ;;  %v4444_v9 = vpop.f32.mrb[101].mxu1 }
 0x399   : > { %v8916_v23 = vld [vmem:[#allocation2 + $0x2e1] ss:$2 sm:$0xff]  ;;  %8579 = vst [vmem:[#allocation2 + $0x318] sm:$0xff] %v8419_v8  ;;  %v11435_v39 = vadd.f32 %v11273_v18, %v10945_v47  ;;  %v7754_v61 = vpop.f32.mrb[101].mxu0  ;;  %v10946_v16 = vpop.f32.mrb[102].mxu1 }
 0x39a   : > { %v8929_v13 = vmax.f32 %v8906_v6, %v8916_v23  ;;  %8577 = vst [vmem:[#allocation2 + $0x308] sm:$0xff] %v8417_v14  ;;  %v11436_v12 = vadd.f32 %v7754_v61, %v4444_v9  ;;  %v11274_v1 = vpop.f32.mrb[102].mxu0  ;;  %v8935_v59 = vmax.f32 %v8925_v5, %v8930_v20  ;;  %v4447_v3 = vpop.f32.mrb[103].mxu1 }
 0x39b   : > { %v8262_v15 = vadd.f32 %v13752_v46, %v11435_v39  ;;  %v11437_v22 = vadd.f32 %v11274_v1, %v10946_v16  ;;  %v7757_v51 = vpop.f32.mrb[103].mxu0 }
 0x39c   : > { %v8934_v53 = vmax.f32 %v8924_v10, %v8929_v13  ;;  %v8260_v57 = vadd.f32 %v13752_v46, %v11436_v12  ;;  %v11438_v7 = vadd.f32 %v7757_v51, %v4447_v3  ;;  %10081 = vst.msk [vmem:[%s13571_s24 + $0xb0] sm:$0xff] %vm8694_vm2, %v8935_v59 }
 0x39d   : > { %v8422_v56 = vmax.f32 %v8262_v15, 0.0  ;;  %v8263_v29 = vadd.f32 %v13752_v46, %v11437_v22 }
 0x39e   : > { %10080 = vst.msk [vmem:[%s13571_s24 + $0xa8] sm:$0xff] %vm8694_vm2, %v8934_v53  ;;  %v8420_v19 = vmax.f32 %v8260_v57, 0.0  ;;  %v8261_v58 = vadd.f32 %v13752_v46, %v11438_v7  ;;  %v10949_v28 = vpop.f32.mrb[104].mxu1 }
 0x39f   : > { %8582 = vst [vmem:[#allocation2 + $0x330] sm:$0xff] %v8422_v56  ;;  %v8423_v24 = vmax.f32 %v8263_v29, 0.0  ;;  %v11277_v60 = vpop.f32.mrb[104].mxu0  ;;  %v4460_v49 = vpop.f32.mrb[105].mxu1 }
 0x3a0   : > { %v8912_v30 = vld [vmem:[#allocation2 + $0x310] ss:$2 sm:$0xff]  ;;  %v8922_v48 = vld [vmem:[#allocation2 + $0x311] ss:$2 sm:$0xff]  ;;  %8580 = vst [vmem:[#allocation2 + $0x320] sm:$0xff] %v8420_v19  ;;  %v8421_v31 = vmax.f32 %v8261_v58, 0.0  ;;  %v11439_v27 = vadd.f32 %v11277_v60, %v10949_v28 }
 0x3a1   : > { %v8932_v11 = vmax.f32 %v8912_v30, %v8922_v48  ;;  %v8910_v63 = vld [vmem:[#allocation2 + $0x300] ss:$2 sm:$0xff]  ;;  %v8920_v32 = vld [vmem:[#allocation2 + $0x301] ss:$2 sm:$0xff]  ;;  %8583 = vst [vmem:[#allocation2 + $0x338] sm:$0xff] %v8423_v24  ;;  %v7770_v50 = vpop.f32.mrb[105].mxu0 }
 0x3a2   : > { %v8931_v52 = vmax.f32 %v8910_v63, %v8920_v32  ;;  %8581 = vst [vmem:[#allocation2 + $0x328] sm:$0xff] %v8421_v31  ;;  %v11440_v33 = vadd.f32 %v7770_v50, %v4460_v49  ;;  %v10950_v55 = vpop.f32.mrb[106].mxu1  ;;  %v11278_v45 = vpop.f32.mrb[106].mxu0  ;;  %v8266_v35 = vadd.f32 %v13752_v46, %v11439_v27 }
 0x3a3   : > { %v8937_v41 = vmax.f32 %v8927_v43, %v8932_v11  ;;  %v11441_v38 = vadd.f32 %v11278_v45, %v10950_v55  ;;  %v4463_v34 = vpop.f32.mrb[107].mxu1  ;;  %v7773_v37 = vpop.f32.mrb[107].mxu0 }
 0x3a4   : > { %v8936_v42 = vmax.f32 %v8926_v54, %v8931_v52  ;;  %v8264_v0 = vadd.f32 %v13752_v46, %v11440_v33  ;;  %v11442_v44 = vadd.f32 %v7773_v37, %v4463_v34  ;;  %v8426_v2 = vmax.f32 %v8266_v35, 0.0 }
 0x3a5   : > { %10083 = vst.msk [vmem:[%s13571_s24 + $0xc0] sm:$0xff] %vm8694_vm2, %v8937_v41  ;;  %v8267_v40 = vadd.f32 %v13752_v46, %v11441_v38 }
 0x3a6   : > { %10082 = vst.msk [vmem:[%s13571_s24 + $0xb8] sm:$0xff] %vm8694_vm2, %v8936_v42  ;;  %v8424_v4 = vmax.f32 %v8264_v0, 0.0  ;;  %v8265_v8 = vadd.f32 %v13752_v46, %v11442_v44  ;;  %8586 = vst [vmem:[#allocation2 + $0x350] sm:$0xff] %v8426_v2  ;;  %v10953_v17 = vpop.f32.mrb[108].mxu1 }
 0x3a7   : > { %v8427_v47 = vmax.f32 %v8267_v40, 0.0  ;;  %v11281_v14 = vpop.f32.mrb[108].mxu0  ;;  %v4476_v5 = vpop.f32.mrb[109].mxu1 }
 0x3a8   : > { %8584 = vst [vmem:[#allocation2 + $0x340] sm:$0xff] %v8424_v4  ;;  %v8425_v36 = vmax.f32 %v8265_v8, 0.0  ;;  %v11443_v18 = vadd.f32 %v11281_v14, %v10953_v17  ;;  %v7786_v20 = vpop.f32.mrb[109].mxu0  ;;  %v10954_v23 = vpop.f32.mrb[110].mxu1 }
 0x3a9   : > { %8587 = vst [vmem:[#allocation2 + $0x358] sm:$0xff] %v8427_v47  ;;  %v11444_v6 = vadd.f32 %v7786_v20, %v4476_v5  ;;  %v11282_v39 = vpop.f32.mrb[110].mxu0  ;;  %v4479_v10 = vpop.f32.mrb[111].mxu1  ;;  %v8945_v60 = vld [vmem:[#allocation2 + $0x320] ss:$2 sm:$0xff] }
 0x3aa   : > { %8585 = vst [vmem:[#allocation2 + $0x348] sm:$0xff] %v8425_v36  ;;  %v8270_v9 = vadd.f32 %v13752_v46, %v11443_v18  ;;  %v11445_v61 = vadd.f32 %v11282_v39, %v10954_v23  ;;  %v7789_v13 = vpop.f32.mrb[111].mxu0  ;;  %v8955_v43 = vld [vmem:[#allocation2 + $0x321] ss:$2 sm:$0xff]  ;;  %v8947_v20 = vld [vmem:[#allocation2 + $0x330] ss:$2 sm:$0xff] }
 0x3ab   : > { %v8268_v12 = vadd.f32 %v13752_v46, %v11444_v6  ;;  %v11446_v16 = vadd.f32 %v7789_v13, %v4479_v10  ;;  %v8984_v33 = vmax.f32 %v8945_v60, %v8955_v43  ;;  %v8957_v6 = vld [vmem:[#allocation2 + $0x331] ss:$2 sm:$0xff] }
 0x3ac   : > { %v8430_v1 = vmax.f32 %v8270_v9, 0.0  ;;  %v8271_v59 = vadd.f32 %v13752_v46, %v11445_v61 }
 0x3ad   : > { %v8428_v15 = vmax.f32 %v8268_v12, 0.0  ;;  %v8269_v22 = vadd.f32 %v13752_v46, %v11446_v16 }
 0x3ae   : > { %8590 = vst [vmem:[#allocation2 + $0x370] sm:$0xff] %v8430_v1  ;;  %v8431_v3 = vmax.f32 %v8271_v59, 0.0  ;;  %v10957_v51 = vpop.f32.mrb[112].mxu1 }
 0x3af   : > { %8588 = vst [vmem:[#allocation2 + $0x360] sm:$0xff] %v8428_v15  ;;  %v8429_v53 = vmax.f32 %v8269_v22, 0.0  ;;  %v11285_v57 = vpop.f32.mrb[112].mxu0  ;;  %v4492_v56 = vpop.f32.mrb[113].mxu1 }
 0x3b0   : > { %8591 = vst [vmem:[#allocation2 + $0x378] sm:$0xff] %v8431_v3  ;;  %v11447_v7 = vadd.f32 %v11285_v57, %v10957_v51  ;;  %v7802_v29 = vpop.f32.mrb[113].mxu0  ;;  %v10958_v25 = vpop.f32.mrb[114].mxu1  ;;  %v8985_v51 = vmax.f32 %v8947_v20, %v8957_v6  ;;  %v13877_v20 = vld [vmem:[%s13952_s2] ss:$0 sm:$0xff] }
 0x3b1   : > { %8589 = vst [vmem:[#allocation2 + $0x368] sm:$0xff] %v8429_v53  ;;  %v11448_v62 = vadd.f32 %v7802_v29, %v4492_v56  ;;  %v11286_v19 = vpop.f32.mrb[114].mxu0  ;;  %v4495_v26 = vpop.f32.mrb[115].mxu1  ;;  %v8949_v36 = vld [vmem:[#allocation2 + $0x340] ss:$2 sm:$0xff] }
 0x3b2   : > { %v8274_v58 = vadd.f32 %v13752_v46, %v11447_v7  ;;  %v11449_v21 = vadd.f32 %v11286_v19, %v10958_v25  ;;  %v7805_v24 = vpop.f32.mrb[115].mxu0  ;;  %v8959_v14 = vld [vmem:[#allocation2 + $0x341] ss:$2 sm:$0xff] }
 0x3b3   : > { %v8272_v28 = vadd.f32 %v13752_v46, %v11448_v62  ;;  %v11450_v30 = vadd.f32 %v7805_v24, %v4495_v26  ;;  %v8986_v12 = vmax.f32 %v8949_v36, %v8959_v14 }
 0x3b4   : > { %v8434_v48 = vmax.f32 %v8274_v58, 0.0  ;;  %v8275_v31 = vadd.f32 %v13752_v46, %v11449_v21 }
 0x3b5   : > { %v8432_v11 = vmax.f32 %v8272_v28, 0.0  ;;  %v8273_v63 = vadd.f32 %v13752_v46, %v11450_v30 }
 0x3b6   : > { %8594 = vst [vmem:[#allocation2 + $0x390] sm:$0xff] %v8434_v48  ;;  %v8435_v32 = vmax.f32 %v8275_v31, 0.0  ;;  %v10961_v27 = vpop.f32.mrb[116].mxu1 }
 0x3b7   : > { %v8965_v49 = vld [vmem:[#allocation2 + $0x370] ss:$2 sm:$0xff]  ;;  %v8975_v50 = vld [vmem:[#allocation2 + $0x371] ss:$2 sm:$0xff]  ;;  %8592 = vst [vmem:[#allocation2 + $0x380] sm:$0xff] %v8432_v11  ;;  %v8433_v54 = vmax.f32 %v8273_v63, 0.0 }
 0x3b8   : > { %v11289_v52 = vpop.f32.mrb[116].mxu0  ;;  %v8989_v55 = vmax.f32 %v8965_v49, %v8975_v50  ;;  %8595 = vst [vmem:[#allocation2 + $0x398] sm:$0xff] %v8435_v32  ;;  %v4508_v41 = vpop.f32.mrb[117].mxu1  ;;  %v8953_v48 = vld [vmem:[#allocation2 + $0x360] ss:$2 sm:$0xff] }
 0x3b9   : > { %v11451_v45 = vadd.f32 %v11289_v52, %v10961_v27  ;;  %v7818_v35 = vpop.f32.mrb[117].mxu0  ;;  %8593 = vst [vmem:[#allocation2 + $0x388] sm:$0xff] %v8433_v54  ;;  %v10962_v34 = vpop.f32.mrb[118].mxu1  ;;  %v8963_v31 = vld [vmem:[#allocation2 + $0x361] ss:$2 sm:$0xff] }
 0x3ba   : > { %v11452_v38 = vadd.f32 %v7818_v35, %v4508_v41  ;;  %v11290_v37 = vpop.f32.mrb[118].mxu0  ;;  %v8994_v42 = vmax.f32 %v8984_v33, %v8989_v55  ;;  %v4511_v2 = vpop.f32.mrb[119].mxu1  ;;  %v8951_v11 = vld [vmem:[#allocation2 + $0x350] ss:$2 sm:$0xff]  ;;  %v8961_v63 = vld [vmem:[#allocation2 + $0x351] ss:$2 sm:$0xff]  ;;  %v8988_v33 = vmax.f32 %v8953_v48, %v8963_v31 }
 0x3bb   : > { %v8278_v0 = vadd.f32 %v13752_v46, %v11451_v45  ;;  %v11453_v44 = vadd.f32 %v11290_v37, %v10962_v34  ;;  %v7821_v40 = vpop.f32.mrb[119].mxu0  ;;  %v8987_v37 = vmax.f32 %v8951_v11, %v8961_v63 }
 0x3bc   : > { %v8276_v4 = vadd.f32 %v13752_v46, %v11452_v38  ;;  %v11454_v8 = vadd.f32 %v7821_v40, %v4511_v2  ;;  %10084 = vst.msk [vmem:[%s13571_s24 + $0xc8] sm:$0xff] %vm8694_vm2, %v8994_v42 }
 0x3bd   : > { %v8438_v47 = vmax.f32 %v8278_v0, 0.0  ;;  %v8279_v17 = vadd.f32 %v13752_v46, %v11453_v44 }
 0x3be   : > { %v8436_v18 = vmax.f32 %v8276_v4, 0.0  ;;  %v8277_v5 = vadd.f32 %v13752_v46, %v11454_v8  ;;  %v10965_v39 = vpop.f32.mrb[120].mxu1 }
 0x3bf   : > { %8598 = vst [vmem:[#allocation2 + $0x3b0] sm:$0xff] %v8438_v47  ;;  %v8439_v23 = vmax.f32 %v8279_v17, 0.0  ;;  %v8969_v9 = vld [vmem:[#allocation2 + $0x390] ss:$2 sm:$0xff]  ;;  %v8979_v61 = vld [vmem:[#allocation2 + $0x391] ss:$2 sm:$0xff] }
 0x3c0   : > { %8596 = vst [vmem:[#allocation2 + $0x3a0] sm:$0xff] %v8436_v18  ;;  %v8437_v10 = vmax.f32 %v8277_v5, 0.0  ;;  %v11293_v13 = vpop.f32.mrb[120].mxu0  ;;  %v8991_v16 = vmax.f32 %v8969_v9, %v8979_v61  ;;  %v8967_v1 = vld [vmem:[#allocation2 + $0x380] ss:$2 sm:$0xff]  ;;  %v4524_v22 = vpop.f32.mrb[121].mxu1 }
 0x3c1   : > { %v8977_v59 = vld [vmem:[#allocation2 + $0x381] ss:$2 sm:$0xff]  ;;  %8599 = vst [vmem:[#allocation2 + $0x3b8] sm:$0xff] %v8439_v23  ;;  %v11455_v15 = vadd.f32 %v11293_v13, %v10965_v39  ;;  %v7834_v3 = vpop.f32.mrb[121].mxu0  ;;  %v10966_v7 = vpop.f32.mrb[122].mxu1 }
 0x3c2   : > { %v8990_v53 = vmax.f32 %v8967_v1, %v8977_v59  ;;  %8597 = vst [vmem:[#allocation2 + $0x3a8] sm:$0xff] %v8437_v10  ;;  %v11456_v57 = vadd.f32 %v7834_v3, %v4524_v22  ;;  %v11294_v56 = vpop.f32.mrb[122].mxu0  ;;  %v8996_v29 = vmax.f32 %v8986_v12, %v8991_v16  ;;  %v4527_v19 = vpop.f32.mrb[123].mxu1 }
 0x3c3   : > { %v8282_v62 = vadd.f32 %v13752_v46, %v11455_v15  ;;  %v11457_v25 = vadd.f32 %v11294_v56, %v10966_v7  ;;  %v7837_v58 = vpop.f32.mrb[123].mxu0 }
 0x3c4   : > { %v8995_v21 = vmax.f32 %v8985_v51, %v8990_v53  ;;  %v8280_v26 = vadd.f32 %v13752_v46, %v11456_v57  ;;  %v11458_v24 = vadd.f32 %v7837_v58, %v4527_v19  ;;  %10086 = vst.msk [vmem:[%s13571_s24 + $0xd8] sm:$0xff] %vm8694_vm2, %v8996_v29 }
 0x3c5   : > { %v8442_v28 = vmax.f32 %v8282_v62, 0.0  ;;  %v8283_v30 = vadd.f32 %v13752_v46, %v11457_v25 }
 0x3c6   : > { %10085 = vst.msk [vmem:[%s13571_s24 + $0xd0] sm:$0xff] %vm8694_vm2, %v8995_v21  ;;  %v8440_v60 = vmax.f32 %v8280_v26, 0.0  ;;  %v8281_v43 = vadd.f32 %v13752_v46, %v11458_v24  ;;  %v10969_v27 = vpop.f32.mrb[124].mxu1 }
 0x3c7   : > { %8602 = vst [vmem:[#allocation2 + $0x3d0] sm:$0xff] %v8442_v28  ;;  %v8443_v32 = vmax.f32 %v8283_v30, 0.0  ;;  %v11297_v52 = vpop.f32.mrb[124].mxu0  ;;  %v4540_v38 = vpop.f32.mrb[125].mxu1 }
 0x3c8   : > { %v8973_v49 = vld [vmem:[#allocation2 + $0x3b0] ss:$2 sm:$0xff]  ;;  %v8983_v50 = vld [vmem:[#allocation2 + $0x3b1] ss:$2 sm:$0xff]  ;;  %8600 = vst [vmem:[#allocation2 + $0x3c0] sm:$0xff] %v8440_v60  ;;  %v8441_v54 = vmax.f32 %v8281_v43, 0.0  ;;  %v11459_v35 = vadd.f32 %v11297_v52, %v10969_v27 }
 0x3c9   : > { %v8993_v55 = vmax.f32 %v8973_v49, %v8983_v50  ;;  %v8971_v45 = vld [vmem:[#allocation2 + $0x3a0] ss:$2 sm:$0xff]  ;;  %v8981_v41 = vld [vmem:[#allocation2 + $0x3a1] ss:$2 sm:$0xff]  ;;  %8603 = vst [vmem:[#allocation2 + $0x3d8] sm:$0xff] %v8443_v32  ;;  %v7850_v34 = vpop.f32.mrb[125].mxu0 }
 0x3ca   : > { %v8992_v42 = vmax.f32 %v8971_v45, %v8981_v41  ;;  %8601 = vst [vmem:[#allocation2 + $0x3c8] sm:$0xff] %v8441_v54  ;;  %v11460_v0 = vadd.f32 %v7850_v34, %v4540_v38  ;;  %v10970_v44 = vpop.f32.mrb[126].mxu1  ;;  %v11298_v2 = vpop.f32.mrb[126].mxu0  ;;  %v8286_v4 = vadd.f32 %v13752_v46, %v11459_v35 }
 0x3cb   : > { %v8998_v40 = vmax.f32 %v8988_v33, %v8993_v55  ;;  %v11461_v8 = vadd.f32 %v11298_v2, %v10970_v44  ;;  %v4543_v47 = vpop.f32.mrb[127].mxu1  ;;  %v7853_v17 = vpop.f32.mrb[127].mxu0 }
 0x3cc   : > { %v8997_v36 = vmax.f32 %v8987_v37, %v8992_v42  ;;  %v8284_v14 = vadd.f32 %v13752_v46, %v11460_v0  ;;  %v11462_v18 = vadd.f32 %v7853_v17, %v4543_v47  ;;  %v8446_v5 = vmax.f32 %v8286_v4, 0.0 }
 0x3cd   : > { %10088 = vst.msk [vmem:[%s13571_s24 + $0xe8] sm:$0xff] %vm8694_vm2, %v8998_v40  ;;  %v8287_v6 = vadd.f32 %v13877_v20, %v11461_v8 }
 0x3ce   : > { %10087 = vst.msk [vmem:[%s13571_s24 + $0xe0] sm:$0xff] %vm8694_vm2, %v8997_v36  ;;  %v8444_v23 = vmax.f32 %v8284_v14, 0.0  ;;  %v8285_v39 = vadd.f32 %v13877_v20, %v11462_v18  ;;  %8606 = vst [vmem:[#allocation2 + $0x3f0] sm:$0xff] %v8446_v5  ;;  %v10973_v61 = vpop.f32.mrb[128].mxu1 }
 0x3cf   : > { %v8447_v9 = vmax.f32 %v8287_v6, 0.0  ;;  %v11301_v10 = vpop.f32.mrb[128].mxu0  ;;  %v4556_v12 = vpop.f32.mrb[129].mxu1 }
 0x3d0   : > { %8604 = vst [vmem:[#allocation2 + $0x3e0] sm:$0xff] %v8444_v23  ;;  %v8445_v46 = vmax.f32 %v8285_v39, 0.0  ;;  %v11463_v13 = vadd.f32 %v11301_v10, %v10973_v61  ;;  %v7866_v16 = vpop.f32.mrb[129].mxu0  ;;  %v10974_v59 = vpop.f32.mrb[130].mxu1 }
 0x3d1   : > { %8607 = vst [vmem:[#allocation2 + $0x3f8] sm:$0xff] %v8447_v9  ;;  %v11464_v1 = vadd.f32 %v7866_v16, %v4556_v12  ;;  %v11302_v15 = vpop.f32.mrb[130].mxu0  ;;  %v4559_v51 = vpop.f32.mrb[131].mxu1  ;;  %v9006_v52 = vld [vmem:[#allocation2 + $0x3c0] ss:$2 sm:$0xff] }
 0x3d2   : > { %8605 = vst [vmem:[#allocation2 + $0x3e8] sm:$0xff] %v8445_v46  ;;  %v8290_v22 = vadd.f32 %v13877_v20, %v11463_v13  ;;  %v11465_v3 = vadd.f32 %v11302_v15, %v10974_v59  ;;  %v7869_v53 = vpop.f32.mrb[131].mxu0  ;;  %v9016_v33 = vld [vmem:[#allocation2 + $0x3c1] ss:$2 sm:$0xff]  ;;  %v9008_v16 = vld [vmem:[#allocation2 + $0x3d0] ss:$2 sm:$0xff] }
 0x3d3   : > { %v8288_v57 = vadd.f32 %v13877_v20, %v11464_v1  ;;  %v11466_v7 = vadd.f32 %v7869_v53, %v4559_v51  ;;  %v9045_v0 = vmax.f32 %v9006_v52, %v9016_v33  ;;  %v9018_v1 = vld [vmem:[#allocation2 + $0x3d1] ss:$2 sm:$0xff] }
 0x3d4   : > { %v8450_v56 = vmax.f32 %v8290_v22, 0.0  ;;  %v8291_v29 = vadd.f32 %v13877_v20, %v11465_v3 }
 0x3d5   : > { %v8448_v62 = vmax.f32 %v8288_v57, 0.0  ;;  %v8289_v25 = vadd.f32 %v13877_v20, %v11466_v7 }
 0x3d6   : > { %8610 = vst [vmem:[#allocation2 + $0x410] sm:$0xff] %v8450_v56  ;;  %v8451_v19 = vmax.f32 %v8291_v29, 0.0  ;;  %v10977_v58 = vpop.f32.mrb[132].mxu1 }
 0x3d7   : > { %8608 = vst [vmem:[#allocation2 + $0x400] sm:$0xff] %v8448_v62  ;;  %v8449_v21 = vmax.f32 %v8289_v25, 0.0  ;;  %v11305_v26 = vpop.f32.mrb[132].mxu0  ;;  %v4572_v28 = vpop.f32.mrb[133].mxu1 }
 0x3d8   : > { %8611 = vst [vmem:[#allocation2 + $0x418] sm:$0xff] %v8451_v19  ;;  %v11467_v24 = vadd.f32 %v11305_v26, %v10977_v58  ;;  %v7882_v30 = vpop.f32.mrb[133].mxu0  ;;  %v10978_v31 = vpop.f32.mrb[134].mxu1  ;;  %v9046_v58 = vmax.f32 %v9008_v16, %v9018_v1 }
 0x3d9   : > { %8609 = vst [vmem:[#allocation2 + $0x408] sm:$0xff] %v8449_v21  ;;  %v11468_v48 = vadd.f32 %v7882_v30, %v4572_v28  ;;  %v11306_v60 = vpop.f32.mrb[134].mxu0  ;;  %v4575_v63 = vpop.f32.mrb[135].mxu1  ;;  %v9010_v46 = vld [vmem:[#allocation2 + $0x3e0] ss:$2 sm:$0xff] }
 0x3da   : > { %v8294_v43 = vadd.f32 %v13877_v20, %v11467_v24  ;;  %v11469_v11 = vadd.f32 %v11306_v60, %v10978_v31  ;;  %v7885_v32 = vpop.f32.mrb[135].mxu0  ;;  %v9020_v10 = vld [vmem:[#allocation2 + $0x3e1] ss:$2 sm:$0xff] }
 0x3db   : > { %v8292_v27 = vadd.f32 %v13877_v20, %v11468_v48  ;;  %v11470_v49 = vadd.f32 %v7885_v32, %v4575_v63  ;;  %v9047_v57 = vmax.f32 %v9010_v46, %v9020_v10 }
 0x3dc   : > { %v8454_v50 = vmax.f32 %v8294_v43, 0.0  ;;  %v8295_v54 = vadd.f32 %v13877_v20, %v11469_v11 }
 0x3dd   : > { %v8452_v55 = vmax.f32 %v8292_v27, 0.0  ;;  %v8293_v45 = vadd.f32 %v13877_v20, %v11470_v49 }
 0x3de   : > { %8614 = vst [vmem:[#allocation2 + $0x430] sm:$0xff] %v8454_v50  ;;  %v8455_v41 = vmax.f32 %v8295_v54, 0.0  ;;  %v10981_v35 = vpop.f32.mrb[136].mxu1 }
 0x3df   : > { %v9026_v38 = vld [vmem:[#allocation2 + $0x410] ss:$2 sm:$0xff]  ;;  %v9036_v34 = vld [vmem:[#allocation2 + $0x411] ss:$2 sm:$0xff]  ;;  %8612 = vst [vmem:[#allocation2 + $0x420] sm:$0xff] %v8452_v55  ;;  %v8453_v37 = vmax.f32 %v8293_v45, 0.0 }
 0x3e0   : > { %v11309_v42 = vpop.f32.mrb[136].mxu0  ;;  %v9050_v44 = vmax.f32 %v9026_v38, %v9036_v34  ;;  %8615 = vst [vmem:[#allocation2 + $0x438] sm:$0xff] %v8455_v41  ;;  %v4588_v40 = vpop.f32.mrb[137].mxu1  ;;  %v9014_v50 = vld [vmem:[#allocation2 + $0x400] ss:$2 sm:$0xff] }
 0x3e1   : > { %v11471_v2 = vadd.f32 %v11309_v42, %v10981_v35  ;;  %v7898_v4 = vpop.f32.mrb[137].mxu0  ;;  %8613 = vst [vmem:[#allocation2 + $0x428] sm:$0xff] %v8453_v37  ;;  %v10982_v47 = vpop.f32.mrb[138].mxu1  ;;  %v9024_v54 = vld [vmem:[#allocation2 + $0x401] ss:$2 sm:$0xff] }
 0x3e2   : > { %v11472_v8 = vadd.f32 %v7898_v4, %v4588_v40  ;;  %v11310_v17 = vpop.f32.mrb[138].mxu0  ;;  %v9055_v36 = vmax.f32 %v9045_v0, %v9050_v44  ;;  %v4591_v5 = vpop.f32.mrb[139].mxu1  ;;  %v9012_v55 = vld [vmem:[#allocation2 + $0x3f0] ss:$2 sm:$0xff]  ;;  %v9022_v45 = vld [vmem:[#allocation2 + $0x3f1] ss:$2 sm:$0xff]  ;;  %v9049_v0 = vmax.f32 %v9014_v50, %v9024_v54 }
 0x3e3   : > { %v8298_v14 = vadd.f32 %v13877_v20, %v11471_v2  ;;  %v11473_v18 = vadd.f32 %v11310_v17, %v10982_v47  ;;  %v7901_v6 = vpop.f32.mrb[139].mxu0  ;;  %v9048_v17 = vmax.f32 %v9012_v55, %v9022_v45 }
 0x3e4   : > { %v8296_v23 = vadd.f32 %v13877_v20, %v11472_v8  ;;  %v11474_v39 = vadd.f32 %v7901_v6, %v4591_v5  ;;  %10089 = vst.msk [vmem:[%s13571_s24 + $0xf0] sm:$0xff] %vm8694_vm2, %v9055_v36 }
 0x3e5   : > { %v8458_v9 = vmax.f32 %v8298_v14, 0.0  ;;  %v8299_v61 = vadd.f32 %v13877_v20, %v11473_v18 }
 0x3e6   : > { %v8456_v13 = vmax.f32 %v8296_v23, 0.0  ;;  %v8297_v12 = vadd.f32 %v13877_v20, %v11474_v39  ;;  %v10985_v15 = vpop.f32.mrb[140].mxu1 }
 0x3e7   : > { %8618 = vst [vmem:[#allocation2 + $0x450] sm:$0xff] %v8458_v9  ;;  %v8459_v59 = vmax.f32 %v8299_v61, 0.0  ;;  %v9030_v22 = vld [vmem:[#allocation2 + $0x430] ss:$2 sm:$0xff]  ;;  %v9040_v3 = vld [vmem:[#allocation2 + $0x431] ss:$2 sm:$0xff] }
 0x3e8   : > { %8616 = vst [vmem:[#allocation2 + $0x440] sm:$0xff] %v8456_v13  ;;  %v8457_v51 = vmax.f32 %v8297_v12, 0.0  ;;  %v11313_v53 = vpop.f32.mrb[140].mxu0  ;;  %v9052_v7 = vmax.f32 %v9030_v22, %v9040_v3  ;;  %v9028_v56 = vld [vmem:[#allocation2 + $0x420] ss:$2 sm:$0xff]  ;;  %v4604_v25 = vpop.f32.mrb[141].mxu1 }
 0x3e9   : > { %v9038_v29 = vld [vmem:[#allocation2 + $0x421] ss:$2 sm:$0xff]  ;;  %8619 = vst [vmem:[#allocation2 + $0x458] sm:$0xff] %v8459_v59  ;;  %v11475_v62 = vadd.f32 %v11313_v53, %v10985_v15  ;;  %v7914_v19 = vpop.f32.mrb[141].mxu0  ;;  %v10986_v24 = vpop.f32.mrb[142].mxu1 }
 0x3ea   : > { %v9051_v21 = vmax.f32 %v9028_v56, %v9038_v29  ;;  %8617 = vst [vmem:[#allocation2 + $0x448] sm:$0xff] %v8457_v51  ;;  %v11476_v26 = vadd.f32 %v7914_v19, %v4604_v25  ;;  %v11314_v28 = vpop.f32.mrb[142].mxu0  ;;  %v9057_v30 = vmax.f32 %v9047_v57, %v9052_v7  ;;  %v4607_v60 = vpop.f32.mrb[143].mxu1 }
 0x3eb   : > { %v8302_v48 = vadd.f32 %v13877_v20, %v11475_v62  ;;  %v11477_v31 = vadd.f32 %v11314_v28, %v10986_v24  ;;  %v7917_v43 = vpop.f32.mrb[143].mxu0 }
 0x3ec   : > { %v9056_v11 = vmax.f32 %v9046_v58, %v9051_v21  ;;  %v8300_v63 = vadd.f32 %v13877_v20, %v11476_v26  ;;  %v11478_v32 = vadd.f32 %v7917_v43, %v4607_v60  ;;  %10091 = vst.msk [vmem:[%s13571_s24 + $0x100] sm:$0xff] %vm8694_vm2, %v9057_v30 }
 0x3ed   : > { %v8462_v27 = vmax.f32 %v8302_v48, 0.0  ;;  %v8303_v49 = vadd.f32 %v13877_v20, %v11477_v31 }
 0x3ee   : > { %10090 = vst.msk [vmem:[%s13571_s24 + $0xf8] sm:$0xff] %vm8694_vm2, %v9056_v11  ;;  %v8460_v52 = vmax.f32 %v8300_v63, 0.0  ;;  %v8301_v33 = vadd.f32 %v13877_v20, %v11478_v32  ;;  %v10989_v35 = vpop.f32.mrb[144].mxu1 }
 0x3ef   : > { %8622 = vst [vmem:[#allocation2 + $0x470] sm:$0xff] %v8462_v27  ;;  %v8463_v41 = vmax.f32 %v8303_v49, 0.0  ;;  %v11317_v42 = vpop.f32.mrb[144].mxu0  ;;  %v4620_v8 = vpop.f32.mrb[145].mxu1 }
 0x3f0   : > { %v9034_v38 = vld [vmem:[#allocation2 + $0x450] ss:$2 sm:$0xff]  ;;  %v9044_v34 = vld [vmem:[#allocation2 + $0x451] ss:$2 sm:$0xff]  ;;  %8620 = vst [vmem:[#allocation2 + $0x460] sm:$0xff] %v8460_v52  ;;  %v8461_v37 = vmax.f32 %v8301_v33, 0.0  ;;  %v11479_v4 = vadd.f32 %v11317_v42, %v10989_v35 }
 0x3f1   : > { %v9054_v44 = vmax.f32 %v9034_v38, %v9044_v34  ;;  %v9032_v2 = vld [vmem:[#allocation2 + $0x440] ss:$2 sm:$0xff]  ;;  %v9042_v40 = vld [vmem:[#allocation2 + $0x441] ss:$2 sm:$0xff]  ;;  %8623 = vst [vmem:[#allocation2 + $0x478] sm:$0xff] %v8463_v41  ;;  %v7930_v47 = vpop.f32.mrb[145].mxu0 }
 0x3f2   : > { %v9053_v36 = vmax.f32 %v9032_v2, %v9042_v40  ;;  %8621 = vst [vmem:[#allocation2 + $0x468] sm:$0xff] %v8461_v37  ;;  %v11480_v14 = vadd.f32 %v7930_v47, %v4620_v8  ;;  %v10990_v18 = vpop.f32.mrb[146].mxu1  ;;  %v11318_v5 = vpop.f32.mrb[146].mxu0  ;;  %v8306_v23 = vadd.f32 %v13877_v20, %v11479_v4 }
 0x3f3   : > { %v9059_v6 = vmax.f32 %v9049_v0, %v9054_v44  ;;  %v11481_v39 = vadd.f32 %v11318_v5, %v10990_v18  ;;  %v4623_v9 = vpop.f32.mrb[147].mxu1  ;;  %v7933_v61 = vpop.f32.mrb[147].mxu0 }
 0x3f4   : > { %v9058_v46 = vmax.f32 %v9048_v17, %v9053_v36  ;;  %v8304_v10 = vadd.f32 %v13877_v20, %v11480_v14  ;;  %v11482_v13 = vadd.f32 %v7933_v61, %v4623_v9  ;;  %v8466_v12 = vmax.f32 %v8306_v23, 0.0 }
 0x3f5   : > { %10093 = vst.msk [vmem:[%s13571_s24 + $0x110] sm:$0xff] %vm8694_vm2, %v9059_v6  ;;  %v8307_v16 = vadd.f32 %v13877_v20, %v11481_v39 }
 0x3f6   : > { %10092 = vst.msk [vmem:[%s13571_s24 + $0x108] sm:$0xff] %vm8694_vm2, %v9058_v46  ;;  %v8464_v1 = vmax.f32 %v8304_v10, 0.0  ;;  %v8305_v59 = vadd.f32 %v13877_v20, %v11482_v13  ;;  %8626 = vst [vmem:[#allocation2 + $0x490] sm:$0xff] %v8466_v12  ;;  %v10993_v22 = vpop.f32.mrb[148].mxu1 }
 0x3f7   : > { %v8467_v15 = vmax.f32 %v8307_v16, 0.0  ;;  %v11321_v51 = vpop.f32.mrb[148].mxu0  ;;  %v4636_v57 = vpop.f32.mrb[149].mxu1 }
 0x3f8   : > { %8624 = vst [vmem:[#allocation2 + $0x480] sm:$0xff] %v8464_v1  ;;  %v8465_v3 = vmax.f32 %v8305_v59, 0.0  ;;  %v11483_v53 = vadd.f32 %v11321_v51, %v10993_v22  ;;  %v7946_v7 = vpop.f32.mrb[149].mxu0  ;;  %v10994_v29 = vpop.f32.mrb[150].mxu1 }
 0x3f9   : > { %8627 = vst [vmem:[#allocation2 + $0x498] sm:$0xff] %v8467_v15  ;;  %v11484_v56 = vadd.f32 %v7946_v7, %v4636_v57  ;;  %v11322_v62 = vpop.f32.mrb[150].mxu0  ;;  %v4639_v58 = vpop.f32.mrb[151].mxu1  ;;  %v9067_v42 = vld [vmem:[#allocation2 + $0x460] ss:$2 sm:$0xff] }
 0x3fa   : > { %8625 = vst [vmem:[#allocation2 + $0x488] sm:$0xff] %v8465_v3  ;;  %v8310_v25 = vadd.f32 %v13877_v20, %v11483_v53  ;;  %v11485_v19 = vadd.f32 %v11322_v62, %v10994_v29  ;;  %v7949_v21 = vpop.f32.mrb[151].mxu0  ;;  %v9077_v0 = vld [vmem:[#allocation2 + $0x461] ss:$2 sm:$0xff]  ;;  %v9069_v7 = vld [vmem:[#allocation2 + $0x470] ss:$2 sm:$0xff] }
 0x3fb   : > { %v8308_v26 = vadd.f32 %v13877_v20, %v11484_v56  ;;  %v11486_v24 = vadd.f32 %v7949_v21, %v4639_v58  ;;  %v9106_v14 = vmax.f32 %v9067_v42, %v9077_v0  ;;  %v9079_v56 = vld [vmem:[#allocation2 + $0x471] ss:$2 sm:$0xff] }
 0x3fc   : > { %v8470_v28 = vmax.f32 %v8310_v25, 0.0  ;;  %v8311_v30 = vadd.f32 %v13877_v20, %v11485_v19 }
 0x3fd   : > { %v8468_v48 = vmax.f32 %v8308_v26, 0.0  ;;  %v8309_v31 = vadd.f32 %v13877_v20, %v11486_v24 }
 0x3fe   : > { %8630 = vst [vmem:[#allocation2 + $0x4b0] sm:$0xff] %v8470_v28  ;;  %v8471_v60 = vmax.f32 %v8311_v30, 0.0  ;;  %v10997_v43 = vpop.f32.mrb[152].mxu1  ;;  %v9107_v28 = vmax.f32 %v9069_v7, %v9079_v56 }
 0x3ff   : > { %8628 = vst [vmem:[#allocation2 + $0x4a0] sm:$0xff] %v8468_v48  ;;  %v8469_v11 = vmax.f32 %v8309_v31, 0.0  ;;  %v11325_v63 = vpop.f32.mrb[152].mxu0  ;;  %v4652_v27 = vpop.f32.mrb[153].mxu1 }
 0x400   : > { %8631 = vst [vmem:[#allocation2 + $0x4b8] sm:$0xff] %v8471_v60  ;;  %v11487_v32 = vadd.f32 %v11325_v63, %v10997_v43  ;;  %v7962_v49 = vpop.f32.mrb[153].mxu0  ;;  %v10998_v54 = vpop.f32.mrb[154].mxu1  ;;  %v9073_v43 = vld [vmem:[#allocation2 + $0x490] ss:$2 sm:$0xff] }
 0x401   : > { %8629 = vst [vmem:[#allocation2 + $0x4a8] sm:$0xff] %v8469_v11  ;;  %v11488_v50 = vadd.f32 %v7962_v49, %v4652_v27  ;;  %v11326_v52 = vpop.f32.mrb[154].mxu0  ;;  %v4655_v45 = vpop.f32.mrb[155].mxu1  ;;  %v9071_v3 = vld [vmem:[#allocation2 + $0x480] ss:$2 sm:$0xff] }
 0x402   : > { %v8314_v33 = vadd.f32 %v13877_v20, %v11487_v32  ;;  %v11489_v55 = vadd.f32 %v11326_v52, %v10998_v54  ;;  %v7965_v41 = vpop.f32.mrb[155].mxu0  ;;  %v9081_v51 = vld [vmem:[#allocation2 + $0x481] ss:$2 sm:$0xff]  ;;  %v9083_v11 = vld [vmem:[#allocation2 + $0x491] ss:$2 sm:$0xff] }
 0x403   : > { %v8312_v35 = vadd.f32 %v13877_v20, %v11488_v50  ;;  %v11490_v38 = vadd.f32 %v7965_v41, %v4655_v45  ;;  %v9108_v58 = vmax.f32 %v9071_v3, %v9081_v51  ;;  %v9109_v52 = vmax.f32 %v9073_v43, %v9083_v11 }
 0x404   : > { %v8474_v34 = vmax.f32 %v8314_v33, 0.0  ;;  %v8315_v37 = vadd.f32 %v13877_v20, %v11489_v55 }
 0x405   : > { %v8472_v44 = vmax.f32 %v8312_v35, 0.0  ;;  %v8313_v2 = vadd.f32 %v13877_v20, %v11490_v38 }
 0x406   : > { %8634 = vst [vmem:[#allocation2 + $0x4d0] sm:$0xff] %v8474_v34  ;;  %v8475_v40 = vmax.f32 %v8315_v37, 0.0  ;;  %v11001_v4 = vpop.f32.mrb[156].mxu1 }
 0x407   : > { %v9087_v8 = vld [vmem:[#allocation2 + $0x4b0] ss:$2 sm:$0xff]  ;;  %v9097_v47 = vld [vmem:[#allocation2 + $0x4b1] ss:$2 sm:$0xff]  ;;  %8632 = vst [vmem:[#allocation2 + $0x4c0] sm:$0xff] %v8472_v44  ;;  %v8473_v17 = vmax.f32 %v8313_v2, 0.0 }
 0x408   : > { %v11329_v36 = vpop.f32.mrb[156].mxu0  ;;  %v9111_v18 = vmax.f32 %v9087_v8, %v9097_v47  ;;  %8635 = vst [vmem:[#allocation2 + $0x4d8] sm:$0xff] %v8475_v40  ;;  %v4668_v6 = vpop.f32.mrb[157].mxu1  ;;  %v9075_v31 = vld [vmem:[#allocation2 + $0x4a0] ss:$2 sm:$0xff] }
 0x409   : > { %v11491_v5 = vadd.f32 %v11329_v36, %v11001_v4  ;;  %v7978_v23 = vpop.f32.mrb[157].mxu0  ;;  %8633 = vst [vmem:[#allocation2 + $0x4c8] sm:$0xff] %v8473_v17  ;;  %v11002_v9 = vpop.f32.mrb[158].mxu1  ;;  %v9085_v60 = vld [vmem:[#allocation2 + $0x4a1] ss:$2 sm:$0xff] }
 0x40a   : > { %v11492_v39 = vadd.f32 %v7978_v23, %v4668_v6  ;;  %v11330_v61 = vpop.f32.mrb[158].mxu0  ;;  %v9116_v46 = vmax.f32 %v9106_v14, %v9111_v18  ;;  %v4671_v12 = vpop.f32.mrb[159].mxu1  ;;  %v9110_v27 = vmax.f32 %v9075_v31, %v9085_v60 }
 0x40b   : > { %v8318_v10 = vadd.f32 %v13877_v20, %v11491_v5  ;;  %v11493_v13 = vadd.f32 %v11330_v61, %v11002_v9  ;;  %v7981_v16 = vpop.f32.mrb[159].mxu0 }
 0x40c   : > { %v8316_v1 = vadd.f32 %v13877_v20, %v11492_v39  ;;  %v11494_v59 = vadd.f32 %v7981_v16, %v4671_v12  ;;  %10094 = vst.msk [vmem:[%s13571_s24 + $0x118] sm:$0xff] %vm8694_vm2, %v9116_v46 }
 0x40d   : > { %v8478_v15 = vmax.f32 %v8318_v10, 0.0  ;;  %v8319_v22 = vadd.f32 %v13877_v20, %v11493_v13 }
 0x40e   : > { %v8476_v53 = vmax.f32 %v8316_v1, 0.0  ;;  %v8317_v57 = vadd.f32 %v13877_v20, %v11494_v59 }
 0x40f   : > { %8638 = vst [vmem:[#allocation2 + $0x4f0] sm:$0xff] %v8478_v15  ;;  %v8479_v29 = vmax.f32 %v8319_v22, 0.0  ;;  %v9091_v62 = vld [vmem:[#allocation2 + $0x4d0] ss:$2 sm:$0xff]  ;;  %v9101_v25 = vld [vmem:[#allocation2 + $0x4d1] ss:$2 sm:$0xff] }
 0x410   : > { %8636 = vst [vmem:[#allocation2 + $0x4e0] sm:$0xff] %v8476_v53  ;;  %v8477_v19 = vmax.f32 %v8317_v57, 0.0  ;;  %v9113_v21 = vmax.f32 %v9091_v62, %v9101_v25  ;;  %v9089_v26 = vld [vmem:[#allocation2 + $0x4c0] ss:$2 sm:$0xff]  ;;  %v9099_v24 = vld [vmem:[#allocation2 + $0x4c1] ss:$2 sm:$0xff] }
 0x411   : > { %8639 = vst [vmem:[#allocation2 + $0x4f8] sm:$0xff] %v8479_v29  ;;  %v9112_v30 = vmax.f32 %v9089_v26, %v9099_v24 }
 0x412   : > { %8637 = vst [vmem:[#allocation2 + $0x4e8] sm:$0xff] %v8477_v19  ;;  %v9118_v48 = vmax.f32 %v9108_v58, %v9113_v21 }
 0x413   : > { %v9117_v20 = vmax.f32 %v9107_v28, %v9112_v30 }
 0x414   : > { %10096 = vst.msk [vmem:[%s13571_s24 + $0x128] sm:$0xff] %vm8694_vm2, %v9118_v48 }
 0x415   : > { %10095 = vst.msk [vmem:[%s13571_s24 + $0x120] sm:$0xff] %vm8694_vm2, %v9117_v20 }
 0x418   : > { %v9095_v63 = vld [vmem:[#allocation2 + $0x4f0] ss:$2 sm:$0xff]  ;;  %v9105_v32 = vld [vmem:[#allocation2 + $0x4f1] ss:$2 sm:$0xff] }
 0x419   : > { %v9115_v49 = vmax.f32 %v9095_v63, %v9105_v32  ;;  %v9093_v50 = vld [vmem:[#allocation2 + $0x4e0] ss:$2 sm:$0xff]  ;;  %v9103_v54 = vld [vmem:[#allocation2 + $0x4e1] ss:$2 sm:$0xff] }
 0x41a   : > { %v9114_v33 = vmax.f32 %v9093_v50, %v9103_v54 }
 0x41b   : > { %v9120_v55 = vmax.f32 %v9110_v27, %v9115_v49 }
 0x41c   : > { %v9119_v45 = vmax.f32 %v9109_v52, %v9114_v33 }
 0x41d   : > { %10098 = vst.msk [vmem:[%s13571_s24 + $0x138] sm:$0xff] %vm8694_vm2, %v9120_v55 }
 0x41e   : > { %10097 = vst.msk [vmem:[%s13571_s24 + $0x130] sm:$0xff] %vm8694_vm2, %v9119_v45 }
 0x41f PF: > { %s13_s16 = sadd.s32 1, %s12476_s16   ;;  %s14017_s12 = smov %s12468_s14 }
 0x420   : > { %p10_p7 = scmp.ge.s32.totalorder %s13_s16, 12   ;;  %s14018_s13 = smov %s12472_s15 }
 0x421   : > { %s14019_s14 = smov %s14022_s17  ;;  %s14020_s15 = smov %s14026_s18 }
 0x422   :  { %12 = sbr.rel (!%p10_p7) target bundleno = 3 (0x3), region = 237 }

// kernel: cnn_forward.5
= control target key start
LH: loop header
LB: loop body
LE: loop exit
PB: predicated region body
PF: predicated region fallthrough
CT: control target
= control target key end

     0   :  { %12 = vsyncpa [#allocation4], 0  ;;  %s2929_s24 = smov 0   ;;  %s3195_s0 = inlined_call_operand.vmem [shape: f32[2,20736], index: 0, kind: input, shape index: {}]   ;;  %s3196_s1 = inlined_call_operand.vmem [shape: bf16[20736,128], index: 1, kind: input, shape index: {}]   ;;  %s3197_s2 = inlined_call_operand.vmem [shape: f32[1,128], index: 2, kind: input, shape index: {}]   ;;  %s3198_s3 = inlined_call_operand.vmem [shape: bf16[128,128], index: 3, kind: input, shape index: {}]   ;;  %s3199_s4 = inlined_call_operand.vmem [shape: f32[1,128], index: 4, kind: input, shape index: {}]   ;;  %s3200_s5 = inlined_call_operand.vmem [shape: bf16[128,4], index: 5, kind: input, shape index: {}]   ;;  %s3201_s6 = inlined_call_operand.vmem [shape: f32[1,4], index: 6, kind: input, shape index: {}]   ;;  %s3202_s7 = inlined_call_operand.hbm [shape: f32[2,4], index: 7, kind: output, shape index: {}]  }
   0x1 LB: > { %s2935_s25 = sadd.s32 4294967295, %s2882_s24   ;;  %p2234_p0 = scmp.ge.s32.totalorder %s2882_s24, 1  ;;  %s2882_s24 = sphi %s2929_s24, %s18_s24  }
   0x2   : > { %p245_p1 = scmp.lt.s32.totalorder %s2882_s24, 10 }
   0x4   : > { %p246_p2 = pnand %p2234_p0, %p245_p1 }
   0x5   : > { %s277_s26 = smul.u32 (!%p246_p2), 18, %s2935_s25  ;;  %p2237_p5 = scmp.ne.s32.totalorder (!%p246_p2), %s2935_s25, 0 }
   0x6   : > { %249 = sbr.rel (%p246_p2) target bundleno = 876 (0x36c), region = 48 }
   0x7   : > { %s283_s27 = smul.u32 (!%p246_p2), 288, %s2935_s25  ;;  %p278_p3 = scmp.lt.s32.totalorder (!%p246_p2), %s277_s26, 161 }
   0x9   : > { %p284_p4 = scmp.lt.s32.totalorder (!%p246_p2), %s283_s27, 2591 }
   0xd   : > { %s3204_s26 = smov (!%p278_p3, %s277_s26), 161  ;;  %s3206_s27 = smov (!%p284_p4, %s283_s27), 2591 }
   0xe   : > { %s2235_s28 = sshll.u32 %s3204_s26, 1  ;;  %s2236_s9 = sshll.u32 %s3206_s27, 2  ;;  %v2884_v0 = vmov (!%p2237_p5), 0.0  }
   0xf   : > { %s2944_s8 = scalar_lea.vmem %s3195_s0, %s2235_s28  ;;  %s2949_s12 = scalar_lea.vmem %s3196_s1, %s2236_s9  ;;  %294 = vst [vmem:[#allocation2] sm:$0x3] (!%p2237_p5), %v2884_v0 }
  0x10   : > { %293 = sbr.rel (%p2237_p5) target bundleno = 23 (0x17), region = 52 }
  0x17 PF: > { %v2682_v1 = vld [vmem:[%s2949_s12 + $0x40] sm:$0xff]   ;;  %v2686_v5 = vld [vmem:[%s2949_s12 + $0x48] sm:$0xff]   ;;  %v2690_v9 = vld [vmem:[%s2949_s12 + $0x50] sm:$0xff]   ;;  %v310_v29 = vlaneseq  ;;  %v2885_v37 = vmov 1983009808   ;;  %p2383_p6 = scmp.ne.s32.totalorder %s2935_s25, 8 }
  0x18   : > { %v2683_v2 = vld [vmem:[%s2949_s12 + $0xc0] sm:$0xff]   ;;  %2407 = vmatprep.subr.bf16.mxu0 %v2682_v1  ;;  %v2687_v6 = vld [vmem:[%s2949_s12 + $0xc8] sm:$0xff]   ;;  %v2691_v10 = vld [vmem:[%s2949_s12 + $0xd0] sm:$0xff]   ;;  %v308_v38 = vunpack.c.l.s4 %v2885_v37  ;;  %vm2887_vm0 = vmmov (!%p2383_p6), 0   ;;  %vm2171_vm1 = vcmask (!%p2383_p6), 25600  }
  0x19   : > { %v2684_v3 = vld [vmem:[%s2949_s12] sm:$0xff]   ;;  %2429 = vmatprep.subr.bf16.mxu1 %v2683_v2  ;;  %v2688_v7 = vld [vmem:[%s2949_s12 + $0x8] sm:$0xff]   ;;  %v2692_v11 = vld [vmem:[%s2949_s12 + $0x10] sm:$0xff]   ;;  %v311_v34 = vshrl.u32 %v310_v29, 7 }
  0x1a   : > { %v2685_v4 = vld [vmem:[%s2949_s12 + $0x80] sm:$0xff]   ;;  %2408 = vmatpush3.bf16.msra.mxu0 %v2684_v3  ;;  %v2689_v8 = vld [vmem:[%s2949_s12 + $0x88] sm:$0xff]   ;;  %v2693_v12 = vld [vmem:[%s2949_s12 + $0x90] sm:$0xff]   ;;  %v309_v39 = vunpack.c.0.s8 %v308_v38 }
  0x1b   : > { %2430 = vmatpush3.bf16.msra.mxu1 %v2685_v4  ;;  %2409 = vmatprep.subr.bf16.mxu0 %v2686_v5  ;;  %v2694_v13 = vld [vmem:[%s2949_s12 + $0x58] sm:$0xff]   ;;  %v2698_v17 = vld [vmem:[%s2949_s12 + $0x60] sm:$0xff]   ;;  %v2702_v21 = vld [vmem:[%s2949_s12 + $0x68] sm:$0xff]  }
  0x1c   : > { %2431 = vmatprep.subr.bf16.mxu1 %v2687_v6  ;;  %v2695_v14 = vld [vmem:[%s2949_s12 + $0xd8] sm:$0xff]   ;;  %v2699_v18 = vld [vmem:[%s2949_s12 + $0xe0] sm:$0xff]   ;;  %v2703_v22 = vld [vmem:[%s2949_s12 + $0xe8] sm:$0xff]   ;;  %v2987_v42 = vsub.s32 %v309_v39, %v311_v34 }
  0x1d   : > { %v2696_v15 = vld [vmem:[%s2949_s12 + $0x18] sm:$0xff]   ;;  %v2700_v19 = vld [vmem:[%s2949_s12 + $0x20] sm:$0xff]   ;;  %v2704_v23 = vld [vmem:[%s2949_s12 + $0x28] sm:$0xff]  }
  0x1e   : > { %2410 = vmatpush3.bf16.msra.mxu0 %v2688_v7  ;;  %v2697_v16 = vld [vmem:[%s2949_s12 + $0x98] sm:$0xff]   ;;  %v2701_v20 = vld [vmem:[%s2949_s12 + $0xa0] sm:$0xff]   ;;  %v2705_v24 = vld [vmem:[%s2949_s12 + $0xa8] sm:$0xff]  }
  0x1f   : > { %2432 = vmatpush3.bf16.msra.mxu1 %v2689_v8  ;;  %2411 = vmatprep.subr.bf16.mxu0 %v2690_v9  ;;  %v2706_v25 = vld [vmem:[%s2949_s12 + $0x70] sm:$0xff]   ;;  %v2710_v30 = vld [vmem:[%s2949_s12 + $0x78] sm:$0xff]   ;;  %v296_v35 = vld [vmem:[%s2944_s8] sm:$0xff] }
  0x20   : > { %2433 = vmatprep.subr.bf16.mxu1 %v2691_v10  ;;  %v2707_v26 = vld [vmem:[%s2949_s12 + $0xf0] sm:$0xff]   ;;  %v2711_v31 = vld [vmem:[%s2949_s12 + $0xf8] sm:$0xff]   ;;  %v2715_v36 = vld [vmem:[%s2949_s12 + $0x140] sm:$0xff]   ;;  %v306_v40 = vcombine.high %v296_v35, %v296_v35  ;;  %v313_v43 = vrot.slane %v296_v35, %v2987_v42 }
  0x21   : > { %v2708_v27 = vld [vmem:[%s2949_s12 + $0x30] sm:$0xff]   ;;  %v2712_v32 = vld [vmem:[%s2949_s12 + $0x38] sm:$0xff]   ;;  %v2717_v41 = vld [vmem:[%s2949_s12 + $0x1c0] sm:$0xff]  }
  0x22   : > { %2412 = vmatpush3.bf16.msra.mxu0 %v2692_v11  ;;  %v2709_v28 = vld [vmem:[%s2949_s12 + $0xb0] sm:$0xff]   ;;  %v2713_v33 = vld [vmem:[%s2949_s12 + $0xb8] sm:$0xff]   ;;  %v320_v44 = vrot.slane %v306_v40, %v2987_v42  ;;  %v321_v45 = vcombine.high %v313_v43, %v313_v43  ;;  %v2716_v47 = vld [vmem:[%s2949_s12 + $0x100] sm:$0xff]   ;;  %v400_v48 = vpack.c.bf16 %v313_v43, %v313_v43 }
  0x23   : > { %2434 = vmatpush3.bf16.msra.mxu1 %v2693_v12  ;;  %2413 = vmatprep.subr.bf16.mxu0 %v2694_v13  ;;  %v2718_v50 = vld [vmem:[%s2949_s12 + $0x180] sm:$0xff]   ;;  %v2719_v53 = vld [vmem:[%s2949_s12 + $0x148] sm:$0xff]   ;;  %v2723_v57 = vld [vmem:[%s2949_s12 + $0x150] sm:$0xff]  }
  0x24   : > { %2435 = vmatprep.subr.bf16.mxu1 %v2695_v14  ;;  %v322_v46 = vcombine.high %v320_v44, %v320_v44  ;;  %v402_v49 = vpack.c.bf16 %v320_v44, %v320_v44  ;;  %v401_v51 = vpack.c.bf16 %v321_v45, %v321_v45  ;;  %v2721_v54 = vld [vmem:[%s2949_s12 + $0x1c8] sm:$0xff]   ;;  %v2725_v58 = vld [vmem:[%s2949_s12 + $0x1d0] sm:$0xff]   ;;  %v2727_v61 = vld [vmem:[%s2949_s12 + $0x158] sm:$0xff]  }
  0x25   : > { %v2720_v55 = vld [vmem:[%s2949_s12 + $0x108] sm:$0xff]   ;;  %v2724_v59 = vld [vmem:[%s2949_s12 + $0x110] sm:$0xff]   ;;  %v2729_v62 = vld [vmem:[%s2949_s12 + $0x1d8] sm:$0xff]  }
  0x26   : > { %2414 = vmatpush3.bf16.msra.mxu0 %v2696_v15  ;;  %v403_v52 = vpack.c.bf16 %v322_v46, %v322_v46  ;;  %1602 = vmatprep.mubr.bf16.mxu0 %v401_v51  ;;  %v2722_v56 = vld [vmem:[%s2949_s12 + $0x188] sm:$0xff]   ;;  %v2726_v60 = vld [vmem:[%s2949_s12 + $0x190] sm:$0xff]   ;;  %v2728_v63 = vld [vmem:[%s2949_s12 + $0x118] sm:$0xff]  }
  0x27   : > { %2436 = vmatpush3.bf16.msra.mxu1 %v2697_v16  ;;  %2415 = vmatprep.subr.bf16.mxu0 %v2698_v17  ;;  %v2730_v0 = vld [vmem:[%s2949_s12 + $0x198] sm:$0xff]   ;;  %v2731_v1 = vld [vmem:[%s2949_s12 + $0x160] sm:$0xff]   ;;  %v2735_v5 = vld [vmem:[%s2949_s12 + $0x168] sm:$0xff]  }
  0x28   : > { %2437 = vmatprep.subr.bf16.mxu1 %v2699_v18  ;;  %1642 = vmatprep.mubr.bf16.mxu1 %v403_v52  ;;  %v2733_v2 = vld [vmem:[%s2949_s12 + $0x1e0] sm:$0xff]   ;;  %v2737_v6 = vld [vmem:[%s2949_s12 + $0x1e8] sm:$0xff]   ;;  %v2739_v9 = vld [vmem:[%s2949_s12 + $0x170] sm:$0xff]  }
  0x29   : > { %v2732_v3 = vld [vmem:[%s2949_s12 + $0x120] sm:$0xff]   ;;  %v2736_v7 = vld [vmem:[%s2949_s12 + $0x128] sm:$0xff]   ;;  %v2741_v11 = vld [vmem:[%s2949_s12 + $0x1f0] sm:$0xff]  }
  0x2a   : > { %2416 = vmatpush3.bf16.msra.mxu0 %v2700_v19  ;;  %v2734_v4 = vld [vmem:[%s2949_s12 + $0x1a0] sm:$0xff]   ;;  %v2738_v8 = vld [vmem:[%s2949_s12 + $0x1a8] sm:$0xff]   ;;  %v2740_v14 = vld [vmem:[%s2949_s12 + $0x130] sm:$0xff]  }
  0x2b   : > { %2438 = vmatpush3.bf16.msra.mxu1 %v2701_v20  ;;  %2417 = vmatprep.subr.bf16.mxu0 %v2702_v21  ;;  %v297_v10 = vld [vmem:[%s2944_s8 + $0x8] sm:$0xff]  ;;  %v2742_v15 = vld [vmem:[%s2949_s12 + $0x1b0] sm:$0xff]   ;;  %v2743_v18 = vld [vmem:[%s2949_s12 + $0x178] sm:$0xff]  }
  0x2c   : > { %2439 = vmatprep.subr.bf16.mxu1 %v2703_v22  ;;  %v330_v12 = vrot.slane %v297_v10, %v2987_v42  ;;  %v323_v13 = vcombine.high %v297_v10, %v297_v10  ;;  %v2745_v19 = vld [vmem:[%s2949_s12 + $0x1f8] sm:$0xff]   ;;  %v2755_v34 = vld [vmem:[%s2949_s12 + $0x288] sm:$0xff]   ;;  %v2756_v35 = vld [vmem:[%s2949_s12 + $0x250] sm:$0xff]  }
  0x2d   : > { %v2744_v22 = vld [vmem:[%s2949_s12 + $0x138] sm:$0xff]   ;;  %v2757_v37 = vld [vmem:[%s2949_s12 + $0x210] sm:$0xff]   ;;  %v2764_v44 = vld [vmem:[%s2949_s12 + $0x260] sm:$0xff]  }
  0x2e   : > { %2418 = vmatpush3.bf16.msra.mxu0 %v2704_v23  ;;  %v338_v16 = vcombine.high %v330_v12, %v330_v12  ;;  %v337_v17 = vrot.slane %v323_v13, %v2987_v42  ;;  %v2746_v23 = vld [vmem:[%s2949_s12 + $0x1b8] sm:$0xff]   ;;  %v2759_v38 = vld [vmem:[%s2949_s12 + $0x290] sm:$0xff]   ;;  %v2766_v45 = vld [vmem:[%s2949_s12 + $0x2e0] sm:$0xff]  }
  0x2f   : > { %2440 = vmatpush3.bf16.msra.mxu1 %v2705_v24  ;;  %2419 = vmatprep.subr.bf16.mxu0 %v2706_v25  ;;  %v2747_v25 = vld [vmem:[%s2949_s12 + $0x240] sm:$0xff]   ;;  %v2760_v39 = vld [vmem:[%s2949_s12 + $0x258] sm:$0xff]   ;;  %v2771_v51 = vld [vmem:[%s2949_s12 + $0x2a8] sm:$0xff]  }
  0x30   : > { %2441 = vmatprep.subr.bf16.mxu1 %v2707_v26  ;;  %v405_v20 = vpack.c.bf16 %v338_v16, %v338_v16  ;;  %v339_v21 = vcombine.high %v337_v17, %v337_v17  ;;  %v2750_v26 = vld [vmem:[%s2949_s12 + $0x2c0] sm:$0xff]   ;;  %v406_v29 = vpack.c.bf16 %v337_v17, %v337_v17  ;;  %v2762_v40 = vld [vmem:[%s2949_s12 + $0x2d8] sm:$0xff]   ;;  %v2772_v52 = vld [vmem:[%s2949_s12 + $0x270] sm:$0xff]  }
  0x31   : > { %v2763_v43 = vld [vmem:[%s2949_s12 + $0x298] sm:$0xff]   ;;  %v2765_v46 = vld [vmem:[%s2949_s12 + $0x220] sm:$0xff]   ;;  %v2785_v10 = vld [vmem:[%s2949_s12 + $0x348] sm:$0xff]  }
  0x32   : > { %2420 = vmatpush3.bf16.msra.mxu0 %v2708_v27  ;;  %v407_v24 = vpack.c.bf16 %v339_v21, %v339_v21  ;;  %v2749_v27 = vld [vmem:[%s2949_s12 + $0x200] sm:$0xff]   ;;  %v2788_v13 = vld [vmem:[%s2949_s12 + $0x388] sm:$0xff]   ;;  %v2790_v16 = vld [vmem:[%s2949_s12 + $0x310] sm:$0xff]  }
  0x33   : > { %2442 = vmatpush3.bf16.msra.mxu1 %v2709_v28  ;;  %2421 = vmatprep.subr.bf16.mxu0 %v2710_v30  ;;  %v404_v28 = vpack.c.bf16 %v330_v12, %v330_v12  ;;  %v2751_v30 = vld [vmem:[%s2949_s12 + $0x280] sm:$0xff]   ;;  %v2786_v12 = vld [vmem:[%s2949_s12 + $0x308] sm:$0xff]   ;;  %v2792_v17 = vld [vmem:[%s2949_s12 + $0x390] sm:$0xff]  }
  0x34   : > { %2443 = vmatprep.subr.bf16.mxu1 %v2711_v31  ;;  %v2752_v31 = vld [vmem:[%s2949_s12 + $0x248] sm:$0xff]   ;;  %v2796_v21 = vld [vmem:[%s2949_s12 + $0x398] sm:$0xff]  }
  0x36   : > { %2422 = vmatpush3.bf16.msra.mxu0 %v2712_v32  ;;  %v2754_v32 = vld [vmem:[%s2949_s12 + $0x2c8] sm:$0xff]  }
  0x37   : > { %2444 = vmatpush3.bf16.msra.mxu1 %v2713_v33  ;;  %2451 = vmatprep.subr.bf16.mxu0 %v2715_v36  ;;  %v2753_v33 = vld [vmem:[%s2949_s12 + $0x208] sm:$0xff]   ;;  %v2758_v36 = vld [vmem:[%s2949_s12 + $0x2d0] sm:$0xff]  }
  0x38   : > { %2473 = vmatprep.subr.bf16.mxu1 %v2717_v41  ;;  %v2761_v41 = vld [vmem:[%s2949_s12 + $0x218] sm:$0xff]  }
  0x39   : > { %1603 = vmatmul.mubr.bf16.vlgmr.msra.gmra.mrb[0].mxu0 %v400_v48  ;;  %v2768_v48 = vld [vmem:[%s2949_s12 + $0x268] sm:$0xff]  }
  0x3a   : > { %1643 = vmatmul.mubr.bf16.vlgmr.msra.gmra.mrb[0].mxu1 %v402_v49  ;;  %2452 = vmatpush3.bf16.msra.mxu0 %v2716_v47  ;;  %v2767_v47 = vld [vmem:[%s2949_s12 + $0x2a0] sm:$0xff]   ;;  %v2770_v49 = vld [vmem:[%s2949_s12 + $0x2e8] sm:$0xff]  }
  0x3b   : > { %2474 = vmatpush3.bf16.msra.mxu1 %v2718_v50  ;;  %2453 = vmatprep.subr.bf16.mxu0 %v2719_v53  ;;  %v2769_v50 = vld [vmem:[%s2949_s12 + $0x228] sm:$0xff]   ;;  %v298_v53 = vld [vmem:[%s2944_s8 + $0x10] sm:$0xff] }
  0x3c   : > { %2475 = vmatprep.subr.bf16.mxu1 %v2721_v54  ;;  %1682 = vmatprep.mubr.bf16.mxu0 %v405_v20  ;;  %v2774_v54 = vld [vmem:[%s2949_s12 + $0x2f0] sm:$0xff]   ;;  %v2794_v20 = vld [vmem:[%s2949_s12 + $0x318] sm:$0xff]  }
  0x3d   : > { %1722 = vmatprep.mubr.bf16.mxu1 %v407_v24  ;;  %v2798_v24 = vld [vmem:[%s2949_s12 + $0x320] sm:$0xff]  }
  0x3e   : > { %2454 = vmatpush3.bf16.msra.mxu0 %v2720_v55  ;;  %v347_v55 = vrot.slane %v298_v53, %v2987_v42 }
  0x3f   : > { %2476 = vmatpush3.bf16.msra.mxu1 %v2722_v56  ;;  %2455 = vmatprep.subr.bf16.mxu0 %v2723_v57  ;;  %v340_v56 = vcombine.high %v298_v53, %v298_v53  ;;  %v2773_v57 = vld [vmem:[%s2949_s12 + $0x230] sm:$0xff]   ;;  %v2238_v53 = vld.sshfl [vmem:[%s2944_s8 + $0x20] sm:$0x33 pattern:$0x76325410] }
  0x40   : > { %2477 = vmatprep.subr.bf16.mxu1 %v2725_v58  ;;  %v2775_v58 = vld [vmem:[%s2949_s12 + $0x2b0] sm:$0xff]  }
  0x42   : > { %2456 = vmatpush3.bf16.msra.mxu0 %v2724_v59  ;;  %v355_v59 = vcombine.high %v347_v55, %v347_v55 }
  0x43   : > { %2478 = vmatpush3.bf16.msra.mxu1 %v2726_v60  ;;  %2457 = vmatprep.subr.bf16.mxu0 %v2727_v61  ;;  %v354_v60 = vrot.slane %v340_v56, %v2987_v42  ;;  %v2776_v61 = vld [vmem:[%s2949_s12 + $0x278] sm:$0xff]  }
  0x44   : > { %2479 = vmatprep.subr.bf16.mxu1 %v2729_v62  ;;  %v2778_v62 = vld [vmem:[%s2949_s12 + $0x2f8] sm:$0xff]  }
  0x45   : > { %v2820_v56 = vld [vmem:[%s2949_s12 + $0x458] sm:$0xff]  }
  0x46   : > { %2458 = vmatpush3.bf16.msra.mxu0 %v2728_v63  ;;  %v409_v63 = vpack.c.bf16 %v355_v59, %v355_v59  ;;  %v2822_v59 = vld [vmem:[%s2949_s12 + $0x460] sm:$0xff]  }
  0x47   : > { %2480 = vmatpush3.bf16.msra.mxu1 %v2730_v0  ;;  %2459 = vmatprep.subr.bf16.mxu0 %v2731_v1  ;;  %v356_v0 = vcombine.high %v354_v60, %v354_v60  ;;  %v2777_v1 = vld [vmem:[%s2949_s12 + $0x238] sm:$0xff]  }
  0x48   : > { %2481 = vmatprep.subr.bf16.mxu1 %v2733_v2  ;;  %v2779_v2 = vld [vmem:[%s2949_s12 + $0x2b8] sm:$0xff]  }
  0x4a   : > { %2460 = vmatpush3.bf16.msra.mxu0 %v2732_v3  ;;  %v411_v3 = vpack.c.bf16 %v356_v0, %v356_v0  ;;  %v2827_v0 = vld [vmem:[%s2949_s12 + $0x430] sm:$0xff]  }
  0x4b   : > { %2482 = vmatpush3.bf16.msra.mxu1 %v2734_v4  ;;  %2461 = vmatprep.subr.bf16.mxu0 %v2735_v5  ;;  %v2780_v4 = vld [vmem:[%s2949_s12 + $0x340] sm:$0xff]  }
  0x4c   : > { %2483 = vmatprep.subr.bf16.mxu1 %v2737_v6  ;;  %v2783_v5 = vld [vmem:[%s2949_s12 + $0x3c0] sm:$0xff]  }
  0x4d   : > { %v2782_v6 = vld [vmem:[%s2949_s12 + $0x300] sm:$0xff]  }
  0x4e   : > { %2462 = vmatpush3.bf16.msra.mxu0 %v2736_v7  ;;  %v408_v7 = vpack.c.bf16 %v347_v55, %v347_v55  ;;  %v2819_v55 = vld [vmem:[%s2949_s12 + $0x410] sm:$0xff]  }
  0x4f   : > { %2484 = vmatpush3.bf16.msra.mxu1 %v2738_v8  ;;  %2463 = vmatprep.subr.bf16.mxu0 %v2739_v9  ;;  %v410_v8 = vpack.c.bf16 %v354_v60, %v354_v60  ;;  %v2784_v9 = vld [vmem:[%s2949_s12 + $0x380] sm:$0xff]  }
  0x50   : > { %2485 = vmatprep.subr.bf16.mxu1 %v2741_v11  ;;  %v2787_v11 = vld [vmem:[%s2949_s12 + $0x3c8] sm:$0xff]   ;;  %v2823_v60 = vld [vmem:[%s2949_s12 + $0x420] sm:$0xff]  }
  0x52   : > { %2464 = vmatpush3.bf16.msra.mxu0 %v2740_v14  ;;  %v2789_v14 = vld [vmem:[%s2949_s12 + $0x350] sm:$0xff]  }
  0x53   : > { %2486 = vmatpush3.bf16.msra.mxu1 %v2742_v15  ;;  %2465 = vmatprep.subr.bf16.mxu0 %v2743_v18  ;;  %v2791_v15 = vld [vmem:[%s2949_s12 + $0x3d0] sm:$0xff]   ;;  %v2793_v18 = vld [vmem:[%s2949_s12 + $0x358] sm:$0xff]  }
  0x54   : > { %2487 = vmatprep.subr.bf16.mxu1 %v2745_v19  ;;  %v2795_v19 = vld [vmem:[%s2949_s12 + $0x3d8] sm:$0xff]  }
  0x56   : > { %2466 = vmatpush3.bf16.msra.mxu0 %v2744_v22  ;;  %v2797_v22 = vld [vmem:[%s2949_s12 + $0x360] sm:$0xff]  }
  0x57   : > { %2488 = vmatpush3.bf16.msra.mxu1 %v2746_v23  ;;  %2495 = vmatprep.subr.bf16.mxu0 %v2747_v25  ;;  %v2799_v23 = vld [vmem:[%s2949_s12 + $0x3e0] sm:$0xff]  }
  0x58   : > { %2517 = vmatprep.subr.bf16.mxu1 %v2750_v26  ;;  %v2800_v25 = vld [vmem:[%s2949_s12 + $0x3a0] sm:$0xff]   ;;  %v2801_v26 = vld [vmem:[%s2949_s12 + $0x368] sm:$0xff]  }
  0x59   : > { %1683 = vmatmul.mubr.bf16.vlgmr.msra.gmra.mrb[4].mxu0 %v404_v28  ;;  %v2802_v28 = vld [vmem:[%s2949_s12 + $0x328] sm:$0xff]  }
  0x5a   : > { %1723 = vmatmul.mubr.bf16.vlgmr.msra.gmra.mrb[4].mxu1 %v406_v29  ;;  %2496 = vmatpush3.bf16.msra.mxu0 %v2749_v27  ;;  %v2803_v27 = vld [vmem:[%s2949_s12 + $0x3e8] sm:$0xff]  }
  0x5b   : > { %2518 = vmatpush3.bf16.msra.mxu1 %v2751_v30  ;;  %2497 = vmatprep.subr.bf16.mxu0 %v2752_v31  ;;  %v2804_v29 = vld [vmem:[%s2949_s12 + $0x3a8] sm:$0xff]   ;;  %v2805_v30 = vld [vmem:[%s2949_s12 + $0x370] sm:$0xff]  }
  0x5c   : > { %2519 = vmatprep.subr.bf16.mxu1 %v2754_v32  ;;  %1762 = vmatprep.mubr.bf16.mxu0 %v409_v63  ;;  %v2807_v31 = vld [vmem:[%s2949_s12 + $0x3f0] sm:$0xff]   ;;  %v299_v32 = vld [vmem:[%s2944_s8 + $0x18] sm:$0xff] }
  0x5d   : > { %1802 = vmatprep.mubr.bf16.mxu1 %v411_v3  ;;  %v2826_v63 = vld [vmem:[%s2949_s12 + $0x470] sm:$0xff]   ;;  %v416_v3 = vpack.c.bf16 %v2238_v53, %v2238_v53 }
  0x5e   : > { %2498 = vmatpush3.bf16.msra.mxu0 %v2753_v33  ;;  %v2806_v33 = vld [vmem:[%s2949_s12 + $0x330] sm:$0xff]  }
  0x5f   : > { %2520 = vmatpush3.bf16.msra.mxu1 %v2755_v34  ;;  %2499 = vmatprep.subr.bf16.mxu0 %v2756_v35  ;;  %v364_v34 = vrot.slane %v299_v32, %v2987_v42  ;;  %v357_v35 = vcombine.high %v299_v32, %v299_v32 }
  0x60   : > { %2521 = vmatprep.subr.bf16.mxu1 %v2758_v36  ;;  %v2808_v36 = vld [vmem:[%s2949_s12 + $0x3b0] sm:$0xff]  }
  0x62   : > { %2500 = vmatpush3.bf16.msra.mxu0 %v2757_v37  ;;  %v2809_v37 = vld [vmem:[%s2949_s12 + $0x378] sm:$0xff]  }
  0x63   : > { %2522 = vmatpush3.bf16.msra.mxu1 %v2759_v38  ;;  %2501 = vmatprep.subr.bf16.mxu0 %v2760_v39  ;;  %v372_v38 = vcombine.high %v364_v34, %v364_v34  ;;  %v371_v39 = vrot.slane %v357_v35, %v2987_v42  ;;  %v412_v42 = vpack.c.bf16 %v364_v34, %v364_v34 }
  0x64   : > { %2523 = vmatprep.subr.bf16.mxu1 %v2762_v40  ;;  %v2811_v40 = vld [vmem:[%s2949_s12 + $0x3f8] sm:$0xff]  }
  0x66   : > { %2502 = vmatpush3.bf16.msra.mxu0 %v2761_v41  ;;  %v413_v41 = vpack.c.bf16 %v372_v38, %v372_v38 }
  0x67   : > { %2524 = vmatpush3.bf16.msra.mxu1 %v2763_v43  ;;  %2503 = vmatprep.subr.bf16.mxu0 %v2764_v44  ;;  %v373_v43 = vcombine.high %v371_v39, %v371_v39  ;;  %v2810_v44 = vld [vmem:[%s2949_s12 + $0x338] sm:$0xff]  }
  0x68   : > { %2525 = vmatprep.subr.bf16.mxu1 %v2766_v45  ;;  %v2812_v45 = vld [vmem:[%s2949_s12 + $0x3b8] sm:$0xff]  }
  0x6a   : > { %2504 = vmatpush3.bf16.msra.mxu0 %v2765_v46  ;;  %v415_v46 = vpack.c.bf16 %v373_v43, %v373_v43 }
  0x6b   : > { %2526 = vmatpush3.bf16.msra.mxu1 %v2767_v47  ;;  %2505 = vmatprep.subr.bf16.mxu0 %v2768_v48  ;;  %v2813_v47 = vld [vmem:[%s2949_s12 + $0x440] sm:$0xff]   ;;  %v414_v48 = vpack.c.bf16 %v371_v39, %v371_v39 }
  0x6c   : > { %2527 = vmatprep.subr.bf16.mxu1 %v2770_v49  ;;  %v2815_v49 = vld [vmem:[%s2949_s12 + $0x400] sm:$0xff]  }
  0x6e   : > { %2506 = vmatpush3.bf16.msra.mxu0 %v2769_v50  ;;  %v2816_v50 = vld [vmem:[%s2949_s12 + $0x448] sm:$0xff]  }
  0x6f   : > { %2528 = vmatpush3.bf16.msra.mxu1 %v2771_v51  ;;  %2507 = vmatprep.subr.bf16.mxu0 %v2772_v52  ;;  %v2817_v51 = vld [vmem:[%s2949_s12 + $0x408] sm:$0xff]   ;;  %v2818_v52 = vld [vmem:[%s2949_s12 + $0x450] sm:$0xff]  }
  0x70   : > { %2529 = vmatprep.subr.bf16.mxu1 %v2774_v54  ;;  %v381_v54 = vcombine.high %v2238_v53, %v2238_v53 }
  0x72   : > { %2508 = vmatpush3.bf16.msra.mxu0 %v2773_v57  ;;  %v417_v57 = vpack.c.bf16 %v381_v54, %v381_v54 }
  0x73   : > { %2530 = vmatpush3.bf16.msra.mxu1 %v2775_v58  ;;  %2509 = vmatprep.subr.bf16.mxu0 %v2776_v61  ;;  %v2821_v58 = vld [vmem:[%s2949_s12 + $0x418] sm:$0xff]   ;;  %v2824_v61 = vld [vmem:[%s2949_s12 + $0x468] sm:$0xff]  }
  0x74   : > { %2531 = vmatprep.subr.bf16.mxu1 %v2778_v62  ;;  %v2825_v62 = vld [vmem:[%s2949_s12 + $0x428] sm:$0xff]  }
  0x76   : > { %2510 = vmatpush3.bf16.msra.mxu0 %v2777_v1  ;;  %v2828_v1 = vld [vmem:[%s2949_s12 + $0x478] sm:$0xff]  }
  0x77   : > { %2532 = vmatpush3.bf16.msra.mxu1 %v2779_v2  ;;  %2539 = vmatprep.subr.bf16.mxu0 %v2780_v4  ;;  %v2829_v2 = vld [vmem:[%s2949_s12 + $0x438] sm:$0xff]  }
  0x78   : > { %2561 = vmatprep.subr.bf16.mxu1 %v2783_v5 }
  0x79   : > { %1763 = vmatmul.mubr.bf16.vlgmr.msra.gmra.mrb[8].mxu0 %v408_v7 }
  0x7a   : > { %1803 = vmatmul.mubr.bf16.vlgmr.msra.gmra.mrb[8].mxu1 %v410_v8  ;;  %2540 = vmatpush3.bf16.msra.mxu0 %v2782_v6 }
  0x7b   : > { %2562 = vmatpush3.bf16.msra.mxu1 %v2784_v9  ;;  %2541 = vmatprep.subr.bf16.mxu0 %v2785_v10 }
  0x7c   : > { %2563 = vmatprep.subr.bf16.mxu1 %v2787_v11  ;;  %1842 = vmatprep.mubr.bf16.mxu0 %v413_v41 }
  0x7d   : > { %1882 = vmatprep.mubr.bf16.mxu1 %v415_v46 }
  0x7e   : > { %2542 = vmatpush3.bf16.msra.mxu0 %v2786_v12 }
  0x7f   : > { %2564 = vmatpush3.bf16.msra.mxu1 %v2788_v13  ;;  %2543 = vmatprep.subr.bf16.mxu0 %v2789_v14 }
  0x80   : > { %2565 = vmatprep.subr.bf16.mxu1 %v2791_v15 }
  0x82   : > { %2544 = vmatpush3.bf16.msra.mxu0 %v2790_v16 }
  0x83   : > { %2566 = vmatpush3.bf16.msra.mxu1 %v2792_v17  ;;  %2545 = vmatprep.subr.bf16.mxu0 %v2793_v18 }
  0x84   : > { %2567 = vmatprep.subr.bf16.mxu1 %v2795_v19 }
  0x86   : > { %2546 = vmatpush3.bf16.msra.mxu0 %v2794_v20 }
  0x87   : > { %2568 = vmatpush3.bf16.msra.mxu1 %v2796_v21  ;;  %2547 = vmatprep.subr.bf16.mxu0 %v2797_v22 }
  0x88   : > { %2569 = vmatprep.subr.bf16.mxu1 %v2799_v23 }
  0x8a   : > { %2548 = vmatpush3.bf16.msra.mxu0 %v2798_v24 }
  0x8b   : > { %2570 = vmatpush3.bf16.msra.mxu1 %v2800_v25  ;;  %2549 = vmatprep.subr.bf16.mxu0 %v2801_v26 }
  0x8c   : > { %2571 = vmatprep.subr.bf16.mxu1 %v2803_v27 }
  0x8e   : > { %2550 = vmatpush3.bf16.msra.mxu0 %v2802_v28 }
  0x8f   : > { %2572 = vmatpush3.bf16.msra.mxu1 %v2804_v29  ;;  %2551 = vmatprep.subr.bf16.mxu0 %v2805_v30 }
  0x90   : > { %2573 = vmatprep.subr.bf16.mxu1 %v2807_v31 }
  0x92   : > { %2552 = vmatpush3.bf16.msra.mxu0 %v2806_v33 }
  0x93   : > { %2574 = vmatpush3.bf16.msra.mxu1 %v2808_v36  ;;  %2553 = vmatprep.subr.bf16.mxu0 %v2809_v37 }
  0x94   : > { %2575 = vmatprep.subr.bf16.mxu1 %v2811_v40 }
  0x96   : > { %2554 = vmatpush3.bf16.msra.mxu0 %v2810_v44 }
  0x97   : > { %2576 = vmatpush3.bf16.msra.mxu1 %v2812_v45  ;;  %2583 = vmatprep.subr.bf16.mxu0 %v2813_v47 }
  0x99   : > { %1843 = vmatmul.mubr.bf16.vlgmr.msra.gmra.mrb[12].mxu0 %v412_v42 }
  0x9a   : > { %1883 = vmatmul.mubr.bf16.vlgmr.msra.gmra.mrb[12].mxu1 %v414_v48  ;;  %2584 = vmatpush3.bf16.msra.mxu0 %v2815_v49 }
  0x9b   : > { %2585 = vmatprep.subr.bf16.mxu0 %v2816_v50  ;;  %1922 = vmatprep.mubr.bf16.mxu0 %v417_v57 }
  0x9e   : > { %2586 = vmatpush3.bf16.msra.mxu0 %v2817_v51 }
  0x9f   : > { %2587 = vmatprep.subr.bf16.mxu0 %v2818_v52 }
  0xa2   : > { %2588 = vmatpush3.bf16.msra.mxu0 %v2819_v55  ;;  %v295_v55 = vld [vmem:[#allocation2] sm:$0x3] }
  0xa3   : > { %2589 = vmatprep.subr.bf16.mxu0 %v2820_v56 }
  0xa6   : > { %2590 = vmatpush3.bf16.msra.mxu0 %v2821_v58 }
  0xa7   : > { %2591 = vmatprep.subr.bf16.mxu0 %v2822_v59  ;;  %v2830_v59 = vld [vmem:[%s3198_s3] sm:$0xff] (!%p2383_p6)  }
  0xaa   : > { %2592 = vmatpush3.bf16.msra.mxu0 %v2823_v60  ;;  %v2886_v60 = vmov (!%p2383_p6), 0.0  }
  0xab   : > { %2593 = vmatprep.subr.bf16.mxu0 %v2824_v61  ;;  %2643 = vmatprep.subr.bf16.mxu1 (!%p2383_p6), %v2886_v60  ;;  %v2831_v61 = vld [vmem:[%s3198_s3 + $0x8] sm:$0xff] (!%p2383_p6)  }
  0xac   : > { %2659 = vmatprep.mubr.msk.bf16.mxu1 (!%p2383_p6), %vm2887_vm0, %v2886_v60 }
  0xae   : > { %2594 = vmatpush3.bf16.msra.mxu0 %v2825_v62  ;;  %v2832_v62 = vld [vmem:[%s3198_s3 + $0x10] sm:$0xff] (!%p2383_p6)  }
  0xaf   : > { %2595 = vmatprep.subr.bf16.mxu0 %v2826_v63  ;;  %v2838_v63 = vld [vmem:[%s3200_s5] sm:$0xff] (!%p2383_p6)  }
  0xb0   : > { %2644 = vmatpush3.bf16.msra.mxu1 (!%p2383_p6), %v2838_v63 }
  0xb1   : > { %2645 = vmatprep.subr.bf16.mxu1 (!%p2383_p6), %v2886_v60 }
  0xb2   : > { %2596 = vmatpush3.bf16.msra.mxu0 %v2827_v0  ;;  %v2833_v0 = vld [vmem:[%s3198_s3 + $0x18] sm:$0xff] (!%p2383_p6)  }
  0xb3   : > { %2597 = vmatprep.subr.bf16.mxu0 %v2828_v1  ;;  %v2839_v1 = vld [vmem:[%s3200_s5 + $0x8] sm:$0xff] (!%p2383_p6)  }
  0xb4   : > { %2646 = vmatpush3.bf16.msra.mxu1 (!%p2383_p6), %v2839_v1 }
  0xb5   : > { %2647 = vmatprep.subr.bf16.mxu1 (!%p2383_p6), %v2886_v60 }
  0xb6   : > { %2598 = vmatpush3.bf16.msra.mxu0 %v2829_v2  ;;  %v2834_v2 = vld [vmem:[%s3198_s3 + $0x20] sm:$0xff] (!%p2383_p6)  }
  0xb7   : > { %2623 = vmatprep.subr.bf16.mxu0 (!%p2383_p6), %v2886_v60 }
  0xb9   : > { %1923 = vmatmul.mubr.bf16.vlgmr.msra.gmra.mrb[16].mxu0 %v416_v3  ;;  %v2840_v3 = vld [vmem:[%s3200_s5 + $0x10] sm:$0xff] (!%p2383_p6)  }
  0xba   : > { %2624 = vmatpush3.bf16.msra.mxu0 (!%p2383_p6), %v2830_v59  ;;  %2639 = vmatprep.mubr.msk.bf16.mxu0 (!%p2383_p6), %vm2887_vm0, %v2886_v60 }
  0xbb   : > { %2625 = vmatprep.subr.bf16.mxu0 (!%p2383_p6), %v2886_v60  ;;  %2648 = vmatpush3.bf16.msra.mxu1 (!%p2383_p6), %v2840_v3 }
  0xbc   : > { %2649 = vmatprep.subr.bf16.mxu1 (!%p2383_p6), %v2886_v60 }
  0xbe   : > { %2626 = vmatpush3.bf16.msra.mxu0 (!%p2383_p6), %v2831_v61 }
  0xbf   : > { %2627 = vmatprep.subr.bf16.mxu0 (!%p2383_p6), %v2886_v60 }
  0xc2   : > { %2628 = vmatpush3.bf16.msra.mxu0 (!%p2383_p6), %v2832_v62 }
  0xc3   : > { %2629 = vmatprep.subr.bf16.mxu0 (!%p2383_p6), %v2886_v60 }
  0xc6   : > { %2630 = vmatpush3.bf16.msra.mxu0 (!%p2383_p6), %v2833_v0 }
  0xc7   : > { %2631 = vmatprep.subr.bf16.mxu0 (!%p2383_p6), %v2886_v60 }
  0xca   : > { %2632 = vmatpush3.bf16.msra.mxu0 (!%p2383_p6), %v2834_v2 }
  0xcb   : > { %2633 = vmatprep.subr.bf16.mxu0 (!%p2383_p6), %v2886_v60 }
 0x10c   : > { %v2423_v4 = vpop.f32.mrb[0].mxu0 }
 0x10d   : > { %v2445_v5 = vpop.f32.mrb[0].mxu1  ;;  %v2424_v6 = vpop.f32.mrb[1].mxu0 }
 0x10e   : > { %v2446_v7 = vpop.f32.mrb[1].mxu1  ;;  %v2425_v8 = vadd.f32 %v2424_v6, %v2423_v4  ;;  %v2426_v10 = vpop.f32.mrb[2].mxu0  ;;  %v2835_v4 = vld [vmem:[%s3198_s3 + $0x28] sm:$0xff] (!%p2383_p6)   ;;  %v2384_v6 = vld [vmem:[%s3197_s2] ss:$0 sm:$0xff] (!%p2383_p6) }
 0x10f   : > { %v2447_v9 = vadd.f32 %v2446_v7, %v2445_v5  ;;  %v2448_v11 = vpop.f32.mrb[2].mxu1  ;;  %v2427_v12 = vpop.f32.mrb[3].mxu0  ;;  %v2841_v7 = vld [vmem:[%s3200_s5 + $0x18] sm:$0xff] (!%p2383_p6)   ;;  %2634 = vmatpush3.bf16.msra.mxu0 (!%p2383_p6), %v2835_v4  ;;  %v2842_v10 = vld [vmem:[%s3200_s5 + $0x20] sm:$0xff] (!%p2383_p6)  }
 0x110   : > { %v2449_v13 = vpop.f32.mrb[3].mxu1  ;;  %2635 = vmatprep.subr.bf16.mxu0 (!%p2383_p6), %v2886_v60  ;;  %2650 = vmatpush3.bf16.msra.mxu1 (!%p2383_p6), %v2841_v7  ;;  %v2837_v12 = vld [vmem:[%s3198_s3 + $0x38] sm:$0xff] (!%p2383_p6)  }
 0x111   : > { %v1645_v14 = vadd.f32 %v2447_v9, %v2425_v8  ;;  %v2836_v9 = vld [vmem:[%s3198_s3 + $0x30] sm:$0xff] (!%p2383_p6)   ;;  %2651 = vmatprep.subr.bf16.mxu1 (!%p2383_p6), %v2886_v60  ;;  %v2843_v13 = vld [vmem:[%s3200_s5 + $0x28] sm:$0xff] (!%p2383_p6)  }
 0x113   : > { %2636 = vmatpush3.bf16.msra.mxu0 (!%p2383_p6), %v2836_v9 }
 0x114   : > { %2637 = vmatprep.subr.bf16.mxu0 (!%p2383_p6), %v2886_v60  ;;  %2652 = vmatpush3.bf16.msra.mxu1 (!%p2383_p6), %v2842_v10 }
 0x115   : > { %2653 = vmatprep.subr.bf16.mxu1 (!%p2383_p6), %v2886_v60 }
 0x117   : > { %2638 = vmatpush3.bf16.msra.mxu0 (!%p2383_p6), %v2837_v12 }
 0x118   : > { %2654 = vmatpush3.bf16.msra.mxu1 (!%p2383_p6), %v2843_v13 }
 0x119   : > { %2655 = vmatprep.subr.bf16.mxu1 (!%p2383_p6), %v2886_v60 }
 0x12c   : > { %v2467_v15 = vpop.f32.mrb[4].mxu0 }
 0x12d   : > { %v2489_v16 = vpop.f32.mrb[4].mxu1  ;;  %v2468_v17 = vpop.f32.mrb[5].mxu0 }
 0x12e   : > { %v2490_v18 = vpop.f32.mrb[5].mxu1  ;;  %v2469_v19 = vadd.f32 %v2468_v17, %v2467_v15  ;;  %v2470_v20 = vpop.f32.mrb[6].mxu0  ;;  %v2844_v15 = vld [vmem:[%s3200_s5 + $0x30] sm:$0xff] (!%p2383_p6)   ;;  %v2385_v17 = vld [vmem:[%s3199_s4] ss:$0 sm:$0xff] (!%p2383_p6) }
 0x12f   : > { %v2491_v21 = vadd.f32 %v2490_v18, %v2489_v16  ;;  %v2492_v22 = vpop.f32.mrb[6].mxu1  ;;  %v2471_v23 = vpop.f32.mrb[7].mxu0  ;;  %2656 = vmatpush3.bf16.msra.mxu1 (!%p2383_p6), %v2844_v15  ;;  %v2845_v16 = vld [vmem:[%s3200_s5 + $0x38] sm:$0xff] (!%p2383_p6)  }
 0x130   : > { %v2493_v24 = vpop.f32.mrb[7].mxu1  ;;  %v1685_v25 = vadd.f32 %v2469_v19, %v1645_v14  ;;  %2657 = vmatprep.subr.bf16.mxu1 (!%p2383_p6), %v2886_v60 }
 0x132   : > { %v1725_v26 = vadd.f32 %v2491_v21, %v1685_v25  ;;  %v2394_v25 = vld [vmem:[%s3201_s6] ss:$0 sm:$0xff] (!%p2383_p6) }
 0x133   : > { %2658 = vmatpush3.bf16.msra.mxu1 (!%p2383_p6), %v2845_v16 }
 0x14c   : > { %v2511_v27 = vpop.f32.mrb[8].mxu0 }
 0x14d   : > { %v2533_v28 = vpop.f32.mrb[8].mxu1  ;;  %v2512_v29 = vpop.f32.mrb[9].mxu0 }
 0x14e   : > { %v2534_v30 = vpop.f32.mrb[9].mxu1  ;;  %v2513_v31 = vadd.f32 %v2512_v29, %v2511_v27  ;;  %v2514_v32 = vpop.f32.mrb[10].mxu0 }
 0x14f   : > { %v2535_v33 = vadd.f32 %v2534_v30, %v2533_v28  ;;  %v2536_v34 = vpop.f32.mrb[10].mxu1  ;;  %v2515_v35 = vpop.f32.mrb[11].mxu0 }
 0x150   : > { %v2537_v36 = vpop.f32.mrb[11].mxu1  ;;  %v1765_v37 = vadd.f32 %v2513_v31, %v1725_v26 }
 0x152   : > { %v1805_v38 = vadd.f32 %v2535_v33, %v1765_v37 }
 0x16c   : > { %v2555_v39 = vpop.f32.mrb[12].mxu0 }
 0x16d   : > { %v2577_v40 = vpop.f32.mrb[12].mxu1  ;;  %v2556_v41 = vpop.f32.mrb[13].mxu0 }
 0x16e   : > { %v2578_v43 = vpop.f32.mrb[13].mxu1  ;;  %v2557_v44 = vadd.f32 %v2556_v41, %v2555_v39  ;;  %v2558_v45 = vpop.f32.mrb[14].mxu0 }
 0x16f   : > { %v2579_v46 = vadd.f32 %v2578_v43, %v2577_v40  ;;  %v2580_v47 = vpop.f32.mrb[14].mxu1  ;;  %v2559_v42 = vpop.f32.mrb[15].mxu0 }
 0x170   : > { %v2581_v48 = vpop.f32.mrb[15].mxu1  ;;  %v1845_v49 = vadd.f32 %v2557_v44, %v1805_v38 }
 0x172   : > { %v1885_v50 = vadd.f32 %v2579_v46, %v1845_v49 }
 0x18c   : > { %v2599_v51 = vpop.f32.mrb[16].mxu0 }
 0x18d   : > { %v2600_v52 = vpop.f32.mrb[17].mxu0 }
 0x18e   : > { %v2601_v53 = vadd.f32 %v2600_v52, %v2599_v51  ;;  %v2602_v54 = vpop.f32.mrb[18].mxu0  ;;  %1935 = sbr.rel (%p2383_p6) target bundleno = 851 (0x353), region = 56 }
 0x18f   : > { %v2603_v56 = vpop.f32.mrb[19].mxu0 }
 0x190   : > { %v1925_v57 = vadd.f32 %v2601_v53, %v1885_v50 }
 0x192   : > { %v1930_v58 = vadd.f32 %v1925_v57, %v295_v55 }
 0x194   : > { %1931 = vst [vmem:[#allocation2] sm:$0x3] %v1930_v58 }
 0x19b   : > { %v1936_v5 = vld [vmem:[#allocation2] sm:$0x3] }
 0x19c   : > { %v1944_v8 = vadd.f32 %v2384_v6, %v1936_v5 }
 0x19e   : > { %v1945_v11 = vmax.f32 %v1944_v8, 0.0 }
 0x1a0   : > { %v1946_v14 = vpack.c.bf16 %v1945_v11, %v1945_v11 }
 0x1a2   : > { %2640 = vmatmul.mubr.bf16.vlgmr.msra.gmra.mrb[0].mxu0 %v1946_v14 }
 0x275   : > { %v2052_v18 = vpop.f32.mrb[0].mxu0 }
 0x276   : > { %v2053_v19 = vadd.f32 %v2385_v17, %v2052_v18  ;;  %v2641_v20 = vpop.f32.mrb[1].mxu0 }
 0x277   : > { %v2055_v21 = vpop.f32.mrb[2].mxu0 }
 0x278   : > { %v2058_v22 = vmax.f32 %v2053_v19, 0.0  ;;  %v2642_v23 = vpop.f32.mrb[3].mxu0 }
 0x27a   : > { %v2059_v24 = vpack.c.bf16 %v2058_v22, %v2058_v22 }
 0x27c   : > { %2660 = vmatmul.mubr.bf16.vlgmr.msra.gmra.mrb[0].mxu1 %v2059_v24 }
 0x34f   : > { %v2165_v26 = vpop.f32.mrb[0].mxu1 }
 0x350   : > { %v2166_v27 = vadd.f32 %v2394_v25, %v2165_v26  ;;  %v2661_v28 = vpop.f32.mrb[1].mxu1 }
 0x351   : > { %v2168_v29 = vpop.f32.mrb[2].mxu1 }
 0x352   : > { %2172 = vst.msk [vmem:[#allocation3] sm:$0x3] %vm2171_vm1, %v2166_v27  ;;  %v2662_v30 = vpop.f32.mrb[3].mxu1 }
 0x353 PF: > { %p2667_p7 = scmp.eq.s32.totalorder %s2935_s25, 8  ;;  %s2888_s9 = smov [#allocation3]  }
 0x354   : > { %s2180_s10 = sshll.u32 %s2888_s9, 4  ;;  %s2181_s10 = int_to_ptr.vmem [resolvable:$true] %s2180_s10 }
 0x355   : > { %s2846_s11 = scalar_lea.vmem %s2181_s10, 32  ;;  %p2853_p11 = scmp.lt.s32.totalorder %s2181_s10, %s2181_s10 }
 0x356   : > { %p2847_p8 = scmp.ne.s32.totalorder %s2181_s10, %s2846_s11  ;;  %p2854_p12 = scmp.lt.s32.totalorder %s2846_s11, %s2846_s11 }
 0x358   : > { %p2848_p9 = pnand %p2847_p8, %p2667_p7  ;;  %p2855_p13 = por %p2854_p12, %p2853_p11 }
 0x35a   : > { %p2849_p10 = pneg %p2848_p9 }
 0x35c   : > { %p2856_p0 = pnand %p2855_p13, %p2849_p10 }
 0x35e   : > { %2859 = shalt.err (!%p2856_p0)
}
 0x35f   : > { %s2860_s14 = scalar_lea.hbm %s3202_s7, 32 }
 0x360   : > { %p2861_p1 = scmp.ne.s32.totalorder %s3202_s7, %s2860_s14  ;;  %p2866_p4 = scmp.lt.u32.totalorder %s2860_s14, %s3202_s7 }
 0x362   : > { %p2862_p2 = pnand %p2861_p1, %p2667_p7 }
 0x364   : > { %p2863_p3 = pneg %p2862_p2 }
 0x366   : > { %p2868_p5 = pnand %p2866_p4, %p2863_p3 }
 0x368   : > { %2871 = shalt.err (!%p2868_p5)
}
 0x369   : > { %2664 = dma.vmem_to_hbm [thread:$0]  (%p2667_p7), %s2181_s10, 32, %s3202_s7, [#allocation4]  }
 0x36a   : > { %2877 = dma.done.wait (%p2667_p7), [#allocation4], 32  }
 0x36b   : > { %2879 = vsyncadd (%p2667_p7), [#allocation4], 4294967264 }
 0x36c PF: > { %s18_s24 = sadd.s32 1, %s2882_s24  }
 0x36d   : > { %p15_p6 = scmp.ge.s32.totalorder %s18_s24, 11  }
 0x36f   :  { %17 = sbr.rel (!%p15_p6) target bundleno = 1 (0x1), region = 86 }
 0x376   :  { %2193 = vsyncpa [#allocation4], 1 }
 0x377   :  { %2195 = vsyncpa [#allocation4 + $0x1], 1 }

// kernel: cnn_forward.4
= control target key start
LH: loop header
LB: loop body
LE: loop exit
PB: predicated region body
PF: predicated region fallthrough
CT: control target
= control target key end

     0   :  { %s8438_s12 = smov 0   ;;  %s8440_s13 = smov 0   ;;  %s10116_s0 = inlined_call_operand.vmem [shape: bf16[2,1600,160], index: 0, kind: input, shape index: {}]   ;;  %s10117_s1 = inlined_call_operand.vmem [shape: bf16[5,160,128], index: 1, kind: input, shape index: {}]   ;;  %s10118_s2 = inlined_call_operand.vmem [shape: f32[1,128], index: 2, kind: input, shape index: {}]   ;;  %s10119_s3 = inlined_call_operand.vmem [shape: f32[2,18,18,64], index: 3, kind: output, shape index: {}]  }
   0x1   :  { %s8442_s14 = smov 0   ;;  %s8444_s15 = smov 0  }
   0x2   :  { %s8446_s16 = smov 0  }
   0x3 LB: > { %s22_s17 = sadd.s32 1, %s8407_s14  ;;  %s25_s18 = sadd.s32 1, %s8411_s15  ;;  %s8415_s16 = sphi %s8446_s16, %s13_s16   ;;  %s8411_s15 = sphi %s8444_s15, %s10301_s15   ;;  %s8407_s14 = sphi %s8442_s14, %s10300_s14   ;;  %s8403_s13 = sphi %s8440_s13, %s10299_s13   ;;  %s8399_s12 = sphi %s8438_s12, %s10298_s12  }
   0x4   : > { %p23_p0 = scmp.ge.s32.totalorder %s22_s17, 2  ;;  %p6736_p1 = scmp.ge.s32.totalorder %s8415_s16, 1 }
   0x5   : > { %p151_p2 = scmp.lt.s32.totalorder %s8415_s16, 5 }
   0x6   : > { %s10303_s17 = smov (%p23_p0, %s22_s17), 0  ;;  %s10305_s18 = smov (!%p23_p0, %s25_s18), %s8411_s15 }
   0x7   : > { %p152_p3 = pnand %p6736_p1, %p151_p2  ;;  %p27_p4 = scmp.ge.s32.totalorder %s10305_s18, 2 }
   0x9   : > { %s10307_s18 = smov (%p27_p4, %s10305_s18), 0  ;;  %155 = sbr.rel (%p152_p3) target bundleno = 1186 (0x4a2), region = 32 }
  0x10   : > { %v7650_v0 = vld [vmem:[%s10117_s1 + $0x50] sm:$0xff]   ;;  %v10120_v1 = vmov 0   ;;  %p180_p5 = scmp.lt.s32.totalorder %s8403_s13, 1  ;;  %v7651_v2 = vld [vmem:[%s10117_s1 + $0x58] sm:$0xff]   ;;  %s8479_s23 = smul.u32 18, %s8399_s12  ;;  %v7652_v3 = vld [vmem:[%s10117_s1 + $0x60] sm:$0xff]  }
  0x11   : > { %1033 = vmatprep.subr.bf16.mxu0 %v10120_v1  ;;  %7586 = vmatprep.subr.bf16.mxu1 %v10120_v1  ;;  %v7653_v4 = vld [vmem:[%s10117_s1 + $0x68] sm:$0xff]   ;;  %vm897_vm0 = vcmask 261120   ;;  %v7654_v7 = vld [vmem:[%s10117_s1 + $0x70] sm:$0xff]   ;;  %v7655_v8 = vld [vmem:[%s10117_s1 + $0x78] sm:$0xff]   ;;  %vm6331_vm1 = vcmask 523264   ;;  %vm6334_vm2 = vcmask 517120  }
  0x12   : > { %1034 = vmatpush1.bf16.msra.mxu0 %v7650_v0  ;;  %7596 = vmatpush1.bf16.msra.mxu1 %v7650_v0  ;;  %s10309_s13 = smov (!%p180_p5, %s8403_s13), 1  ;;  %s314_s24 = sadd.s32 1, %s8479_s23  ;;  %v7656_v9 = vld [vmem:[%s10117_s1 + $0x80] sm:$0xff]   ;;  %v7657_v10 = vld [vmem:[%s10117_s1 + $0x88] sm:$0xff]   ;;  %v7658_v11 = vld [vmem:[%s10117_s1 + $0x90] sm:$0xff]  }
  0x13   : > { %1035 = vmatprep.subr.bf16.mxu0 %v10120_v1  ;;  %7587 = vmatprep.subr.bf16.mxu1 %v10120_v1  ;;  %s7606_s25 = smul.u32 1600, %s10309_s13  ;;  %v7659_v12 = vld [vmem:[%s10117_s1 + $0x98] sm:$0xff]   ;;  %v7666_v15 = vld [vmem:[%s10117_s1 + $0xa0] sm:$0xff]   ;;  %v7680_v19 = vld [vmem:[%s10117_s1 + $0xa8] sm:$0xff]   ;;  %s2419_s22 = sadd.s32 2, %s8479_s23 }
  0x14   : > { %s315_s28 = smul.u32 40, %s314_s24  ;;  %v7671_v18 = vld [vmem:[%s10117_s1] sm:$0xff]   ;;  %v7687_v21 = vld [vmem:[%s10117_s1 + $0x8] sm:$0xff]   ;;  %v7694_v25 = vld [vmem:[%s10117_s1 + $0xb0] sm:$0xff]  }
  0x15   : > { %s8495_s4 = scalar_lea.vmem %s10116_s0, %s7606_s25  ;;  %v7701_v26 = vld [vmem:[%s10117_s1 + $0x10] sm:$0xff]   ;;  %v7714_v29 = vld [vmem:[%s10117_s1 + $0xb8] sm:$0xff]   ;;  %v7728_v33 = vld [vmem:[%s10117_s1 + $0xc0] sm:$0xff]   ;;  %s2420_s24 = smul.u32 40, %s2419_s22 }
  0x16   : > { %1036 = vmatpush1.bf16.msra.mxu0 %v7651_v2  ;;  %7597 = vmatpush1.bf16.msra.mxu1 %v7651_v2  ;;  %s316_s5 = sshra.s32 %s315_s28, 3  ;;  %v7715_v30 = vld [vmem:[%s10117_s1 + $0x18] sm:$0xff]   ;;  %v7729_v34 = vld [vmem:[%s10117_s1 + $0x20] sm:$0xff]   ;;  %v7742_v35 = vld [vmem:[%s10117_s1 + $0xc8] sm:$0xff]  }
  0x17   : > { %1037 = vmatprep.subr.bf16.mxu0 %v10120_v1  ;;  %7588 = vmatprep.subr.bf16.mxu1 %v10120_v1  ;;  %s7582_s6 = sshll.u32 %s316_s5, 3  ;;  %v7747_v36 = vld [vmem:[%s10117_s1 + $0x28] sm:$0xff]   ;;  %v7762_v41 = vld [vmem:[%s10117_s1 + $0xd0] sm:$0xff]   ;;  %v7776_v47 = vld [vmem:[%s10117_s1 + $0xd8] sm:$0xff]   ;;  %s2421_s25 = sshra.s32 %s2420_s24, 3 }
  0x18   : > { %s8501_s9 = scalar_lea.vmem %s8495_s4, %s7582_s6  ;;  %v7763_v42 = vld [vmem:[%s10117_s1 + $0x30] sm:$0xff]   ;;  %v7777_v48 = vld [vmem:[%s10117_s1 + $0x38] sm:$0xff]   ;;  %v7790_v53 = vld [vmem:[%s10117_s1 + $0x40] sm:$0xff]   ;;  %s198_s6 = smul.u32 720, %s8399_s12 }
  0x19   : > { %v7662_v5 = vld [vmem:[%s8501_s9 + $0x4] ss:$8 sps:$4 sm:$0xff]   ;;  %v7665_v6 = vld [vmem:[%s8501_s9 + $0x174] ss:$8 sps:$4 sm:$0xff]   ;;  %v7660_v13 = vld [vmem:[%s8501_s9] ss:$8 sps:$4 sm:$0xff]  }
  0x1a   : > { %1038 = vmatpush1.bf16.msra.mxu0 %v7652_v3  ;;  %7598 = vmatpush1.bf16.msra.mxu1 %v7652_v3  ;;  %v7663_v14 = vld [vmem:[%s8501_s9 + $0x170] ss:$8 sps:$4 sm:$0xff]   ;;  %v7667_v16 = vld [vmem:[%s8501_s9 + $0x14] ss:$8 sps:$4 sm:$0xff]   ;;  %v7669_v17 = vld [vmem:[%s8501_s9 + $0x184] ss:$8 sps:$4 sm:$0xff]  }
  0x1b   : > { %1039 = vmatprep.subr.bf16.mxu0 %v10120_v1  ;;  %7589 = vmatprep.subr.bf16.mxu1 %v10120_v1  ;;  %v7672_v20 = vld [vmem:[%s8501_s9 + $0x10] ss:$8 sps:$4 sm:$0xff]   ;;  %v7673_v22 = vld [vmem:[%s8501_s9 + $0x180] ss:$8 sps:$4 sm:$0xff]   ;;  %v7674_v23 = vld [vmem:[%s8501_s9 + $0x24] ss:$8 sps:$4 sm:$0xff]  }
  0x1c   : > { %6863 = vmatprep.mubr.msk.bf16.mxu0 %vm897_vm0, %v7662_v5  ;;  %6886 = vmatprep.mubr.msk.bf16.mxu1 %vm897_vm0, %v7665_v6  ;;  %v7676_v24 = vld [vmem:[%s8501_s9 + $0x194] ss:$8 sps:$4 sm:$0xff]   ;;  %v7678_v27 = vld [vmem:[%s8501_s9 + $0x20] ss:$8 sps:$4 sm:$0xff]   ;;  %v7679_v28 = vld [vmem:[%s8501_s9 + $0x190] ss:$8 sps:$4 sm:$0xff]  }
  0x1d   : > { %v7681_v31 = vld [vmem:[%s8501_s9 + $0x34] ss:$8 sps:$4 sm:$0xff]   ;;  %v7683_v32 = vld [vmem:[%s8501_s9 + $0x1a4] ss:$8 sps:$4 sm:$0xff]   ;;  %v7685_v37 = vld [vmem:[%s8501_s9 + $0x30] ss:$8 sps:$4 sm:$0xff]  }
  0x1e   : > { %1040 = vmatpush1.bf16.msra.mxu0 %v7653_v4  ;;  %7599 = vmatpush1.bf16.msra.mxu1 %v7653_v4  ;;  %v7686_v38 = vld [vmem:[%s8501_s9 + $0x1a0] ss:$8 sps:$4 sm:$0xff]   ;;  %v7688_v39 = vld [vmem:[%s8501_s9 + $0x44] ss:$8 sps:$4 sm:$0xff]   ;;  %v7690_v40 = vld [vmem:[%s8501_s9 + $0x1b4] ss:$8 sps:$4 sm:$0xff]  }
  0x1f   : > { %1041 = vmatprep.subr.bf16.mxu0 %v10120_v1  ;;  %7590 = vmatprep.subr.bf16.mxu1 %v10120_v1  ;;  %v7692_v43 = vld [vmem:[%s8501_s9 + $0x40] ss:$8 sps:$4 sm:$0xff]   ;;  %v7693_v44 = vld [vmem:[%s8501_s9 + $0x1b0] ss:$8 sps:$4 sm:$0xff]   ;;  %v7695_v45 = vld [vmem:[%s8501_s9 + $0x54] ss:$8 sps:$4 sm:$0xff]  }
  0x20   : > { %v7697_v46 = vld [vmem:[%s8501_s9 + $0x1c4] ss:$8 sps:$4 sm:$0xff]   ;;  %v7699_v49 = vld [vmem:[%s8501_s9 + $0x50] ss:$8 sps:$4 sm:$0xff]   ;;  %v7700_v50 = vld [vmem:[%s8501_s9 + $0x1c0] ss:$8 sps:$4 sm:$0xff]  }
  0x21   : > { %v7702_v51 = vld [vmem:[%s8501_s9 + $0x64] ss:$8 sps:$4 sm:$0xff]   ;;  %v7704_v52 = vld [vmem:[%s8501_s9 + $0x1d4] ss:$8 sps:$4 sm:$0xff]   ;;  %v7706_v55 = vld [vmem:[%s8501_s9 + $0x60] ss:$8 sps:$4 sm:$0xff]  }
  0x22   : > { %1042 = vmatpush1.bf16.msra.mxu0 %v7654_v7  ;;  %7600 = vmatpush1.bf16.msra.mxu1 %v7654_v7  ;;  %v7791_v54 = vld [vmem:[%s10117_s1 + $0xe0] sm:$0xff]   ;;  %v7707_v56 = vld [vmem:[%s8501_s9 + $0x1d0] ss:$8 sps:$4 sm:$0xff]   ;;  %v7804_v57 = vld [vmem:[%s10117_s1 + $0x48] sm:$0xff]   ;;  %s199_s10 = sshra.s32 %s198_s6, 3  ;;  %s7583_s26 = sshll.u32 %s2421_s25, 3 }
  0x23   : > { %1043 = vmatprep.subr.bf16.mxu0 %v10120_v1  ;;  %7591 = vmatprep.subr.bf16.mxu1 %v10120_v1  ;;  %v7708_v58 = vld [vmem:[%s8501_s9 + $0x74] ss:$8 sps:$4 sm:$0xff]   ;;  %s7581_s11 = sshll.u32 %s199_s10, 3  ;;  %v7710_v59 = vld [vmem:[%s8501_s9 + $0x1e4] ss:$8 sps:$4 sm:$0xff]   ;;  %s8672_s27 = scalar_lea.vmem %s8495_s4, %s7583_s26 }
  0x24   : > { %v7809_v60 = vld [vmem:[%s10117_s1 + $0xe8] sm:$0xff]   ;;  %s8662_s21 = scalar_lea.vmem %s8495_s4, %s7581_s11  ;;  %v7712_v61 = vld [vmem:[%s8501_s9 + $0x70] ss:$8 sps:$4 sm:$0xff]   ;;  %v7718_v0 = vld [vmem:[%s8501_s9 + $0x1f4] ss:$8 sps:$4 sm:$0xff]   ;;  %s3620_s10 = sadd.s32 3, %s8479_s23 }
  0x25   : > { %v7713_v62 = vld [vmem:[%s8501_s9 + $0x1e0] ss:$8 sps:$4 sm:$0xff]   ;;  %v7716_v63 = vld [vmem:[%s8501_s9 + $0x84] ss:$8 sps:$4 sm:$0xff]   ;;  %v7721_v3 = vld [vmem:[%s8501_s9 + $0x1f0] ss:$8 sps:$4 sm:$0xff]  }
  0x26   : > { %1044 = vmatpush1.bf16.msra.mxu0 %v7655_v8  ;;  %7601 = vmatpush1.bf16.msra.mxu1 %v7655_v8  ;;  %v7720_v2 = vld [vmem:[%s8501_s9 + $0x80] ss:$8 sps:$4 sm:$0xff]   ;;  %v7722_v4 = vld [vmem:[%s8501_s9 + $0x94] ss:$8 sps:$4 sm:$0xff]   ;;  %v7724_v5 = vld [vmem:[%s8501_s9 + $0x204] ss:$8 sps:$4 sm:$0xff]  }
  0x27   : > { %1045 = vmatprep.subr.bf16.mxu0 %v10120_v1  ;;  %7592 = vmatprep.subr.bf16.mxu1 %v10120_v1  ;;  %v7726_v6 = vld [vmem:[%s8501_s9 + $0x90] ss:$8 sps:$4 sm:$0xff]   ;;  %v7727_v7 = vld [vmem:[%s8501_s9 + $0x200] ss:$8 sps:$4 sm:$0xff]   ;;  %v7730_v8 = vld [vmem:[%s8501_s9 + $0xa4] ss:$8 sps:$4 sm:$0xff]  }
  0x28   : > { %s3621_s11 = smul.u32 40, %s3620_s10  ;;  %s4821_s24 = sadd.s32 4, %s8479_s23 }
  0x29   : > { %s4822_s25 = smul.u32 40, %s4821_s24 }
  0x2a   : > { %1046 = vmatpush1.bf16.msra.mxu0 %v7656_v9  ;;  %7602 = vmatpush1.bf16.msra.mxu1 %v7656_v9  ;;  %v7732_v9 = vld [vmem:[%s8501_s9 + $0x214] ss:$8 sps:$4 sm:$0xff]   ;;  %s3622_s19 = sshra.s32 %s3621_s11, 3 }
  0x2b   : > { %1047 = vmatprep.subr.bf16.mxu0 %v10120_v1  ;;  %7593 = vmatprep.subr.bf16.mxu1 %v10120_v1  ;;  %s7584_s20 = sshll.u32 %s3622_s19, 3  ;;  %s4823_s26 = sshra.s32 %s4822_s25, 3 }
  0x2c   : > { %s9207_s22 = scalar_lea.vmem %s8495_s4, %s7584_s20  ;;  %s7585_s28 = sshll.u32 %s4823_s26, 3 }
  0x2d   : > { %s9223_s23 = scalar_lea.vmem %s8495_s4, %s7585_s28 }
  0x2e   : > { %1048 = vmatpush1.bf16.msra.mxu0 %v7657_v10  ;;  %7603 = vmatpush1.bf16.msra.mxu1 %v7657_v10  ;;  %v7734_v10 = vld [vmem:[%s8501_s9 + $0xa0] ss:$8 sps:$4 sm:$0xff]  }
  0x2f   : > { %1049 = vmatprep.subr.bf16.mxu0 %v10120_v1  ;;  %7594 = vmatprep.subr.bf16.mxu1 %v10120_v1 }
  0x32   : > { %1050 = vmatpush1.bf16.msra.mxu0 %v7658_v11  ;;  %7604 = vmatpush1.bf16.msra.mxu1 %v7658_v11  ;;  %v7735_v11 = vld [vmem:[%s8501_s9 + $0x210] ss:$8 sps:$4 sm:$0xff]  }
  0x33   : > { %1051 = vmatprep.subr.bf16.mxu0 %v10120_v1  ;;  %7595 = vmatprep.subr.bf16.mxu1 %v10120_v1 }
  0x36   : > { %1052 = vmatpush1.bf16.msra.mxu0 %v7659_v12  ;;  %7605 = vmatpush1.bf16.msra.mxu1 %v7659_v12  ;;  %v7736_v12 = vld [vmem:[%s8501_s9 + $0xb4] ss:$8 sps:$4 sm:$0xff]  }
  0x37   : > { %3137 = vmatprep.subr.bf16.mxu0 %v10120_v1  ;;  %2026 = vmatprep.subr.bf16.mxu1 %v10120_v1 }
  0x39   : > { %1066 = vmatmul.mubr.bf16.vlgmr.msra.gmra.mrb[0].mxu0 %v7660_v13  ;;  %1250 = vmatmul.mubr.bf16.vlgmr.msra.gmra.mrb[0].mxu1 %v7663_v14  ;;  %v7738_v13 = vld [vmem:[%s8501_s9 + $0x224] ss:$8 sps:$4 sm:$0xff]   ;;  %v7740_v14 = vld [vmem:[%s8501_s9 + $0xb0] ss:$8 sps:$4 sm:$0xff]  }
  0x3a   : > { %3138 = vmatpush1.bf16.msra.mxu0 %v7666_v15  ;;  %6864 = vmatprep.mubr.msk.bf16.mxu0 %vm897_vm0, %v7667_v16  ;;  %v7741_v15 = vld [vmem:[%s8501_s9 + $0x220] ss:$8 sps:$4 sm:$0xff]   ;;  %v7743_v16 = vld [vmem:[%s8501_s9 + $0xc4] ss:$8 sps:$4 sm:$0xff]  }
  0x3b   : > { %6887 = vmatprep.mubr.msk.bf16.mxu1 %vm897_vm0, %v7669_v17  ;;  %2027 = vmatpush1.bf16.msra.mxu1 %v7671_v18  ;;  %v7745_v17 = vld [vmem:[%s8501_s9 + $0x234] ss:$8 sps:$4 sm:$0xff]   ;;  %v7748_v18 = vld [vmem:[%s8501_s9 + $0xc0] ss:$8 sps:$4 sm:$0xff]  }
  0x3c   : > { %3139 = vmatprep.subr.bf16.mxu0 %v10120_v1  ;;  %2028 = vmatprep.subr.bf16.mxu1 %v10120_v1 }
  0x3e   : > { %3140 = vmatpush1.bf16.msra.mxu0 %v7680_v19  ;;  %v7749_v19 = vld [vmem:[%s8501_s9 + $0x230] ss:$8 sps:$4 sm:$0xff]  }
  0x3f   : > { %2029 = vmatpush1.bf16.msra.mxu1 %v7687_v21  ;;  %3141 = vmatprep.subr.bf16.mxu0 %v10120_v1  ;;  %v7752_v21 = vld [vmem:[%s8501_s9 + $0x244] ss:$8 sps:$4 sm:$0xff]  }
  0x40   : > { %2030 = vmatprep.subr.bf16.mxu1 %v10120_v1 }
  0x41   : > { %1074 = vmatmul.mubr.bf16.gmra.mrb[4].mxu0 %v7672_v20  ;;  %1258 = vmatmul.mubr.bf16.gmra.mrb[4].mxu1 %v7673_v22  ;;  %v7750_v20 = vld [vmem:[%s8501_s9 + $0xd4] ss:$8 sps:$4 sm:$0xff]   ;;  %v7754_v22 = vld [vmem:[%s8501_s9 + $0xd0] ss:$8 sps:$4 sm:$0xff]  }
  0x42   : > { %6865 = vmatprep.mubr.msk.bf16.mxu0 %vm897_vm0, %v7674_v23  ;;  %6888 = vmatprep.mubr.msk.bf16.mxu1 %vm897_vm0, %v7676_v24  ;;  %v7755_v23 = vld [vmem:[%s8501_s9 + $0x240] ss:$8 sps:$4 sm:$0xff]   ;;  %v7756_v24 = vld [vmem:[%s8501_s9 + $0xe4] ss:$8 sps:$4 sm:$0xff]  }
  0x43   : > { %3142 = vmatpush1.bf16.msra.mxu0 %v7694_v25  ;;  %2031 = vmatpush1.bf16.msra.mxu1 %v7701_v26  ;;  %v7758_v25 = vld [vmem:[%s8501_s9 + $0x254] ss:$8 sps:$4 sm:$0xff]   ;;  %v7760_v26 = vld [vmem:[%s8501_s9 + $0xe0] ss:$8 sps:$4 sm:$0xff]  }
  0x44   : > { %3143 = vmatprep.subr.bf16.mxu0 %v10120_v1  ;;  %2032 = vmatprep.subr.bf16.mxu1 %v10120_v1 }
  0x47   : > { %3144 = vmatpush1.bf16.msra.mxu0 %v7714_v29  ;;  %2033 = vmatpush1.bf16.msra.mxu1 %v7715_v30  ;;  %v7766_v29 = vld [vmem:[%s8501_s9 + $0x264] ss:$8 sps:$4 sm:$0xff]   ;;  %v7768_v30 = vld [vmem:[%s8501_s9 + $0xf0] ss:$8 sps:$4 sm:$0xff]  }
  0x48   : > { %3145 = vmatprep.subr.bf16.mxu0 %v10120_v1  ;;  %2034 = vmatprep.subr.bf16.mxu1 %v10120_v1 }
  0x49   : > { %1082 = vmatmul.mubr.bf16.gmra.mrb[8].mxu0 %v7678_v27  ;;  %1266 = vmatmul.mubr.bf16.gmra.mrb[8].mxu1 %v7679_v28  ;;  %v7761_v27 = vld [vmem:[%s8501_s9 + $0x250] ss:$8 sps:$4 sm:$0xff]   ;;  %v7764_v28 = vld [vmem:[%s8501_s9 + $0xf4] ss:$8 sps:$4 sm:$0xff]  }
  0x4a   : > { %6866 = vmatprep.mubr.msk.bf16.mxu0 %vm897_vm0, %v7681_v31  ;;  %6889 = vmatprep.mubr.msk.bf16.mxu1 %vm897_vm0, %v7683_v32  ;;  %v7769_v31 = vld [vmem:[%s8501_s9 + $0x260] ss:$8 sps:$4 sm:$0xff]   ;;  %v7770_v32 = vld [vmem:[%s8501_s9 + $0x104] ss:$8 sps:$4 sm:$0xff]  }
  0x4b   : > { %3146 = vmatpush1.bf16.msra.mxu0 %v7728_v33  ;;  %2035 = vmatpush1.bf16.msra.mxu1 %v7729_v34  ;;  %v7772_v33 = vld [vmem:[%s8501_s9 + $0x274] ss:$8 sps:$4 sm:$0xff]   ;;  %v7774_v34 = vld [vmem:[%s8501_s9 + $0x100] ss:$8 sps:$4 sm:$0xff]  }
  0x4c   : > { %3147 = vmatprep.subr.bf16.mxu0 %v10120_v1  ;;  %2036 = vmatprep.subr.bf16.mxu1 %v10120_v1 }
  0x4f   : > { %3148 = vmatpush1.bf16.msra.mxu0 %v7742_v35  ;;  %2037 = vmatpush1.bf16.msra.mxu1 %v7747_v36  ;;  %v7775_v35 = vld [vmem:[%s8501_s9 + $0x270] ss:$8 sps:$4 sm:$0xff]   ;;  %v7778_v36 = vld [vmem:[%s8501_s9 + $0x114] ss:$8 sps:$4 sm:$0xff]  }
  0x50   : > { %3149 = vmatprep.subr.bf16.mxu0 %v10120_v1  ;;  %2038 = vmatprep.subr.bf16.mxu1 %v10120_v1 }
  0x51   : > { %1090 = vmatmul.mubr.bf16.gmra.mrb[12].mxu0 %v7685_v37  ;;  %1274 = vmatmul.mubr.bf16.gmra.mrb[12].mxu1 %v7686_v38  ;;  %v7780_v37 = vld [vmem:[%s8501_s9 + $0x284] ss:$8 sps:$4 sm:$0xff]   ;;  %v7782_v38 = vld [vmem:[%s8501_s9 + $0x110] ss:$8 sps:$4 sm:$0xff]  }
  0x52   : > { %6867 = vmatprep.mubr.msk.bf16.mxu0 %vm897_vm0, %v7688_v39  ;;  %6890 = vmatprep.mubr.msk.bf16.mxu1 %vm897_vm0, %v7690_v40  ;;  %v7783_v39 = vld [vmem:[%s8501_s9 + $0x280] ss:$8 sps:$4 sm:$0xff]   ;;  %v7784_v40 = vld [vmem:[%s8501_s9 + $0x124] ss:$8 sps:$4 sm:$0xff]  }
  0x53   : > { %3150 = vmatpush1.bf16.msra.mxu0 %v7762_v41  ;;  %2039 = vmatpush1.bf16.msra.mxu1 %v7763_v42  ;;  %v7786_v41 = vld [vmem:[%s8501_s9 + $0x294] ss:$8 sps:$4 sm:$0xff]   ;;  %v7788_v42 = vld [vmem:[%s8501_s9 + $0x120] ss:$8 sps:$4 sm:$0xff]  }
  0x54   : > { %3151 = vmatprep.subr.bf16.mxu0 %v10120_v1  ;;  %2040 = vmatprep.subr.bf16.mxu1 %v10120_v1 }
  0x57   : > { %3152 = vmatpush1.bf16.msra.mxu0 %v7776_v47  ;;  %2041 = vmatpush1.bf16.msra.mxu1 %v7777_v48  ;;  %v7797_v47 = vld [vmem:[%s8501_s9 + $0x2a0] ss:$8 sps:$4 sm:$0xff]   ;;  %v7798_v48 = vld [vmem:[%s8501_s9 + $0x144] ss:$8 sps:$4 sm:$0xff]  }
  0x58   : > { %3153 = vmatprep.subr.bf16.mxu0 %v10120_v1  ;;  %2042 = vmatprep.subr.bf16.mxu1 %v10120_v1 }
  0x59   : > { %1098 = vmatmul.mubr.bf16.gmra.mrb[16].mxu0 %v7692_v43  ;;  %1282 = vmatmul.mubr.bf16.gmra.mrb[16].mxu1 %v7693_v44  ;;  %v7789_v43 = vld [vmem:[%s8501_s9 + $0x290] ss:$8 sps:$4 sm:$0xff]   ;;  %v7792_v44 = vld [vmem:[%s8501_s9 + $0x134] ss:$8 sps:$4 sm:$0xff]  }
  0x5a   : > { %6868 = vmatprep.mubr.msk.bf16.mxu0 %vm897_vm0, %v7695_v45  ;;  %6891 = vmatprep.mubr.msk.bf16.mxu1 %vm897_vm0, %v7697_v46  ;;  %v7794_v45 = vld [vmem:[%s8501_s9 + $0x2a4] ss:$8 sps:$4 sm:$0xff]   ;;  %v7796_v46 = vld [vmem:[%s8501_s9 + $0x130] ss:$8 sps:$4 sm:$0xff]  }
  0x5b   : > { %2043 = vmatpush1.bf16.msra.mxu1 %v7790_v53  ;;  %3154 = vmatpush1.bf16.msra.mxu0 %v7791_v54  ;;  %v7807_v53 = vld [vmem:[%s8501_s9 + $0x2c4] ss:$8 sps:$4 sm:$0xff]   ;;  %v7810_v54 = vld [vmem:[%s8501_s9 + $0x150] ss:$8 sps:$4 sm:$0xff]  }
  0x5c   : > { %2044 = vmatprep.subr.bf16.mxu1 %v10120_v1  ;;  %3155 = vmatprep.subr.bf16.mxu0 %v10120_v1 }
  0x5f   : > { %2045 = vmatpush1.bf16.msra.mxu1 %v7804_v57  ;;  %3156 = vmatpush1.bf16.msra.mxu0 %v7809_v60  ;;  %v7816_v57 = vld [vmem:[%s8662_s21 + $0x4] ss:$8 sps:$4 sm:$0xff]   ;;  %v7818_v60 = vld [vmem:[%s8662_s21 + $0x14] ss:$8 sps:$4 sm:$0xff]  }
  0x60   : > { %4338 = vmatprep.subr.bf16.mxu1 %v10120_v1  ;;  %5539 = vmatprep.subr.bf16.mxu0 %v10120_v1 }
  0x61   : > { %1106 = vmatmul.mubr.bf16.gmra.mrb[20].mxu0 %v7699_v49  ;;  %1290 = vmatmul.mubr.bf16.gmra.mrb[20].mxu1 %v7700_v50  ;;  %v7800_v49 = vld [vmem:[%s8501_s9 + $0x2b4] ss:$8 sps:$4 sm:$0xff]   ;;  %v7802_v50 = vld [vmem:[%s8501_s9 + $0x140] ss:$8 sps:$4 sm:$0xff]  }
  0x62   : > { %6869 = vmatprep.mubr.msk.bf16.mxu0 %vm897_vm0, %v7702_v51  ;;  %6892 = vmatprep.mubr.msk.bf16.mxu1 %vm897_vm0, %v7704_v52  ;;  %v7803_v51 = vld [vmem:[%s8501_s9 + $0x2b0] ss:$8 sps:$4 sm:$0xff]   ;;  %v7805_v52 = vld [vmem:[%s8501_s9 + $0x154] ss:$8 sps:$4 sm:$0xff]  }
  0x69   : > { %1114 = vmatmul.mubr.bf16.gmra.mrb[24].mxu0 %v7706_v55  ;;  %1298 = vmatmul.mubr.bf16.gmra.mrb[24].mxu1 %v7707_v56  ;;  %v7811_v55 = vld [vmem:[%s8501_s9 + $0x2c0] ss:$8 sps:$4 sm:$0xff]   ;;  %v7812_v56 = vld [vmem:[%s8501_s9 + $0x164] ss:$8 sps:$4 sm:$0xff]  }
  0x6a   : > { %6870 = vmatprep.mubr.msk.bf16.mxu0 %vm897_vm0, %v7708_v58  ;;  %6893 = vmatprep.mubr.msk.bf16.mxu1 %vm897_vm0, %v7710_v59  ;;  %v7814_v58 = vld [vmem:[%s8662_s21] ss:$8 sps:$4 sm:$0xff]  }
  0x6b   : > { %v7817_v59 = vld [vmem:[%s8501_s9 + $0x160] ss:$8 sps:$4 sm:$0xff]  }
  0x71   : > { %1122 = vmatmul.mubr.bf16.gmra.mrb[28].mxu0 %v7712_v61  ;;  %1306 = vmatmul.mubr.bf16.gmra.mrb[28].mxu1 %v7713_v62  ;;  %v7822_v61 = vld [vmem:[%s8672_s27 + $0x4] ss:$8 sps:$4 sm:$0xff]   ;;  %v7823_v62 = vld [vmem:[%s10117_s1 + $0xf0] sm:$0xff]  }
  0x72   : > { %6871 = vmatprep.mubr.msk.bf16.mxu0 %vm897_vm0, %v7716_v63  ;;  %6894 = vmatprep.mubr.msk.bf16.mxu1 %vm897_vm0, %v7718_v0  ;;  %v7850_v63 = vld [vmem:[%s10117_s1 + $0xf8] sm:$0xff]   ;;  %v7820_v0 = vld [vmem:[%s8672_s27] ss:$8 sps:$4 sm:$0xff]  }
  0x79   : > { %1130 = vmatmul.mubr.bf16.gmra.mrb[32].mxu0 %v7720_v2  ;;  %1314 = vmatmul.mubr.bf16.gmra.mrb[32].mxu1 %v7721_v3  ;;  %v7824_v2 = vld [vmem:[%s8662_s21 + $0x10] ss:$8 sps:$4 sm:$0xff]   ;;  %v7825_v3 = vld [vmem:[%s10117_s1 + $0x140] sm:$0xff]  }
  0x7a   : > { %6872 = vmatprep.mubr.msk.bf16.mxu0 %vm897_vm0, %v7722_v4  ;;  %6895 = vmatprep.mubr.msk.bf16.mxu1 %vm897_vm0, %v7724_v5  ;;  %v7826_v4 = vld [vmem:[%s8662_s21 + $0x24] ss:$8 sps:$4 sm:$0xff]   ;;  %v7828_v5 = vld [vmem:[%s8672_s27 + $0x14] ss:$8 sps:$4 sm:$0xff]  }
  0x81   : > { %1138 = vmatmul.mubr.bf16.gmra.mrb[36].mxu0 %v7726_v6  ;;  %1322 = vmatmul.mubr.bf16.gmra.mrb[36].mxu1 %v7727_v7  ;;  %v7880_v6 = vld [vmem:[%s10117_s1 + $0x100] sm:$0xff]   ;;  %v7851_v7 = vld [vmem:[%s10117_s1 + $0x148] sm:$0xff]  }
  0x82   : > { %6873 = vmatprep.mubr.msk.bf16.mxu0 %vm897_vm0, %v7730_v8  ;;  %6896 = vmatprep.mubr.msk.bf16.mxu1 %vm897_vm0, %v7732_v9  ;;  %v7908_v8 = vld [vmem:[%s10117_s1 + $0x108] sm:$0xff]  }
  0x83   : > { %v7830_v9 = vld [vmem:[%s8662_s21 + $0x20] ss:$8 sps:$4 sm:$0xff]  }
  0x89   : > { %1146 = vmatmul.mubr.bf16.gmra.mrb[40].mxu0 %v7734_v10  ;;  %1330 = vmatmul.mubr.bf16.gmra.mrb[40].mxu1 %v7735_v11  ;;  %v7831_v10 = vld [vmem:[%s8672_s27 + $0x10] ss:$8 sps:$4 sm:$0xff]   ;;  %v7832_v11 = vld [vmem:[%s8662_s21 + $0x34] ss:$8 sps:$4 sm:$0xff]  }
  0x8a   : > { %6874 = vmatprep.mubr.msk.bf16.mxu0 %vm897_vm0, %v7736_v12  ;;  %6897 = vmatprep.mubr.msk.bf16.mxu1 %vm897_vm0, %v7738_v13  ;;  %v7834_v12 = vld [vmem:[%s8672_s27 + $0x24] ss:$8 sps:$4 sm:$0xff]   ;;  %v7883_v13 = vld [vmem:[%s10117_s1 + $0x150] sm:$0xff]  }
  0x91   : > { %1154 = vmatmul.mubr.bf16.gmra.mrb[44].mxu0 %v7740_v14  ;;  %1338 = vmatmul.mubr.bf16.gmra.mrb[44].mxu1 %v7741_v15  ;;  %v7909_v14 = vld [vmem:[%s10117_s1 + $0x158] sm:$0xff]  }
  0x92   : > { %6875 = vmatprep.mubr.msk.bf16.mxu0 %vm897_vm0, %v7743_v16  ;;  %6898 = vmatprep.mubr.msk.bf16.mxu1 %vm897_vm0, %v7745_v17  ;;  %v7836_v15 = vld [vmem:[%s8662_s21 + $0x30] ss:$8 sps:$4 sm:$0xff]   ;;  %v7837_v16 = vld [vmem:[%s8672_s27 + $0x20] ss:$8 sps:$4 sm:$0xff]   ;;  %v7838_v17 = vld [vmem:[%s8662_s21 + $0x44] ss:$8 sps:$4 sm:$0xff]  }
  0x99   : > { %1162 = vmatmul.mubr.bf16.gmra.mrb[48].mxu0 %v7748_v18  ;;  %1346 = vmatmul.mubr.bf16.gmra.mrb[48].mxu1 %v7749_v19  ;;  %v7840_v18 = vld [vmem:[%s8672_s27 + $0x34] ss:$8 sps:$4 sm:$0xff]  }
  0x9a   : > { %6876 = vmatprep.mubr.msk.bf16.mxu0 %vm897_vm0, %v7750_v20  ;;  %6899 = vmatprep.mubr.msk.bf16.mxu1 %vm897_vm0, %v7752_v21  ;;  %v7938_v19 = vld [vmem:[%s10117_s1 + $0x110] sm:$0xff]   ;;  %v7941_v20 = vld [vmem:[%s10117_s1 + $0x160] sm:$0xff]  }
  0x9b   : > { %v7842_v21 = vld [vmem:[%s8662_s21 + $0x40] ss:$8 sps:$4 sm:$0xff]  }
  0xa1   : > { %1170 = vmatmul.mubr.bf16.gmra.mrb[52].mxu0 %v7754_v22  ;;  %1354 = vmatmul.mubr.bf16.gmra.mrb[52].mxu1 %v7755_v23  ;;  %v7843_v22 = vld [vmem:[%s8672_s27 + $0x30] ss:$8 sps:$4 sm:$0xff]   ;;  %v7844_v23 = vld [vmem:[%s8662_s21 + $0x54] ss:$8 sps:$4 sm:$0xff]  }
  0xa2   : > { %6877 = vmatprep.mubr.msk.bf16.mxu0 %vm897_vm0, %v7756_v24  ;;  %6900 = vmatprep.mubr.msk.bf16.mxu1 %vm897_vm0, %v7758_v25  ;;  %v7846_v24 = vld [vmem:[%s8672_s27 + $0x44] ss:$8 sps:$4 sm:$0xff]  }
  0xa9   : > { %1178 = vmatmul.mubr.bf16.gmra.mrb[56].mxu0 %v7760_v26  ;;  %1362 = vmatmul.mubr.bf16.gmra.mrb[56].mxu1 %v7761_v27 }
  0xaa   : > { %6878 = vmatprep.mubr.msk.bf16.mxu0 %vm897_vm0, %v7764_v28  ;;  %6901 = vmatprep.mubr.msk.bf16.mxu1 %vm897_vm0, %v7766_v29  ;;  %v7848_v29 = vld [vmem:[%s8662_s21 + $0x50] ss:$8 sps:$4 sm:$0xff]  }
  0xb1   : > { %1186 = vmatmul.mubr.bf16.gmra.mrb[60].mxu0 %v7768_v30  ;;  %1370 = vmatmul.mubr.bf16.gmra.mrb[60].mxu1 %v7769_v31  ;;  %v7849_v30 = vld [vmem:[%s8672_s27 + $0x40] ss:$8 sps:$4 sm:$0xff]  }
  0xb2   : > { %6879 = vmatprep.mubr.msk.bf16.mxu0 %vm897_vm0, %v7770_v32  ;;  %6902 = vmatprep.mubr.msk.bf16.mxu1 %vm897_vm0, %v7772_v33  ;;  %v7852_v33 = vld [vmem:[%s8662_s21 + $0x64] ss:$8 sps:$4 sm:$0xff]  }
  0xb9   : > { %1194 = vmatmul.mubr.bf16.gmra.mrb[64].mxu0 %v7774_v34  ;;  %1378 = vmatmul.mubr.bf16.gmra.mrb[64].mxu1 %v7775_v35  ;;  %v7854_v34 = vld [vmem:[%s8672_s27 + $0x54] ss:$8 sps:$4 sm:$0xff]  }
  0xba   : > { %6880 = vmatprep.mubr.msk.bf16.mxu0 %vm897_vm0, %v7778_v36  ;;  %6903 = vmatprep.mubr.msk.bf16.mxu1 %vm897_vm0, %v7780_v37 }
  0xc1   : > { %1202 = vmatmul.mubr.bf16.gmra.mrb[68].mxu0 %v7782_v38  ;;  %1386 = vmatmul.mubr.bf16.gmra.mrb[68].mxu1 %v7783_v39 }
  0xc2   : > { %6881 = vmatprep.mubr.msk.bf16.mxu0 %vm897_vm0, %v7784_v40  ;;  %6904 = vmatprep.mubr.msk.bf16.mxu1 %vm897_vm0, %v7786_v41  ;;  %v7856_v41 = vld [vmem:[%s8662_s21 + $0x60] ss:$8 sps:$4 sm:$0xff]  }
  0xc9   : > { %1210 = vmatmul.mubr.bf16.gmra.mrb[72].mxu0 %v7788_v42  ;;  %1394 = vmatmul.mubr.bf16.gmra.mrb[72].mxu1 %v7789_v43  ;;  %v7857_v42 = vld [vmem:[%s8672_s27 + $0x50] ss:$8 sps:$4 sm:$0xff]  }
  0xca   : > { %6882 = vmatprep.mubr.msk.bf16.mxu0 %vm897_vm0, %v7792_v44  ;;  %6905 = vmatprep.mubr.msk.bf16.mxu1 %vm897_vm0, %v7794_v45  ;;  %v7858_v45 = vld [vmem:[%s8662_s21 + $0x74] ss:$8 sps:$4 sm:$0xff]  }
  0xd1   : > { %1218 = vmatmul.mubr.bf16.gmra.mrb[76].mxu0 %v7796_v46  ;;  %1402 = vmatmul.mubr.bf16.gmra.mrb[76].mxu1 %v7797_v47  ;;  %v7860_v46 = vld [vmem:[%s8672_s27 + $0x64] ss:$8 sps:$4 sm:$0xff]  }
  0xd2   : > { %6883 = vmatprep.mubr.msk.bf16.mxu0 %vm897_vm0, %v7798_v48  ;;  %6906 = vmatprep.mubr.msk.bf16.mxu1 %vm897_vm0, %v7800_v49 }
  0xd9   : > { %1226 = vmatmul.mubr.bf16.gmra.mrb[80].mxu0 %v7802_v50  ;;  %1410 = vmatmul.mubr.bf16.gmra.mrb[80].mxu1 %v7803_v51 }
  0xda   : > { %6884 = vmatprep.mubr.msk.bf16.mxu0 %vm897_vm0, %v7805_v52  ;;  %6907 = vmatprep.mubr.msk.bf16.mxu1 %vm897_vm0, %v7807_v53  ;;  %v7862_v53 = vld [vmem:[%s8662_s21 + $0x70] ss:$8 sps:$4 sm:$0xff]  }
  0xe1   : > { %1234 = vmatmul.mubr.bf16.gmra.mrb[84].mxu0 %v7810_v54  ;;  %1418 = vmatmul.mubr.bf16.gmra.mrb[84].mxu1 %v7811_v55  ;;  %v7863_v54 = vld [vmem:[%s8672_s27 + $0x60] ss:$8 sps:$4 sm:$0xff]  }
  0xe2   : > { %6885 = vmatprep.mubr.msk.bf16.mxu0 %vm897_vm0, %v7812_v56  ;;  %7008 = vmatprep.mubr.msk.bf16.mxu1 %vm897_vm0, %v7816_v57  ;;  %v7864_v57 = vld [vmem:[%s8662_s21 + $0x84] ss:$8 sps:$4 sm:$0xff]  }
  0xe9   : > { %1242 = vmatmul.mubr.bf16.gmra.mrb[88].mxu0 %v7817_v59  ;;  %2059 = vmatmul.mubr.bf16.vlgmr.msra.gmra.mrb[88].mxu1 %v7814_v58  ;;  %v7866_v58 = vld [vmem:[%s8672_s27 + $0x74] ss:$8 sps:$4 sm:$0xff]  }
  0xea   : > { %7009 = vmatprep.mubr.msk.bf16.mxu1 %vm897_vm0, %v7818_v60  ;;  %7175 = vmatprep.mubr.msk.bf16.mxu0 %vm897_vm0, %v7822_v61 }
  0xeb   : > { %4339 = vmatpush1.bf16.msra.mxu1 %v7823_v62 }
  0xec   : > { %4340 = vmatprep.subr.bf16.mxu1 %v10120_v1 }
  0xef   : > { %4341 = vmatpush1.bf16.msra.mxu1 %v7850_v63  ;;  %v7868_v63 = vld [vmem:[%s8662_s21 + $0x80] ss:$8 sps:$4 sm:$0xff]  }
  0xf0   : > { %4342 = vmatprep.subr.bf16.mxu1 %v10120_v1 }
  0xf1   : > { %2067 = vmatmul.mubr.bf16.gmra.mrb[92].mxu1 %v7824_v2  ;;  %3170 = vmatmul.mubr.bf16.vlgmr.msra.gmra.mrb[92].mxu0 %v7820_v0  ;;  %v7966_v0 = vld [vmem:[%s10117_s1 + $0x118] sm:$0xff]  }
  0xf2   : > { %5540 = vmatpush1.bf16.msra.mxu0 %v7825_v3  ;;  %7010 = vmatprep.mubr.msk.bf16.mxu1 %vm897_vm0, %v7826_v4  ;;  %v7869_v4 = vld [vmem:[%s8672_s27 + $0x70] ss:$8 sps:$4 sm:$0xff]  }
  0xf3   : > { %7176 = vmatprep.mubr.msk.bf16.mxu0 %vm897_vm0, %v7828_v5  ;;  %5541 = vmatprep.subr.bf16.mxu0 %v10120_v1  ;;  %v7870_v5 = vld [vmem:[%s8662_s21 + $0x94] ss:$8 sps:$4 sm:$0xff]  }
  0xf4   : > { %4343 = vmatpush1.bf16.msra.mxu1 %v7880_v6 }
  0xf5   : > { %4344 = vmatprep.subr.bf16.mxu1 %v10120_v1 }
  0xf6   : > { %5542 = vmatpush1.bf16.msra.mxu0 %v7851_v7 }
  0xf7   : > { %5543 = vmatprep.subr.bf16.mxu0 %v10120_v1 }
  0xf8   : > { %4345 = vmatpush1.bf16.msra.mxu1 %v7908_v8  ;;  %v7872_v8 = vld [vmem:[%s8672_s27 + $0x84] ss:$8 sps:$4 sm:$0xff]  }
  0xf9   : > { %2075 = vmatmul.mubr.bf16.gmra.mrb[96].mxu1 %v7830_v9  ;;  %3178 = vmatmul.mubr.bf16.gmra.mrb[96].mxu0 %v7831_v10  ;;  %v7967_v9 = vld [vmem:[%s10117_s1 + $0x168] sm:$0xff]  }
  0xfa   : > { %7011 = vmatprep.mubr.msk.bf16.mxu1 %vm897_vm0, %v7832_v11  ;;  %7177 = vmatprep.mubr.msk.bf16.mxu0 %vm897_vm0, %v7834_v12 }
  0xfb   : > { %5544 = vmatpush1.bf16.msra.mxu0 %v7883_v13  ;;  %4346 = vmatprep.subr.bf16.mxu1 %v10120_v1 }
  0xfc   : > { %5545 = vmatprep.subr.bf16.mxu0 %v10120_v1  ;;  %4347 = vmatpush1.bf16.msra.mxu1 %v7938_v19 }
  0xfd   : > { %4348 = vmatprep.subr.bf16.mxu1 %v10120_v1 }
  0xff   : > { %5546 = vmatpush1.bf16.msra.mxu0 %v7909_v14 }
 0x100   : > { %5547 = vmatprep.subr.bf16.mxu0 %v10120_v1  ;;  %4349 = vmatpush1.bf16.msra.mxu1 %v7966_v0 }
 0x101   : > { %2083 = vmatmul.mubr.bf16.gmra.mrb[100].mxu1 %v7836_v15  ;;  %3186 = vmatmul.mubr.bf16.gmra.mrb[100].mxu0 %v7837_v16  ;;  %v7874_v16 = vld [vmem:[%s8662_s21 + $0x90] ss:$8 sps:$4 sm:$0xff]  }
 0x102   : > { %7012 = vmatprep.mubr.msk.bf16.mxu1 %vm897_vm0, %v7838_v17  ;;  %7178 = vmatprep.mubr.msk.bf16.mxu0 %vm897_vm0, %v7840_v18  ;;  %v7875_v17 = vld [vmem:[%s8672_s27 + $0x80] ss:$8 sps:$4 sm:$0xff]  }
 0x103   : > { %5548 = vmatpush1.bf16.msra.mxu0 %v7941_v20  ;;  %4350 = vmatprep.subr.bf16.mxu1 %v10120_v1  ;;  %v7876_v20 = vld [vmem:[%s8662_s21 + $0xa4] ss:$8 sps:$4 sm:$0xff]  }
 0x104   : > { %5549 = vmatprep.subr.bf16.mxu0 %v10120_v1 }
 0x107   : > { %5550 = vmatpush1.bf16.msra.mxu0 %v7967_v9  ;;  %v7896_v9 = vld [vmem:[%s8662_s21 + $0xd4] ss:$8 sps:$4 sm:$0xff]  }
 0x108   : > { %5551 = vmatprep.subr.bf16.mxu0 %v10120_v1 }
 0x109   : > { %2091 = vmatmul.mubr.bf16.gmra.mrb[104].mxu1 %v7842_v21  ;;  %3194 = vmatmul.mubr.bf16.gmra.mrb[104].mxu0 %v7843_v22  ;;  %v7878_v21 = vld [vmem:[%s8672_s27 + $0x94] ss:$8 sps:$4 sm:$0xff]  }
 0x10a   : > { %7013 = vmatprep.mubr.msk.bf16.mxu1 %vm897_vm0, %v7844_v23  ;;  %7179 = vmatprep.mubr.msk.bf16.mxu0 %vm897_vm0, %v7846_v24 }
 0x10c   : > { %v8831_v25 = vpop.f32.mrb[0].mxu0  ;;  %v8833_v26 = vpop.f32.mrb[0].mxu1 }
 0x10d   : > { %v1069_v27 = vpop.f32.mrb[1].mxu0  ;;  %v1253_v28 = vpop.f32.mrb[1].mxu1 }
 0x10e   : > { %v8837_v31 = vpop.f32.mrb[2].mxu0  ;;  %v8839_v32 = vpop.f32.mrb[2].mxu1 }
 0x10f   : > { %v1072_v35 = vpop.f32.mrb[3].mxu0  ;;  %v1256_v36 = vpop.f32.mrb[3].mxu1 }
 0x110   : > { %v7884_v36 = vld [vmem:[%s8662_s21 + $0xb4] ss:$8 sps:$4 sm:$0xff]  }
 0x111   : > { %2099 = vmatmul.mubr.bf16.gmra.mrb[108].mxu1 %v7848_v29  ;;  %3202 = vmatmul.mubr.bf16.gmra.mrb[108].mxu0 %v7849_v30  ;;  %v7881_v30 = vld [vmem:[%s8662_s21 + $0xa0] ss:$8 sps:$4 sm:$0xff]  }
 0x112   : > { %7014 = vmatprep.mubr.msk.bf16.mxu1 %vm897_vm0, %v7852_v33  ;;  %7180 = vmatprep.mubr.msk.bf16.mxu0 %vm897_vm0, %v7854_v34  ;;  %v7882_v33 = vld [vmem:[%s8672_s27 + $0x90] ss:$8 sps:$4 sm:$0xff]  }
 0x114   : > { %v8845_v37 = vpop.f32.mrb[4].mxu0  ;;  %v8847_v38 = vpop.f32.mrb[4].mxu1 }
 0x115   : > { %10122 = vst [vmem:[#allocation3_spill] sm:$0xff] %v8847_v38  ;;  %v1077_v39 = vpop.f32.mrb[5].mxu0  ;;  %v1261_v40 = vpop.f32.mrb[5].mxu1 }
 0x116   : > { %v8851_v43 = vpop.f32.mrb[6].mxu0  ;;  %v8853_v44 = vpop.f32.mrb[6].mxu1  ;;  %v7886_v39 = vld [vmem:[%s8672_s27 + $0xa4] ss:$8 sps:$4 sm:$0xff]  }
 0x117   : > { %10123 = vst [vmem:[#allocation4_spill] sm:$0xff] %v8853_v44  ;;  %v1080_v47 = vpop.f32.mrb[7].mxu0  ;;  %v1264_v48 = vpop.f32.mrb[7].mxu1  ;;  %v7998_v44 = vld [vmem:[%s8672_s27 + $0x1b0] ss:$8 sps:$4 sm:$0xff]  }
 0x118   : > { %v7888_v48 = vld [vmem:[%s8662_s21 + $0xb0] ss:$8 sps:$4 sm:$0xff]  }
 0x119   : > { %2107 = vmatmul.mubr.bf16.gmra.mrb[112].mxu1 %v7856_v41  ;;  %3210 = vmatmul.mubr.bf16.gmra.mrb[112].mxu0 %v7857_v42 }
 0x11a   : > { %7015 = vmatprep.mubr.msk.bf16.mxu1 %vm897_vm0, %v7858_v45  ;;  %7181 = vmatprep.mubr.msk.bf16.mxu0 %vm897_vm0, %v7860_v46 }
 0x11c   : > { %v8859_v49 = vpop.f32.mrb[8].mxu0  ;;  %v8861_v50 = vpop.f32.mrb[8].mxu1 }
 0x11d   : > { %10124 = vst [vmem:[#allocation5_spill] sm:$0xff] %v8861_v50  ;;  %v1085_v51 = vpop.f32.mrb[9].mxu0  ;;  %v1269_v52 = vpop.f32.mrb[9].mxu1  ;;  %v7997_v50 = vld [vmem:[%s8662_s21 + $0x1c0] ss:$8 sps:$4 sm:$0xff]  }
 0x11e   : > { %v8865_v55 = vpop.f32.mrb[10].mxu0  ;;  %v8867_v56 = vpop.f32.mrb[10].mxu1  ;;  %v7889_v51 = vld [vmem:[%s8672_s27 + $0xa0] ss:$8 sps:$4 sm:$0xff]  }
 0x11f   : > { %10125 = vst [vmem:[#allocation6_spill] sm:$0xff] %v8867_v56  ;;  %v1088_v59 = vpop.f32.mrb[11].mxu0  ;;  %v1272_v60 = vpop.f32.mrb[11].mxu1 }
 0x121   : > { %2115 = vmatmul.mubr.bf16.gmra.mrb[116].mxu1 %v7862_v53  ;;  %3218 = vmatmul.mubr.bf16.gmra.mrb[116].mxu0 %v7863_v54  ;;  %v7890_v54 = vld [vmem:[%s8662_s21 + $0xc4] ss:$8 sps:$4 sm:$0xff]  }
 0x122   : > { %7016 = vmatprep.mubr.msk.bf16.mxu1 %vm897_vm0, %v7864_v57  ;;  %7182 = vmatprep.mubr.msk.bf16.mxu0 %vm897_vm0, %v7866_v58  ;;  %v7892_v57 = vld [vmem:[%s8672_s27 + $0xb4] ss:$8 sps:$4 sm:$0xff]  }
 0x124   : > { %v8873_v61 = vpop.f32.mrb[12].mxu0  ;;  %v8875_v62 = vpop.f32.mrb[12].mxu1 }
 0x125   : > { %10126 = vst [vmem:[#allocation7_spill] sm:$0xff] %v8875_v62  ;;  %v1093_v2 = vpop.f32.mrb[13].mxu0  ;;  %v1277_v3 = vpop.f32.mrb[13].mxu1 }
 0x126   : > { %v8883_v6 = vpop.f32.mrb[14].mxu0  ;;  %v8885_v7 = vpop.f32.mrb[14].mxu1  ;;  %v7894_v3 = vld [vmem:[%s8662_s21 + $0xc0] ss:$8 sps:$4 sm:$0xff]  }
 0x127   : > { %10127 = vst [vmem:[#allocation8_spill] sm:$0xff] %v8885_v7  ;;  %v1096_v10 = vpop.f32.mrb[15].mxu0  ;;  %v1280_v11 = vpop.f32.mrb[15].mxu1 }
 0x128   : > { %v7898_v10 = vld [vmem:[%s8672_s27 + $0xc4] ss:$8 sps:$4 sm:$0xff]  }
 0x129   : > { %2123 = vmatmul.mubr.bf16.gmra.mrb[120].mxu1 %v7868_v63  ;;  %3226 = vmatmul.mubr.bf16.gmra.mrb[120].mxu0 %v7869_v4  ;;  %v7895_v4 = vld [vmem:[%s8672_s27 + $0xb0] ss:$8 sps:$4 sm:$0xff]  }
 0x12a   : > { %7017 = vmatprep.mubr.msk.bf16.mxu1 %vm897_vm0, %v7870_v5  ;;  %7183 = vmatprep.mubr.msk.bf16.mxu0 %vm897_vm0, %v7872_v8 }
 0x12c   : > { %v8895_v12 = vpop.f32.mrb[16].mxu0  ;;  %v8897_v13 = vpop.f32.mrb[16].mxu1 }
 0x12d   : > { %10128 = vst [vmem:[#allocation9_spill] sm:$0xff] %v8897_v13  ;;  %v1101_v14 = vpop.f32.mrb[17].mxu0  ;;  %v1285_v15 = vpop.f32.mrb[17].mxu1  ;;  %v7991_v13 = vld [vmem:[%s8672_s27 + $0x1a0] ss:$8 sps:$4 sm:$0xff]  }
 0x12e   : > { %v8901_v18 = vpop.f32.mrb[18].mxu0  ;;  %v8903_v19 = vpop.f32.mrb[18].mxu1  ;;  %v7996_v15 = vld [vmem:[%s10117_s1 + $0x120] sm:$0xff]  }
 0x12f   : > { %10129 = vst [vmem:[#allocation10_spill] sm:$0xff] %v8903_v19  ;;  %v1104_v22 = vpop.f32.mrb[19].mxu0  ;;  %v1288_v23 = vpop.f32.mrb[19].mxu1  ;;  %4351 = vmatpush1.bf16.msra.mxu1 %v7996_v15  ;;  %v7915_v15 = vld [vmem:[%s8672_s27 + $0xe0] ss:$8 sps:$4 sm:$0xff]  }
 0x130   : > { %4352 = vmatprep.subr.bf16.mxu1 %v10120_v1  ;;  %v7900_v23 = vld [vmem:[%s8662_s21 + $0xd0] ss:$8 sps:$4 sm:$0xff]  }
 0x131   : > { %2131 = vmatmul.mubr.bf16.gmra.mrb[124].mxu1 %v7874_v16  ;;  %3234 = vmatmul.mubr.bf16.gmra.mrb[124].mxu0 %v7875_v17  ;;  %v7999_v16 = vld [vmem:[%s10117_s1 + $0x170] sm:$0xff]  }
 0x132   : > { %7018 = vmatprep.mubr.msk.bf16.mxu1 %vm897_vm0, %v7876_v20  ;;  %7184 = vmatprep.mubr.msk.bf16.mxu0 %vm897_vm0, %v7878_v21 }
 0x133   : > { %5552 = vmatpush1.bf16.msra.mxu0 %v7999_v16 }
 0x134   : > { %v8909_v24 = vpop.f32.mrb[20].mxu0  ;;  %v8911_v27 = vpop.f32.mrb[20].mxu1  ;;  %5553 = vmatprep.subr.bf16.mxu0 %v10120_v1 }
 0x135   : > { %10130 = vst [vmem:[#allocation11_spill] sm:$0xff] %v8911_v27  ;;  %v1109_v28 = vpop.f32.mrb[21].mxu0  ;;  %v1293_v29 = vpop.f32.mrb[21].mxu1 }
 0x136   : > { %v8915_v34 = vpop.f32.mrb[22].mxu0  ;;  %v8917_v35 = vpop.f32.mrb[22].mxu1  ;;  %v7901_v28 = vld [vmem:[%s8672_s27 + $0xc0] ss:$8 sps:$4 sm:$0xff]  }
 0x137   : > { %10131 = vst [vmem:[#allocation12_spill] sm:$0xff] %v8917_v35  ;;  %v1112_v40 = vpop.f32.mrb[23].mxu0  ;;  %v1296_v41 = vpop.f32.mrb[23].mxu1 }
 0x139   : > { %2139 = vmatmul.mubr.bf16.gmra.mrb[128].mxu1 %v7881_v30  ;;  %3242 = vmatmul.mubr.bf16.gmra.mrb[128].mxu0 %v7882_v33  ;;  %v7902_v33 = vld [vmem:[%s8662_s21 + $0xe4] ss:$8 sps:$4 sm:$0xff]  }
 0x13a   : > { %7019 = vmatprep.mubr.msk.bf16.mxu1 %vm897_vm0, %v7884_v36  ;;  %7185 = vmatprep.mubr.msk.bf16.mxu0 %vm897_vm0, %v7886_v39  ;;  %v7904_v36 = vld [vmem:[%s8672_s27 + $0xd4] ss:$8 sps:$4 sm:$0xff]  }
 0x13c   : > { %v8923_v42 = vpop.f32.mrb[24].mxu0  ;;  %v8925_v45 = vpop.f32.mrb[24].mxu1 }
 0x13d   : > { %10132 = vst [vmem:[#allocation13_spill] sm:$0xff] %v8925_v45  ;;  %v1117_v46 = vpop.f32.mrb[25].mxu0  ;;  %v1301_v47 = vpop.f32.mrb[25].mxu1  ;;  %v7979_v45 = vld [vmem:[%s8672_s27 + $0x180] ss:$8 sps:$4 sm:$0xff]  }
 0x13e   : > { %v8929_v52 = vpop.f32.mrb[26].mxu0  ;;  %v8931_v53 = vpop.f32.mrb[26].mxu1 }
 0x13f   : > { %10133 = vst [vmem:[#allocation14_spill] sm:$0xff] %v8931_v53  ;;  %v1120_v58 = vpop.f32.mrb[27].mxu0  ;;  %v1304_v59 = vpop.f32.mrb[27].mxu1 }
 0x140   : > { %v7910_v59 = vld [vmem:[%s8662_s21 + $0xf4] ss:$8 sps:$4 sm:$0xff]  }
 0x141   : > { %2147 = vmatmul.mubr.bf16.gmra.mrb[132].mxu1 %v7888_v48  ;;  %3250 = vmatmul.mubr.bf16.gmra.mrb[132].mxu0 %v7889_v51  ;;  %v7906_v51 = vld [vmem:[%s8662_s21 + $0xe0] ss:$8 sps:$4 sm:$0xff]  }
 0x142   : > { %7020 = vmatprep.mubr.msk.bf16.mxu1 %vm897_vm0, %v7890_v54  ;;  %7186 = vmatprep.mubr.msk.bf16.mxu0 %vm897_vm0, %v7892_v57  ;;  %v7907_v54 = vld [vmem:[%s8672_s27 + $0xd0] ss:$8 sps:$4 sm:$0xff]  }
 0x144   : > { %v8937_v60 = vpop.f32.mrb[28].mxu0  ;;  %v8939_v63 = vpop.f32.mrb[28].mxu1 }
 0x145   : > { %10134 = vst [vmem:[#allocation15_spill] sm:$0xff] %v8939_v63  ;;  %v1125_v0 = vpop.f32.mrb[29].mxu0  ;;  %v1309_v2 = vpop.f32.mrb[29].mxu1  ;;  %v7972_v63 = vld [vmem:[%s8662_s21 + $0x180] ss:$8 sps:$4 sm:$0xff]  }
 0x146   : > { %v8943_v5 = vpop.f32.mrb[30].mxu0  ;;  %v8945_v8 = vpop.f32.mrb[30].mxu1  ;;  %v7912_v0 = vld [vmem:[%s8672_s27 + $0xe4] ss:$8 sps:$4 sm:$0xff]  }
 0x147   : > { %10135 = vst [vmem:[#allocation16_spill] sm:$0xff] %v8945_v8  ;;  %v1128_v11 = vpop.f32.mrb[31].mxu0  ;;  %v1312_v14 = vpop.f32.mrb[31].mxu1 }
 0x148   : > { %v7914_v14 = vld [vmem:[%s8662_s21 + $0xf0] ss:$8 sps:$4 sm:$0xff]  }
 0x149   : > { %2155 = vmatmul.mubr.bf16.gmra.mrb[136].mxu1 %v7894_v3  ;;  %3258 = vmatmul.mubr.bf16.gmra.mrb[136].mxu0 %v7895_v4 }
 0x14a   : > { %7021 = vmatprep.mubr.msk.bf16.mxu1 %vm897_vm0, %v7896_v9  ;;  %7187 = vmatprep.mubr.msk.bf16.mxu0 %vm897_vm0, %v7898_v10 }
 0x14c   : > { %v8957_v17 = vpop.f32.mrb[32].mxu0  ;;  %v8959_v20 = vpop.f32.mrb[32].mxu1 }
 0x14d   : > { %10136 = vst [vmem:[#allocation17_spill] sm:$0xff] %v8959_v20  ;;  %v1133_v21 = vpop.f32.mrb[33].mxu0  ;;  %v1317_v22 = vpop.f32.mrb[33].mxu1  ;;  %v7964_v20 = vld [vmem:[%s8662_s21 + $0x170] ss:$8 sps:$4 sm:$0xff]  }
 0x14e   : > { %v8965_v29 = vpop.f32.mrb[34].mxu0  ;;  %v8967_v30 = vpop.f32.mrb[34].mxu1  ;;  %v7916_v22 = vld [vmem:[%s8662_s21 + $0x104] ss:$8 sps:$4 sm:$0xff]  }
 0x14f   : > { %10137 = vst [vmem:[#allocation18_spill] sm:$0xff] %v8967_v30  ;;  %v1136_v39 = vpop.f32.mrb[35].mxu0  ;;  %v1320_v40 = vpop.f32.mrb[35].mxu1 }
 0x151   : > { %2163 = vmatmul.mubr.bf16.gmra.mrb[140].mxu1 %v7900_v23  ;;  %3266 = vmatmul.mubr.bf16.gmra.mrb[140].mxu0 %v7901_v28  ;;  %v7918_v23 = vld [vmem:[%s8672_s27 + $0xf4] ss:$8 sps:$4 sm:$0xff]  }
 0x152   : > { %7022 = vmatprep.mubr.msk.bf16.mxu1 %vm897_vm0, %v7902_v33  ;;  %7188 = vmatprep.mubr.msk.bf16.mxu0 %vm897_vm0, %v7904_v36 }
 0x154   : > { %v8973_v41 = vpop.f32.mrb[36].mxu0  ;;  %v8975_v46 = vpop.f32.mrb[36].mxu1 }
 0x155   : > { %10138 = vst [vmem:[#allocation19_spill] sm:$0xff] %v8975_v46  ;;  %v1141_v47 = vpop.f32.mrb[37].mxu0  ;;  %v1325_v48 = vpop.f32.mrb[37].mxu1 }
 0x156   : > { %v8979_v57 = vpop.f32.mrb[38].mxu0  ;;  %v8981_v58 = vpop.f32.mrb[38].mxu1  ;;  %v7920_v48 = vld [vmem:[%s8662_s21 + $0x100] ss:$8 sps:$4 sm:$0xff]  }
 0x157   : > { %10139 = vst [vmem:[#allocation20_spill] sm:$0xff] %v8981_v58  ;;  %v1144_v2 = vpop.f32.mrb[39].mxu0  ;;  %v1328_v3 = vpop.f32.mrb[39].mxu1 }
 0x158   : > { %v7924_v2 = vld [vmem:[%s8672_s27 + $0x104] ss:$8 sps:$4 sm:$0xff]  }
 0x159   : > { %2171 = vmatmul.mubr.bf16.gmra.mrb[144].mxu1 %v7906_v51  ;;  %3274 = vmatmul.mubr.bf16.gmra.mrb[144].mxu0 %v7907_v54  ;;  %v7921_v51 = vld [vmem:[%s8672_s27 + $0xf0] ss:$8 sps:$4 sm:$0xff]  }
 0x15a   : > { %7023 = vmatprep.mubr.msk.bf16.mxu1 %vm897_vm0, %v7910_v59  ;;  %7189 = vmatprep.mubr.msk.bf16.mxu0 %vm897_vm0, %v7912_v0  ;;  %v7922_v0 = vld [vmem:[%s8662_s21 + $0x114] ss:$8 sps:$4 sm:$0xff]  }
 0x15c   : > { %v8987_v4 = vpop.f32.mrb[40].mxu0  ;;  %v8989_v9 = vpop.f32.mrb[40].mxu1 }
 0x15d   : > { %10140 = vst [vmem:[#allocation21_spill] sm:$0xff] %v8989_v9  ;;  %v1149_v10 = vpop.f32.mrb[41].mxu0  ;;  %v1333_v11 = vpop.f32.mrb[41].mxu1  ;;  %v7952_v9 = vld [vmem:[%s8662_s21 + $0x150] ss:$8 sps:$4 sm:$0xff]  }
 0x15e   : > { %v8993_v16 = vpop.f32.mrb[42].mxu0  ;;  %v8995_v21 = vpop.f32.mrb[42].mxu1 }
 0x15f   : > { %10141 = vst [vmem:[#allocation22_spill] sm:$0xff] %v8995_v21  ;;  %v1152_v28 = vpop.f32.mrb[43].mxu0  ;;  %v1336_v33 = vpop.f32.mrb[43].mxu1 }
 0x160   : > { %v7927_v28 = vld [vmem:[%s8672_s27 + $0x100] ss:$8 sps:$4 sm:$0xff]  }
 0x161   : > { %2179 = vmatmul.mubr.bf16.gmra.mrb[148].mxu1 %v7914_v14  ;;  %3282 = vmatmul.mubr.bf16.gmra.mrb[148].mxu0 %v7915_v15  ;;  %v7926_v15 = vld [vmem:[%s8662_s21 + $0x110] ss:$8 sps:$4 sm:$0xff]   ;;  %v8024_v33 = vld [vmem:[%s10117_s1 + $0x128] sm:$0xff]  }
 0x162   : > { %7024 = vmatprep.mubr.msk.bf16.mxu1 %vm897_vm0, %v7916_v22  ;;  %7190 = vmatprep.mubr.msk.bf16.mxu0 %vm897_vm0, %v7918_v23 }
 0x163   : > { %4353 = vmatpush1.bf16.msra.mxu1 %v8024_v33 }
 0x164   : > { %v9001_v36 = vpop.f32.mrb[44].mxu0  ;;  %v9003_v39 = vpop.f32.mrb[44].mxu1  ;;  %4354 = vmatprep.subr.bf16.mxu1 %v10120_v1 }
 0x165   : > { %10142 = vst [vmem:[#allocation23_spill] sm:$0xff] %v9003_v39  ;;  %v1157_v40 = vpop.f32.mrb[45].mxu0  ;;  %v1341_v47 = vpop.f32.mrb[45].mxu1  ;;  %v7946_v39 = vld [vmem:[%s8662_s21 + $0x140] ss:$8 sps:$4 sm:$0xff]  }
 0x166   : > { %v9007_v54 = vpop.f32.mrb[46].mxu0  ;;  %v9009_v59 = vpop.f32.mrb[46].mxu1 }
 0x167   : > { %10143 = vst [vmem:[#allocation24_spill] sm:$0xff] %v9009_v59  ;;  %v1160_v3 = vpop.f32.mrb[47].mxu0  ;;  %v1344_v10 = vpop.f32.mrb[47].mxu1 }
 0x168   : > { %v8025_v3 = vld [vmem:[%s10117_s1 + $0x178] sm:$0xff]  }
 0x169   : > { %2187 = vmatmul.mubr.bf16.gmra.mrb[152].mxu1 %v7920_v48  ;;  %3290 = vmatmul.mubr.bf16.gmra.mrb[152].mxu0 %v7921_v51  ;;  %v7928_v48 = vld [vmem:[%s8662_s21 + $0x124] ss:$8 sps:$4 sm:$0xff]   ;;  %v7930_v51 = vld [vmem:[%s8672_s27 + $0x114] ss:$8 sps:$4 sm:$0xff]  }
 0x16a   : > { %7025 = vmatprep.mubr.msk.bf16.mxu1 %vm897_vm0, %v7922_v0  ;;  %7191 = vmatprep.mubr.msk.bf16.mxu0 %vm897_vm0, %v7924_v2 }
 0x16b   : > { %5554 = vmatpush1.bf16.msra.mxu0 %v8025_v3 }
 0x16c   : > { %v9015_v11 = vpop.f32.mrb[48].mxu0  ;;  %v9017_v14 = vpop.f32.mrb[48].mxu1  ;;  %5555 = vmatprep.subr.bf16.mxu0 %v10120_v1 }
 0x16d   : > { %10144 = vst [vmem:[#allocation25_spill] sm:$0xff] %v9017_v14  ;;  %v1165_v22 = vpop.f32.mrb[49].mxu0  ;;  %v1349_v23 = vpop.f32.mrb[49].mxu1  ;;  %v7939_v14 = vld [vmem:[%s8662_s21 + $0x130] ss:$8 sps:$4 sm:$0xff]  }
 0x16e   : > { %v9024_v40 = vpop.f32.mrb[50].mxu0  ;;  %v9026_v47 = vpop.f32.mrb[50].mxu1 }
 0x16f   : > { %10145 = vst [vmem:[#allocation26_spill] sm:$0xff] %v9026_v47  ;;  %v1168_v0 = vpop.f32.mrb[51].mxu0  ;;  %v1352_v2 = vpop.f32.mrb[51].mxu1 }
 0x170   : > { %v7932_v0 = vld [vmem:[%s8662_s21 + $0x120] ss:$8 sps:$4 sm:$0xff]   ;;  %v7933_v2 = vld [vmem:[%s8672_s27 + $0x110] ss:$8 sps:$4 sm:$0xff]  }
 0x171   : > { %2195 = vmatmul.mubr.bf16.gmra.mrb[156].mxu1 %v7926_v15  ;;  %3298 = vmatmul.mubr.bf16.gmra.mrb[156].mxu0 %v7927_v28  ;;  %v7934_v28 = vld [vmem:[%s8662_s21 + $0x134] ss:$8 sps:$4 sm:$0xff]  }
 0x172   : > { %7026 = vmatprep.mubr.msk.bf16.mxu1 %vm897_vm0, %v7928_v48  ;;  %7192 = vmatprep.mubr.msk.bf16.mxu0 %vm897_vm0, %v7930_v51  ;;  %v7936_v48 = vld [vmem:[%s8672_s27 + $0x124] ss:$8 sps:$4 sm:$0xff]  }
 0x174   : > { %v9036_v10 = vpop.f32.mrb[52].mxu0  ;;  %v9038_v22 = vpop.f32.mrb[52].mxu1 }
 0x175   : > { %10146 = vst [vmem:[#allocation27_spill] sm:$0xff] %v9038_v22  ;;  %v1173_v23 = vpop.f32.mrb[53].mxu0  ;;  %v1357_v33 = vpop.f32.mrb[53].mxu1 }
 0x176   : > { %v9043_v47 = vpop.f32.mrb[54].mxu0  ;;  %v9045_v15 = vpop.f32.mrb[54].mxu1 }
 0x177   : > { %10147 = vst [vmem:[#allocation28_spill] sm:$0xff] %v9045_v15  ;;  %v1176_v51 = vpop.f32.mrb[55].mxu0  ;;  %v1360_v3 = vpop.f32.mrb[55].mxu1  ;;  %v7940_v15 = vld [vmem:[%s8672_s27 + $0x120] ss:$8 sps:$4 sm:$0xff]  }
 0x179   : > { %2203 = vmatmul.mubr.bf16.gmra.mrb[160].mxu1 %v7932_v0  ;;  %3306 = vmatmul.mubr.bf16.gmra.mrb[160].mxu0 %v7933_v2  ;;  %v7942_v0 = vld [vmem:[%s8662_s21 + $0x144] ss:$8 sps:$4 sm:$0xff]   ;;  %v7944_v2 = vld [vmem:[%s8672_s27 + $0x134] ss:$8 sps:$4 sm:$0xff]  }
 0x17a   : > { %7027 = vmatprep.mubr.msk.bf16.mxu1 %vm897_vm0, %v7934_v28  ;;  %7193 = vmatprep.mubr.msk.bf16.mxu0 %vm897_vm0, %v7936_v48 }
 0x17c   : > { %v9051_v23 = vpop.f32.mrb[56].mxu0  ;;  %v9053_v33 = vpop.f32.mrb[56].mxu1 }
 0x17d   : > { %10148 = vst [vmem:[#allocation29_spill] sm:$0xff] %v9053_v33  ;;  %v1181_v1 = vpop.f32.mrb[57].mxu0  ;;  %v1365_v22 = vpop.f32.mrb[57].mxu1 }
 0x17e   : > { %v9057_v59 = vpop.f32.mrb[58].mxu0  ;;  %v9059_v51 = vpop.f32.mrb[58].mxu1 }
 0x17f   : > { %10149 = vst [vmem:[#allocation30_spill] sm:$0xff] %v9059_v51  ;;  %v1184_v28 = vpop.f32.mrb[59].mxu0  ;;  %v1368_v48 = vpop.f32.mrb[59].mxu1  ;;  %v7947_v51 = vld [vmem:[%s8672_s27 + $0x130] ss:$8 sps:$4 sm:$0xff]  }
 0x181   : > { %2211 = vmatmul.mubr.bf16.gmra.mrb[164].mxu1 %v7939_v14  ;;  %3314 = vmatmul.mubr.bf16.gmra.mrb[164].mxu0 %v7940_v15  ;;  %v7948_v14 = vld [vmem:[%s8662_s21 + $0x154] ss:$8 sps:$4 sm:$0xff]   ;;  %v7950_v15 = vld [vmem:[%s8672_s27 + $0x144] ss:$8 sps:$4 sm:$0xff]  }
 0x182   : > { %7028 = vmatprep.mubr.msk.bf16.mxu1 %vm897_vm0, %v7942_v0  ;;  %7194 = vmatprep.mubr.msk.bf16.mxu0 %vm897_vm0, %v7944_v2 }
 0x184   : > { %v9065_v1 = vpop.f32.mrb[60].mxu0  ;;  %v9067_v22 = vpop.f32.mrb[60].mxu1 }
 0x185   : > { %10150 = vst [vmem:[#allocation31_spill] sm:$0xff] %v9067_v22  ;;  %v1189_v3 = vpop.f32.mrb[61].mxu0  ;;  %v1373_v33 = vpop.f32.mrb[61].mxu1 }
 0x186   : > { %v9071_v21 = vpop.f32.mrb[62].mxu0  ;;  %v9073_v28 = vpop.f32.mrb[62].mxu1 }
 0x187   : > { %10151 = vst [vmem:[#allocation32_spill] sm:$0xff] %v9073_v28  ;;  %v1192_v0 = vpop.f32.mrb[63].mxu0  ;;  %v1376_v2 = vpop.f32.mrb[63].mxu1  ;;  %v7953_v28 = vld [vmem:[%s8672_s27 + $0x140] ss:$8 sps:$4 sm:$0xff]  }
 0x188   : > { %v7954_v0 = vld [vmem:[%s8662_s21 + $0x164] ss:$8 sps:$4 sm:$0xff]   ;;  %v7956_v2 = vld [vmem:[%s8672_s27 + $0x154] ss:$8 sps:$4 sm:$0xff]  }
 0x189   : > { %2219 = vmatmul.mubr.bf16.gmra.mrb[168].mxu1 %v7946_v39  ;;  %3322 = vmatmul.mubr.bf16.gmra.mrb[168].mxu0 %v7947_v51 }
 0x18a   : > { %7029 = vmatprep.mubr.msk.bf16.mxu1 %vm897_vm0, %v7948_v14  ;;  %7195 = vmatprep.mubr.msk.bf16.mxu0 %vm897_vm0, %v7950_v15  ;;  %v8054_v14 = vld [vmem:[%s10117_s1 + $0x130] sm:$0xff]  }
 0x18b   : > { %4355 = vmatpush1.bf16.msra.mxu1 %v8054_v14  ;;  %v7962_v14 = vld [vmem:[%s8672_s27 + $0x164] ss:$8 sps:$4 sm:$0xff]  }
 0x18c   : > { %v9079_v33 = vpop.f32.mrb[64].mxu0  ;;  %v9081_v48 = vpop.f32.mrb[64].mxu1 }
 0x18d   : > { %10152 = vst [vmem:[#allocation33_spill] sm:$0xff] %v9081_v48  ;;  %v1197_v3 = vpop.f32.mrb[65].mxu0  ;;  %v1381_v22 = vpop.f32.mrb[65].mxu1 }
 0x18e   : > { %v9085_v58 = vpop.f32.mrb[66].mxu0  ;;  %v9087_v46 = vpop.f32.mrb[66].mxu1  ;;  %v8057_v22 = vld [vmem:[%s10117_s1 + $0x180] sm:$0xff]  }
 0x18f   : > { %10153 = vst [vmem:[#allocation34_spill] sm:$0xff] %v9087_v46  ;;  %v1200_v39 = vpop.f32.mrb[67].mxu0  ;;  %v1384_v51 = vpop.f32.mrb[67].mxu1  ;;  %5556 = vmatpush1.bf16.msra.mxu0 %v8057_v22  ;;  %v7959_v46 = vld [vmem:[%s8672_s27 + $0x150] ss:$8 sps:$4 sm:$0xff]  }
 0x190   : > { %v10155_v39 = vmov 0   ;;  %v7958_v51 = vld [vmem:[%s8662_s21 + $0x160] ss:$8 sps:$4 sm:$0xff]  }
 0x191   : > { %2227 = vmatmul.mubr.bf16.gmra.mrb[172].mxu1 %v7952_v9  ;;  %3330 = vmatmul.mubr.bf16.gmra.mrb[172].mxu0 %v7953_v28 }
 0x192   : > { %7030 = vmatprep.mubr.msk.bf16.mxu1 %vm897_vm0, %v7954_v0  ;;  %7196 = vmatprep.mubr.msk.bf16.mxu0 %vm897_vm0, %v7956_v2  ;;  %v7960_v2 = vld [vmem:[%s8662_s21 + $0x174] ss:$8 sps:$4 sm:$0xff]  }
 0x193   : > { %4356 = vmatprep.subr.bf16.mxu1 %v10155_v39  ;;  %5557 = vmatprep.subr.bf16.mxu0 %v10155_v39 }
 0x194   : > { %v9099_v15 = vpop.f32.mrb[68].mxu0  ;;  %v9101_v3 = vpop.f32.mrb[68].mxu1 }
 0x195   : > { %10154 = vst [vmem:[#allocation35_spill] sm:$0xff] %v9101_v3  ;;  %v1205_v9 = vpop.f32.mrb[69].mxu0  ;;  %v1389_v28 = vpop.f32.mrb[69].mxu1 }
 0x196   : > { %v9107_v48 = vpop.f32.mrb[70].mxu0  ;;  %v9109_v0 = vpop.f32.mrb[70].mxu1 }
 0x197   : > { %10156 = vst [vmem:[#allocation36_spill] sm:$0xff] %v9109_v0  ;;  %v1208_v22 = vpop.f32.mrb[71].mxu0  ;;  %v1392_v3 = vpop.f32.mrb[71].mxu1  ;;  %v7965_v0 = vld [vmem:[%s8672_s27 + $0x160] ss:$8 sps:$4 sm:$0xff]  }
 0x198   : > { %v7968_v3 = vld [vmem:[%s8662_s21 + $0x184] ss:$8 sps:$4 sm:$0xff]  }
 0x199   : > { %2235 = vmatmul.mubr.bf16.gmra.mrb[176].mxu1 %v7958_v51  ;;  %3338 = vmatmul.mubr.bf16.gmra.mrb[176].mxu0 %v7959_v46  ;;  %v7970_v46 = vld [vmem:[%s8672_s27 + $0x174] ss:$8 sps:$4 sm:$0xff]  }
 0x19a   : > { %7031 = vmatprep.mubr.msk.bf16.mxu1 %vm897_vm0, %v7960_v2  ;;  %7197 = vmatprep.mubr.msk.bf16.mxu0 %vm897_vm0, %v7962_v14 }
 0x19c   : > { %v9115_v39 = vpop.f32.mrb[72].mxu0  ;;  %v9117_v9 = vpop.f32.mrb[72].mxu1 }
 0x19d   : > { %10157 = vst [vmem:[#allocation37_spill] sm:$0xff] %v9117_v9  ;;  %v1213_v28 = vpop.f32.mrb[73].mxu0  ;;  %v1397_v30 = vpop.f32.mrb[73].mxu1 }
 0x19e   : > { %v9121_v8 = vpop.f32.mrb[74].mxu0  ;;  %v9123_v22 = vpop.f32.mrb[74].mxu1 }
 0x19f   : > { %10158 = vst [vmem:[#allocation38_spill] sm:$0xff] %v9123_v22  ;;  %v1216_v51 = vpop.f32.mrb[75].mxu0  ;;  %v1400_v2 = vpop.f32.mrb[75].mxu1  ;;  %v7973_v22 = vld [vmem:[%s8672_s27 + $0x170] ss:$8 sps:$4 sm:$0xff]  }
 0x1a1   : > { %2243 = vmatmul.mubr.bf16.gmra.mrb[180].mxu1 %v7964_v20  ;;  %3346 = vmatmul.mubr.bf16.gmra.mrb[180].mxu0 %v7965_v0  ;;  %v7974_v20 = vld [vmem:[%s8662_s21 + $0x194] ss:$8 sps:$4 sm:$0xff]   ;;  %v7976_v0 = vld [vmem:[%s8672_s27 + $0x184] ss:$8 sps:$4 sm:$0xff]  }
 0x1a2   : > { %7032 = vmatprep.mubr.msk.bf16.mxu1 %vm897_vm0, %v7968_v3  ;;  %7198 = vmatprep.mubr.msk.bf16.mxu0 %vm897_vm0, %v7970_v46 }
 0x1a4   : > { %v9129_v30 = vpop.f32.mrb[76].mxu0  ;;  %v9131_v14 = vpop.f32.mrb[76].mxu1 }
 0x1a5   : > { %10159 = vst [vmem:[#allocation39_spill] sm:$0xff] %v9131_v14  ;;  %v1221_v28 = vpop.f32.mrb[77].mxu0  ;;  %v1405_v9 = vpop.f32.mrb[77].mxu1 }
 0x1a6   : > { %v9135_v53 = vpop.f32.mrb[78].mxu0  ;;  %v9137_v51 = vpop.f32.mrb[78].mxu1 }
 0x1a7   : > { %10160 = vst [vmem:[#allocation40_spill] sm:$0xff] %v9137_v51  ;;  %v1224_v3 = vpop.f32.mrb[79].mxu0  ;;  %v1408_v46 = vpop.f32.mrb[79].mxu1  ;;  %v7978_v51 = vld [vmem:[%s8662_s21 + $0x190] ss:$8 sps:$4 sm:$0xff]  }
 0x1a9   : > { %2251 = vmatmul.mubr.bf16.gmra.mrb[184].mxu1 %v7972_v63  ;;  %3354 = vmatmul.mubr.bf16.gmra.mrb[184].mxu0 %v7973_v22  ;;  %v7980_v63 = vld [vmem:[%s8662_s21 + $0x1a4] ss:$8 sps:$4 sm:$0xff]   ;;  %v7982_v22 = vld [vmem:[%s8672_s27 + $0x194] ss:$8 sps:$4 sm:$0xff]  }
 0x1aa   : > { %7033 = vmatprep.mubr.msk.bf16.mxu1 %vm897_vm0, %v7974_v20  ;;  %7199 = vmatprep.mubr.msk.bf16.mxu0 %vm897_vm0, %v7976_v0 }
 0x1ac   : > { %v9143_v9 = vpop.f32.mrb[80].mxu0  ;;  %v9145_v2 = vpop.f32.mrb[80].mxu1 }
 0x1ad   : > { %10161 = vst [vmem:[#allocation41_spill] sm:$0xff] %v9145_v2  ;;  %v1229_v28 = vpop.f32.mrb[81].mxu0  ;;  %v1413_v14 = vpop.f32.mrb[81].mxu1 }
 0x1ae   : > { %v9149_v35 = vpop.f32.mrb[82].mxu0  ;;  %v9151_v3 = vpop.f32.mrb[82].mxu1  ;;  %v7984_v28 = vld [vmem:[%s8662_s21 + $0x1a0] ss:$8 sps:$4 sm:$0xff]  }
 0x1af   : > { %10162 = vst [vmem:[#allocation42_spill] sm:$0xff] %v9151_v3  ;;  %v1232_v20 = vpop.f32.mrb[83].mxu0  ;;  %v1416_v0 = vpop.f32.mrb[83].mxu1  ;;  %v7985_v3 = vld [vmem:[%s8672_s27 + $0x190] ss:$8 sps:$4 sm:$0xff]  }
 0x1b0   : > { %v8082_v20 = vld [vmem:[%s10117_s1 + $0x138] sm:$0xff]  }
 0x1b1   : > { %2259 = vmatmul.mubr.bf16.gmra.mrb[188].mxu1 %v7978_v51  ;;  %3362 = vmatmul.mubr.bf16.gmra.mrb[188].mxu0 %v7979_v45  ;;  %v7986_v45 = vld [vmem:[%s8662_s21 + $0x1b4] ss:$8 sps:$4 sm:$0xff]  }
 0x1b2   : > { %7034 = vmatprep.mubr.msk.bf16.mxu1 %vm897_vm0, %v7980_v63  ;;  %7200 = vmatprep.mubr.msk.bf16.mxu0 %vm897_vm0, %v7982_v22  ;;  %v7988_v63 = vld [vmem:[%s8672_s27 + $0x1a4] ss:$8 sps:$4 sm:$0xff]  }
 0x1b3   : > { %4357 = vmatpush1.bf16.msra.mxu1 %v8082_v20 }
 0x1b4   : > { %v9157_v14 = vpop.f32.mrb[84].mxu0  ;;  %v9159_v46 = vpop.f32.mrb[84].mxu1 }
 0x1b5   : > { %10163 = vst [vmem:[#allocation43_spill] sm:$0xff] %v9159_v46  ;;  %v1237_v2 = vpop.f32.mrb[85].mxu0  ;;  %v1421_v27 = vpop.f32.mrb[85].mxu1  ;;  %v7990_v46 = vld [vmem:[%s8662_s21 + $0x1b0] ss:$8 sps:$4 sm:$0xff]  }
 0x1b6   : > { %v9166_v19 = vpop.f32.mrb[86].mxu0  ;;  %v9168_v51 = vpop.f32.mrb[86].mxu1  ;;  %v8083_v27 = vld [vmem:[%s10117_s1 + $0x188] sm:$0xff]  }
 0x1b7   : > { %10164 = vst [vmem:[#allocation44_spill] sm:$0xff] %v9168_v51  ;;  %v1240_v22 = vpop.f32.mrb[87].mxu0  ;;  %v1424_v0 = vpop.f32.mrb[87].mxu1  ;;  %5558 = vmatpush1.bf16.msra.mxu0 %v8083_v27 }
 0x1b9   : > { %2267 = vmatmul.mubr.bf16.gmra.mrb[192].mxu1 %v7984_v28  ;;  %3370 = vmatmul.mubr.bf16.gmra.mrb[192].mxu0 %v7985_v3  ;;  %v7992_v3 = vld [vmem:[%s8662_s21 + $0x1c4] ss:$8 sps:$4 sm:$0xff]   ;;  %v7994_v28 = vld [vmem:[%s8672_s27 + $0x1b4] ss:$8 sps:$4 sm:$0xff]  }
 0x1ba   : > { %7035 = vmatprep.mubr.msk.bf16.mxu1 %vm897_vm0, %v7986_v45  ;;  %7201 = vmatprep.mubr.msk.bf16.mxu0 %vm897_vm0, %v7988_v63 }
 0x1bc   : > { %v9177_v2 = vpop.f32.mrb[88].mxu0  ;;  %v2060_v51 = vpop.f32.mrb[88].mxu1 }
 0x1bd   : > { %v2061_v22 = vadd.f32 %v2060_v51, %v8831_v25  ;;  %v1245_v0 = vpop.f32.mrb[89].mxu0  ;;  %v2062_v20 = vpop.f32.mrb[89].mxu1 }
 0x1be   : > { %v9182_v7 = vpop.f32.mrb[90].mxu0  ;;  %v2063_v62 = vpop.f32.mrb[90].mxu1 }
 0x1bf   : > { %v2064_v45 = vadd.f32 %v2063_v62, %v8837_v31  ;;  %v1248_v63 = vpop.f32.mrb[91].mxu0  ;;  %v2065_v27 = vpop.f32.mrb[91].mxu1 }
 0x1c1   : > { %2275 = vmatmul.mubr.bf16.gmra.mrb[196].mxu1 %v7990_v46  ;;  %3378 = vmatmul.mubr.bf16.gmra.mrb[196].mxu0 %v7991_v13  ;;  %v8000_v46 = vld [vmem:[%s8662_s21 + $0x1d4] ss:$8 sps:$4 sm:$0xff]   ;;  %v8002_v13 = vld [vmem:[%s8672_s27 + $0x1c4] ss:$8 sps:$4 sm:$0xff]  }
 0x1c2   : > { %7036 = vmatprep.mubr.msk.bf16.mxu1 %vm897_vm0, %v7992_v3  ;;  %7202 = vmatprep.mubr.msk.bf16.mxu0 %vm897_vm0, %v7994_v28 }
 0x1c4   : > { %v2068_v25 = vpop.f32.mrb[92].mxu1  ;;  %v3171_v51 = vpop.f32.mrb[92].mxu0 }
 0x1c5   : > { %v2069_v0 = vadd.f32 %v2068_v25, %v8845_v37  ;;  %v2070_v20 = vpop.f32.mrb[93].mxu1  ;;  %v3173_v56 = vpop.f32.mrb[93].mxu0  ;;  %v9192_v31 = vadd.f32 %v3171_v51, %v2061_v22  ;;  %v8005_v51 = vld [vmem:[%s8672_s27 + $0x1c0] ss:$8 sps:$4 sm:$0xff]  }
 0x1c6   : > { %v2071_v62 = vpop.f32.mrb[94].mxu1  ;;  %v3174_v63 = vpop.f32.mrb[94].mxu0  ;;  %v8006_v20 = vld [vmem:[%s8662_s21 + $0x1e4] ss:$8 sps:$4 sm:$0xff]  }
 0x1c7   : > { %v2072_v3 = vadd.f32 %v2071_v62, %v8851_v43  ;;  %v3176_v27 = vpop.f32.mrb[95].mxu0  ;;  %v2073_v28 = vpop.f32.mrb[95].mxu1  ;;  %v9197_v38 = vadd.f32 %v3174_v63, %v2064_v45  ;;  %v8004_v43 = vld [vmem:[%s8662_s21 + $0x1d0] ss:$8 sps:$4 sm:$0xff]   ;;  %v8008_v63 = vld [vmem:[%s8672_s27 + $0x1d4] ss:$8 sps:$4 sm:$0xff]  }
 0x1c9   : > { %2283 = vmatmul.mubr.bf16.gmra.mrb[200].mxu1 %v7997_v50  ;;  %3386 = vmatmul.mubr.bf16.gmra.mrb[200].mxu0 %v7998_v44 }
 0x1ca   : > { %7037 = vmatprep.mubr.msk.bf16.mxu1 %vm897_vm0, %v8000_v46  ;;  %7203 = vmatprep.mubr.msk.bf16.mxu0 %vm897_vm0, %v8002_v13 }
 0x1cc   : > { %v2076_v37 = vpop.f32.mrb[96].mxu1  ;;  %v3179_v56 = vpop.f32.mrb[96].mxu0 }
 0x1cd   : > { %v2077_v22 = vadd.f32 %v2076_v37, %v8859_v49  ;;  %v2078_v45 = vpop.f32.mrb[97].mxu1  ;;  %v3181_v25 = vpop.f32.mrb[97].mxu0  ;;  %v9209_v44 = vadd.f32 %v3179_v56, %v2069_v0  ;;  %v8010_v49 = vld [vmem:[%s8662_s21 + $0x1e0] ss:$8 sps:$4 sm:$0xff]   ;;  %v8011_v0 = vld [vmem:[%s8672_s27 + $0x1d0] ss:$8 sps:$4 sm:$0xff]  }
 0x1ce   : > { %v2079_v50 = vpop.f32.mrb[98].mxu1  ;;  %v3182_v62 = vpop.f32.mrb[98].mxu0 }
 0x1cf   : > { %v2080_v46 = vadd.f32 %v2079_v50, %v8865_v55  ;;  %v3184_v13 = vpop.f32.mrb[99].mxu0  ;;  %v2081_v27 = vpop.f32.mrb[99].mxu1  ;;  %v9213_v28 = vadd.f32 %v3182_v62, %v2072_v3  ;;  %v8012_v55 = vld [vmem:[%s8662_s21 + $0x1f4] ss:$8 sps:$4 sm:$0xff]   ;;  %v8014_v50 = vld [vmem:[%s8672_s27 + $0x1e4] ss:$8 sps:$4 sm:$0xff]  }
 0x1d1   : > { %2291 = vmatmul.mubr.bf16.gmra.mrb[204].mxu1 %v8004_v43  ;;  %3394 = vmatmul.mubr.bf16.gmra.mrb[204].mxu0 %v8005_v51 }
 0x1d2   : > { %7038 = vmatprep.mubr.msk.bf16.mxu1 %vm897_vm0, %v8006_v20  ;;  %7204 = vmatprep.mubr.msk.bf16.mxu0 %vm897_vm0, %v8008_v63 }
 0x1d4   : > { %v2084_v37 = vpop.f32.mrb[100].mxu1  ;;  %v3187_v56 = vpop.f32.mrb[100].mxu0 }
 0x1d5   : > { %v2085_v3 = vadd.f32 %v2084_v37, %v8873_v61  ;;  %v2086_v45 = vpop.f32.mrb[101].mxu1  ;;  %v3189_v43 = vpop.f32.mrb[101].mxu0  ;;  %v9225_v25 = vadd.f32 %v3187_v56, %v2077_v22  ;;  %v8016_v61 = vld [vmem:[%s8662_s21 + $0x1f0] ss:$8 sps:$4 sm:$0xff]   ;;  %v8017_v22 = vld [vmem:[%s8672_s27 + $0x1e0] ss:$8 sps:$4 sm:$0xff]  }
 0x1d6   : > { %v2087_v51 = vpop.f32.mrb[102].mxu1  ;;  %v3190_v20 = vpop.f32.mrb[102].mxu0 }
 0x1d7   : > { %v2088_v62 = vadd.f32 %v2087_v51, %v8883_v6  ;;  %v3192_v63 = vpop.f32.mrb[103].mxu0  ;;  %v2089_v13 = vpop.f32.mrb[103].mxu1  ;;  %v9229_v27 = vadd.f32 %v3190_v20, %v2080_v46 }
 0x1d9   : > { %2299 = vmatmul.mubr.bf16.gmra.mrb[208].mxu1 %v8010_v49  ;;  %3402 = vmatmul.mubr.bf16.gmra.mrb[208].mxu0 %v8011_v0  ;;  %v8018_v49 = vld [vmem:[%s8662_s21 + $0x204] ss:$8 sps:$4 sm:$0xff]   ;;  %v8020_v0 = vld [vmem:[%s8672_s27 + $0x1f4] ss:$8 sps:$4 sm:$0xff]  }
 0x1da   : > { %7039 = vmatprep.mubr.msk.bf16.mxu1 %vm897_vm0, %v8012_v55  ;;  %7205 = vmatprep.mubr.msk.bf16.mxu0 %vm897_vm0, %v8014_v50 }
 0x1dc   : > { %v2092_v37 = vpop.f32.mrb[104].mxu1  ;;  %v3195_v56 = vpop.f32.mrb[104].mxu0 }
 0x1dd   : > { %v2093_v45 = vadd.f32 %v2092_v37, %v8895_v12  ;;  %v2094_v6 = vpop.f32.mrb[105].mxu1  ;;  %v3197_v43 = vpop.f32.mrb[105].mxu0  ;;  %v9236_v51 = vadd.f32 %v3195_v56, %v2085_v3  ;;  %v8022_v12 = vld [vmem:[%s8662_s21 + $0x200] ss:$8 sps:$4 sm:$0xff]   ;;  %v8023_v3 = vld [vmem:[%s8672_s27 + $0x1f0] ss:$8 sps:$4 sm:$0xff]  }
 0x1de   : > { %v2095_v46 = vpop.f32.mrb[106].mxu1  ;;  %v3198_v20 = vpop.f32.mrb[106].mxu0 }
 0x1df   : > { %v2096_v55 = vadd.f32 %v2095_v46, %v8901_v18  ;;  %v3200_v63 = vpop.f32.mrb[107].mxu0  ;;  %v2097_v50 = vpop.f32.mrb[107].mxu1  ;;  %v9241_v13 = vadd.f32 %v3198_v20, %v2088_v62 }
 0x1e1   : > { %2307 = vmatmul.mubr.bf16.gmra.mrb[212].mxu1 %v8016_v61  ;;  %3410 = vmatmul.mubr.bf16.gmra.mrb[212].mxu0 %v8017_v22  ;;  %v8026_v61 = vld [vmem:[%s8662_s21 + $0x214] ss:$8 sps:$4 sm:$0xff]   ;;  %v8028_v22 = vld [vmem:[%s8672_s27 + $0x204] ss:$8 sps:$4 sm:$0xff]  }
 0x1e2   : > { %7040 = vmatprep.mubr.msk.bf16.mxu1 %vm897_vm0, %v8018_v49  ;;  %7206 = vmatprep.mubr.msk.bf16.mxu0 %vm897_vm0, %v8020_v0 }
 0x1e4   : > { %v2100_v37 = vpop.f32.mrb[108].mxu1  ;;  %v3203_v56 = vpop.f32.mrb[108].mxu0 }
 0x1e5   : > { %v2101_v6 = vadd.f32 %v2100_v37, %v8909_v24  ;;  %v2102_v18 = vpop.f32.mrb[109].mxu1  ;;  %v3205_v43 = vpop.f32.mrb[109].mxu0  ;;  %v9248_v46 = vadd.f32 %v3203_v56, %v2093_v45  ;;  %v8030_v24 = vld [vmem:[%s8662_s21 + $0x210] ss:$8 sps:$4 sm:$0xff]   ;;  %v8031_v45 = vld [vmem:[%s8672_s27 + $0x200] ss:$8 sps:$4 sm:$0xff]  }
 0x1e6   : > { %v2103_v62 = vpop.f32.mrb[110].mxu1  ;;  %v3206_v20 = vpop.f32.mrb[110].mxu0 }
 0x1e7   : > { %v2104_v49 = vadd.f32 %v2103_v62, %v8915_v34  ;;  %v3208_v63 = vpop.f32.mrb[111].mxu0  ;;  %v2105_v0 = vpop.f32.mrb[111].mxu1  ;;  %v9253_v50 = vadd.f32 %v3206_v20, %v2096_v55 }
 0x1e9   : > { %2315 = vmatmul.mubr.bf16.gmra.mrb[216].mxu1 %v8022_v12  ;;  %3418 = vmatmul.mubr.bf16.gmra.mrb[216].mxu0 %v8023_v3  ;;  %v8032_v12 = vld [vmem:[%s8662_s21 + $0x224] ss:$8 sps:$4 sm:$0xff]   ;;  %v8034_v3 = vld [vmem:[%s8672_s27 + $0x214] ss:$8 sps:$4 sm:$0xff]  }
 0x1ea   : > { %7041 = vmatprep.mubr.msk.bf16.mxu1 %vm897_vm0, %v8026_v61  ;;  %7207 = vmatprep.mubr.msk.bf16.mxu0 %vm897_vm0, %v8028_v22 }
 0x1ec   : > { %v2108_v37 = vpop.f32.mrb[112].mxu1  ;;  %v3211_v56 = vpop.f32.mrb[112].mxu0 }
 0x1ed   : > { %v2109_v18 = vadd.f32 %v2108_v37, %v8923_v42  ;;  %v2110_v34 = vpop.f32.mrb[113].mxu1  ;;  %v3213_v43 = vpop.f32.mrb[113].mxu0  ;;  %v9260_v62 = vadd.f32 %v3211_v56, %v2101_v6  ;;  %v8036_v42 = vld [vmem:[%s8662_s21 + $0x220] ss:$8 sps:$4 sm:$0xff]   ;;  %v8037_v6 = vld [vmem:[%s8672_s27 + $0x210] ss:$8 sps:$4 sm:$0xff]  }
 0x1ee   : > { %v2111_v55 = vpop.f32.mrb[114].mxu1  ;;  %v3214_v20 = vpop.f32.mrb[114].mxu0 }
 0x1ef   : > { %v2112_v61 = vadd.f32 %v2111_v55, %v8929_v52  ;;  %v3216_v63 = vpop.f32.mrb[115].mxu0  ;;  %v2113_v22 = vpop.f32.mrb[115].mxu1  ;;  %v9265_v0 = vadd.f32 %v3214_v20, %v2104_v49 }
 0x1f1   : > { %2323 = vmatmul.mubr.bf16.gmra.mrb[220].mxu1 %v8030_v24  ;;  %3426 = vmatmul.mubr.bf16.gmra.mrb[220].mxu0 %v8031_v45  ;;  %v8038_v24 = vld [vmem:[%s8662_s21 + $0x234] ss:$8 sps:$4 sm:$0xff]   ;;  %v8040_v45 = vld [vmem:[%s8672_s27 + $0x224] ss:$8 sps:$4 sm:$0xff]  }
 0x1f2   : > { %7042 = vmatprep.mubr.msk.bf16.mxu1 %vm897_vm0, %v8032_v12  ;;  %7208 = vmatprep.mubr.msk.bf16.mxu0 %vm897_vm0, %v8034_v3 }
 0x1f4   : > { %v2116_v37 = vpop.f32.mrb[116].mxu1  ;;  %v3219_v56 = vpop.f32.mrb[116].mxu0 }
 0x1f5   : > { %v2117_v34 = vadd.f32 %v2116_v37, %v8937_v60  ;;  %v2118_v52 = vpop.f32.mrb[117].mxu1  ;;  %v3221_v43 = vpop.f32.mrb[117].mxu0  ;;  %v9272_v55 = vadd.f32 %v3219_v56, %v2109_v18  ;;  %v8042_v60 = vld [vmem:[%s8662_s21 + $0x230] ss:$8 sps:$4 sm:$0xff]   ;;  %v8043_v18 = vld [vmem:[%s8672_s27 + $0x220] ss:$8 sps:$4 sm:$0xff]  }
 0x1f6   : > { %v2119_v49 = vpop.f32.mrb[118].mxu1  ;;  %v3222_v20 = vpop.f32.mrb[118].mxu0 }
 0x1f7   : > { %v2120_v12 = vadd.f32 %v2119_v49, %v8943_v5  ;;  %v3224_v63 = vpop.f32.mrb[119].mxu0  ;;  %v2121_v3 = vpop.f32.mrb[119].mxu1  ;;  %v9277_v22 = vadd.f32 %v3222_v20, %v2112_v61 }
 0x1f9   : > { %2331 = vmatmul.mubr.bf16.gmra.mrb[224].mxu1 %v8036_v42  ;;  %3434 = vmatmul.mubr.bf16.gmra.mrb[224].mxu0 %v8037_v6  ;;  %v8044_v42 = vld [vmem:[%s8662_s21 + $0x244] ss:$8 sps:$4 sm:$0xff]   ;;  %v8046_v6 = vld [vmem:[%s8672_s27 + $0x234] ss:$8 sps:$4 sm:$0xff]  }
 0x1fa   : > { %7043 = vmatprep.mubr.msk.bf16.mxu1 %vm897_vm0, %v8038_v24  ;;  %7209 = vmatprep.mubr.msk.bf16.mxu0 %vm897_vm0, %v8040_v45 }
 0x1fc   : > { %v2124_v37 = vpop.f32.mrb[120].mxu1  ;;  %v3227_v56 = vpop.f32.mrb[120].mxu0 }
 0x1fd   : > { %v2125_v52 = vadd.f32 %v2124_v37, %v8957_v17  ;;  %v2126_v5 = vpop.f32.mrb[121].mxu1  ;;  %v3229_v43 = vpop.f32.mrb[121].mxu0  ;;  %v9284_v49 = vadd.f32 %v3227_v56, %v2117_v34  ;;  %v8048_v17 = vld [vmem:[%s8662_s21 + $0x240] ss:$8 sps:$4 sm:$0xff]   ;;  %v8049_v34 = vld [vmem:[%s8672_s27 + $0x230] ss:$8 sps:$4 sm:$0xff]  }
 0x1fe   : > { %v2127_v61 = vpop.f32.mrb[122].mxu1  ;;  %v3230_v20 = vpop.f32.mrb[122].mxu0 }
 0x1ff   : > { %v2128_v24 = vadd.f32 %v2127_v61, %v8965_v29  ;;  %v3232_v63 = vpop.f32.mrb[123].mxu0  ;;  %v2129_v45 = vpop.f32.mrb[123].mxu1  ;;  %v9289_v3 = vadd.f32 %v3230_v20, %v2120_v12 }
 0x201   : > { %2339 = vmatmul.mubr.bf16.gmra.mrb[228].mxu1 %v8042_v60  ;;  %3442 = vmatmul.mubr.bf16.gmra.mrb[228].mxu0 %v8043_v18  ;;  %v8050_v60 = vld [vmem:[%s8662_s21 + $0x254] ss:$8 sps:$4 sm:$0xff]   ;;  %v8052_v18 = vld [vmem:[%s8672_s27 + $0x244] ss:$8 sps:$4 sm:$0xff]  }
 0x202   : > { %7044 = vmatprep.mubr.msk.bf16.mxu1 %vm897_vm0, %v8044_v42  ;;  %7210 = vmatprep.mubr.msk.bf16.mxu0 %vm897_vm0, %v8046_v6 }
 0x204   : > { %v2132_v37 = vpop.f32.mrb[124].mxu1  ;;  %v3235_v56 = vpop.f32.mrb[124].mxu0 }
 0x205   : > { %v2133_v5 = vadd.f32 %v2132_v37, %v8973_v41  ;;  %v2134_v29 = vpop.f32.mrb[125].mxu1  ;;  %v3237_v43 = vpop.f32.mrb[125].mxu0  ;;  %v9296_v61 = vadd.f32 %v3235_v56, %v2125_v52  ;;  %v8055_v41 = vld [vmem:[%s8662_s21 + $0x250] ss:$8 sps:$4 sm:$0xff]   ;;  %v8056_v52 = vld [vmem:[%s8672_s27 + $0x240] ss:$8 sps:$4 sm:$0xff]  }
 0x206   : > { %v2135_v12 = vpop.f32.mrb[126].mxu1  ;;  %v3238_v20 = vpop.f32.mrb[126].mxu0 }
 0x207   : > { %v2136_v42 = vadd.f32 %v2135_v12, %v8979_v57  ;;  %v3240_v63 = vpop.f32.mrb[127].mxu0  ;;  %v2137_v6 = vpop.f32.mrb[127].mxu1  ;;  %v9301_v45 = vadd.f32 %v3238_v20, %v2128_v24 }
 0x209   : > { %2347 = vmatmul.mubr.bf16.gmra.mrb[232].mxu1 %v8048_v17  ;;  %3450 = vmatmul.mubr.bf16.gmra.mrb[232].mxu0 %v8049_v34  ;;  %v8058_v17 = vld [vmem:[%s8662_s21 + $0x264] ss:$8 sps:$4 sm:$0xff]   ;;  %v8060_v34 = vld [vmem:[%s8672_s27 + $0x254] ss:$8 sps:$4 sm:$0xff]  }
 0x20a   : > { %7045 = vmatprep.mubr.msk.bf16.mxu1 %vm897_vm0, %v8050_v60  ;;  %7211 = vmatprep.mubr.msk.bf16.mxu0 %vm897_vm0, %v8052_v18 }
 0x20c   : > { %v2140_v37 = vpop.f32.mrb[128].mxu1  ;;  %v3243_v56 = vpop.f32.mrb[128].mxu0 }
 0x20d   : > { %v2141_v29 = vadd.f32 %v2140_v37, %v8987_v4  ;;  %v2142_v57 = vpop.f32.mrb[129].mxu1  ;;  %v3245_v43 = vpop.f32.mrb[129].mxu0  ;;  %v9308_v12 = vadd.f32 %v3243_v56, %v2133_v5  ;;  %v8062_v4 = vld [vmem:[%s8662_s21 + $0x260] ss:$8 sps:$4 sm:$0xff]   ;;  %v8063_v5 = vld [vmem:[%s8672_s27 + $0x250] ss:$8 sps:$4 sm:$0xff]  }
 0x20e   : > { %v2143_v24 = vpop.f32.mrb[130].mxu1  ;;  %v3246_v20 = vpop.f32.mrb[130].mxu0 }
 0x20f   : > { %v2144_v60 = vadd.f32 %v2143_v24, %v8993_v16  ;;  %v3248_v63 = vpop.f32.mrb[131].mxu0  ;;  %v2145_v18 = vpop.f32.mrb[131].mxu1  ;;  %v9313_v6 = vadd.f32 %v3246_v20, %v2136_v42 }
 0x210   : > { %v8064_v63 = vld [vmem:[%s8662_s21 + $0x274] ss:$8 sps:$4 sm:$0xff]  }
 0x211   : > { %2355 = vmatmul.mubr.bf16.gmra.mrb[236].mxu1 %v8055_v41  ;;  %3458 = vmatmul.mubr.bf16.gmra.mrb[236].mxu0 %v8056_v52  ;;  %v8066_v41 = vld [vmem:[%s8672_s27 + $0x264] ss:$8 sps:$4 sm:$0xff]  }
 0x212   : > { %7046 = vmatprep.mubr.msk.bf16.mxu1 %vm897_vm0, %v8058_v17  ;;  %7212 = vmatprep.mubr.msk.bf16.mxu0 %vm897_vm0, %v8060_v34 }
 0x214   : > { %v2148_v37 = vpop.f32.mrb[132].mxu1  ;;  %v3251_v56 = vpop.f32.mrb[132].mxu0 }
 0x215   : > { %v2149_v57 = vadd.f32 %v2148_v37, %v9001_v36  ;;  %v2150_v16 = vpop.f32.mrb[133].mxu1  ;;  %v3253_v43 = vpop.f32.mrb[133].mxu0  ;;  %v9320_v24 = vadd.f32 %v3251_v56, %v2141_v29  ;;  %v8068_v36 = vld [vmem:[%s8662_s21 + $0x270] ss:$8 sps:$4 sm:$0xff]  }
 0x216   : > { %v2151_v42 = vpop.f32.mrb[134].mxu1  ;;  %v3254_v20 = vpop.f32.mrb[134].mxu0 }
 0x217   : > { %v2152_v52 = vadd.f32 %v2151_v42, %v9007_v54  ;;  %v3256_v17 = vpop.f32.mrb[135].mxu0  ;;  %v2153_v34 = vpop.f32.mrb[135].mxu1  ;;  %v9325_v18 = vadd.f32 %v3254_v20, %v2144_v60  ;;  %v8069_v54 = vld [vmem:[%s8672_s27 + $0x260] ss:$8 sps:$4 sm:$0xff]   ;;  %v8070_v20 = vld [vmem:[%s8662_s21 + $0x284] ss:$8 sps:$4 sm:$0xff]  }
 0x219   : > { %2363 = vmatmul.mubr.bf16.gmra.mrb[240].mxu1 %v8062_v4  ;;  %3466 = vmatmul.mubr.bf16.gmra.mrb[240].mxu0 %v8063_v5  ;;  %v8072_v4 = vld [vmem:[%s8672_s27 + $0x274] ss:$8 sps:$4 sm:$0xff]  }
 0x21a   : > { %7047 = vmatprep.mubr.msk.bf16.mxu1 %vm897_vm0, %v8064_v63  ;;  %7213 = vmatprep.mubr.msk.bf16.mxu0 %vm897_vm0, %v8066_v41 }
 0x21c   : > { %v2156_v29 = vpop.f32.mrb[136].mxu1  ;;  %v3259_v37 = vpop.f32.mrb[136].mxu0 }
 0x21d   : > { %v2157_v56 = vadd.f32 %v2156_v29, %v9015_v11  ;;  %v2158_v16 = vpop.f32.mrb[137].mxu1  ;;  %v3261_v43 = vpop.f32.mrb[137].mxu0  ;;  %v9332_v42 = vadd.f32 %v3259_v37, %v2149_v57 }
 0x21e   : > { %v2159_v17 = vpop.f32.mrb[138].mxu1  ;;  %v3262_v60 = vpop.f32.mrb[138].mxu0  ;;  %v8074_v43 = vld [vmem:[%s8662_s21 + $0x280] ss:$8 sps:$4 sm:$0xff]  }
 0x21f   : > { %v2160_v5 = vadd.f32 %v2159_v17, %v9024_v40  ;;  %v3264_v63 = vpop.f32.mrb[139].mxu0  ;;  %v2161_v41 = vpop.f32.mrb[139].mxu1  ;;  %v9337_v34 = vadd.f32 %v3262_v60, %v2152_v52  ;;  %v8075_v40 = vld [vmem:[%s8672_s27 + $0x270] ss:$8 sps:$4 sm:$0xff]   ;;  %v8076_v60 = vld [vmem:[%s8662_s21 + $0x294] ss:$8 sps:$4 sm:$0xff]  }
 0x221   : > { %2371 = vmatmul.mubr.bf16.gmra.mrb[244].mxu1 %v8068_v36  ;;  %3474 = vmatmul.mubr.bf16.gmra.mrb[244].mxu0 %v8069_v54  ;;  %v8078_v36 = vld [vmem:[%s8672_s27 + $0x284] ss:$8 sps:$4 sm:$0xff]  }
 0x222   : > { %7048 = vmatprep.mubr.msk.bf16.mxu1 %vm897_vm0, %v8070_v20  ;;  %7214 = vmatprep.mubr.msk.bf16.mxu0 %vm897_vm0, %v8072_v4 }
 0x224   : > { %v2164_v11 = vpop.f32.mrb[140].mxu1  ;;  %v3267_v57 = vpop.f32.mrb[140].mxu0 }
 0x225   : > { %v2165_v29 = vadd.f32 %v2164_v11, %v9036_v10  ;;  %v2166_v37 = vpop.f32.mrb[141].mxu1  ;;  %v3269_v16 = vpop.f32.mrb[141].mxu0  ;;  %v9344_v17 = vadd.f32 %v3267_v57, %v2157_v56 }
 0x226   : > { %v2167_v63 = vpop.f32.mrb[142].mxu1  ;;  %v3270_v52 = vpop.f32.mrb[142].mxu0  ;;  %v8080_v16 = vld [vmem:[%s8662_s21 + $0x290] ss:$8 sps:$4 sm:$0xff]  }
 0x227   : > { %v2168_v54 = vadd.f32 %v2167_v63, %v9043_v47  ;;  %v3272_v20 = vpop.f32.mrb[143].mxu0  ;;  %v2169_v4 = vpop.f32.mrb[143].mxu1  ;;  %v9349_v41 = vadd.f32 %v3270_v52, %v2160_v5  ;;  %v8081_v47 = vld [vmem:[%s8672_s27 + $0x280] ss:$8 sps:$4 sm:$0xff]   ;;  %v8086_v52 = vld [vmem:[%s8662_s21 + $0x2a4] ss:$8 sps:$4 sm:$0xff]  }
 0x229   : > { %2379 = vmatmul.mubr.bf16.gmra.mrb[248].mxu1 %v8074_v43  ;;  %3482 = vmatmul.mubr.bf16.gmra.mrb[248].mxu0 %v8075_v40  ;;  %v8089_v43 = vld [vmem:[%s8672_s27 + $0x294] ss:$8 sps:$4 sm:$0xff]  }
 0x22a   : > { %7049 = vmatprep.mubr.msk.bf16.mxu1 %vm897_vm0, %v8076_v60  ;;  %7215 = vmatprep.mubr.msk.bf16.mxu0 %vm897_vm0, %v8078_v36 }
 0x22c   : > { %v2172_v10 = vpop.f32.mrb[144].mxu1  ;;  %v3275_v56 = vpop.f32.mrb[144].mxu0 }
 0x22d   : > { %v2173_v11 = vadd.f32 %v2172_v10, %v9051_v23  ;;  %v2174_v57 = vpop.f32.mrb[145].mxu1  ;;  %v3277_v37 = vpop.f32.mrb[145].mxu0  ;;  %v9356_v63 = vadd.f32 %v3275_v56, %v2165_v29 }
 0x22e   : > { %v2175_v20 = vpop.f32.mrb[146].mxu1  ;;  %v3278_v5 = vpop.f32.mrb[146].mxu0  ;;  %v8084_v37 = vld [vmem:[%s8662_s21 + $0x2a0] ss:$8 sps:$4 sm:$0xff]  }
 0x22f   : > { %v2176_v40 = vadd.f32 %v2175_v20, %v9057_v59  ;;  %v3280_v60 = vpop.f32.mrb[147].mxu0  ;;  %v2177_v36 = vpop.f32.mrb[147].mxu1  ;;  %v9361_v4 = vadd.f32 %v3278_v5, %v2168_v54  ;;  %v8087_v59 = vld [vmem:[%s8672_s27 + $0x290] ss:$8 sps:$4 sm:$0xff]   ;;  %v8092_v5 = vld [vmem:[%s8662_s21 + $0x2b4] ss:$8 sps:$4 sm:$0xff]  }
 0x231   : > { %2387 = vmatmul.mubr.bf16.gmra.mrb[252].mxu1 %v8080_v16  ;;  %3490 = vmatmul.mubr.bf16.gmra.mrb[252].mxu0 %v8081_v47  ;;  %v8095_v16 = vld [vmem:[%s8672_s27 + $0x2a4] ss:$8 sps:$4 sm:$0xff]  }
 0x232   : > { %7050 = vmatprep.mubr.msk.bf16.mxu1 %vm897_vm0, %v8086_v52  ;;  %7216 = vmatprep.mubr.msk.bf16.mxu0 %vm897_vm0, %v8089_v43 }
 0x234   : > { %v2180_v23 = vpop.f32.mrb[148].mxu1  ;;  %v3283_v29 = vpop.f32.mrb[148].mxu0 }
 0x235   : > { %v2181_v10 = vadd.f32 %v2180_v23, %v9065_v1  ;;  %v2182_v56 = vpop.f32.mrb[149].mxu1  ;;  %v3285_v57 = vpop.f32.mrb[149].mxu0  ;;  %v9368_v20 = vadd.f32 %v3283_v29, %v2173_v11 }
 0x236   : > { %v2183_v60 = vpop.f32.mrb[150].mxu1  ;;  %v3286_v54 = vpop.f32.mrb[150].mxu0  ;;  %v8090_v57 = vld [vmem:[%s8662_s21 + $0x2b0] ss:$8 sps:$4 sm:$0xff]  }
 0x237   : > { %v2184_v47 = vadd.f32 %v2183_v60, %v9071_v21  ;;  %v3288_v52 = vpop.f32.mrb[151].mxu0  ;;  %v2185_v43 = vpop.f32.mrb[151].mxu1  ;;  %v9373_v36 = vadd.f32 %v3286_v54, %v2176_v40  ;;  %v8093_v21 = vld [vmem:[%s8672_s27 + $0x2a0] ss:$8 sps:$4 sm:$0xff]   ;;  %v8098_v54 = vld [vmem:[%s8662_s21 + $0x2c4] ss:$8 sps:$4 sm:$0xff]  }
 0x239   : > { %2395 = vmatmul.mubr.bf16.gmra.mrb[0].mxu1 %v8084_v37  ;;  %3498 = vmatmul.mubr.bf16.gmra.mrb[0].mxu0 %v8087_v59  ;;  %v8101_v37 = vld [vmem:[%s8672_s27 + $0x2b4] ss:$8 sps:$4 sm:$0xff]  }
 0x23a   : > { %7051 = vmatprep.mubr.msk.bf16.mxu1 %vm897_vm0, %v8092_v5  ;;  %7217 = vmatprep.mubr.msk.bf16.mxu0 %vm897_vm0, %v8095_v16 }
 0x23c   : > { %v2188_v1 = vpop.f32.mrb[152].mxu1  ;;  %v3291_v11 = vpop.f32.mrb[152].mxu0 }
 0x23d   : > { %v2189_v23 = vadd.f32 %v2188_v1, %v9079_v33  ;;  %v2190_v29 = vpop.f32.mrb[153].mxu1  ;;  %v3293_v56 = vpop.f32.mrb[153].mxu0  ;;  %v9380_v60 = vadd.f32 %v3291_v11, %v2181_v10 }
 0x23e   : > { %v2191_v52 = vpop.f32.mrb[154].mxu1  ;;  %v3294_v40 = vpop.f32.mrb[154].mxu0  ;;  %v8096_v56 = vld [vmem:[%s8662_s21 + $0x2c0] ss:$8 sps:$4 sm:$0xff]  }
 0x23f   : > { %v2192_v59 = vadd.f32 %v2191_v52, %v9085_v58  ;;  %v3296_v5 = vpop.f32.mrb[155].mxu0  ;;  %v2193_v16 = vpop.f32.mrb[155].mxu1  ;;  %v9385_v43 = vadd.f32 %v3294_v40, %v2184_v47  ;;  %v8099_v58 = vld [vmem:[%s8672_s27 + $0x2b0] ss:$8 sps:$4 sm:$0xff]   ;;  %v8104_v40 = vld [vmem:[%s8672_s27 + $0x2c4] ss:$8 sps:$4 sm:$0xff]  }
 0x241   : > { %2403 = vmatmul.mubr.bf16.gmra.mrb[4].mxu1 %v8090_v57  ;;  %3506 = vmatmul.mubr.bf16.gmra.mrb[4].mxu0 %v8093_v21  ;;  %v8107_v57 = vld [vmem:[%s9207_s22 + $0x4] ss:$8 sps:$4 sm:$0xff]  }
 0x242   : > { %7052 = vmatprep.mubr.msk.bf16.mxu1 %vm897_vm0, %v8098_v54  ;;  %7218 = vmatprep.mubr.msk.bf16.mxu0 %vm897_vm0, %v8101_v37 }
 0x244   : > { %v2196_v33 = vpop.f32.mrb[156].mxu1  ;;  %v3299_v10 = vpop.f32.mrb[156].mxu0 }
 0x245   : > { %v2197_v1 = vadd.f32 %v2196_v33, %v9099_v15  ;;  %v2198_v11 = vpop.f32.mrb[157].mxu1  ;;  %v3301_v29 = vpop.f32.mrb[157].mxu0  ;;  %v9392_v52 = vadd.f32 %v3299_v10, %v2189_v23 }
 0x246   : > { %v2199_v5 = vpop.f32.mrb[158].mxu1  ;;  %v3302_v47 = vpop.f32.mrb[158].mxu0  ;;  %v8102_v29 = vld [vmem:[%s8672_s27 + $0x2c0] ss:$8 sps:$4 sm:$0xff]   ;;  %s185_s27 = smul.u32 9, %s8399_s12 }
 0x247   : > { %v2200_v21 = vadd.f32 %v2199_v5, %v9107_v48  ;;  %v3304_v54 = vpop.f32.mrb[159].mxu0  ;;  %v2201_v37 = vpop.f32.mrb[159].mxu1  ;;  %v9397_v16 = vadd.f32 %v3302_v47, %v2192_v59  ;;  %v8105_v48 = vld [vmem:[%s9207_s22] ss:$8 sps:$4 sm:$0xff]   ;;  %v8110_v47 = vld [vmem:[%s9207_s22 + $0x14] ss:$8 sps:$4 sm:$0xff]  }
 0x248   : > { %p9771_p6 = scmp.lt.s32.totalorder %s185_s27, 17  ;;  %s7608_s12 = smul.u32 54, %s10309_s13 }
 0x249   : > { %2411 = vmatmul.mubr.bf16.gmra.mrb[8].mxu1 %v8096_v56  ;;  %3514 = vmatmul.mubr.bf16.gmra.mrb[8].mxu0 %v8099_v58  ;;  %v8113_v56 = vld [vmem:[%s9223_s23 + $0x4] ss:$8 sps:$4 sm:$0xff]  }
 0x24a   : > { %7219 = vmatprep.mubr.msk.bf16.mxu0 %vm897_vm0, %v8104_v40  ;;  %7342 = vmatprep.mubr.msk.bf16.mxu1 %vm897_vm0, %v8107_v57  ;;  %s10311_s27 = smov (!%p9771_p6, %s185_s27), 17 }
 0x24b   : > { %s7607_s30 = smul.u32 3, %s10311_s27 }
 0x24c   : > { %v2204_v15 = vpop.f32.mrb[160].mxu1  ;;  %v3307_v23 = vpop.f32.mrb[160].mxu0 }
 0x24d   : > { %v2205_v33 = vadd.f32 %v2204_v15, %v9115_v39  ;;  %v2206_v10 = vpop.f32.mrb[161].mxu1  ;;  %v3309_v11 = vpop.f32.mrb[161].mxu0  ;;  %v9404_v5 = vadd.f32 %v3307_v23, %v2197_v1  ;;  %s192_s13 = sadd.s32 %s7608_s12, %s7607_s30 }
 0x24e   : > { %v2207_v54 = vpop.f32.mrb[162].mxu1  ;;  %v3310_v59 = vpop.f32.mrb[162].mxu0  ;;  %v8108_v11 = vld [vmem:[%s9207_s22 + $0x10] ss:$8 sps:$4 sm:$0xff]   ;;  %s6738_s5 = sshll.u32 %s192_s13, 3 }
 0x24f   : > { %v2208_v58 = vadd.f32 %v2207_v54, %v9121_v8  ;;  %v3312_v40 = vpop.f32.mrb[163].mxu0  ;;  %v2209_v57 = vpop.f32.mrb[163].mxu1  ;;  %v9409_v37 = vadd.f32 %v3310_v59, %v2200_v21  ;;  %v8111_v8 = vld [vmem:[%s9223_s23] ss:$8 sps:$4 sm:$0xff]   ;;  %v8116_v59 = vld [vmem:[%s9207_s22 + $0x24] ss:$8 sps:$4 sm:$0xff]   ;;  %s9806_s7 = scalar_lea.vmem %s10119_s3, %s6738_s5 }
 0x251   : > { %3522 = vmatmul.mubr.bf16.gmra.mrb[12].mxu0 %v8102_v29  ;;  %4371 = vmatmul.mubr.bf16.vlgmr.msra.gmra.mrb[12].mxu1 %v8105_v48  ;;  %v8119_v29 = vld [vmem:[%s9223_s23 + $0x14] ss:$8 sps:$4 sm:$0xff]  }
 0x252   : > { %7343 = vmatprep.mubr.msk.bf16.mxu1 %vm897_vm0, %v8110_v47  ;;  %7509 = vmatprep.mubr.msk.bf16.mxu0 %vm897_vm0, %v8113_v56 }
 0x254   : > { %v2212_v39 = vpop.f32.mrb[164].mxu1  ;;  %v3315_v1 = vpop.f32.mrb[164].mxu0 }
 0x255   : > { %v2213_v15 = vadd.f32 %v2212_v39, %v9129_v30  ;;  %v2214_v23 = vpop.f32.mrb[165].mxu1  ;;  %v3317_v10 = vpop.f32.mrb[165].mxu0  ;;  %v9416_v54 = vadd.f32 %v3315_v1, %v2205_v33 }
 0x256   : > { %v2215_v40 = vpop.f32.mrb[166].mxu1  ;;  %v3318_v21 = vpop.f32.mrb[166].mxu0  ;;  %v8114_v10 = vld [vmem:[%s9207_s22 + $0x20] ss:$8 sps:$4 sm:$0xff]  }
 0x257   : > { %v2216_v48 = vadd.f32 %v2215_v40, %v9135_v53  ;;  %v3320_v47 = vpop.f32.mrb[167].mxu0  ;;  %v2217_v56 = vpop.f32.mrb[167].mxu1  ;;  %v9421_v57 = vadd.f32 %v3318_v21, %v2208_v58  ;;  %v8117_v53 = vld [vmem:[%s9223_s23 + $0x10] ss:$8 sps:$4 sm:$0xff]   ;;  %v8122_v21 = vld [vmem:[%s9207_s22 + $0x34] ss:$8 sps:$4 sm:$0xff]  }
 0x259   : > { %4379 = vmatmul.mubr.bf16.gmra.mrb[16].mxu1 %v8108_v11  ;;  %5572 = vmatmul.mubr.bf16.vlgmr.msra.gmra.mrb[16].mxu0 %v8111_v8  ;;  %v8125_v11 = vld [vmem:[%s9223_s23 + $0x24] ss:$8 sps:$4 sm:$0xff]  }
 0x25a   : > { %7344 = vmatprep.mubr.msk.bf16.mxu1 %vm897_vm0, %v8116_v59  ;;  %7510 = vmatprep.mubr.msk.bf16.mxu0 %vm897_vm0, %v8119_v29 }
 0x25c   : > { %v2220_v30 = vpop.f32.mrb[168].mxu1  ;;  %v3323_v33 = vpop.f32.mrb[168].mxu0 }
 0x25d   : > { %v2221_v39 = vadd.f32 %v2220_v30, %v9143_v9  ;;  %v2222_v1 = vpop.f32.mrb[169].mxu1  ;;  %v3325_v23 = vpop.f32.mrb[169].mxu0  ;;  %v9428_v40 = vadd.f32 %v3323_v33, %v2213_v15 }
 0x25e   : > { %v2223_v47 = vpop.f32.mrb[170].mxu1  ;;  %v3326_v58 = vpop.f32.mrb[170].mxu0  ;;  %v8120_v23 = vld [vmem:[%s9207_s22 + $0x30] ss:$8 sps:$4 sm:$0xff]  }
 0x25f   : > { %v2224_v8 = vadd.f32 %v2223_v47, %v9149_v35  ;;  %v3328_v59 = vpop.f32.mrb[171].mxu0  ;;  %v2225_v29 = vpop.f32.mrb[171].mxu1  ;;  %v9433_v56 = vadd.f32 %v3326_v58, %v2216_v48  ;;  %v8123_v35 = vld [vmem:[%s9223_s23 + $0x20] ss:$8 sps:$4 sm:$0xff]   ;;  %v8128_v58 = vld [vmem:[%s9207_s22 + $0x44] ss:$8 sps:$4 sm:$0xff]  }
 0x261   : > { %4387 = vmatmul.mubr.bf16.gmra.mrb[20].mxu1 %v8114_v10  ;;  %5580 = vmatmul.mubr.bf16.gmra.mrb[20].mxu0 %v8117_v53  ;;  %v8131_v10 = vld [vmem:[%s9223_s23 + $0x34] ss:$8 sps:$4 sm:$0xff]  }
 0x262   : > { %7345 = vmatprep.mubr.msk.bf16.mxu1 %vm897_vm0, %v8122_v21  ;;  %7511 = vmatprep.mubr.msk.bf16.mxu0 %vm897_vm0, %v8125_v11 }
 0x264   : > { %v2228_v9 = vpop.f32.mrb[172].mxu1  ;;  %v3331_v15 = vpop.f32.mrb[172].mxu0 }
 0x265   : > { %v2229_v30 = vadd.f32 %v2228_v9, %v9157_v14  ;;  %v2230_v33 = vpop.f32.mrb[173].mxu1  ;;  %v3333_v1 = vpop.f32.mrb[173].mxu0  ;;  %v9440_v47 = vadd.f32 %v3331_v15, %v2221_v39 }
 0x266   : > { %v2231_v59 = vpop.f32.mrb[174].mxu1  ;;  %v3334_v48 = vpop.f32.mrb[174].mxu0  ;;  %v8126_v1 = vld [vmem:[%s9207_s22 + $0x40] ss:$8 sps:$4 sm:$0xff]  }
 0x267   : > { %v2232_v53 = vadd.f32 %v2231_v59, %v9166_v19  ;;  %v3336_v21 = vpop.f32.mrb[175].mxu0  ;;  %v2233_v11 = vpop.f32.mrb[175].mxu1  ;;  %v9445_v29 = vadd.f32 %v3334_v48, %v2224_v8  ;;  %v8129_v19 = vld [vmem:[%s9223_s23 + $0x30] ss:$8 sps:$4 sm:$0xff]   ;;  %v8134_v48 = vld [vmem:[%s9207_s22 + $0x54] ss:$8 sps:$4 sm:$0xff]  }
 0x269   : > { %4395 = vmatmul.mubr.bf16.gmra.mrb[24].mxu1 %v8120_v23  ;;  %5588 = vmatmul.mubr.bf16.gmra.mrb[24].mxu0 %v8123_v35  ;;  %v8137_v23 = vld [vmem:[%s9223_s23 + $0x44] ss:$8 sps:$4 sm:$0xff]  }
 0x26a   : > { %7346 = vmatprep.mubr.msk.bf16.mxu1 %vm897_vm0, %v8128_v58  ;;  %7512 = vmatprep.mubr.msk.bf16.mxu0 %vm897_vm0, %v8131_v10 }
 0x26c   : > { %v2236_v14 = vpop.f32.mrb[176].mxu1  ;;  %v3339_v39 = vpop.f32.mrb[176].mxu0 }
 0x26d   : > { %v2237_v9 = vadd.f32 %v2236_v14, %v9177_v2  ;;  %v2238_v15 = vpop.f32.mrb[177].mxu1  ;;  %v3341_v33 = vpop.f32.mrb[177].mxu0  ;;  %v9452_v59 = vadd.f32 %v3339_v39, %v2229_v30 }
 0x26e   : > { %v2239_v21 = vpop.f32.mrb[178].mxu1  ;;  %v3342_v8 = vpop.f32.mrb[178].mxu0  ;;  %v8132_v33 = vld [vmem:[%s9207_s22 + $0x50] ss:$8 sps:$4 sm:$0xff]  }
 0x26f   : > { %v2240_v35 = vadd.f32 %v2239_v21, %v9182_v7  ;;  %v3344_v58 = vpop.f32.mrb[179].mxu0  ;;  %v2241_v10 = vpop.f32.mrb[179].mxu1  ;;  %v9457_v11 = vadd.f32 %v3342_v8, %v2232_v53  ;;  %v8135_v7 = vld [vmem:[%s9223_s23 + $0x40] ss:$8 sps:$4 sm:$0xff]   ;;  %v8140_v8 = vld [vmem:[%s9207_s22 + $0x64] ss:$8 sps:$4 sm:$0xff]  }
 0x271   : > { %4403 = vmatmul.mubr.bf16.gmra.mrb[28].mxu1 %v8126_v1  ;;  %5596 = vmatmul.mubr.bf16.gmra.mrb[28].mxu0 %v8129_v19  ;;  %v8143_v1 = vld [vmem:[%s9223_s23 + $0x54] ss:$8 sps:$4 sm:$0xff]  }
 0x272   : > { %7347 = vmatprep.mubr.msk.bf16.mxu1 %vm897_vm0, %v8134_v48  ;;  %7513 = vmatprep.mubr.msk.bf16.mxu0 %vm897_vm0, %v8137_v23 }
 0x274   : > { %v2244_v2 = vpop.f32.mrb[180].mxu1  ;;  %v3347_v30 = vpop.f32.mrb[180].mxu0 }
 0x275   : > { %v2245_v14 = vadd.f32 %v2244_v2, %v8833_v26  ;;  %v2246_v39 = vpop.f32.mrb[181].mxu1  ;;  %v3349_v15 = vpop.f32.mrb[181].mxu0  ;;  %v9464_v21 = vadd.f32 %v3347_v30, %v2237_v9  ;;  %v10167_v2 = vld [vmem:[#allocation3_spill] sm:$0xff] }
 0x276   : > { %v2247_v58 = vpop.f32.mrb[182].mxu1  ;;  %v3350_v53 = vpop.f32.mrb[182].mxu0 }
 0x277   : > { %10165 = vst [vmem:[#allocation45_spill] sm:$0xff] %v9464_v21  ;;  %v2248_v19 = vadd.f32 %v2247_v58, %v8839_v32  ;;  %v3352_v48 = vpop.f32.mrb[183].mxu0  ;;  %v2249_v23 = vpop.f32.mrb[183].mxu1  ;;  %v9469_v10 = vadd.f32 %v3350_v53, %v2240_v35  ;;  %v8138_v21 = vld [vmem:[%s9207_s22 + $0x60] ss:$8 sps:$4 sm:$0xff]  }
 0x278   : > { %v8141_v32 = vld [vmem:[%s9223_s23 + $0x50] ss:$8 sps:$4 sm:$0xff]   ;;  %v8146_v53 = vld [vmem:[%s9207_s22 + $0x74] ss:$8 sps:$4 sm:$0xff]  }
 0x279   : > { %10166 = vst [vmem:[#allocation46_spill] sm:$0xff] %v9469_v10  ;;  %4411 = vmatmul.mubr.bf16.gmra.mrb[32].mxu1 %v8132_v33  ;;  %5604 = vmatmul.mubr.bf16.gmra.mrb[32].mxu0 %v8135_v7  ;;  %v8149_v33 = vld [vmem:[%s9223_s23 + $0x64] ss:$8 sps:$4 sm:$0xff]   ;;  %v10169_v7 = vld [vmem:[#allocation4_spill] sm:$0xff] }
 0x27a   : > { %7348 = vmatprep.mubr.msk.bf16.mxu1 %vm897_vm0, %v8140_v8  ;;  %7514 = vmatprep.mubr.msk.bf16.mxu0 %vm897_vm0, %v8143_v1 }
 0x27c   : > { %v2252_v26 = vpop.f32.mrb[184].mxu1  ;;  %v3355_v9 = vpop.f32.mrb[184].mxu0 }
 0x27d   : > { %v2253_v30 = vadd.f32 %v2252_v26, %v10167_v2  ;;  %v2254_v39 = vpop.f32.mrb[185].mxu1  ;;  %v3357_v15 = vpop.f32.mrb[185].mxu0  ;;  %v9476_v58 = vadd.f32 %v3355_v9, %v2245_v14  ;;  %v10171_v9 = vld [vmem:[#allocation5_spill] sm:$0xff] }
 0x27e   : > { %v2255_v48 = vpop.f32.mrb[186].mxu1  ;;  %v3358_v35 = vpop.f32.mrb[186].mxu0 }
 0x27f   : > { %10168 = vst [vmem:[#allocation3_spill] sm:$0xff] %v9476_v58  ;;  %v2256_v8 = vadd.f32 %v2255_v48, %v10169_v7  ;;  %v3360_v23 = vpop.f32.mrb[187].mxu0  ;;  %v2257_v1 = vpop.f32.mrb[187].mxu1  ;;  %v9481_v10 = vadd.f32 %v3358_v35, %v2248_v19  ;;  %v8144_v58 = vld [vmem:[%s9207_s22 + $0x70] ss:$8 sps:$4 sm:$0xff]  }
 0x280   : > { %v8147_v48 = vld [vmem:[%s9223_s23 + $0x60] ss:$8 sps:$4 sm:$0xff]   ;;  %v8152_v35 = vld [vmem:[%s9207_s22 + $0x84] ss:$8 sps:$4 sm:$0xff]  }
 0x281   : > { %10170 = vst [vmem:[#allocation4_spill] sm:$0xff] %v9481_v10  ;;  %4419 = vmatmul.mubr.bf16.gmra.mrb[36].mxu1 %v8138_v21  ;;  %5612 = vmatmul.mubr.bf16.gmra.mrb[36].mxu0 %v8141_v32  ;;  %v8155_v21 = vld [vmem:[%s9223_s23 + $0x74] ss:$8 sps:$4 sm:$0xff]   ;;  %v10173_v32 = vld [vmem:[#allocation6_spill] sm:$0xff] }
 0x282   : > { %7349 = vmatprep.mubr.msk.bf16.mxu1 %vm897_vm0, %v8146_v53  ;;  %7515 = vmatprep.mubr.msk.bf16.mxu0 %vm897_vm0, %v8149_v33 }
 0x284   : > { %v2260_v14 = vpop.f32.mrb[188].mxu1  ;;  %v3363_v26 = vpop.f32.mrb[188].mxu0 }
 0x285   : > { %v2261_v2 = vadd.f32 %v2260_v14, %v10171_v9  ;;  %v2262_v39 = vpop.f32.mrb[189].mxu1  ;;  %v3365_v15 = vpop.f32.mrb[189].mxu0  ;;  %v9488_v7 = vadd.f32 %v3363_v26, %v2253_v30  ;;  %v10175_v26 = vld [vmem:[#allocation7_spill] sm:$0xff] }
 0x286   : > { %v2263_v23 = vpop.f32.mrb[190].mxu1  ;;  %v3366_v19 = vpop.f32.mrb[190].mxu0 }
 0x287   : > { %10172 = vst [vmem:[#allocation5_spill] sm:$0xff] %v9488_v7  ;;  %v2264_v53 = vadd.f32 %v2263_v23, %v10173_v32  ;;  %v3368_v1 = vpop.f32.mrb[191].mxu0  ;;  %v2265_v33 = vpop.f32.mrb[191].mxu1  ;;  %v9493_v10 = vadd.f32 %v3366_v19, %v2256_v8  ;;  %v8150_v7 = vld [vmem:[%s9207_s22 + $0x80] ss:$8 sps:$4 sm:$0xff]  }
 0x288   : > { %v8153_v23 = vld [vmem:[%s9223_s23 + $0x70] ss:$8 sps:$4 sm:$0xff]   ;;  %v8158_v19 = vld [vmem:[%s9207_s22 + $0x94] ss:$8 sps:$4 sm:$0xff]  }
 0x289   : > { %10174 = vst [vmem:[#allocation6_spill] sm:$0xff] %v9493_v10  ;;  %4427 = vmatmul.mubr.bf16.gmra.mrb[40].mxu1 %v8144_v58  ;;  %5620 = vmatmul.mubr.bf16.gmra.mrb[40].mxu0 %v8147_v48  ;;  %v8161_v58 = vld [vmem:[%s9223_s23 + $0x84] ss:$8 sps:$4 sm:$0xff]   ;;  %v10177_v48 = vld [vmem:[#allocation8_spill] sm:$0xff] }
 0x28a   : > { %7350 = vmatprep.mubr.msk.bf16.mxu1 %vm897_vm0, %v8152_v35  ;;  %7516 = vmatprep.mubr.msk.bf16.mxu0 %vm897_vm0, %v8155_v21 }
 0x28c   : > { %v2268_v30 = vpop.f32.mrb[192].mxu1  ;;  %v3371_v14 = vpop.f32.mrb[192].mxu0 }
 0x28d   : > { %v2269_v9 = vadd.f32 %v2268_v30, %v10175_v26  ;;  %v2270_v39 = vpop.f32.mrb[193].mxu1  ;;  %v3373_v15 = vpop.f32.mrb[193].mxu0  ;;  %v9500_v32 = vadd.f32 %v3371_v14, %v2261_v2  ;;  %v10179_v14 = vld [vmem:[#allocation9_spill] sm:$0xff] }
 0x28e   : > { %v2271_v1 = vpop.f32.mrb[194].mxu1  ;;  %v3374_v8 = vpop.f32.mrb[194].mxu0 }
 0x28f   : > { %10176 = vst [vmem:[#allocation7_spill] sm:$0xff] %v9500_v32  ;;  %v2272_v35 = vadd.f32 %v2271_v1, %v10177_v48  ;;  %v3376_v33 = vpop.f32.mrb[195].mxu0  ;;  %v2273_v21 = vpop.f32.mrb[195].mxu1  ;;  %v9505_v10 = vadd.f32 %v3374_v8, %v2264_v53  ;;  %v8156_v48 = vld [vmem:[%s9207_s22 + $0x90] ss:$8 sps:$4 sm:$0xff]  }
 0x290   : > { %v8159_v33 = vld [vmem:[%s9223_s23 + $0x80] ss:$8 sps:$4 sm:$0xff]   ;;  %v8164_v8 = vld [vmem:[%s9207_s22 + $0xa4] ss:$8 sps:$4 sm:$0xff]  }
 0x291   : > { %10178 = vst [vmem:[#allocation8_spill] sm:$0xff] %v9505_v10  ;;  %4435 = vmatmul.mubr.bf16.gmra.mrb[44].mxu1 %v8150_v7  ;;  %5628 = vmatmul.mubr.bf16.gmra.mrb[44].mxu0 %v8153_v23  ;;  %v8167_v7 = vld [vmem:[%s9223_s23 + $0x94] ss:$8 sps:$4 sm:$0xff]   ;;  %v10181_v23 = vld [vmem:[#allocation10_spill] sm:$0xff] }
 0x292   : > { %7351 = vmatprep.mubr.msk.bf16.mxu1 %vm897_vm0, %v8158_v19  ;;  %7517 = vmatprep.mubr.msk.bf16.mxu0 %vm897_vm0, %v8161_v58 }
 0x294   : > { %v2276_v2 = vpop.f32.mrb[196].mxu1  ;;  %v3379_v30 = vpop.f32.mrb[196].mxu0 }
 0x295   : > { %v2277_v26 = vadd.f32 %v2276_v2, %v10179_v14  ;;  %v9510_v39 = vadd.f32 %v3379_v30, %v2269_v9  ;;  %v2278_v15 = vpop.f32.mrb[197].mxu1  ;;  %v3381_v1 = vpop.f32.mrb[197].mxu0  ;;  %v10183_v30 = vld [vmem:[#allocation11_spill] sm:$0xff] }
 0x296   : > { %v2279_v21 = vpop.f32.mrb[198].mxu1  ;;  %v3382_v53 = vpop.f32.mrb[198].mxu0 }
 0x297   : > { %10180 = vst [vmem:[#allocation9_spill] sm:$0xff] %v9510_v39  ;;  %v2280_v19 = vadd.f32 %v2279_v21, %v10181_v23  ;;  %v9517_v10 = vadd.f32 %v3382_v53, %v2272_v35  ;;  %v3384_v58 = vpop.f32.mrb[199].mxu0  ;;  %v2281_v32 = vpop.f32.mrb[199].mxu1  ;;  %v8162_v35 = vld [vmem:[%s9207_s22 + $0xa0] ss:$8 sps:$4 sm:$0xff]  }
 0x298   : > { %v8165_v53 = vld [vmem:[%s9223_s23 + $0x90] ss:$8 sps:$4 sm:$0xff]   ;;  %v8170_v32 = vld [vmem:[%s9207_s22 + $0xb4] ss:$8 sps:$4 sm:$0xff]  }
 0x299   : > { %10182 = vst [vmem:[#allocation10_spill] sm:$0xff] %v9517_v10  ;;  %4443 = vmatmul.mubr.bf16.gmra.mrb[48].mxu1 %v8156_v48  ;;  %5636 = vmatmul.mubr.bf16.gmra.mrb[48].mxu0 %v8159_v33  ;;  %v8173_v48 = vld [vmem:[%s9223_s23 + $0xa4] ss:$8 sps:$4 sm:$0xff]   ;;  %v10185_v33 = vld [vmem:[#allocation12_spill] sm:$0xff] }
 0x29a   : > { %7352 = vmatprep.mubr.msk.bf16.mxu1 %vm897_vm0, %v8164_v8  ;;  %7518 = vmatprep.mubr.msk.bf16.mxu0 %vm897_vm0, %v8167_v7 }
 0x29c   : > { %v2284_v9 = vpop.f32.mrb[200].mxu1  ;;  %v3387_v2 = vpop.f32.mrb[200].mxu0 }
 0x29d   : > { %v2285_v14 = vadd.f32 %v2284_v9, %v10183_v30  ;;  %v9522_v15 = vadd.f32 %v3387_v2, %v2277_v26  ;;  %v2286_v1 = vpop.f32.mrb[201].mxu1  ;;  %v3389_v21 = vpop.f32.mrb[201].mxu0  ;;  %v10187_v2 = vld [vmem:[#allocation13_spill] sm:$0xff] }
 0x29e   : > { %v2287_v23 = vpop.f32.mrb[202].mxu1  ;;  %v3390_v58 = vpop.f32.mrb[202].mxu0 }
 0x29f   : > { %10184 = vst [vmem:[#allocation11_spill] sm:$0xff] %v9522_v15  ;;  %v2288_v8 = vadd.f32 %v2287_v23, %v10185_v33  ;;  %v9529_v10 = vadd.f32 %v3390_v58, %v2280_v19  ;;  %v3392_v7 = vpop.f32.mrb[203].mxu0  ;;  %v2289_v39 = vpop.f32.mrb[203].mxu1  ;;  %v8168_v19 = vld [vmem:[%s9207_s22 + $0xb0] ss:$8 sps:$4 sm:$0xff]  }
 0x2a0   : > { %v8171_v58 = vld [vmem:[%s9223_s23 + $0xa0] ss:$8 sps:$4 sm:$0xff]   ;;  %v8176_v39 = vld [vmem:[%s9207_s22 + $0xc4] ss:$8 sps:$4 sm:$0xff]  }
 0x2a1   : > { %10186 = vst [vmem:[#allocation12_spill] sm:$0xff] %v9529_v10  ;;  %4451 = vmatmul.mubr.bf16.gmra.mrb[52].mxu1 %v8162_v35  ;;  %5644 = vmatmul.mubr.bf16.gmra.mrb[52].mxu0 %v8165_v53  ;;  %v8179_v35 = vld [vmem:[%s9223_s23 + $0xb4] ss:$8 sps:$4 sm:$0xff]   ;;  %v10189_v53 = vld [vmem:[#allocation14_spill] sm:$0xff] }
 0x2a2   : > { %7353 = vmatprep.mubr.msk.bf16.mxu1 %vm897_vm0, %v8170_v32  ;;  %7519 = vmatprep.mubr.msk.bf16.mxu0 %vm897_vm0, %v8173_v48 }
 0x2a4   : > { %v2292_v26 = vpop.f32.mrb[204].mxu1  ;;  %v3395_v9 = vpop.f32.mrb[204].mxu0 }
 0x2a5   : > { %v2293_v30 = vadd.f32 %v2292_v26, %v10187_v2  ;;  %v9534_v1 = vadd.f32 %v3395_v9, %v2285_v14  ;;  %v2294_v21 = vpop.f32.mrb[205].mxu1  ;;  %v3397_v23 = vpop.f32.mrb[205].mxu0  ;;  %v10191_v9 = vld [vmem:[#allocation15_spill] sm:$0xff] }
 0x2a6   : > { %v2295_v33 = vpop.f32.mrb[206].mxu1  ;;  %v3398_v7 = vpop.f32.mrb[206].mxu0 }
 0x2a7   : > { %10188 = vst [vmem:[#allocation13_spill] sm:$0xff] %v9534_v1  ;;  %v2296_v32 = vadd.f32 %v2295_v33, %v10189_v53  ;;  %v9541_v10 = vadd.f32 %v3398_v7, %v2288_v8  ;;  %v3400_v48 = vpop.f32.mrb[207].mxu0  ;;  %v2297_v15 = vpop.f32.mrb[207].mxu1  ;;  %v8174_v8 = vld [vmem:[%s9207_s22 + $0xc0] ss:$8 sps:$4 sm:$0xff]  }
 0x2a8   : > { %v8177_v7 = vld [vmem:[%s9223_s23 + $0xb0] ss:$8 sps:$4 sm:$0xff]   ;;  %v8182_v15 = vld [vmem:[%s9207_s22 + $0xd4] ss:$8 sps:$4 sm:$0xff]  }
 0x2a9   : > { %10190 = vst [vmem:[#allocation14_spill] sm:$0xff] %v9541_v10  ;;  %4459 = vmatmul.mubr.bf16.gmra.mrb[56].mxu1 %v8168_v19  ;;  %5652 = vmatmul.mubr.bf16.gmra.mrb[56].mxu0 %v8171_v58  ;;  %v8185_v19 = vld [vmem:[%s9223_s23 + $0xc4] ss:$8 sps:$4 sm:$0xff]   ;;  %v10193_v58 = vld [vmem:[#allocation16_spill] sm:$0xff] }
 0x2aa   : > { %7354 = vmatprep.mubr.msk.bf16.mxu1 %vm897_vm0, %v8176_v39  ;;  %7520 = vmatprep.mubr.msk.bf16.mxu0 %vm897_vm0, %v8179_v35 }
 0x2ac   : > { %v2300_v14 = vpop.f32.mrb[208].mxu1  ;;  %v3403_v26 = vpop.f32.mrb[208].mxu0 }
 0x2ad   : > { %v2301_v2 = vadd.f32 %v2300_v14, %v10191_v9  ;;  %v9546_v21 = vadd.f32 %v3403_v26, %v2293_v30  ;;  %v2302_v23 = vpop.f32.mrb[209].mxu1  ;;  %v3405_v33 = vpop.f32.mrb[209].mxu0  ;;  %v10195_v26 = vld [vmem:[#allocation17_spill] sm:$0xff] }
 0x2ae   : > { %v2303_v53 = vpop.f32.mrb[210].mxu1  ;;  %v3406_v48 = vpop.f32.mrb[210].mxu0 }
 0x2af   : > { %10192 = vst [vmem:[#allocation15_spill] sm:$0xff] %v9546_v21  ;;  %v2304_v39 = vadd.f32 %v2303_v53, %v10193_v58  ;;  %v9553_v10 = vadd.f32 %v3406_v48, %v2296_v32  ;;  %v3408_v35 = vpop.f32.mrb[211].mxu0  ;;  %v2305_v1 = vpop.f32.mrb[211].mxu1  ;;  %v8180_v32 = vld [vmem:[%s9207_s22 + $0xd0] ss:$8 sps:$4 sm:$0xff]  }
 0x2b0   : > { %v8183_v48 = vld [vmem:[%s9223_s23 + $0xc0] ss:$8 sps:$4 sm:$0xff]   ;;  %v8188_v1 = vld [vmem:[%s9207_s22 + $0xe4] ss:$8 sps:$4 sm:$0xff]  }
 0x2b1   : > { %10194 = vst [vmem:[#allocation16_spill] sm:$0xff] %v9553_v10  ;;  %4467 = vmatmul.mubr.bf16.gmra.mrb[60].mxu1 %v8174_v8  ;;  %5660 = vmatmul.mubr.bf16.gmra.mrb[60].mxu0 %v8177_v7  ;;  %v8191_v8 = vld [vmem:[%s9223_s23 + $0xd4] ss:$8 sps:$4 sm:$0xff]   ;;  %v10197_v7 = vld [vmem:[#allocation18_spill] sm:$0xff] }
 0x2b2   : > { %7355 = vmatprep.mubr.msk.bf16.mxu1 %vm897_vm0, %v8182_v15  ;;  %7521 = vmatprep.mubr.msk.bf16.mxu0 %vm897_vm0, %v8185_v19 }
 0x2b4   : > { %v2308_v30 = vpop.f32.mrb[212].mxu1  ;;  %v3411_v14 = vpop.f32.mrb[212].mxu0 }
 0x2b5   : > { %v2309_v9 = vadd.f32 %v2308_v30, %v10195_v26  ;;  %v9558_v23 = vadd.f32 %v3411_v14, %v2301_v2  ;;  %v2310_v33 = vpop.f32.mrb[213].mxu1  ;;  %v3413_v53 = vpop.f32.mrb[213].mxu0  ;;  %v10199_v14 = vld [vmem:[#allocation19_spill] sm:$0xff] }
 0x2b6   : > { %v2311_v58 = vpop.f32.mrb[214].mxu1  ;;  %v3414_v35 = vpop.f32.mrb[214].mxu0 }
 0x2b7   : > { %10196 = vst [vmem:[#allocation17_spill] sm:$0xff] %v9558_v23  ;;  %v2312_v15 = vadd.f32 %v2311_v58, %v10197_v7  ;;  %v9565_v10 = vadd.f32 %v3414_v35, %v2304_v39  ;;  %v3416_v19 = vpop.f32.mrb[215].mxu0  ;;  %v2313_v21 = vpop.f32.mrb[215].mxu1  ;;  %v8186_v39 = vld [vmem:[%s9207_s22 + $0xe0] ss:$8 sps:$4 sm:$0xff]  }
 0x2b8   : > { %v8189_v35 = vld [vmem:[%s9223_s23 + $0xd0] ss:$8 sps:$4 sm:$0xff]   ;;  %v8194_v21 = vld [vmem:[%s9207_s22 + $0xf4] ss:$8 sps:$4 sm:$0xff]  }
 0x2b9   : > { %10198 = vst [vmem:[#allocation18_spill] sm:$0xff] %v9565_v10  ;;  %4475 = vmatmul.mubr.bf16.gmra.mrb[64].mxu1 %v8180_v32  ;;  %5668 = vmatmul.mubr.bf16.gmra.mrb[64].mxu0 %v8183_v48  ;;  %v8197_v32 = vld [vmem:[%s9223_s23 + $0xe4] ss:$8 sps:$4 sm:$0xff]   ;;  %v10201_v48 = vld [vmem:[#allocation20_spill] sm:$0xff] }
 0x2ba   : > { %7356 = vmatprep.mubr.msk.bf16.mxu1 %vm897_vm0, %v8188_v1  ;;  %7522 = vmatprep.mubr.msk.bf16.mxu0 %vm897_vm0, %v8191_v8 }
 0x2bc   : > { %v2316_v2 = vpop.f32.mrb[216].mxu1  ;;  %v3419_v30 = vpop.f32.mrb[216].mxu0 }
 0x2bd   : > { %v2317_v26 = vadd.f32 %v2316_v2, %v10199_v14  ;;  %v9570_v33 = vadd.f32 %v3419_v30, %v2309_v9  ;;  %v2318_v53 = vpop.f32.mrb[217].mxu1  ;;  %v3421_v58 = vpop.f32.mrb[217].mxu0  ;;  %v10203_v30 = vld [vmem:[#allocation21_spill] sm:$0xff] }
 0x2be   : > { %v2319_v7 = vpop.f32.mrb[218].mxu1  ;;  %v3422_v19 = vpop.f32.mrb[218].mxu0 }
 0x2bf   : > { %10200 = vst [vmem:[#allocation19_spill] sm:$0xff] %v9570_v33  ;;  %v2320_v1 = vadd.f32 %v2319_v7, %v10201_v48  ;;  %v9577_v10 = vadd.f32 %v3422_v19, %v2312_v15  ;;  %v3424_v8 = vpop.f32.mrb[219].mxu0  ;;  %v2321_v23 = vpop.f32.mrb[219].mxu1  ;;  %v8192_v15 = vld [vmem:[%s9207_s22 + $0xf0] ss:$8 sps:$4 sm:$0xff]  }
 0x2c0   : > { %v8195_v19 = vld [vmem:[%s9223_s23 + $0xe0] ss:$8 sps:$4 sm:$0xff]   ;;  %v8200_v23 = vld [vmem:[%s9207_s22 + $0x104] ss:$8 sps:$4 sm:$0xff]  }
 0x2c1   : > { %10202 = vst [vmem:[#allocation20_spill] sm:$0xff] %v9577_v10  ;;  %4483 = vmatmul.mubr.bf16.gmra.mrb[68].mxu1 %v8186_v39  ;;  %5676 = vmatmul.mubr.bf16.gmra.mrb[68].mxu0 %v8189_v35  ;;  %v8203_v39 = vld [vmem:[%s9223_s23 + $0xf4] ss:$8 sps:$4 sm:$0xff]   ;;  %v10205_v35 = vld [vmem:[#allocation22_spill] sm:$0xff] }
 0x2c2   : > { %7357 = vmatprep.mubr.msk.bf16.mxu1 %vm897_vm0, %v8194_v21  ;;  %7523 = vmatprep.mubr.msk.bf16.mxu0 %vm897_vm0, %v8197_v32 }
 0x2c4   : > { %v2324_v9 = vpop.f32.mrb[220].mxu1  ;;  %v3427_v2 = vpop.f32.mrb[220].mxu0 }
 0x2c5   : > { %v2325_v14 = vadd.f32 %v2324_v9, %v10203_v30  ;;  %v9582_v53 = vadd.f32 %v3427_v2, %v2317_v26  ;;  %v2326_v58 = vpop.f32.mrb[221].mxu1  ;;  %v3429_v7 = vpop.f32.mrb[221].mxu0  ;;  %v10207_v2 = vld [vmem:[#allocation23_spill] sm:$0xff] }
 0x2c6   : > { %v2327_v48 = vpop.f32.mrb[222].mxu1  ;;  %v3430_v8 = vpop.f32.mrb[222].mxu0 }
 0x2c7   : > { %10204 = vst [vmem:[#allocation21_spill] sm:$0xff] %v9582_v53  ;;  %v2328_v21 = vadd.f32 %v2327_v48, %v10205_v35  ;;  %v9589_v10 = vadd.f32 %v3430_v8, %v2320_v1  ;;  %v3432_v32 = vpop.f32.mrb[223].mxu0  ;;  %v2329_v33 = vpop.f32.mrb[223].mxu1  ;;  %v8198_v1 = vld [vmem:[%s9207_s22 + $0x100] ss:$8 sps:$4 sm:$0xff]  }
 0x2c8   : > { %v8201_v8 = vld [vmem:[%s9223_s23 + $0xf0] ss:$8 sps:$4 sm:$0xff]   ;;  %v8206_v33 = vld [vmem:[%s9207_s22 + $0x114] ss:$8 sps:$4 sm:$0xff]  }
 0x2c9   : > { %10206 = vst [vmem:[#allocation22_spill] sm:$0xff] %v9589_v10  ;;  %4491 = vmatmul.mubr.bf16.gmra.mrb[72].mxu1 %v8192_v15  ;;  %5684 = vmatmul.mubr.bf16.gmra.mrb[72].mxu0 %v8195_v19  ;;  %v8209_v15 = vld [vmem:[%s9223_s23 + $0x104] ss:$8 sps:$4 sm:$0xff]   ;;  %v10209_v19 = vld [vmem:[#allocation24_spill] sm:$0xff] }
 0x2ca   : > { %7358 = vmatprep.mubr.msk.bf16.mxu1 %vm897_vm0, %v8200_v23  ;;  %7524 = vmatprep.mubr.msk.bf16.mxu0 %vm897_vm0, %v8203_v39 }
 0x2cc   : > { %v2332_v26 = vpop.f32.mrb[224].mxu1  ;;  %v3435_v9 = vpop.f32.mrb[224].mxu0 }
 0x2cd   : > { %v2333_v30 = vadd.f32 %v2332_v26, %v10207_v2  ;;  %v9594_v58 = vadd.f32 %v3435_v9, %v2325_v14  ;;  %v2334_v7 = vpop.f32.mrb[225].mxu1  ;;  %v3437_v48 = vpop.f32.mrb[225].mxu0  ;;  %v10211_v9 = vld [vmem:[#allocation25_spill] sm:$0xff] }
 0x2ce   : > { %v2335_v35 = vpop.f32.mrb[226].mxu1  ;;  %v3438_v32 = vpop.f32.mrb[226].mxu0 }
 0x2cf   : > { %10208 = vst [vmem:[#allocation23_spill] sm:$0xff] %v9594_v58  ;;  %v2336_v23 = vadd.f32 %v2335_v35, %v10209_v19  ;;  %v9601_v10 = vadd.f32 %v3438_v32, %v2328_v21  ;;  %v3440_v39 = vpop.f32.mrb[227].mxu0  ;;  %v2337_v53 = vpop.f32.mrb[227].mxu1  ;;  %v8204_v21 = vld [vmem:[%s9207_s22 + $0x110] ss:$8 sps:$4 sm:$0xff]  }
 0x2d0   : > { %v8207_v32 = vld [vmem:[%s9223_s23 + $0x100] ss:$8 sps:$4 sm:$0xff]   ;;  %v8212_v53 = vld [vmem:[%s9207_s22 + $0x124] ss:$8 sps:$4 sm:$0xff]  }
 0x2d1   : > { %10210 = vst [vmem:[#allocation24_spill] sm:$0xff] %v9601_v10  ;;  %4499 = vmatmul.mubr.bf16.gmra.mrb[76].mxu1 %v8198_v1  ;;  %5692 = vmatmul.mubr.bf16.gmra.mrb[76].mxu0 %v8201_v8  ;;  %v8215_v1 = vld [vmem:[%s9223_s23 + $0x114] ss:$8 sps:$4 sm:$0xff]   ;;  %v10213_v8 = vld [vmem:[#allocation26_spill] sm:$0xff] }
 0x2d2   : > { %7359 = vmatprep.mubr.msk.bf16.mxu1 %vm897_vm0, %v8206_v33  ;;  %7525 = vmatprep.mubr.msk.bf16.mxu0 %vm897_vm0, %v8209_v15 }
 0x2d4   : > { %v2340_v14 = vpop.f32.mrb[228].mxu1  ;;  %v3443_v26 = vpop.f32.mrb[228].mxu0 }
 0x2d5   : > { %v2341_v2 = vadd.f32 %v2340_v14, %v10211_v9  ;;  %v9606_v7 = vadd.f32 %v3443_v26, %v2333_v30  ;;  %v2342_v48 = vpop.f32.mrb[229].mxu1  ;;  %v3445_v35 = vpop.f32.mrb[229].mxu0  ;;  %v10215_v26 = vld [vmem:[#allocation27_spill] sm:$0xff] }
 0x2d6   : > { %v2343_v19 = vpop.f32.mrb[230].mxu1  ;;  %v3446_v39 = vpop.f32.mrb[230].mxu0 }
 0x2d7   : > { %10212 = vst [vmem:[#allocation25_spill] sm:$0xff] %v9606_v7  ;;  %v2344_v33 = vadd.f32 %v2343_v19, %v10213_v8  ;;  %v9613_v10 = vadd.f32 %v3446_v39, %v2336_v23  ;;  %v3448_v15 = vpop.f32.mrb[231].mxu0  ;;  %v2345_v58 = vpop.f32.mrb[231].mxu1  ;;  %v8210_v23 = vld [vmem:[%s9207_s22 + $0x120] ss:$8 sps:$4 sm:$0xff]  }
 0x2d8   : > { %v8213_v39 = vld [vmem:[%s9223_s23 + $0x110] ss:$8 sps:$4 sm:$0xff]   ;;  %v8218_v58 = vld [vmem:[%s9207_s22 + $0x134] ss:$8 sps:$4 sm:$0xff]  }
 0x2d9   : > { %10214 = vst [vmem:[#allocation26_spill] sm:$0xff] %v9613_v10  ;;  %4507 = vmatmul.mubr.bf16.gmra.mrb[80].mxu1 %v8204_v21  ;;  %5700 = vmatmul.mubr.bf16.gmra.mrb[80].mxu0 %v8207_v32  ;;  %v8221_v21 = vld [vmem:[%s9223_s23 + $0x124] ss:$8 sps:$4 sm:$0xff]   ;;  %v10217_v32 = vld [vmem:[#allocation28_spill] sm:$0xff] }
 0x2da   : > { %7360 = vmatprep.mubr.msk.bf16.mxu1 %vm897_vm0, %v8212_v53  ;;  %7526 = vmatprep.mubr.msk.bf16.mxu0 %vm897_vm0, %v8215_v1 }
 0x2dc   : > { %v2348_v30 = vpop.f32.mrb[232].mxu1  ;;  %v3451_v14 = vpop.f32.mrb[232].mxu0 }
 0x2dd   : > { %v2349_v9 = vadd.f32 %v2348_v30, %v10215_v26  ;;  %v9618_v48 = vadd.f32 %v3451_v14, %v2341_v2  ;;  %v2350_v35 = vpop.f32.mrb[233].mxu1  ;;  %v3453_v19 = vpop.f32.mrb[233].mxu0  ;;  %v10219_v14 = vld [vmem:[#allocation29_spill] sm:$0xff] }
 0x2de   : > { %v2351_v8 = vpop.f32.mrb[234].mxu1  ;;  %v3454_v15 = vpop.f32.mrb[234].mxu0 }
 0x2df   : > { %10216 = vst [vmem:[#allocation27_spill] sm:$0xff] %v9618_v48  ;;  %v2352_v53 = vadd.f32 %v2351_v8, %v10217_v32  ;;  %v9625_v10 = vadd.f32 %v3454_v15, %v2344_v33  ;;  %v3456_v1 = vpop.f32.mrb[235].mxu0  ;;  %v2353_v7 = vpop.f32.mrb[235].mxu1  ;;  %v8216_v33 = vld [vmem:[%s9207_s22 + $0x130] ss:$8 sps:$4 sm:$0xff]  }
 0x2e0   : > { %v8219_v15 = vld [vmem:[%s9223_s23 + $0x120] ss:$8 sps:$4 sm:$0xff]   ;;  %v8224_v7 = vld [vmem:[%s9207_s22 + $0x144] ss:$8 sps:$4 sm:$0xff]  }
 0x2e1   : > { %10218 = vst [vmem:[#allocation28_spill] sm:$0xff] %v9625_v10  ;;  %4515 = vmatmul.mubr.bf16.gmra.mrb[84].mxu1 %v8210_v23  ;;  %5708 = vmatmul.mubr.bf16.gmra.mrb[84].mxu0 %v8213_v39  ;;  %v8227_v23 = vld [vmem:[%s9223_s23 + $0x134] ss:$8 sps:$4 sm:$0xff]   ;;  %v10221_v39 = vld [vmem:[#allocation30_spill] sm:$0xff] }
 0x2e2   : > { %7361 = vmatprep.mubr.msk.bf16.mxu1 %vm897_vm0, %v8218_v58  ;;  %7527 = vmatprep.mubr.msk.bf16.mxu0 %vm897_vm0, %v8221_v21 }
 0x2e4   : > { %v2356_v2 = vpop.f32.mrb[236].mxu1  ;;  %v3459_v30 = vpop.f32.mrb[236].mxu0 }
 0x2e5   : > { %v2357_v26 = vadd.f32 %v2356_v2, %v10219_v14  ;;  %v9630_v35 = vadd.f32 %v3459_v30, %v2349_v9  ;;  %v2358_v19 = vpop.f32.mrb[237].mxu1  ;;  %v3461_v8 = vpop.f32.mrb[237].mxu0  ;;  %v10223_v30 = vld [vmem:[#allocation31_spill] sm:$0xff] }
 0x2e6   : > { %v2359_v32 = vpop.f32.mrb[238].mxu1  ;;  %v3462_v1 = vpop.f32.mrb[238].mxu0 }
 0x2e7   : > { %10220 = vst [vmem:[#allocation29_spill] sm:$0xff] %v9630_v35  ;;  %v2360_v58 = vadd.f32 %v2359_v32, %v10221_v39  ;;  %v9637_v10 = vadd.f32 %v3462_v1, %v2352_v53  ;;  %v3464_v21 = vpop.f32.mrb[239].mxu0  ;;  %v2361_v48 = vpop.f32.mrb[239].mxu1  ;;  %v8222_v53 = vld [vmem:[%s9207_s22 + $0x140] ss:$8 sps:$4 sm:$0xff]  }
 0x2e8   : > { %v8225_v1 = vld [vmem:[%s9223_s23 + $0x130] ss:$8 sps:$4 sm:$0xff]   ;;  %v8230_v48 = vld [vmem:[%s9207_s22 + $0x154] ss:$8 sps:$4 sm:$0xff]  }
 0x2e9   : > { %10222 = vst [vmem:[#allocation30_spill] sm:$0xff] %v9637_v10  ;;  %4523 = vmatmul.mubr.bf16.gmra.mrb[88].mxu1 %v8216_v33  ;;  %5716 = vmatmul.mubr.bf16.gmra.mrb[88].mxu0 %v8219_v15  ;;  %v8233_v33 = vld [vmem:[%s9223_s23 + $0x144] ss:$8 sps:$4 sm:$0xff]   ;;  %v10225_v15 = vld [vmem:[#allocation32_spill] sm:$0xff] }
 0x2ea   : > { %7362 = vmatprep.mubr.msk.bf16.mxu1 %vm897_vm0, %v8224_v7  ;;  %7528 = vmatprep.mubr.msk.bf16.mxu0 %vm897_vm0, %v8227_v23 }
 0x2ec   : > { %v2364_v9 = vpop.f32.mrb[240].mxu1  ;;  %v3467_v2 = vpop.f32.mrb[240].mxu0 }
 0x2ed   : > { %v2365_v14 = vadd.f32 %v2364_v9, %v10223_v30  ;;  %v9642_v19 = vadd.f32 %v3467_v2, %v2357_v26  ;;  %v2366_v8 = vpop.f32.mrb[241].mxu1  ;;  %v3469_v32 = vpop.f32.mrb[241].mxu0  ;;  %v10227_v2 = vld [vmem:[#allocation33_spill] sm:$0xff] }
 0x2ee   : > { %v2367_v39 = vpop.f32.mrb[242].mxu1  ;;  %v3470_v21 = vpop.f32.mrb[242].mxu0 }
 0x2ef   : > { %10224 = vst [vmem:[#allocation31_spill] sm:$0xff] %v9642_v19  ;;  %v2368_v7 = vadd.f32 %v2367_v39, %v10225_v15  ;;  %v9649_v10 = vadd.f32 %v3470_v21, %v2360_v58  ;;  %v3472_v23 = vpop.f32.mrb[243].mxu0  ;;  %v2369_v35 = vpop.f32.mrb[243].mxu1  ;;  %v8228_v58 = vld [vmem:[%s9207_s22 + $0x150] ss:$8 sps:$4 sm:$0xff]  }
 0x2f0   : > { %v8231_v21 = vld [vmem:[%s9223_s23 + $0x140] ss:$8 sps:$4 sm:$0xff]   ;;  %v8236_v35 = vld [vmem:[%s9207_s22 + $0x164] ss:$8 sps:$4 sm:$0xff]  }
 0x2f1   : > { %10226 = vst [vmem:[#allocation32_spill] sm:$0xff] %v9649_v10  ;;  %4531 = vmatmul.mubr.bf16.gmra.mrb[92].mxu1 %v8222_v53  ;;  %5724 = vmatmul.mubr.bf16.gmra.mrb[92].mxu0 %v8225_v1  ;;  %v8239_v53 = vld [vmem:[%s9223_s23 + $0x154] ss:$8 sps:$4 sm:$0xff]   ;;  %v10229_v1 = vld [vmem:[#allocation34_spill] sm:$0xff] }
 0x2f2   : > { %7363 = vmatprep.mubr.msk.bf16.mxu1 %vm897_vm0, %v8230_v48  ;;  %7529 = vmatprep.mubr.msk.bf16.mxu0 %vm897_vm0, %v8233_v33 }
 0x2f4   : > { %v2372_v26 = vpop.f32.mrb[244].mxu1  ;;  %v3475_v9 = vpop.f32.mrb[244].mxu0 }
 0x2f5   : > { %v2373_v30 = vadd.f32 %v2372_v26, %v10227_v2  ;;  %v9654_v8 = vadd.f32 %v3475_v9, %v2365_v14  ;;  %v2374_v32 = vpop.f32.mrb[245].mxu1  ;;  %v3477_v39 = vpop.f32.mrb[245].mxu0  ;;  %v10231_v9 = vld [vmem:[#allocation35_spill] sm:$0xff] }
 0x2f6   : > { %v2375_v15 = vpop.f32.mrb[246].mxu1  ;;  %v3478_v23 = vpop.f32.mrb[246].mxu0 }
 0x2f7   : > { %10228 = vst [vmem:[#allocation33_spill] sm:$0xff] %v9654_v8  ;;  %v2376_v48 = vadd.f32 %v2375_v15, %v10229_v1  ;;  %v9661_v10 = vadd.f32 %v3478_v23, %v2368_v7  ;;  %v3480_v33 = vpop.f32.mrb[247].mxu0  ;;  %v2377_v19 = vpop.f32.mrb[247].mxu1  ;;  %v8234_v7 = vld [vmem:[%s9207_s22 + $0x160] ss:$8 sps:$4 sm:$0xff]  }
 0x2f8   : > { %v8237_v23 = vld [vmem:[%s9223_s23 + $0x150] ss:$8 sps:$4 sm:$0xff]   ;;  %v8242_v19 = vld [vmem:[%s9207_s22 + $0x174] ss:$8 sps:$4 sm:$0xff]  }
 0x2f9   : > { %10230 = vst [vmem:[#allocation34_spill] sm:$0xff] %v9661_v10  ;;  %4539 = vmatmul.mubr.bf16.gmra.mrb[96].mxu1 %v8228_v58  ;;  %5732 = vmatmul.mubr.bf16.gmra.mrb[96].mxu0 %v8231_v21  ;;  %v8245_v58 = vld [vmem:[%s9223_s23 + $0x164] ss:$8 sps:$4 sm:$0xff]   ;;  %v10233_v21 = vld [vmem:[#allocation36_spill] sm:$0xff] }
 0x2fa   : > { %7364 = vmatprep.mubr.msk.bf16.mxu1 %vm897_vm0, %v8236_v35  ;;  %7530 = vmatprep.mubr.msk.bf16.mxu0 %vm897_vm0, %v8239_v53 }
 0x2fc   : > { %v2380_v14 = vpop.f32.mrb[248].mxu1  ;;  %v3483_v26 = vpop.f32.mrb[248].mxu0 }
 0x2fd   : > { %v2381_v2 = vadd.f32 %v2380_v14, %v10231_v9  ;;  %v9666_v32 = vadd.f32 %v3483_v26, %v2373_v30  ;;  %v2382_v39 = vpop.f32.mrb[249].mxu1  ;;  %v3485_v15 = vpop.f32.mrb[249].mxu0  ;;  %v10235_v26 = vld [vmem:[#allocation37_spill] sm:$0xff] }
 0x2fe   : > { %v2383_v1 = vpop.f32.mrb[250].mxu1  ;;  %v3486_v33 = vpop.f32.mrb[250].mxu0 }
 0x2ff   : > { %10232 = vst [vmem:[#allocation35_spill] sm:$0xff] %v9666_v32  ;;  %v2384_v35 = vadd.f32 %v2383_v1, %v10233_v21  ;;  %v9673_v10 = vadd.f32 %v3486_v33, %v2376_v48  ;;  %v3488_v53 = vpop.f32.mrb[251].mxu0  ;;  %v2385_v8 = vpop.f32.mrb[251].mxu1  ;;  %v8240_v48 = vld [vmem:[%s9207_s22 + $0x170] ss:$8 sps:$4 sm:$0xff]  }
 0x300   : > { %v8243_v33 = vld [vmem:[%s9223_s23 + $0x160] ss:$8 sps:$4 sm:$0xff]   ;;  %v8248_v8 = vld [vmem:[%s9207_s22 + $0x184] ss:$8 sps:$4 sm:$0xff]  }
 0x301   : > { %10234 = vst [vmem:[#allocation36_spill] sm:$0xff] %v9673_v10  ;;  %4547 = vmatmul.mubr.bf16.gmra.mrb[100].mxu1 %v8234_v7  ;;  %5740 = vmatmul.mubr.bf16.gmra.mrb[100].mxu0 %v8237_v23  ;;  %v8251_v7 = vld [vmem:[%s9223_s23 + $0x174] ss:$8 sps:$4 sm:$0xff]   ;;  %v10237_v23 = vld [vmem:[#allocation38_spill] sm:$0xff] }
 0x302   : > { %7365 = vmatprep.mubr.msk.bf16.mxu1 %vm897_vm0, %v8242_v19  ;;  %7531 = vmatprep.mubr.msk.bf16.mxu0 %vm897_vm0, %v8245_v58 }
 0x304   : > { %v2388_v30 = vpop.f32.mrb[252].mxu1  ;;  %v3491_v14 = vpop.f32.mrb[252].mxu0 }
 0x305   : > { %v2389_v9 = vadd.f32 %v2388_v30, %v10235_v26  ;;  %v9678_v39 = vadd.f32 %v3491_v14, %v2381_v2  ;;  %v2390_v15 = vpop.f32.mrb[253].mxu1  ;;  %v3493_v1 = vpop.f32.mrb[253].mxu0  ;;  %v10239_v14 = vld [vmem:[#allocation39_spill] sm:$0xff] }
 0x306   : > { %v2391_v21 = vpop.f32.mrb[254].mxu1  ;;  %v3494_v53 = vpop.f32.mrb[254].mxu0 }
 0x307   : > { %10236 = vst [vmem:[#allocation37_spill] sm:$0xff] %v9678_v39  ;;  %v2392_v19 = vadd.f32 %v2391_v21, %v10237_v23  ;;  %v9685_v10 = vadd.f32 %v3494_v53, %v2384_v35  ;;  %v3496_v58 = vpop.f32.mrb[255].mxu0  ;;  %v2393_v32 = vpop.f32.mrb[255].mxu1  ;;  %v8246_v35 = vld [vmem:[%s9207_s22 + $0x180] ss:$8 sps:$4 sm:$0xff]  }
 0x308   : > { %v8249_v53 = vld [vmem:[%s9223_s23 + $0x170] ss:$8 sps:$4 sm:$0xff]   ;;  %v8254_v32 = vld [vmem:[%s9207_s22 + $0x194] ss:$8 sps:$4 sm:$0xff]  }
 0x309   : > { %10238 = vst [vmem:[#allocation38_spill] sm:$0xff] %v9685_v10  ;;  %4555 = vmatmul.mubr.bf16.gmra.mrb[104].mxu1 %v8240_v48  ;;  %5748 = vmatmul.mubr.bf16.gmra.mrb[104].mxu0 %v8243_v33  ;;  %v8257_v48 = vld [vmem:[%s9223_s23 + $0x184] ss:$8 sps:$4 sm:$0xff]   ;;  %v10241_v33 = vld [vmem:[#allocation40_spill] sm:$0xff] }
 0x30a   : > { %7366 = vmatprep.mubr.msk.bf16.mxu1 %vm897_vm0, %v8248_v8  ;;  %7532 = vmatprep.mubr.msk.bf16.mxu0 %vm897_vm0, %v8251_v7 }
 0x30c   : > { %v2396_v2 = vpop.f32.mrb[0].mxu1  ;;  %v3499_v30 = vpop.f32.mrb[0].mxu0 }
 0x30d   : > { %v2397_v26 = vadd.f32 %v2396_v2, %v10239_v14  ;;  %v9690_v15 = vadd.f32 %v3499_v30, %v2389_v9  ;;  %v2398_v1 = vpop.f32.mrb[1].mxu1  ;;  %v3501_v21 = vpop.f32.mrb[1].mxu0  ;;  %v10243_v30 = vld [vmem:[#allocation41_spill] sm:$0xff] }
 0x30e   : > { %v2399_v23 = vpop.f32.mrb[2].mxu1  ;;  %v3502_v58 = vpop.f32.mrb[2].mxu0 }
 0x30f   : > { %10240 = vst [vmem:[#allocation39_spill] sm:$0xff] %v9690_v15  ;;  %v2400_v8 = vadd.f32 %v2399_v23, %v10241_v33  ;;  %v9697_v10 = vadd.f32 %v3502_v58, %v2392_v19  ;;  %v3504_v7 = vpop.f32.mrb[3].mxu0  ;;  %v2401_v39 = vpop.f32.mrb[3].mxu1  ;;  %v8252_v19 = vld [vmem:[%s9207_s22 + $0x190] ss:$8 sps:$4 sm:$0xff]  }
 0x310   : > { %v8255_v58 = vld [vmem:[%s9223_s23 + $0x180] ss:$8 sps:$4 sm:$0xff]   ;;  %v8260_v39 = vld [vmem:[%s9207_s22 + $0x1a4] ss:$8 sps:$4 sm:$0xff]  }
 0x311   : > { %10242 = vst [vmem:[#allocation40_spill] sm:$0xff] %v9697_v10  ;;  %4563 = vmatmul.mubr.bf16.gmra.mrb[108].mxu1 %v8246_v35  ;;  %5756 = vmatmul.mubr.bf16.gmra.mrb[108].mxu0 %v8249_v53  ;;  %v8263_v35 = vld [vmem:[%s9223_s23 + $0x194] ss:$8 sps:$4 sm:$0xff]   ;;  %v10245_v53 = vld [vmem:[#allocation42_spill] sm:$0xff] }
 0x312   : > { %7367 = vmatprep.mubr.msk.bf16.mxu1 %vm897_vm0, %v8254_v32  ;;  %7533 = vmatprep.mubr.msk.bf16.mxu0 %vm897_vm0, %v8257_v48 }
 0x314   : > { %v2404_v9 = vpop.f32.mrb[4].mxu1  ;;  %v3507_v2 = vpop.f32.mrb[4].mxu0 }
 0x315   : > { %v2405_v14 = vadd.f32 %v2404_v9, %v10243_v30  ;;  %v9702_v1 = vadd.f32 %v3507_v2, %v2397_v26  ;;  %v2406_v21 = vpop.f32.mrb[5].mxu1  ;;  %v3509_v23 = vpop.f32.mrb[5].mxu0  ;;  %v10247_v2 = vld [vmem:[#allocation43_spill] sm:$0xff] }
 0x316   : > { %v2407_v33 = vpop.f32.mrb[6].mxu1  ;;  %v3510_v7 = vpop.f32.mrb[6].mxu0 }
 0x317   : > { %10244 = vst [vmem:[#allocation41_spill] sm:$0xff] %v9702_v1  ;;  %v2408_v32 = vadd.f32 %v2407_v33, %v10245_v53  ;;  %v9709_v10 = vadd.f32 %v3510_v7, %v2400_v8  ;;  %v3512_v48 = vpop.f32.mrb[7].mxu0  ;;  %v2409_v15 = vpop.f32.mrb[7].mxu1  ;;  %v8258_v8 = vld [vmem:[%s9207_s22 + $0x1a0] ss:$8 sps:$4 sm:$0xff]  }
 0x318   : > { %v8261_v7 = vld [vmem:[%s9223_s23 + $0x190] ss:$8 sps:$4 sm:$0xff]   ;;  %v8266_v15 = vld [vmem:[%s9207_s22 + $0x1b4] ss:$8 sps:$4 sm:$0xff]  }
 0x319   : > { %10246 = vst [vmem:[#allocation42_spill] sm:$0xff] %v9709_v10  ;;  %4571 = vmatmul.mubr.bf16.gmra.mrb[112].mxu1 %v8252_v19  ;;  %5764 = vmatmul.mubr.bf16.gmra.mrb[112].mxu0 %v8255_v58  ;;  %v8269_v19 = vld [vmem:[%s9223_s23 + $0x1a4] ss:$8 sps:$4 sm:$0xff]   ;;  %v10248_v58 = vld [vmem:[#allocation44_spill] sm:$0xff] }
 0x31a   : > { %7368 = vmatprep.mubr.msk.bf16.mxu1 %vm897_vm0, %v8260_v39  ;;  %7534 = vmatprep.mubr.msk.bf16.mxu0 %vm897_vm0, %v8263_v35 }
 0x31c   : > { %v2412_v26 = vpop.f32.mrb[8].mxu1  ;;  %v3515_v9 = vpop.f32.mrb[8].mxu0 }
 0x31d   : > { %v2413_v30 = vadd.f32 %v2412_v26, %v10247_v2  ;;  %v9714_v21 = vadd.f32 %v3515_v9, %v2405_v14  ;;  %v2414_v23 = vpop.f32.mrb[9].mxu1  ;;  %v3517_v33 = vpop.f32.mrb[9].mxu0 }
 0x31e   : > { %v2415_v53 = vpop.f32.mrb[10].mxu1  ;;  %v3518_v48 = vpop.f32.mrb[10].mxu0 }
 0x31f   : > { %v2416_v39 = vadd.f32 %v2415_v53, %v10248_v58  ;;  %v9721_v10 = vadd.f32 %v3518_v48, %v2408_v32  ;;  %v3520_v35 = vpop.f32.mrb[11].mxu0  ;;  %v2417_v1 = vpop.f32.mrb[11].mxu1  ;;  %v8264_v32 = vld [vmem:[%s9207_s22 + $0x1b0] ss:$8 sps:$4 sm:$0xff]   ;;  %v8267_v53 = vld [vmem:[%s9223_s23 + $0x1a0] ss:$8 sps:$4 sm:$0xff]  }
 0x320   : > { %v8272_v1 = vld [vmem:[%s9207_s22 + $0x1c4] ss:$8 sps:$4 sm:$0xff]   ;;  %v8275_v35 = vld [vmem:[%s9223_s23 + $0x1b4] ss:$8 sps:$4 sm:$0xff]  }
 0x321   : > { %10249 = vst [vmem:[#allocation43_spill] sm:$0xff] %v9721_v10  ;;  %4579 = vmatmul.mubr.bf16.gmra.mrb[116].mxu1 %v8258_v8  ;;  %5772 = vmatmul.mubr.bf16.gmra.mrb[116].mxu0 %v8261_v7 }
 0x322   : > { %7369 = vmatprep.mubr.msk.bf16.mxu1 %vm897_vm0, %v8266_v15  ;;  %7535 = vmatprep.mubr.msk.bf16.mxu0 %vm897_vm0, %v8269_v19 }
 0x324   : > { %v3523_v14 = vpop.f32.mrb[12].mxu0  ;;  %v4372_v26 = vpop.f32.mrb[12].mxu1 }
 0x325   : > { %v9725_v9 = vadd.f32 %v3523_v14, %v2413_v30  ;;  %v4731_v2 = vadd.f32 %v4372_v26, %v9192_v31  ;;  %v3525_v23 = vpop.f32.mrb[13].mxu0  ;;  %v4374_v33 = vpop.f32.mrb[13].mxu1 }
 0x326   : > { %v3526_v48 = vpop.f32.mrb[14].mxu0  ;;  %v4375_v58 = vpop.f32.mrb[14].mxu1  ;;  %v8270_v33 = vld [vmem:[%s9207_s22 + $0x1c0] ss:$8 sps:$4 sm:$0xff]  }
 0x327   : > { %10250 = vst [vmem:[#allocation44_spill] sm:$0xff] %v9725_v9  ;;  %v9732_v8 = vadd.f32 %v3526_v48, %v2416_v39  ;;  %v4732_v7 = vadd.f32 %v4375_v58, %v9197_v38  ;;  %v3528_v15 = vpop.f32.mrb[15].mxu0  ;;  %v4377_v19 = vpop.f32.mrb[15].mxu1  ;;  %v9740_v39 = vld [vmem:[%s10118_s2] ss:$0 sm:$0xff] }
 0x328   : > { %v8278_v58 = vld [vmem:[%s9207_s22 + $0x1d4] ss:$8 sps:$4 sm:$0xff]  }
 0x329   : > { %10251 = vst [vmem:[#allocation47_spill] sm:$0xff] %v9732_v8  ;;  %4587 = vmatmul.mubr.bf16.gmra.mrb[120].mxu1 %v8264_v32  ;;  %5780 = vmatmul.mubr.bf16.gmra.mrb[120].mxu0 %v8267_v53  ;;  %v8273_v32 = vld [vmem:[%s9223_s23 + $0x1b0] ss:$8 sps:$4 sm:$0xff]  }
 0x32a   : > { %7370 = vmatprep.mubr.msk.bf16.mxu1 %vm897_vm0, %v8272_v1  ;;  %7536 = vmatprep.mubr.msk.bf16.mxu0 %vm897_vm0, %v8275_v35  ;;  %v8281_v1 = vld [vmem:[%s9223_s23 + $0x1c4] ss:$8 sps:$4 sm:$0xff]  }
 0x32c   : > { %v4380_v31 = vpop.f32.mrb[16].mxu1  ;;  %v5573_v30 = vpop.f32.mrb[16].mxu0 }
 0x32d   : > { %v4733_v14 = vadd.f32 %v4380_v31, %v9209_v44  ;;  %v5932_v38 = vadd.f32 %v5573_v30, %v4731_v2  ;;  %v4382_v26 = vpop.f32.mrb[17].mxu1  ;;  %v5575_v23 = vpop.f32.mrb[17].mxu0 }
 0x32e   : > { %v4383_v48 = vpop.f32.mrb[18].mxu1  ;;  %v5576_v53 = vpop.f32.mrb[18].mxu0  ;;  %v8279_v26 = vld [vmem:[%s9223_s23 + $0x1c0] ss:$8 sps:$4 sm:$0xff]  }
 0x32f   : > { %v6029_v35 = vadd.f32 %v9740_v39, %v5932_v38  ;;  %v4734_v15 = vadd.f32 %v4383_v48, %v9213_v28  ;;  %v5933_v19 = vadd.f32 %v5576_v53, %v4732_v7  ;;  %v5578_v8 = vpop.f32.mrb[19].mxu0  ;;  %v4385_v9 = vpop.f32.mrb[19].mxu1  ;;  %v8276_v38 = vld [vmem:[%s9207_s22 + $0x1d0] ss:$8 sps:$4 sm:$0xff]   ;;  %v8287_v48 = vld [vmem:[%s9223_s23 + $0x1d4] ss:$8 sps:$4 sm:$0xff]  }
 0x331   : > { %v6119_v10 = vmax.f32 %v6029_v35, 0.0  ;;  %v6030_v44 = vadd.f32 %v9740_v39, %v5933_v19  ;;  %4595 = vmatmul.mubr.bf16.gmra.mrb[124].mxu1 %v8270_v33  ;;  %5788 = vmatmul.mubr.bf16.gmra.mrb[124].mxu0 %v8273_v32  ;;  %v8284_v32 = vld [vmem:[%s9207_s22 + $0x1e4] ss:$8 sps:$4 sm:$0xff]  }
 0x332   : > { %7371 = vmatprep.mubr.msk.bf16.mxu1 %vm897_vm0, %v8278_v58  ;;  %7537 = vmatprep.mubr.msk.bf16.mxu0 %vm897_vm0, %v8281_v1 }
 0x333   : > { %6209 = vst [vmem:[#allocation2] sm:$0xff] %v6119_v10  ;;  %v6120_v2 = vmax.f32 %v6030_v44, 0.0 }
 0x334   : > { %v4388_v31 = vpop.f32.mrb[20].mxu1  ;;  %v5581_v28 = vpop.f32.mrb[20].mxu0 }
 0x335   : > { %6210 = vst [vmem:[#allocation2 + $0x8] sm:$0xff] %v6120_v2  ;;  %v4735_v9 = vadd.f32 %v4388_v31, %v9225_v25  ;;  %v5934_v8 = vadd.f32 %v5581_v28, %v4733_v14  ;;  %v4390_v7 = vpop.f32.mrb[21].mxu1  ;;  %v5583_v30 = vpop.f32.mrb[21].mxu0 }
 0x336   : > { %v4391_v23 = vpop.f32.mrb[22].mxu1  ;;  %v5584_v33 = vpop.f32.mrb[22].mxu0  ;;  %v8285_v7 = vld [vmem:[%s9223_s23 + $0x1d0] ss:$8 sps:$4 sm:$0xff]   ;;  %v8290_v30 = vld [vmem:[%s9207_s22 + $0x1f4] ss:$8 sps:$4 sm:$0xff]  }
 0x337   : > { %v6031_v53 = vadd.f32 %v9740_v39, %v5934_v8  ;;  %v4736_v10 = vadd.f32 %v4391_v23, %v9229_v27  ;;  %v5935_v58 = vadd.f32 %v5584_v33, %v4734_v15  ;;  %v5586_v1 = vpop.f32.mrb[23].mxu0  ;;  %v4393_v35 = vpop.f32.mrb[23].mxu1  ;;  %v8282_v15 = vld [vmem:[%s9207_s22 + $0x1e0] ss:$8 sps:$4 sm:$0xff]   ;;  %v8293_v23 = vld [vmem:[%s9223_s23 + $0x1e4] ss:$8 sps:$4 sm:$0xff]  }
 0x338   : > { %v8288_v35 = vld [vmem:[%s9207_s22 + $0x1f0] ss:$8 sps:$4 sm:$0xff]  }
 0x339   : > { %v6121_v19 = vmax.f32 %v6031_v53, 0.0  ;;  %v6032_v25 = vadd.f32 %v9740_v39, %v5935_v58  ;;  %4603 = vmatmul.mubr.bf16.gmra.mrb[128].mxu1 %v8276_v38  ;;  %5796 = vmatmul.mubr.bf16.gmra.mrb[128].mxu0 %v8279_v26 }
 0x33a   : > { %7372 = vmatprep.mubr.msk.bf16.mxu1 %vm897_vm0, %v8284_v32  ;;  %7538 = vmatprep.mubr.msk.bf16.mxu0 %vm897_vm0, %v8287_v48 }
 0x33b   : > { %6211 = vst [vmem:[#allocation2 + $0x10] sm:$0xff] %v6121_v19  ;;  %v6122_v14 = vmax.f32 %v6032_v25, 0.0 }
 0x33c   : > { %v4396_v44 = vpop.f32.mrb[24].mxu1  ;;  %v5589_v27 = vpop.f32.mrb[24].mxu0 }
 0x33d   : > { %6212 = vst [vmem:[#allocation2 + $0x18] sm:$0xff] %v6122_v14  ;;  %v4737_v2 = vadd.f32 %v4396_v44, %v9236_v51  ;;  %v5936_v31 = vadd.f32 %v5589_v27, %v4735_v9  ;;  %v4398_v28 = vpop.f32.mrb[25].mxu1  ;;  %v5591_v8 = vpop.f32.mrb[25].mxu0  ;;  %v8291_v27 = vld [vmem:[%s9223_s23 + $0x1e0] ss:$8 sps:$4 sm:$0xff]  }
 0x33e   : > { %v4399_v38 = vpop.f32.mrb[26].mxu1  ;;  %v5592_v26 = vpop.f32.mrb[26].mxu0  ;;  %v8299_v8 = vld [vmem:[%s9223_s23 + $0x1f4] ss:$8 sps:$4 sm:$0xff]  }
 0x33f   : > { %v6033_v33 = vadd.f32 %v9740_v39, %v5936_v31  ;;  %v4738_v32 = vadd.f32 %v4399_v38, %v9241_v13  ;;  %v5937_v48 = vadd.f32 %v5592_v26, %v4736_v10  ;;  %v5594_v53 = vpop.f32.mrb[27].mxu0  ;;  %v4401_v58 = vpop.f32.mrb[27].mxu1 }
 0x341   : > { %v6123_v1 = vmax.f32 %v6033_v33, 0.0  ;;  %v6034_v51 = vadd.f32 %v9740_v39, %v5937_v48  ;;  %4611 = vmatmul.mubr.bf16.gmra.mrb[132].mxu1 %v8282_v15  ;;  %5804 = vmatmul.mubr.bf16.gmra.mrb[132].mxu0 %v8285_v7  ;;  %v8296_v15 = vld [vmem:[%s9207_s22 + $0x204] ss:$8 sps:$4 sm:$0xff]  }
 0x342   : > { %7373 = vmatprep.mubr.msk.bf16.mxu1 %vm897_vm0, %v8290_v30  ;;  %7539 = vmatprep.mubr.msk.bf16.mxu0 %vm897_vm0, %v8293_v23 }
 0x343   : > { %6213 = vst [vmem:[#allocation2 + $0x20] sm:$0xff] %v6123_v1  ;;  %v6124_v13 = vmax.f32 %v6034_v51, 0.0  ;;  %v8294_v51 = vld [vmem:[%s9207_s22 + $0x200] ss:$8 sps:$4 sm:$0xff]  }
 0x344   : > { %v4404_v9 = vpop.f32.mrb[28].mxu1  ;;  %v5597_v10 = vpop.f32.mrb[28].mxu0 }
 0x345   : > { %6214 = vst [vmem:[#allocation2 + $0x28] sm:$0xff] %v6124_v13  ;;  %v4739_v19 = vadd.f32 %v4404_v9, %v9248_v46  ;;  %v5938_v25 = vadd.f32 %v5597_v10, %v4737_v2  ;;  %v4406_v14 = vpop.f32.mrb[29].mxu1  ;;  %v5599_v44 = vpop.f32.mrb[29].mxu0  ;;  %v8297_v13 = vld [vmem:[%s9223_s23 + $0x1f0] ss:$8 sps:$4 sm:$0xff]  }
 0x346   : > { %v4407_v31 = vpop.f32.mrb[30].mxu1  ;;  %v5600_v28 = vpop.f32.mrb[30].mxu0 }
 0x347   : > { %v6035_v7 = vadd.f32 %v9740_v39, %v5938_v25  ;;  %v4740_v30 = vadd.f32 %v4407_v31, %v9253_v50  ;;  %v5939_v38 = vadd.f32 %v5600_v28, %v4738_v32  ;;  %v5602_v26 = vpop.f32.mrb[31].mxu0  ;;  %v4409_v23 = vpop.f32.mrb[31].mxu1  ;;  %v8305_v25 = vld [vmem:[%s9223_s23 + $0x204] ss:$8 sps:$4 sm:$0xff]  }
 0x348   : > { %v6299_v28 = vld [vmem:[#allocation2] ss:$2 sm:$0xff] }
 0x349   : > { %v6125_v46 = vmax.f32 %v6035_v7, 0.0  ;;  %v6036_v2 = vadd.f32 %v9740_v39, %v5939_v38  ;;  %4619 = vmatmul.mubr.bf16.gmra.mrb[136].mxu1 %v8288_v35  ;;  %5812 = vmatmul.mubr.bf16.gmra.mrb[136].mxu0 %v8291_v27  ;;  %v8302_v35 = vld [vmem:[%s9207_s22 + $0x214] ss:$8 sps:$4 sm:$0xff]  }
 0x34a   : > { %7374 = vmatprep.mubr.msk.bf16.mxu1 %vm897_vm0, %v8296_v15  ;;  %7540 = vmatprep.mubr.msk.bf16.mxu0 %vm897_vm0, %v8299_v8  ;;  %v6305_v8 = vld [vmem:[#allocation2 + $0x1] ss:$2 sm:$0xff] }
 0x34b   : > { %6215 = vst [vmem:[#allocation2 + $0x30] sm:$0xff] %v6125_v46  ;;  %v6126_v50 = vmax.f32 %v6036_v2, 0.0 }
 0x34c   : > { %v4412_v33 = vpop.f32.mrb[32].mxu1  ;;  %v5605_v32 = vpop.f32.mrb[32].mxu0 }
 0x34d   : > { %6216 = vst [vmem:[#allocation2 + $0x38] sm:$0xff] %v6126_v50  ;;  %v4741_v48 = vadd.f32 %v4412_v33, %v9260_v62  ;;  %v5940_v53 = vadd.f32 %v5605_v32, %v4739_v19  ;;  %v4414_v58 = vpop.f32.mrb[33].mxu1  ;;  %v5607_v1 = vpop.f32.mrb[33].mxu0 }
 0x34e   : > { %v4415_v9 = vpop.f32.mrb[34].mxu1  ;;  %v5608_v10 = vpop.f32.mrb[34].mxu0  ;;  %v8300_v58 = vld [vmem:[%s9207_s22 + $0x210] ss:$8 sps:$4 sm:$0xff]   ;;  %v8303_v1 = vld [vmem:[%s9223_s23 + $0x200] ss:$8 sps:$4 sm:$0xff]  }
 0x34f   : > { %v6037_v14 = vadd.f32 %v9740_v39, %v5940_v53  ;;  %v4742_v44 = vadd.f32 %v4415_v9, %v9265_v0  ;;  %v5941_v27 = vadd.f32 %v5608_v10, %v4740_v30  ;;  %v5610_v15 = vpop.f32.mrb[35].mxu0  ;;  %v4417_v31 = vpop.f32.mrb[35].mxu1  ;;  %v6322_v0 = vmax.f32 %v6299_v28, %v6305_v8  ;;  %v8308_v9 = vld [vmem:[%s9207_s22 + $0x224] ss:$8 sps:$4 sm:$0xff]   ;;  %v8311_v10 = vld [vmem:[%s9223_s23 + $0x214] ss:$8 sps:$4 sm:$0xff]  }
 0x350   : > { %v6309_v28 = vld [vmem:[#allocation2 + $0x21] ss:$2 sm:$0xf] }
 0x351   : > { %v6127_v62 = vmax.f32 %v6037_v14, 0.0  ;;  %v6038_v19 = vadd.f32 %v9740_v39, %v5941_v27  ;;  %4627 = vmatmul.mubr.bf16.gmra.mrb[140].mxu1 %v8294_v51  ;;  %5820 = vmatmul.mubr.bf16.gmra.mrb[140].mxu0 %v8297_v13 }
 0x352   : > { %v6311_v7 = vld [vmem:[#allocation2 + $0x28] ss:$2 sm:$0xff]  ;;  %v6317_v38 = vld [vmem:[#allocation2 + $0x29] ss:$2 sm:$0xff]  ;;  %7375 = vmatprep.mubr.msk.bf16.mxu1 %vm897_vm0, %v8302_v35  ;;  %7541 = vmatprep.mubr.msk.bf16.mxu0 %vm897_vm0, %v8305_v25 }
 0x353   : > { %v6325_v30 = vmax.f32 %v6311_v7, %v6317_v38  ;;  %6217 = vst [vmem:[#allocation2 + $0x40] sm:$0xff] %v6127_v62  ;;  %v6128_v26 = vmax.f32 %v6038_v19, 0.0  ;;  %v6301_v35 = vld [vmem:[#allocation2 + $0x10] ss:$2 sm:$0xff] }
 0x354   : > { %v4420_v23 = vpop.f32.mrb[36].mxu1  ;;  %v5613_v46 = vpop.f32.mrb[36].mxu0 }
 0x355   : > { %v6328_v2 = vmax.f32 %v6322_v0, %v6325_v30  ;;  %6218 = vst [vmem:[#allocation2 + $0x48] sm:$0xff] %v6128_v26  ;;  %v4743_v50 = vadd.f32 %v4420_v23, %v9272_v55  ;;  %v5942_v33 = vadd.f32 %v5613_v46, %v4741_v48  ;;  %v4422_v32 = vpop.f32.mrb[37].mxu1  ;;  %v5615_v53 = vpop.f32.mrb[37].mxu0  ;;  %v6307_v55 = vld [vmem:[#allocation2 + $0x11] ss:$2 sm:$0xff] }
 0x356   : > { %v4423_v51 = vpop.f32.mrb[38].mxu1  ;;  %v5616_v13 = vpop.f32.mrb[38].mxu0  ;;  %v6303_v48 = vld [vmem:[#allocation2 + $0x20] ss:$2 sm:$0xf] }
 0x357   : > { %6332 = vst.msk [vmem:[%s9806_s7] sm:$0xff] %vm6331_vm1, %v6328_v2  ;;  %v6039_v25 = vadd.f32 %v9740_v39, %v5942_v33  ;;  %v4744_v14 = vadd.f32 %v4423_v51, %v9277_v22  ;;  %v5943_v27 = vadd.f32 %v5616_v13, %v4742_v44  ;;  %v5618_v15 = vpop.f32.mrb[39].mxu0  ;;  %v4425_v31 = vpop.f32.mrb[39].mxu1  ;;  %v6323_v22 = vmax.f32 %v6301_v35, %v6307_v55  ;;  %v8306_v32 = vld [vmem:[%s9207_s22 + $0x220] ss:$8 sps:$4 sm:$0xff]  }
 0x358   : > { %v6324_v26 = vmax.f32 %v6303_v48, %v6309_v28  ;;  %v8309_v53 = vld [vmem:[%s9223_s23 + $0x210] ss:$8 sps:$4 sm:$0xff]  }
 0x359   : > { %v6129_v8 = vmax.f32 %v6039_v25, 0.0  ;;  %v6040_v62 = vadd.f32 %v9740_v39, %v5943_v27  ;;  %4635 = vmatmul.mubr.bf16.gmra.mrb[144].mxu1 %v8300_v58  ;;  %5828 = vmatmul.mubr.bf16.gmra.mrb[144].mxu0 %v8303_v1 }
 0x35a   : > { %v6313_v19 = vld [vmem:[#allocation2 + $0x38] ss:$2 sm:$0xff]  ;;  %v6319_v7 = vld [vmem:[#allocation2 + $0x39] ss:$2 sm:$0xff]  ;;  %7376 = vmatprep.mubr.msk.bf16.mxu1 %vm897_vm0, %v8308_v9  ;;  %7542 = vmatprep.mubr.msk.bf16.mxu0 %vm897_vm0, %v8311_v10 }
 0x35b   : > { %v6326_v44 = vmax.f32 %v6313_v19, %v6319_v7  ;;  %6219 = vst [vmem:[#allocation2 + $0x50] sm:$0xff] %v6129_v8  ;;  %v6130_v38 = vmax.f32 %v6040_v62, 0.0  ;;  %v8314_v9 = vld [vmem:[%s9207_s22 + $0x234] ss:$8 sps:$4 sm:$0xff]   ;;  %v8317_v10 = vld [vmem:[%s9223_s23 + $0x224] ss:$8 sps:$4 sm:$0xff]  }
 0x35c   : > { %v6315_v0 = vld [vmem:[#allocation2 + $0x48] ss:$2 sm:$0xf]  ;;  %v6321_v30 = vld [vmem:[#allocation2 + $0x49] ss:$2 sm:$0xf] }
 0x35d   : > { %v6329_v23 = vmax.f32 %v6323_v22, %v6326_v44  ;;  %v6327_v46 = vmax.f32 %v6315_v0, %v6321_v30  ;;  %6220 = vst [vmem:[#allocation2 + $0x58] sm:$0xff] %v6130_v38  ;;  %v4428_v2 = vpop.f32.mrb[40].mxu1  ;;  %v5621_v33 = vpop.f32.mrb[40].mxu0  ;;  %v8312_v7 = vld [vmem:[%s9207_s22 + $0x230] ss:$8 sps:$4 sm:$0xff]  }
 0x35e   : > { %v4745_v58 = vadd.f32 %v4428_v2, %v9284_v49  ;;  %v5944_v1 = vadd.f32 %v5621_v33, %v4743_v50  ;;  %v4430_v51 = vpop.f32.mrb[41].mxu1  ;;  %v5623_v13 = vpop.f32.mrb[41].mxu0  ;;  %v8315_v22 = vld [vmem:[%s9223_s23 + $0x220] ss:$8 sps:$4 sm:$0xff]   ;;  %v8320_v30 = vld [vmem:[%s9207_s22 + $0x244] ss:$8 sps:$4 sm:$0xff]  }
 0x35f   : > { %6333 = vst.msk [vmem:[%s9806_s7 + $0x8] sm:$0xff] %vm6331_vm1, %v6329_v23  ;;  %v6330_v35 = vmax.f32 %v6324_v26, %v6327_v46  ;;  %v4431_v25 = vpop.f32.mrb[42].mxu1  ;;  %v5624_v27 = vpop.f32.mrb[42].mxu0  ;;  %v8323_v26 = vld [vmem:[%s9223_s23 + $0x234] ss:$8 sps:$4 sm:$0xff]  }
 0x360   : > { %v6041_v15 = vadd.f32 %v9740_v39, %v5944_v1  ;;  %v4746_v31 = vadd.f32 %v4431_v25, %v9289_v3  ;;  %v5945_v55 = vadd.f32 %v5624_v27, %v4744_v14  ;;  %v5626_v48 = vpop.f32.mrb[43].mxu0  ;;  %v4433_v28 = vpop.f32.mrb[43].mxu1  ;;  %v8318_v25 = vld [vmem:[%s9207_s22 + $0x240] ss:$8 sps:$4 sm:$0xff]   ;;  %v8321_v27 = vld [vmem:[%s9223_s23 + $0x230] ss:$8 sps:$4 sm:$0xff]  }
 0x361   : > { %6335 = vst.msk [vmem:[%s9806_s7 + $0x10] sm:$0x3] %vm6334_vm2, %v6330_v35  ;;  %4643 = vmatmul.mubr.bf16.gmra.mrb[148].mxu1 %v8306_v32  ;;  %5836 = vmatmul.mubr.bf16.gmra.mrb[148].mxu0 %v8309_v53  ;;  %v8329_v48 = vld [vmem:[%s9223_s23 + $0x244] ss:$8 sps:$4 sm:$0xff]  }
 0x362   : > { %v6131_v49 = vmax.f32 %v6041_v15, 0.0  ;;  %v6042_v50 = vadd.f32 %v9740_v39, %v5945_v55  ;;  %7377 = vmatprep.mubr.msk.bf16.mxu1 %vm897_vm0, %v8314_v9  ;;  %7543 = vmatprep.mubr.msk.bf16.mxu0 %vm897_vm0, %v8317_v10  ;;  %v8326_v55 = vld [vmem:[%s9207_s22 + $0x254] ss:$8 sps:$4 sm:$0xff]  }
 0x364   : > { %6221 = vst [vmem:[#allocation2 + $0x60] sm:$0xff] %v6131_v49  ;;  %v6132_v3 = vmax.f32 %v6042_v50, 0.0  ;;  %v4436_v14 = vpop.f32.mrb[44].mxu1  ;;  %v5629_v62 = vpop.f32.mrb[44].mxu0 }
 0x365   : > { %v4747_v8 = vadd.f32 %v4436_v14, %v9296_v61  ;;  %v4438_v19 = vpop.f32.mrb[45].mxu1  ;;  %v5946_v44 = vadd.f32 %v5629_v62, %v4745_v58  ;;  %v5631_v38 = vpop.f32.mrb[45].mxu0 }
 0x366   : > { %6222 = vst [vmem:[#allocation2 + $0x68] sm:$0xff] %v6132_v3  ;;  %v4439_v0 = vpop.f32.mrb[46].mxu1  ;;  %v5632_v46 = vpop.f32.mrb[46].mxu0 }
 0x367   : > { %v4748_v23 = vadd.f32 %v4439_v0, %v9301_v45  ;;  %v4441_v2 = vpop.f32.mrb[47].mxu1  ;;  %v6043_v33 = vadd.f32 %v9740_v39, %v5946_v44  ;;  %v5947_v32 = vadd.f32 %v5632_v46, %v4746_v31  ;;  %v5634_v53 = vpop.f32.mrb[47].mxu0  ;;  %v8324_v0 = vld [vmem:[%s9207_s22 + $0x250] ss:$8 sps:$4 sm:$0xff]   ;;  %v8332_v46 = vld [vmem:[%s9207_s22 + $0x264] ss:$8 sps:$4 sm:$0xff]  }
 0x368   : > { %v8335_v2 = vld [vmem:[%s9223_s23 + $0x254] ss:$8 sps:$4 sm:$0xff]  }
 0x369   : > { %4651 = vmatmul.mubr.bf16.gmra.mrb[152].mxu1 %v8312_v7  ;;  %5844 = vmatmul.mubr.bf16.gmra.mrb[152].mxu0 %v8315_v22  ;;  %v6133_v61 = vmax.f32 %v6043_v33, 0.0  ;;  %v6044_v1 = vadd.f32 %v9740_v39, %v5947_v32 }
 0x36a   : > { %7378 = vmatprep.mubr.msk.bf16.mxu1 %vm897_vm0, %v8320_v30  ;;  %7544 = vmatprep.mubr.msk.bf16.mxu0 %vm897_vm0, %v8323_v26  ;;  %v8327_v30 = vld [vmem:[%s9223_s23 + $0x240] ss:$8 sps:$4 sm:$0xff]  }
 0x36b   : > { %6223 = vst [vmem:[#allocation2 + $0x70] sm:$0xff] %v6133_v61  ;;  %v6134_v45 = vmax.f32 %v6044_v1, 0.0 }
 0x36c   : > { %v4444_v58 = vpop.f32.mrb[48].mxu1  ;;  %v5637_v51 = vpop.f32.mrb[48].mxu0 }
 0x36d   : > { %v4749_v13 = vadd.f32 %v4444_v58, %v9308_v12  ;;  %v5948_v9 = vadd.f32 %v5637_v51, %v4747_v8  ;;  %v4446_v10 = vpop.f32.mrb[49].mxu1  ;;  %v5639_v35 = vpop.f32.mrb[49].mxu0  ;;  %6224 = vst [vmem:[#allocation2 + $0x78] sm:$0xff] %v6134_v45  ;;  %v6337_v45 = vld [vmem:[#allocation2 + $0x50] ss:$2 sm:$0xff] }
 0x36e   : > { %v4447_v15 = vpop.f32.mrb[50].mxu1  ;;  %v5640_v31 = vpop.f32.mrb[50].mxu0  ;;  %v6343_v58 = vld [vmem:[#allocation2 + $0x51] ss:$2 sm:$0xff] }
 0x36f   : > { %v6045_v28 = vadd.f32 %v9740_v39, %v5948_v9  ;;  %v4750_v49 = vadd.f32 %v4447_v15, %v9313_v6  ;;  %v5949_v50 = vadd.f32 %v5640_v31, %v4748_v23  ;;  %v5642_v3 = vpop.f32.mrb[51].mxu0  ;;  %v4449_v14 = vpop.f32.mrb[51].mxu1  ;;  %v6360_v10 = vmax.f32 %v6337_v45, %v6343_v58 }
 0x371   : > { %v6135_v12 = vmax.f32 %v6045_v28, 0.0  ;;  %v6046_v8 = vadd.f32 %v9740_v39, %v5949_v50  ;;  %4659 = vmatmul.mubr.bf16.gmra.mrb[156].mxu1 %v8318_v25  ;;  %5852 = vmatmul.mubr.bf16.gmra.mrb[156].mxu0 %v8321_v27  ;;  %v8333_v50 = vld [vmem:[%s9223_s23 + $0x250] ss:$8 sps:$4 sm:$0xff]  }
 0x372   : > { %7379 = vmatprep.mubr.msk.bf16.mxu1 %vm897_vm0, %v8326_v55  ;;  %7545 = vmatprep.mubr.msk.bf16.mxu0 %vm897_vm0, %v8329_v48 }
 0x373   : > { %6225 = vst [vmem:[#allocation2 + $0x80] sm:$0xff] %v6135_v12  ;;  %v6136_v62 = vmax.f32 %v6046_v8, 0.0  ;;  %v8338_v12 = vld [vmem:[%s9207_s22 + $0x274] ss:$8 sps:$4 sm:$0xff]   ;;  %v8341_v8 = vld [vmem:[%s9223_s23 + $0x264] ss:$8 sps:$4 sm:$0xff]  }
 0x374   : > { %v4452_v19 = vpop.f32.mrb[52].mxu1  ;;  %v5645_v6 = vpop.f32.mrb[52].mxu0 }
 0x375   : > { %v4751_v7 = vadd.f32 %v4452_v19, %v9320_v24  ;;  %v5950_v22 = vadd.f32 %v5645_v6, %v4749_v13  ;;  %v4454_v44 = vpop.f32.mrb[53].mxu1  ;;  %v5647_v38 = vpop.f32.mrb[53].mxu0  ;;  %6226 = vst [vmem:[#allocation2 + $0x88] sm:$0xff] %v6136_v62  ;;  %v6339_v62 = vld [vmem:[#allocation2 + $0x60] ss:$2 sm:$0xff] }
 0x376   : > { %v4455_v26 = vpop.f32.mrb[54].mxu1  ;;  %v5648_v23 = vpop.f32.mrb[54].mxu0 }
 0x377   : > { %v6047_v33 = vadd.f32 %v9740_v39, %v5950_v22  ;;  %v4752_v32 = vadd.f32 %v4455_v26, %v9325_v18  ;;  %v5951_v53 = vadd.f32 %v5648_v23, %v4750_v49  ;;  %v5650_v61 = vpop.f32.mrb[55].mxu0  ;;  %v4457_v1 = vpop.f32.mrb[55].mxu1  ;;  %v8330_v49 = vld [vmem:[%s9207_s22 + $0x260] ss:$8 sps:$4 sm:$0xff]  }
 0x379   : > { %v6137_v24 = vmax.f32 %v6047_v33, 0.0  ;;  %v6048_v51 = vadd.f32 %v9740_v39, %v5951_v53  ;;  %4667 = vmatmul.mubr.bf16.gmra.mrb[160].mxu1 %v8324_v0  ;;  %5860 = vmatmul.mubr.bf16.gmra.mrb[160].mxu0 %v8327_v30  ;;  %v6347_v0 = vld [vmem:[#allocation2 + $0x71] ss:$2 sm:$0xf] }
 0x37a   : > { %v6349_v13 = vld [vmem:[#allocation2 + $0x78] ss:$2 sm:$0xff]  ;;  %v6355_v9 = vld [vmem:[#allocation2 + $0x79] ss:$2 sm:$0xff]  ;;  %7380 = vmatprep.mubr.msk.bf16.mxu1 %vm897_vm0, %v8332_v46  ;;  %7546 = vmatprep.mubr.msk.bf16.mxu0 %vm897_vm0, %v8335_v2 }
 0x37b   : > { %v6363_v18 = vmax.f32 %v6349_v13, %v6355_v9  ;;  %6227 = vst [vmem:[#allocation2 + $0x90] sm:$0xff] %v6137_v24  ;;  %v6138_v35 = vmax.f32 %v6048_v51, 0.0  ;;  %v8336_v51 = vld [vmem:[%s9207_s22 + $0x270] ss:$8 sps:$4 sm:$0xff]   ;;  %v8339_v13 = vld [vmem:[%s9223_s23 + $0x260] ss:$8 sps:$4 sm:$0xff]  }
 0x37c   : > { %v4460_v25 = vpop.f32.mrb[56].mxu1  ;;  %v5653_v27 = vpop.f32.mrb[56].mxu0 }
 0x37d   : > { %v6366_v15 = vmax.f32 %v6360_v10, %v6363_v18  ;;  %6228 = vst [vmem:[#allocation2 + $0x98] sm:$0xff] %v6138_v35  ;;  %v4753_v31 = vadd.f32 %v4460_v25, %v9332_v42  ;;  %v5952_v55 = vadd.f32 %v5653_v27, %v4751_v7  ;;  %v4462_v48 = vpop.f32.mrb[57].mxu1  ;;  %v5655_v28 = vpop.f32.mrb[57].mxu0  ;;  %v6345_v42 = vld [vmem:[#allocation2 + $0x61] ss:$2 sm:$0xff] }
 0x37e   : > { %v4463_v3 = vpop.f32.mrb[58].mxu1  ;;  %v5656_v14 = vpop.f32.mrb[58].mxu0  ;;  %v6341_v7 = vld [vmem:[#allocation2 + $0x70] ss:$2 sm:$0xf] }
 0x37f   : > { %7555 = vst.msk [vmem:[%s9806_s7 + $0x18] sm:$0xff] %vm6331_vm1, %v6366_v15  ;;  %v6049_v19 = vadd.f32 %v9740_v39, %v5952_v55  ;;  %v4754_v6 = vadd.f32 %v4463_v3, %v9337_v34  ;;  %v5953_v22 = vadd.f32 %v5656_v14, %v4752_v32  ;;  %v5658_v44 = vpop.f32.mrb[59].mxu0  ;;  %v4465_v38 = vpop.f32.mrb[59].mxu1  ;;  %v6361_v34 = vmax.f32 %v6339_v62, %v6345_v42  ;;  %v8344_v25 = vld [vmem:[%s9207_s22 + $0x284] ss:$8 sps:$4 sm:$0xff]  }
 0x380   : > { %v6362_v61 = vmax.f32 %v6341_v7, %v6347_v0  ;;  %v8347_v27 = vld [vmem:[%s9223_s23 + $0x274] ss:$8 sps:$4 sm:$0xff]   ;;  %v8353_v0 = vld [vmem:[%s9223_s23 + $0x284] ss:$8 sps:$4 sm:$0xff]  }
 0x381   : > { %v6139_v30 = vmax.f32 %v6049_v19, 0.0  ;;  %v6050_v26 = vadd.f32 %v9740_v39, %v5953_v22  ;;  %4675 = vmatmul.mubr.bf16.gmra.mrb[164].mxu1 %v8330_v49  ;;  %5868 = vmatmul.mubr.bf16.gmra.mrb[164].mxu0 %v8333_v50  ;;  %v8345_v22 = vld [vmem:[%s9223_s23 + $0x270] ss:$8 sps:$4 sm:$0xff]   ;;  %v8350_v7 = vld [vmem:[%s9207_s22 + $0x294] ss:$8 sps:$4 sm:$0xff]  }
 0x382   : > { %v6351_v23 = vld [vmem:[#allocation2 + $0x88] ss:$2 sm:$0xff]  ;;  %v6357_v46 = vld [vmem:[#allocation2 + $0x89] ss:$2 sm:$0xff]  ;;  %7381 = vmatprep.mubr.msk.bf16.mxu1 %vm897_vm0, %v8338_v12  ;;  %7547 = vmatprep.mubr.msk.bf16.mxu0 %vm897_vm0, %v8341_v8 }
 0x383   : > { %v6364_v2 = vmax.f32 %v6351_v23, %v6357_v46  ;;  %6229 = vst [vmem:[#allocation2 + $0xa0] sm:$0xff] %v6139_v30  ;;  %v6140_v33 = vmax.f32 %v6050_v26, 0.0 }
 0x384   : > { %v6353_v32 = vld [vmem:[#allocation2 + $0x98] ss:$2 sm:$0xf]  ;;  %v6359_v53 = vld [vmem:[#allocation2 + $0x99] ss:$2 sm:$0xf] }
 0x385   : > { %v6367_v1 = vmax.f32 %v6361_v34, %v6364_v2  ;;  %v6365_v45 = vmax.f32 %v6353_v32, %v6359_v53  ;;  %6230 = vst [vmem:[#allocation2 + $0xa8] sm:$0xff] %v6140_v33  ;;  %v4468_v58 = vpop.f32.mrb[60].mxu1  ;;  %v5661_v24 = vpop.f32.mrb[60].mxu0 }
 0x386   : > { %v4755_v9 = vadd.f32 %v4468_v58, %v9344_v17  ;;  %v5954_v10 = vadd.f32 %v5661_v24, %v4753_v31  ;;  %v4470_v18 = vpop.f32.mrb[61].mxu1  ;;  %v5663_v35 = vpop.f32.mrb[61].mxu0  ;;  %v8348_v24 = vld [vmem:[%s9207_s22 + $0x290] ss:$8 sps:$4 sm:$0xff]  }
 0x387   : > { %7556 = vst.msk [vmem:[%s9806_s7 + $0x20] sm:$0xff] %vm6331_vm1, %v6367_v1  ;;  %v6368_v15 = vmax.f32 %v6362_v61, %v6365_v45  ;;  %v4471_v55 = vpop.f32.mrb[62].mxu1  ;;  %v5664_v48 = vpop.f32.mrb[62].mxu0  ;;  %v8359_v18 = vld [vmem:[%s9223_s23 + $0x294] ss:$8 sps:$4 sm:$0xff]  }
 0x388   : > { %v6051_v28 = vadd.f32 %v9740_v39, %v5954_v10  ;;  %v4756_v49 = vadd.f32 %v4471_v55, %v9349_v41  ;;  %v5955_v50 = vadd.f32 %v5664_v48, %v4754_v6  ;;  %v5666_v3 = vpop.f32.mrb[63].mxu0  ;;  %v4473_v14 = vpop.f32.mrb[63].mxu1  ;;  %v8342_v6 = vld [vmem:[%s9207_s22 + $0x280] ss:$8 sps:$4 sm:$0xff]   ;;  %v8356_v10 = vld [vmem:[%s9207_s22 + $0x2a4] ss:$8 sps:$4 sm:$0xff]  }
 0x389   : > { %7557 = vst.msk [vmem:[%s9806_s7 + $0x28] sm:$0x3] %vm6334_vm2, %v6368_v15  ;;  %4683 = vmatmul.mubr.bf16.gmra.mrb[168].mxu1 %v8336_v51  ;;  %5876 = vmatmul.mubr.bf16.gmra.mrb[168].mxu0 %v8339_v13  ;;  %v8351_v51 = vld [vmem:[%s9223_s23 + $0x280] ss:$8 sps:$4 sm:$0xff]  }
 0x38a   : > { %v6141_v17 = vmax.f32 %v6051_v28, 0.0  ;;  %v6052_v31 = vadd.f32 %v9740_v39, %v5955_v50  ;;  %7382 = vmatprep.mubr.msk.bf16.mxu1 %vm897_vm0, %v8344_v25  ;;  %7548 = vmatprep.mubr.msk.bf16.mxu0 %vm897_vm0, %v8347_v27 }
 0x38c   : > { %6231 = vst [vmem:[#allocation2 + $0xb0] sm:$0xff] %v6141_v17  ;;  %v6142_v41 = vmax.f32 %v6052_v31, 0.0  ;;  %v4476_v12 = vpop.f32.mrb[64].mxu1  ;;  %v5669_v62 = vpop.f32.mrb[64].mxu0  ;;  %v8354_v31 = vld [vmem:[%s9207_s22 + $0x2a0] ss:$8 sps:$4 sm:$0xff]  }
 0x38d   : > { %v4757_v8 = vadd.f32 %v4476_v12, %v9356_v63  ;;  %v4478_v19 = vpop.f32.mrb[65].mxu1  ;;  %v5956_v44 = vadd.f32 %v5669_v62, %v4755_v9  ;;  %v5671_v38 = vpop.f32.mrb[65].mxu0  ;;  %v8362_v62 = vld [vmem:[%s9207_s22 + $0x2b4] ss:$8 sps:$4 sm:$0xff]  }
 0x38e   : > { %6232 = vst [vmem:[#allocation2 + $0xb8] sm:$0xff] %v6142_v41  ;;  %v4479_v42 = vpop.f32.mrb[66].mxu1  ;;  %v5672_v26 = vpop.f32.mrb[66].mxu0  ;;  %v8357_v41 = vld [vmem:[%s9223_s23 + $0x290] ss:$8 sps:$4 sm:$0xff]  }
 0x38f   : > { %v4758_v30 = vadd.f32 %v4479_v42, %v9361_v4  ;;  %v4481_v23 = vpop.f32.mrb[67].mxu1  ;;  %v6053_v46 = vadd.f32 %v9740_v39, %v5956_v44  ;;  %v5957_v34 = vadd.f32 %v5672_v26, %v4756_v49  ;;  %v5674_v2 = vpop.f32.mrb[67].mxu0  ;;  %v8365_v19 = vld [vmem:[%s9223_s23 + $0x2a4] ss:$8 sps:$4 sm:$0xff]  }
 0x391   : > { %4691 = vmatmul.mubr.bf16.gmra.mrb[172].mxu1 %v8342_v6  ;;  %5884 = vmatmul.mubr.bf16.gmra.mrb[172].mxu0 %v8345_v22  ;;  %v6143_v63 = vmax.f32 %v6053_v46, 0.0  ;;  %v6054_v33 = vadd.f32 %v9740_v39, %v5957_v34 }
 0x392   : > { %7383 = vmatprep.mubr.msk.bf16.mxu1 %vm897_vm0, %v8350_v7  ;;  %7549 = vmatprep.mubr.msk.bf16.mxu0 %vm897_vm0, %v8353_v0  ;;  %v6374_v7 = vld [vmem:[#allocation2 + $0xa0] ss:$2 sm:$0xff]  ;;  %v6380_v0 = vld [vmem:[#allocation2 + $0xa1] ss:$2 sm:$0xff] }
 0x393   : > { %6233 = vst [vmem:[#allocation2 + $0xc0] sm:$0xff] %v6143_v63  ;;  %v6144_v4 = vmax.f32 %v6054_v33, 0.0  ;;  %v6397_v46 = vmax.f32 %v6374_v7, %v6380_v0 }
 0x394   : > { %v4484_v32 = vpop.f32.mrb[68].mxu1  ;;  %v5677_v53 = vpop.f32.mrb[68].mxu0 }
 0x395   : > { %v4759_v61 = vadd.f32 %v4484_v32, %v9368_v20  ;;  %v5958_v1 = vadd.f32 %v5677_v53, %v4757_v8  ;;  %v4486_v45 = vpop.f32.mrb[69].mxu1  ;;  %v5679_v58 = vpop.f32.mrb[69].mxu0  ;;  %6234 = vst [vmem:[#allocation2 + $0xc8] sm:$0xff] %v6144_v4 }
 0x396   : > { %v4487_v13 = vpop.f32.mrb[70].mxu1  ;;  %v5680_v9 = vpop.f32.mrb[70].mxu0  ;;  %v8363_v45 = vld [vmem:[%s9223_s23 + $0x2a0] ss:$8 sps:$4 sm:$0xff]  }
 0x397   : > { %v6055_v35 = vadd.f32 %v9740_v39, %v5958_v1  ;;  %v4760_v25 = vadd.f32 %v4487_v13, %v9373_v36  ;;  %v5959_v27 = vadd.f32 %v5680_v9, %v4758_v30  ;;  %v5682_v15 = vpop.f32.mrb[71].mxu0  ;;  %v4489_v55 = vpop.f32.mrb[71].mxu1  ;;  %v8360_v1 = vld [vmem:[%s9207_s22 + $0x2b0] ss:$8 sps:$4 sm:$0xff]   ;;  %v8371_v13 = vld [vmem:[%s9223_s23 + $0x2b4] ss:$8 sps:$4 sm:$0xff]  }
 0x398   : > { %v6376_v9 = vld [vmem:[#allocation2 + $0xb0] ss:$2 sm:$0xff] }
 0x399   : > { %v6145_v20 = vmax.f32 %v6055_v35, 0.0  ;;  %v6056_v48 = vadd.f32 %v9740_v39, %v5959_v27  ;;  %4699 = vmatmul.mubr.bf16.gmra.mrb[176].mxu1 %v8348_v24  ;;  %5892 = vmatmul.mubr.bf16.gmra.mrb[176].mxu0 %v8351_v51  ;;  %v8368_v51 = vld [vmem:[%s9207_s22 + $0x2c4] ss:$8 sps:$4 sm:$0xff]  }
 0x39a   : > { %7384 = vmatprep.mubr.msk.bf16.mxu1 %vm897_vm0, %v8356_v10  ;;  %7550 = vmatprep.mubr.msk.bf16.mxu0 %vm897_vm0, %v8359_v18  ;;  %v6378_v15 = vld [vmem:[#allocation2 + $0xc0] ss:$2 sm:$0xf]  ;;  %v6384_v55 = vld [vmem:[#allocation2 + $0xc1] ss:$2 sm:$0xf] }
 0x39b   : > { %6235 = vst [vmem:[#allocation2 + $0xd0] sm:$0xff] %v6145_v20  ;;  %v6146_v28 = vmax.f32 %v6056_v48, 0.0 }
 0x39c   : > { %v4492_v49 = vpop.f32.mrb[72].mxu1  ;;  %v5685_v36 = vpop.f32.mrb[72].mxu0 }
 0x39d   : > { %v4761_v50 = vadd.f32 %v4492_v49, %v9380_v60  ;;  %v5960_v3 = vadd.f32 %v5685_v36, %v4759_v61  ;;  %v4494_v14 = vpop.f32.mrb[73].mxu1  ;;  %v5687_v17 = vpop.f32.mrb[73].mxu0  ;;  %6236 = vst [vmem:[#allocation2 + $0xd8] sm:$0xff] %v6146_v28 }
 0x39e   : > { %v4495_v12 = vpop.f32.mrb[74].mxu1  ;;  %v5688_v8 = vpop.f32.mrb[74].mxu0  ;;  %v6399_v17 = vmax.f32 %v6378_v15, %v6384_v55 }
 0x39f   : > { %v6057_v6 = vadd.f32 %v9740_v39, %v5960_v3  ;;  %v4762_v22 = vadd.f32 %v4495_v12, %v9385_v43  ;;  %v5961_v44 = vadd.f32 %v5688_v8, %v4760_v25  ;;  %v5690_v38 = vpop.f32.mrb[75].mxu0  ;;  %v4497_v42 = vpop.f32.mrb[75].mxu1 }
 0x3a0   : > { %v8374_v42 = vld [vmem:[%s9223_s23 + $0x2c4] ss:$8 sps:$4 sm:$0xff]  }
 0x3a1   : > { %v6147_v60 = vmax.f32 %v6057_v6, 0.0  ;;  %v6058_v30 = vadd.f32 %v9740_v39, %v5961_v44  ;;  %4707 = vmatmul.mubr.bf16.gmra.mrb[180].mxu1 %v8354_v31  ;;  %5900 = vmatmul.mubr.bf16.gmra.mrb[180].mxu0 %v8357_v41 }
 0x3a2   : > { %v6386_v26 = vld [vmem:[#allocation2 + $0xc8] ss:$2 sm:$0xff]  ;;  %v6392_v23 = vld [vmem:[#allocation2 + $0xc9] ss:$2 sm:$0xff]  ;;  %7385 = vmatprep.mubr.msk.bf16.mxu1 %vm897_vm0, %v8362_v62  ;;  %7551 = vmatprep.mubr.msk.bf16.mxu0 %vm897_vm0, %v8365_v19 }
 0x3a3   : > { %v6400_v43 = vmax.f32 %v6386_v26, %v6392_v23  ;;  %6237 = vst [vmem:[#allocation2 + $0xe0] sm:$0xff] %v6147_v60  ;;  %v6148_v34 = vmax.f32 %v6058_v30, 0.0  ;;  %v8366_v62 = vld [vmem:[%s9207_s22 + $0x2c0] ss:$8 sps:$4 sm:$0xff]   ;;  %v8369_v19 = vld [vmem:[%s9223_s23 + $0x2b0] ss:$8 sps:$4 sm:$0xff]  }
 0x3a4   : > { %v4500_v2 = vpop.f32.mrb[76].mxu1  ;;  %v5693_v63 = vpop.f32.mrb[76].mxu0 }
 0x3a5   : > { %v6403_v33 = vmax.f32 %v6397_v46, %v6400_v43  ;;  %6238 = vst [vmem:[#allocation2 + $0xe8] sm:$0xff] %v6148_v34  ;;  %v4763_v4 = vadd.f32 %v4500_v2, %v9392_v52  ;;  %v5962_v32 = vadd.f32 %v5693_v63, %v4761_v50  ;;  %v4502_v53 = vpop.f32.mrb[77].mxu1  ;;  %v5695_v61 = vpop.f32.mrb[77].mxu0  ;;  %v6382_v52 = vld [vmem:[#allocation2 + $0xb1] ss:$2 sm:$0xff] }
 0x3a6   : > { %v4503_v58 = vpop.f32.mrb[78].mxu1  ;;  %v5696_v24 = vpop.f32.mrb[78].mxu0  ;;  %v9945_v34 = vld [vmem:[%s10118_s2] ss:$0 sm:$0xff] }
 0x3a7   : > { %7558 = vst.msk [vmem:[%s9806_s7 + $0x30] sm:$0xff] %vm6331_vm1, %v6403_v33  ;;  %v6059_v10 = vadd.f32 %v9740_v39, %v5962_v32  ;;  %v4764_v18 = vadd.f32 %v4503_v58, %v9397_v16  ;;  %v5963_v35 = vadd.f32 %v5696_v24, %v4762_v22  ;;  %v5698_v25 = vpop.f32.mrb[79].mxu0  ;;  %v4505_v27 = vpop.f32.mrb[79].mxu1  ;;  %v6398_v16 = vmax.f32 %v6376_v9, %v6382_v52  ;;  %v8372_v32 = vld [vmem:[%s9223_s23 + $0x2c0] ss:$8 sps:$4 sm:$0xff]  }
 0x3a9   : > { %v6149_v20 = vmax.f32 %v6059_v10, 0.0  ;;  %v6060_v48 = vadd.f32 %v9740_v39, %v5963_v35  ;;  %4715 = vmatmul.mubr.bf16.gmra.mrb[184].mxu1 %v8360_v1  ;;  %5908 = vmatmul.mubr.bf16.gmra.mrb[184].mxu0 %v8363_v45 }
 0x3aa   : > { %v6388_v28 = vld [vmem:[#allocation2 + $0xd8] ss:$2 sm:$0xff]  ;;  %v6394_v49 = vld [vmem:[#allocation2 + $0xd9] ss:$2 sm:$0xff]  ;;  %7386 = vmatprep.mubr.msk.bf16.mxu1 %vm897_vm0, %v8368_v51  ;;  %7552 = vmatprep.mubr.msk.bf16.mxu0 %vm897_vm0, %v8371_v13 }
 0x3ab   : > { %v6401_v36 = vmax.f32 %v6388_v28, %v6394_v49  ;;  %6239 = vst [vmem:[#allocation2 + $0xf0] sm:$0xff] %v6149_v20  ;;  %v6150_v50 = vmax.f32 %v6060_v48, 0.0 }
 0x3ac   : > { %v6390_v3 = vld [vmem:[#allocation2 + $0xe8] ss:$2 sm:$0xf]  ;;  %v6396_v14 = vld [vmem:[#allocation2 + $0xe9] ss:$2 sm:$0xf] }
 0x3ad   : > { %v6404_v31 = vmax.f32 %v6398_v16, %v6401_v36  ;;  %v6402_v41 = vmax.f32 %v6390_v3, %v6396_v14  ;;  %6240 = vst [vmem:[#allocation2 + $0xf8] sm:$0xff] %v6150_v50  ;;  %v4508_v12 = vpop.f32.mrb[80].mxu1  ;;  %v5701_v8 = vpop.f32.mrb[80].mxu0 }
 0x3ae   : > { %v4765_v6 = vadd.f32 %v4508_v12, %v9404_v5  ;;  %v5964_v22 = vadd.f32 %v5701_v8, %v4763_v4  ;;  %v4510_v44 = vpop.f32.mrb[81].mxu1  ;;  %v5703_v38 = vpop.f32.mrb[81].mxu0 }
 0x3af   : > { %7559 = vst.msk [vmem:[%s9806_s7 + $0x38] sm:$0xff] %vm6331_vm1, %v6404_v31  ;;  %v6405_v7 = vmax.f32 %v6399_v17, %v6402_v41  ;;  %v4511_v0 = vpop.f32.mrb[82].mxu1  ;;  %v5704_v60 = vpop.f32.mrb[82].mxu0 }
 0x3b0   : > { %v6061_v30 = vadd.f32 %v9740_v39, %v5964_v22  ;;  %v4766_v26 = vadd.f32 %v4511_v0, %v9409_v37  ;;  %v5965_v23 = vadd.f32 %v5704_v60, %v4764_v18  ;;  %v5706_v46 = vpop.f32.mrb[83].mxu0  ;;  %v4513_v43 = vpop.f32.mrb[83].mxu1 }
 0x3b1   : > { %7560 = vst.msk [vmem:[%s9806_s7 + $0x40] sm:$0x3] %vm6334_vm2, %v6405_v7  ;;  %4723 = vmatmul.mubr.bf16.gmra.mrb[188].mxu1 %v8366_v62  ;;  %5916 = vmatmul.mubr.bf16.gmra.mrb[188].mxu0 %v8369_v19 }
 0x3b2   : > { %v6151_v5 = vmax.f32 %v6061_v30, 0.0  ;;  %v6062_v2 = vadd.f32 %v9945_v34, %v5965_v23  ;;  %7553 = vmatprep.mubr.msk.bf16.mxu0 %vm897_vm0, %v8374_v42 }
 0x3b4   : > { %6241 = vst [vmem:[#allocation2 + $0x100] sm:$0xff] %v6151_v5  ;;  %v6152_v37 = vmax.f32 %v6062_v2, 0.0  ;;  %v4516_v39 = vpop.f32.mrb[84].mxu1  ;;  %v5709_v33 = vpop.f32.mrb[84].mxu0  ;;  %v6411_v42 = vld [vmem:[#allocation2 + $0xf0] ss:$2 sm:$0xff] }
 0x3b5   : > { %v4767_v63 = vadd.f32 %v4516_v39, %v9416_v54  ;;  %v4518_v4 = vpop.f32.mrb[85].mxu1  ;;  %v5966_v53 = vadd.f32 %v5709_v33, %v4765_v6  ;;  %v5711_v61 = vpop.f32.mrb[85].mxu0  ;;  %v6417_v7 = vld [vmem:[#allocation2 + $0xf1] ss:$2 sm:$0xff] }
 0x3b6   : > { %6242 = vst [vmem:[#allocation2 + $0x108] sm:$0xff] %v6152_v37  ;;  %v4519_v1 = vpop.f32.mrb[86].mxu1  ;;  %v5712_v58 = vpop.f32.mrb[86].mxu0 }
 0x3b7   : > { %v4768_v45 = vadd.f32 %v4519_v1, %v9421_v57  ;;  %v4521_v24 = vpop.f32.mrb[87].mxu1  ;;  %v6063_v51 = vadd.f32 %v9945_v34, %v5966_v53  ;;  %v5967_v13 = vadd.f32 %v5712_v58, %v4766_v26  ;;  %v5714_v9 = vpop.f32.mrb[87].mxu0  ;;  %v6434_v26 = vmax.f32 %v6411_v42, %v6417_v7 }
 0x3b9   : > { %5924 = vmatmul.mubr.bf16.gmra.mrb[192].mxu0 %v8372_v32  ;;  %v6153_v10 = vmax.f32 %v6063_v51, 0.0  ;;  %v6064_v18 = vadd.f32 %v9945_v34, %v5967_v13 }
 0x3bb   : > { %6243 = vst [vmem:[#allocation2 + $0x110] sm:$0xff] %v6153_v10  ;;  %v6154_v54 = vmax.f32 %v6064_v18, 0.0 }
 0x3bc   : > { %v4524_v35 = vpop.f32.mrb[88].mxu1  ;;  %v5717_v25 = vpop.f32.mrb[88].mxu0 }
 0x3bd   : > { %v4769_v27 = vadd.f32 %v4524_v35, %v9428_v40  ;;  %v5968_v52 = vadd.f32 %v5717_v25, %v4767_v63  ;;  %v4526_v15 = vpop.f32.mrb[89].mxu1  ;;  %v5719_v55 = vpop.f32.mrb[89].mxu0  ;;  %6244 = vst [vmem:[#allocation2 + $0x118] sm:$0xff] %v6154_v54  ;;  %v6413_v32 = vld [vmem:[#allocation2 + $0x100] ss:$2 sm:$0xff] }
 0x3be   : > { %v4527_v57 = vpop.f32.mrb[90].mxu1  ;;  %v5720_v20 = vpop.f32.mrb[90].mxu0  ;;  %v6419_v24 = vld [vmem:[#allocation2 + $0x101] ss:$2 sm:$0xff] }
 0x3bf   : > { %v6065_v48 = vadd.f32 %v9945_v34, %v5968_v52  ;;  %v4770_v28 = vadd.f32 %v4527_v57, %v9433_v56  ;;  %v5969_v49 = vadd.f32 %v5720_v20, %v4768_v45  ;;  %v5722_v16 = vpop.f32.mrb[91].mxu0  ;;  %v4529_v36 = vpop.f32.mrb[91].mxu1  ;;  %v6435_v54 = vmax.f32 %v6413_v32, %v6419_v24  ;;  %v10258_v24 = vld [vmem:[#allocation6_spill] sm:$0xff] }
 0x3c1   : > { %v6155_v50 = vmax.f32 %v6065_v48, 0.0  ;;  %v6066_v3 = vadd.f32 %v9945_v34, %v5969_v49  ;;  %v10253_v48 = vld [vmem:[#allocation45_spill] sm:$0xff] }
 0x3c2   : > { %v6415_v51 = vld [vmem:[#allocation2 + $0x110] ss:$2 sm:$0xf]  ;;  %v6421_v13 = vld [vmem:[#allocation2 + $0x111] ss:$2 sm:$0xf] }
 0x3c3   : > { %6245 = vst [vmem:[#allocation2 + $0x120] sm:$0xff] %v6155_v50  ;;  %v6156_v14 = vmax.f32 %v6066_v3, 0.0  ;;  %v6436_v15 = vmax.f32 %v6415_v51, %v6421_v13 }
 0x3c4   : > { %v4532_v17 = vpop.f32.mrb[92].mxu1  ;;  %v5725_v40 = vpop.f32.mrb[92].mxu0 }
 0x3c5   : > { %v4771_v31 = vadd.f32 %v4532_v17, %v9440_v47  ;;  %v5970_v41 = vadd.f32 %v5725_v40, %v4769_v27  ;;  %v4534_v12 = vpop.f32.mrb[93].mxu1  ;;  %v5727_v8 = vpop.f32.mrb[93].mxu0  ;;  %6246 = vst [vmem:[#allocation2 + $0x128] sm:$0xff] %v6156_v14  ;;  %v10254_v40 = vld [vmem:[#allocation46_spill] sm:$0xff] }
 0x3c6   : > { %v4535_v62 = vpop.f32.mrb[94].mxu1  ;;  %v5728_v19 = vpop.f32.mrb[94].mxu0 }
 0x3c7   : > { %v6067_v56 = vadd.f32 %v9945_v34, %v5970_v41  ;;  %v4772_v6 = vadd.f32 %v4535_v62, %v9445_v29  ;;  %v5971_v22 = vadd.f32 %v5728_v19, %v4770_v28  ;;  %v5730_v44 = vpop.f32.mrb[95].mxu0  ;;  %v4537_v38 = vpop.f32.mrb[95].mxu1 }
 0x3c9   : > { %v6157_v0 = vmax.f32 %v6067_v56, 0.0  ;;  %v6068_v60 = vadd.f32 %v9945_v34, %v5971_v22  ;;  %v10255_v22 = vld [vmem:[#allocation3_spill] sm:$0xff] }
 0x3ca   : > { %v6423_v30 = vld [vmem:[#allocation2 + $0x118] ss:$2 sm:$0xff]  ;;  %v6429_v47 = vld [vmem:[#allocation2 + $0x119] ss:$2 sm:$0xff] }
 0x3cb   : > { %v6437_v23 = vmax.f32 %v6423_v30, %v6429_v47  ;;  %6247 = vst [vmem:[#allocation2 + $0x130] sm:$0xff] %v6157_v0  ;;  %v6158_v46 = vmax.f32 %v6068_v60, 0.0  ;;  %v10256_v30 = vld [vmem:[#allocation4_spill] sm:$0xff] }
 0x3cc   : > { %v4540_v43 = vpop.f32.mrb[96].mxu1  ;;  %v5733_v5 = vpop.f32.mrb[96].mxu0 }
 0x3cd   : > { %v6440_v2 = vmax.f32 %v6434_v26, %v6437_v23  ;;  %6248 = vst [vmem:[#allocation2 + $0x138] sm:$0xff] %v6158_v46  ;;  %v4773_v29 = vadd.f32 %v4540_v43, %v9452_v59  ;;  %v5972_v37 = vadd.f32 %v5733_v5, %v4771_v31  ;;  %v4542_v39 = vpop.f32.mrb[97].mxu1  ;;  %v5735_v63 = vpop.f32.mrb[97].mxu0 }
 0x3ce   : > { %v4543_v33 = vpop.f32.mrb[98].mxu1  ;;  %v5736_v4 = vpop.f32.mrb[98].mxu0 }
 0x3cf   : > { %7561 = vst.msk [vmem:[%s9806_s7 + $0x48] sm:$0xff] %vm6331_vm1, %v6440_v2  ;;  %v6069_v53 = vadd.f32 %v9945_v34, %v5972_v37  ;;  %v4774_v61 = vadd.f32 %v4543_v33, %v9457_v11  ;;  %v5973_v1 = vadd.f32 %v5736_v4, %v4772_v6  ;;  %v5738_v45 = vpop.f32.mrb[99].mxu0  ;;  %v4545_v58 = vpop.f32.mrb[99].mxu1  ;;  %v10257_v33 = vld [vmem:[#allocation5_spill] sm:$0xff] }
 0x3d1   : > { %v6159_v9 = vmax.f32 %v6069_v53, 0.0  ;;  %v6070_v59 = vadd.f32 %v9945_v34, %v5973_v1 }
 0x3d2   : > { %v6425_v10 = vld [vmem:[#allocation2 + $0x128] ss:$2 sm:$0xff]  ;;  %v6431_v18 = vld [vmem:[#allocation2 + $0x129] ss:$2 sm:$0xff] }
 0x3d3   : > { %v6438_v35 = vmax.f32 %v6425_v10, %v6431_v18  ;;  %6249 = vst [vmem:[#allocation2 + $0x140] sm:$0xff] %v6159_v9  ;;  %v6160_v25 = vmax.f32 %v6070_v59, 0.0 }
 0x3d4   : > { %v6427_v27 = vld [vmem:[#allocation2 + $0x138] ss:$2 sm:$0xf]  ;;  %v6433_v52 = vld [vmem:[#allocation2 + $0x139] ss:$2 sm:$0xf] }
 0x3d5   : > { %v6441_v11 = vmax.f32 %v6435_v54, %v6438_v35  ;;  %v6439_v55 = vmax.f32 %v6427_v27, %v6433_v52  ;;  %6250 = vst [vmem:[#allocation2 + $0x148] sm:$0xff] %v6160_v25  ;;  %v4548_v57 = vpop.f32.mrb[100].mxu1  ;;  %v5741_v20 = vpop.f32.mrb[100].mxu0  ;;  %v10259_v27 = vld [vmem:[#allocation7_spill] sm:$0xff] }
 0x3d6   : > { %v4775_v28 = vadd.f32 %v4548_v57, %v10253_v48  ;;  %v5974_v49 = vadd.f32 %v5741_v20, %v4773_v29  ;;  %v4550_v16 = vpop.f32.mrb[101].mxu1  ;;  %v5743_v36 = vpop.f32.mrb[101].mxu0 }
 0x3d7   : > { %7562 = vst.msk [vmem:[%s9806_s7 + $0x50] sm:$0xff] %vm6331_vm1, %v6441_v11  ;;  %v6442_v50 = vmax.f32 %v6436_v15, %v6439_v55  ;;  %v4551_v3 = vpop.f32.mrb[102].mxu1  ;;  %v5744_v14 = vpop.f32.mrb[102].mxu0 }
 0x3d8   : > { %v6071_v17 = vadd.f32 %v9945_v34, %v5974_v49  ;;  %v4776_v31 = vadd.f32 %v4551_v3, %v10254_v40  ;;  %v5975_v41 = vadd.f32 %v5744_v14, %v4774_v61  ;;  %v5746_v12 = vpop.f32.mrb[103].mxu0  ;;  %v4553_v8 = vpop.f32.mrb[103].mxu1 }
 0x3d9   : > { %7563 = vst.msk [vmem:[%s9806_s7 + $0x58] sm:$0x3] %vm6334_vm2, %v6442_v50 }
 0x3da   : > { %v6161_v62 = vmax.f32 %v6071_v17, 0.0  ;;  %v6072_v19 = vadd.f32 %v9945_v34, %v5975_v41 }
 0x3dc   : > { %6251 = vst [vmem:[#allocation2 + $0x150] sm:$0xff] %v6161_v62  ;;  %v6162_v56 = vmax.f32 %v6072_v19, 0.0  ;;  %v4556_v6 = vpop.f32.mrb[104].mxu1  ;;  %v5749_v38 = vpop.f32.mrb[104].mxu0  ;;  %v6448_v3 = vld [vmem:[#allocation2 + $0x140] ss:$2 sm:$0xff] }
 0x3dd   : > { %v4777_v44 = vadd.f32 %v4556_v6, %v10255_v22  ;;  %v4558_v42 = vpop.f32.mrb[105].mxu1  ;;  %v5976_v7 = vadd.f32 %v5749_v38, %v4775_v28  ;;  %v5751_v0 = vpop.f32.mrb[105].mxu0  ;;  %v10260_v28 = vld [vmem:[#allocation8_spill] sm:$0xff]  ;;  %v6454_v14 = vld [vmem:[#allocation2 + $0x141] ss:$2 sm:$0xff] }
 0x3de   : > { %6252 = vst [vmem:[#allocation2 + $0x158] sm:$0xff] %v6162_v56  ;;  %v4559_v60 = vpop.f32.mrb[106].mxu1  ;;  %v5752_v26 = vpop.f32.mrb[106].mxu0  ;;  %v6471_v12 = vmax.f32 %v6448_v3, %v6454_v14  ;;  %v10261_v22 = vld [vmem:[#allocation9_spill] sm:$0xff] }
 0x3df   : > { %v4778_v47 = vadd.f32 %v4559_v60, %v10256_v30  ;;  %v4561_v23 = vpop.f32.mrb[107].mxu1  ;;  %v6073_v46 = vadd.f32 %v9945_v34, %v5976_v7  ;;  %v5977_v43 = vadd.f32 %v5752_v26, %v4776_v31  ;;  %v5754_v5 = vpop.f32.mrb[107].mxu0  ;;  %v10262_v26 = vld [vmem:[#allocation10_spill] sm:$0xff] }
 0x3e1   : > { %v6163_v2 = vmax.f32 %v6073_v46, 0.0  ;;  %v6074_v29 = vadd.f32 %v9945_v34, %v5977_v43 }
 0x3e3   : > { %6253 = vst [vmem:[#allocation2 + $0x160] sm:$0xff] %v6163_v2  ;;  %v6164_v37 = vmax.f32 %v6074_v29, 0.0 }
 0x3e4   : > { %v4564_v39 = vpop.f32.mrb[108].mxu1  ;;  %v5757_v63 = vpop.f32.mrb[108].mxu0 }
 0x3e5   : > { %v4779_v4 = vadd.f32 %v4564_v39, %v10257_v33  ;;  %v5978_v32 = vadd.f32 %v5757_v63, %v4777_v44  ;;  %v4566_v53 = vpop.f32.mrb[109].mxu1  ;;  %v5759_v61 = vpop.f32.mrb[109].mxu0  ;;  %6254 = vst [vmem:[#allocation2 + $0x168] sm:$0xff] %v6164_v37  ;;  %v6450_v30 = vld [vmem:[#allocation2 + $0x150] ss:$2 sm:$0xff] }
 0x3e6   : > { %v4567_v1 = vpop.f32.mrb[110].mxu1  ;;  %v5760_v45 = vpop.f32.mrb[110].mxu0  ;;  %v6456_v2 = vld [vmem:[#allocation2 + $0x151] ss:$2 sm:$0xff] }
 0x3e7   : > { %v6075_v58 = vadd.f32 %v9945_v34, %v5978_v32  ;;  %v4780_v51 = vadd.f32 %v4567_v1, %v10258_v24  ;;  %v5979_v13 = vadd.f32 %v5760_v45, %v4778_v47  ;;  %v5762_v9 = vpop.f32.mrb[111].mxu0  ;;  %v4569_v59 = vpop.f32.mrb[111].mxu1  ;;  %v6472_v32 = vmax.f32 %v6450_v30, %v6456_v2  ;;  %v10268_v2 = vld [vmem:[#allocation16_spill] sm:$0xff] }
 0x3e8   : > { %v10263_v59 = vld [vmem:[#allocation11_spill] sm:$0xff] }
 0x3e9   : > { %v6165_v10 = vmax.f32 %v6075_v58, 0.0  ;;  %v6076_v18 = vadd.f32 %v9945_v34, %v5979_v13 }
 0x3ea   : > { %v6452_v29 = vld [vmem:[#allocation2 + $0x160] ss:$2 sm:$0xf]  ;;  %v6458_v37 = vld [vmem:[#allocation2 + $0x161] ss:$2 sm:$0xf] }
 0x3eb   : > { %6255 = vst [vmem:[#allocation2 + $0x170] sm:$0xff] %v6165_v10  ;;  %v6166_v54 = vmax.f32 %v6076_v18, 0.0  ;;  %v6473_v58 = vmax.f32 %v6452_v29, %v6458_v37 }
 0x3ec   : > { %v4572_v35 = vpop.f32.mrb[112].mxu1  ;;  %v5765_v25 = vpop.f32.mrb[112].mxu0 }
 0x3ed   : > { %v4781_v52 = vadd.f32 %v4572_v35, %v10259_v27  ;;  %v5980_v15 = vadd.f32 %v5765_v25, %v4779_v4  ;;  %v4574_v11 = vpop.f32.mrb[113].mxu1  ;;  %v5767_v55 = vpop.f32.mrb[113].mxu0  ;;  %6256 = vst [vmem:[#allocation2 + $0x178] sm:$0xff] %v6166_v54 }
 0x3ee   : > { %v4575_v57 = vpop.f32.mrb[114].mxu1  ;;  %v5768_v20 = vpop.f32.mrb[114].mxu0  ;;  %v10264_v11 = vld [vmem:[#allocation12_spill] sm:$0xff] }
 0x3ef   : > { %v6077_v48 = vadd.f32 %v9945_v34, %v5980_v15  ;;  %v4782_v49 = vadd.f32 %v4575_v57, %v10260_v28  ;;  %v5981_v16 = vadd.f32 %v5768_v20, %v4780_v51  ;;  %v5770_v36 = vpop.f32.mrb[115].mxu0  ;;  %v4577_v50 = vpop.f32.mrb[115].mxu1 }
 0x3f0   : > { %v10265_v50 = vld [vmem:[#allocation13_spill] sm:$0xff] }
 0x3f1   : > { %v6167_v17 = vmax.f32 %v6077_v48, 0.0  ;;  %v6078_v40 = vadd.f32 %v9945_v34, %v5981_v16 }
 0x3f2   : > { %v6460_v31 = vld [vmem:[#allocation2 + $0x168] ss:$2 sm:$0xff]  ;;  %v6466_v41 = vld [vmem:[#allocation2 + $0x169] ss:$2 sm:$0xff] }
 0x3f3   : > { %v6474_v8 = vmax.f32 %v6460_v31, %v6466_v41  ;;  %6257 = vst [vmem:[#allocation2 + $0x180] sm:$0xff] %v6167_v17  ;;  %v6168_v62 = vmax.f32 %v6078_v40, 0.0 }
 0x3f4   : > { %v4580_v19 = vpop.f32.mrb[116].mxu1  ;;  %v5773_v56 = vpop.f32.mrb[116].mxu0 }
 0x3f5   : > { %v6477_v6 = vmax.f32 %v6471_v12, %v6474_v8  ;;  %6258 = vst [vmem:[#allocation2 + $0x188] sm:$0xff] %v6168_v62  ;;  %v4783_v44 = vadd.f32 %v4580_v19, %v10261_v22  ;;  %v5982_v38 = vadd.f32 %v5773_v56, %v4781_v52  ;;  %v4582_v42 = vpop.f32.mrb[117].mxu1  ;;  %v5775_v7 = vpop.f32.mrb[117].mxu0  ;;  %v10266_v12 = vld [vmem:[#allocation14_spill] sm:$0xff] }
 0x3f6   : > { %v4583_v0 = vpop.f32.mrb[118].mxu1  ;;  %v5776_v60 = vpop.f32.mrb[118].mxu0 }
 0x3f7   : > { %7564 = vst.msk [vmem:[%s9806_s7 + $0x60] sm:$0xff] %vm6331_vm1, %v6477_v6  ;;  %v6079_v47 = vadd.f32 %v9945_v34, %v5982_v38  ;;  %v4784_v23 = vadd.f32 %v4583_v0, %v10262_v26  ;;  %v5983_v46 = vadd.f32 %v5776_v60, %v4782_v49  ;;  %v5778_v43 = vpop.f32.mrb[119].mxu0  ;;  %v4585_v5 = vpop.f32.mrb[119].mxu1  ;;  %v10267_v60 = vld [vmem:[#allocation15_spill] sm:$0xff] }
 0x3f9   : > { %v6169_v39 = vmax.f32 %v6079_v47, 0.0  ;;  %v6080_v63 = vadd.f32 %v9945_v34, %v5983_v46 }
 0x3fa   : > { %v6462_v33 = vld [vmem:[#allocation2 + $0x178] ss:$2 sm:$0xff]  ;;  %v6468_v4 = vld [vmem:[#allocation2 + $0x179] ss:$2 sm:$0xff] }
 0x3fb   : > { %v6475_v53 = vmax.f32 %v6462_v33, %v6468_v4  ;;  %6259 = vst [vmem:[#allocation2 + $0x190] sm:$0xff] %v6169_v39  ;;  %v6170_v61 = vmax.f32 %v6080_v63, 0.0 }
 0x3fc   : > { %v6464_v1 = vld [vmem:[#allocation2 + $0x188] ss:$2 sm:$0xf]  ;;  %v6470_v45 = vld [vmem:[#allocation2 + $0x189] ss:$2 sm:$0xf] }
 0x3fd   : > { %v6478_v24 = vmax.f32 %v6472_v32, %v6475_v53  ;;  %v6476_v51 = vmax.f32 %v6464_v1, %v6470_v45  ;;  %6260 = vst [vmem:[#allocation2 + $0x198] sm:$0xff] %v6170_v61  ;;  %v4588_v13 = vpop.f32.mrb[120].mxu1  ;;  %v5781_v9 = vpop.f32.mrb[120].mxu0  ;;  %v10269_v1 = vld [vmem:[#allocation17_spill] sm:$0xff] }
 0x3fe   : > { %v4785_v10 = vadd.f32 %v4588_v13, %v10263_v59  ;;  %v5984_v18 = vadd.f32 %v5781_v9, %v4783_v44  ;;  %v4590_v54 = vpop.f32.mrb[121].mxu1  ;;  %v5783_v35 = vpop.f32.mrb[121].mxu0 }
 0x3ff   : > { %7565 = vst.msk [vmem:[%s9806_s7 + $0x68] sm:$0xff] %vm6331_vm1, %v6478_v24  ;;  %v6479_v25 = vmax.f32 %v6473_v58, %v6476_v51  ;;  %v4591_v27 = vpop.f32.mrb[122].mxu1  ;;  %v5784_v52 = vpop.f32.mrb[122].mxu0 }
 0x400   : > { %v6081_v15 = vadd.f32 %v9945_v34, %v5984_v18  ;;  %v4786_v55 = vadd.f32 %v4591_v27, %v10264_v11  ;;  %v5985_v57 = vadd.f32 %v5784_v52, %v4784_v23  ;;  %v5786_v20 = vpop.f32.mrb[123].mxu0  ;;  %v4593_v48 = vpop.f32.mrb[123].mxu1 }
 0x401   : > { %7566 = vst.msk [vmem:[%s9806_s7 + $0x70] sm:$0x3] %vm6334_vm2, %v6479_v25 }
 0x402   : > { %v6171_v28 = vmax.f32 %v6081_v15, 0.0  ;;  %v6082_v49 = vadd.f32 %v9945_v34, %v5985_v57 }
 0x404   : > { %6261 = vst [vmem:[#allocation2 + $0x1a0] sm:$0xff] %v6171_v28  ;;  %v6172_v16 = vmax.f32 %v6082_v49, 0.0  ;;  %v4596_v36 = vpop.f32.mrb[124].mxu1  ;;  %v5789_v14 = vpop.f32.mrb[124].mxu0  ;;  %v6485_v27 = vld [vmem:[#allocation2 + $0x190] ss:$2 sm:$0xff] }
 0x405   : > { %v4787_v3 = vadd.f32 %v4596_v36, %v10265_v50  ;;  %v4598_v17 = vpop.f32.mrb[125].mxu1  ;;  %v5986_v40 = vadd.f32 %v5789_v14, %v4785_v10  ;;  %v5791_v31 = vpop.f32.mrb[125].mxu0  ;;  %v10270_v10 = vld [vmem:[#allocation18_spill] sm:$0xff]  ;;  %v6491_v52 = vld [vmem:[#allocation2 + $0x191] ss:$2 sm:$0xff] }
 0x406   : > { %6262 = vst [vmem:[#allocation2 + $0x1a8] sm:$0xff] %v6172_v16  ;;  %v4599_v41 = vpop.f32.mrb[126].mxu1  ;;  %v5792_v62 = vpop.f32.mrb[126].mxu0  ;;  %v6508_v20 = vmax.f32 %v6485_v27, %v6491_v52  ;;  %v10271_v50 = vld [vmem:[#allocation19_spill] sm:$0xff] }
 0x407   : > { %v4788_v8 = vadd.f32 %v4599_v41, %v10266_v12  ;;  %v4601_v19 = vpop.f32.mrb[127].mxu1  ;;  %v6083_v56 = vadd.f32 %v9945_v34, %v5986_v40  ;;  %v5987_v6 = vadd.f32 %v5792_v62, %v4786_v55  ;;  %v5794_v22 = vpop.f32.mrb[127].mxu0  ;;  %v10272_v62 = vld [vmem:[#allocation20_spill] sm:$0xff] }
 0x409   : > { %v6173_v44 = vmax.f32 %v6083_v56, 0.0  ;;  %v6084_v38 = vadd.f32 %v9945_v34, %v5987_v6 }
 0x40b   : > { %6263 = vst [vmem:[#allocation2 + $0x1b0] sm:$0xff] %v6173_v44  ;;  %v6174_v42 = vmax.f32 %v6084_v38, 0.0 }
 0x40c   : > { %v4604_v7 = vpop.f32.mrb[128].mxu1  ;;  %v5797_v0 = vpop.f32.mrb[128].mxu0 }
 0x40d   : > { %v4789_v30 = vadd.f32 %v4604_v7, %v10267_v60  ;;  %v5988_v47 = vadd.f32 %v5797_v0, %v4787_v3  ;;  %v4606_v26 = vpop.f32.mrb[129].mxu1  ;;  %v5799_v23 = vpop.f32.mrb[129].mxu0  ;;  %6264 = vst [vmem:[#allocation2 + $0x1b8] sm:$0xff] %v6174_v42  ;;  %v6487_v12 = vld [vmem:[#allocation2 + $0x1a0] ss:$2 sm:$0xff] }
 0x40e   : > { %v4607_v46 = vpop.f32.mrb[130].mxu1  ;;  %v5800_v43 = vpop.f32.mrb[130].mxu0  ;;  %v6493_v44 = vld [vmem:[#allocation2 + $0x1a1] ss:$2 sm:$0xff] }
 0x40f   : > { %v6085_v5 = vadd.f32 %v9945_v34, %v5988_v47  ;;  %v4790_v29 = vadd.f32 %v4607_v46, %v10268_v2  ;;  %v5989_v37 = vadd.f32 %v5800_v43, %v4788_v8  ;;  %v5802_v39 = vpop.f32.mrb[131].mxu0  ;;  %v4609_v63 = vpop.f32.mrb[131].mxu1  ;;  %v6509_v47 = vmax.f32 %v6487_v12, %v6493_v44  ;;  %v10278_v44 = vld [vmem:[#allocation26_spill] sm:$0xff] }
 0x410   : > { %v10273_v63 = vld [vmem:[#allocation21_spill] sm:$0xff] }
 0x411   : > { %v6175_v33 = vmax.f32 %v6085_v5, 0.0  ;;  %v6086_v4 = vadd.f32 %v9945_v34, %v5989_v37 }
 0x412   : > { %v6489_v38 = vld [vmem:[#allocation2 + $0x1b0] ss:$2 sm:$0xf]  ;;  %v6495_v42 = vld [vmem:[#allocation2 + $0x1b1] ss:$2 sm:$0xf] }
 0x413   : > { %6265 = vst [vmem:[#allocation2 + $0x1c0] sm:$0xff] %v6175_v33  ;;  %v6176_v32 = vmax.f32 %v6086_v4, 0.0  ;;  %v6510_v5 = vmax.f32 %v6489_v38, %v6495_v42 }
 0x414   : > { %v4612_v53 = vpop.f32.mrb[132].mxu1  ;;  %v5805_v61 = vpop.f32.mrb[132].mxu0 }
 0x415   : > { %v4791_v45 = vadd.f32 %v4612_v53, %v10269_v1  ;;  %v5990_v58 = vadd.f32 %v5805_v61, %v4789_v30  ;;  %v4614_v24 = vpop.f32.mrb[133].mxu1  ;;  %v5807_v51 = vpop.f32.mrb[133].mxu0  ;;  %6266 = vst [vmem:[#allocation2 + $0x1c8] sm:$0xff] %v6176_v32 }
 0x416   : > { %v4615_v13 = vpop.f32.mrb[134].mxu1  ;;  %v5808_v9 = vpop.f32.mrb[134].mxu0  ;;  %v10274_v24 = vld [vmem:[#allocation22_spill] sm:$0xff] }
 0x417   : > { %v6087_v59 = vadd.f32 %v9945_v34, %v5990_v58  ;;  %v4792_v18 = vadd.f32 %v4615_v13, %v10270_v10  ;;  %v5991_v54 = vadd.f32 %v5808_v9, %v4790_v29  ;;  %v5810_v35 = vpop.f32.mrb[135].mxu0  ;;  %v4617_v25 = vpop.f32.mrb[135].mxu1 }
 0x418   : > { %v10275_v25 = vld [vmem:[#allocation23_spill] sm:$0xff] }
 0x419   : > { %v6177_v15 = vmax.f32 %v6087_v59, 0.0  ;;  %v6088_v11 = vadd.f32 %v9945_v34, %v5991_v54 }
 0x41a   : > { %v6497_v55 = vld [vmem:[#allocation2 + $0x1b8] ss:$2 sm:$0xff]  ;;  %v6503_v57 = vld [vmem:[#allocation2 + $0x1b9] ss:$2 sm:$0xff] }
 0x41b   : > { %v6511_v48 = vmax.f32 %v6497_v55, %v6503_v57  ;;  %6267 = vst [vmem:[#allocation2 + $0x1d0] sm:$0xff] %v6177_v15  ;;  %v6178_v28 = vmax.f32 %v6088_v11, 0.0 }
 0x41c   : > { %v4620_v49 = vpop.f32.mrb[136].mxu1  ;;  %v5813_v16 = vpop.f32.mrb[136].mxu0 }
 0x41d   : > { %v6514_v36 = vmax.f32 %v6508_v20, %v6511_v48  ;;  %6268 = vst [vmem:[#allocation2 + $0x1d8] sm:$0xff] %v6178_v28  ;;  %v4793_v3 = vadd.f32 %v4620_v49, %v10271_v50  ;;  %v5992_v14 = vadd.f32 %v5813_v16, %v4791_v45  ;;  %v4622_v17 = vpop.f32.mrb[137].mxu1  ;;  %v5815_v40 = vpop.f32.mrb[137].mxu0  ;;  %v10276_v20 = vld [vmem:[#allocation24_spill] sm:$0xff] }
 0x41e   : > { %v4623_v31 = vpop.f32.mrb[138].mxu1  ;;  %v5816_v41 = vpop.f32.mrb[138].mxu0 }
 0x41f   : > { %7567 = vst.msk [vmem:[%s9806_s7 + $0x78] sm:$0xff] %vm6331_vm1, %v6514_v36  ;;  %v6089_v8 = vadd.f32 %v9945_v34, %v5992_v14  ;;  %v4794_v19 = vadd.f32 %v4623_v31, %v10272_v62  ;;  %v5993_v56 = vadd.f32 %v5816_v41, %v4792_v18  ;;  %v5818_v6 = vpop.f32.mrb[139].mxu0  ;;  %v4625_v22 = vpop.f32.mrb[139].mxu1  ;;  %v10277_v41 = vld [vmem:[#allocation25_spill] sm:$0xff] }
 0x421   : > { %v6179_v7 = vmax.f32 %v6089_v8, 0.0  ;;  %v6090_v0 = vadd.f32 %v9945_v34, %v5993_v56 }
 0x422   : > { %v6499_v60 = vld [vmem:[#allocation2 + $0x1c8] ss:$2 sm:$0xff]  ;;  %v6505_v30 = vld [vmem:[#allocation2 + $0x1c9] ss:$2 sm:$0xff] }
 0x423   : > { %v6512_v26 = vmax.f32 %v6499_v60, %v6505_v30  ;;  %6269 = vst [vmem:[#allocation2 + $0x1e0] sm:$0xff] %v6179_v7  ;;  %v6180_v23 = vmax.f32 %v6090_v0, 0.0 }
 0x424   : > { %v6501_v46 = vld [vmem:[#allocation2 + $0x1d8] ss:$2 sm:$0xf]  ;;  %v6507_v43 = vld [vmem:[#allocation2 + $0x1d9] ss:$2 sm:$0xf] }
 0x425   : > { %v6515_v2 = vmax.f32 %v6509_v47, %v6512_v26  ;;  %v6513_v29 = vmax.f32 %v6501_v46, %v6507_v43  ;;  %6270 = vst [vmem:[#allocation2 + $0x1e8] sm:$0xff] %v6180_v23  ;;  %v4628_v37 = vpop.f32.mrb[140].mxu1  ;;  %v5821_v39 = vpop.f32.mrb[140].mxu0  ;;  %v10279_v46 = vld [vmem:[#allocation27_spill] sm:$0xff] }
 0x426   : > { %v4795_v33 = vadd.f32 %v4628_v37, %v10273_v63  ;;  %v5994_v4 = vadd.f32 %v5821_v39, %v4793_v3  ;;  %v4630_v32 = vpop.f32.mrb[141].mxu1  ;;  %v5823_v53 = vpop.f32.mrb[141].mxu0 }
 0x427   : > { %7568 = vst.msk [vmem:[%s9806_s7 + $0x80] sm:$0xff] %vm6331_vm1, %v6515_v2  ;;  %v6516_v61 = vmax.f32 %v6510_v5, %v6513_v29  ;;  %v4631_v1 = vpop.f32.mrb[142].mxu1  ;;  %v5824_v45 = vpop.f32.mrb[142].mxu0 }
 0x428   : > { %v6091_v58 = vadd.f32 %v9945_v34, %v5994_v4  ;;  %v4796_v51 = vadd.f32 %v4631_v1, %v10274_v24  ;;  %v5995_v13 = vadd.f32 %v5824_v45, %v4794_v19  ;;  %v5826_v9 = vpop.f32.mrb[143].mxu0  ;;  %v4633_v59 = vpop.f32.mrb[143].mxu1 }
 0x429   : > { %7569 = vst.msk [vmem:[%s9806_s7 + $0x88] sm:$0x3] %vm6334_vm2, %v6516_v61 }
 0x42a   : > { %v6181_v10 = vmax.f32 %v6091_v58, 0.0  ;;  %v6092_v18 = vadd.f32 %v9945_v34, %v5995_v13 }
 0x42c   : > { %6271 = vst [vmem:[#allocation2 + $0x1f0] sm:$0xff] %v6181_v10  ;;  %v6182_v54 = vmax.f32 %v6092_v18, 0.0  ;;  %v4636_v35 = vpop.f32.mrb[144].mxu1  ;;  %v5829_v52 = vpop.f32.mrb[144].mxu0  ;;  %v6522_v1 = vld [vmem:[#allocation2 + $0x1e0] ss:$2 sm:$0xff] }
 0x42d   : > { %v4797_v27 = vadd.f32 %v4636_v35, %v10275_v25  ;;  %v4638_v15 = vpop.f32.mrb[145].mxu1  ;;  %v5996_v11 = vadd.f32 %v5829_v52, %v4795_v33  ;;  %v5831_v55 = vpop.f32.mrb[145].mxu0  ;;  %v10280_v33 = vld [vmem:[#allocation28_spill] sm:$0xff]  ;;  %v6528_v45 = vld [vmem:[#allocation2 + $0x1e1] ss:$2 sm:$0xff] }
 0x42e   : > { %6272 = vst [vmem:[#allocation2 + $0x1f8] sm:$0xff] %v6182_v54  ;;  %v4639_v57 = vpop.f32.mrb[146].mxu1  ;;  %v5832_v28 = vpop.f32.mrb[146].mxu0  ;;  %v6545_v9 = vmax.f32 %v6522_v1, %v6528_v45  ;;  %v10281_v25 = vld [vmem:[#allocation29_spill] sm:$0xff] }
 0x42f   : > { %v4798_v48 = vadd.f32 %v4639_v57, %v10276_v20  ;;  %v4641_v49 = vpop.f32.mrb[147].mxu1  ;;  %v6093_v16 = vadd.f32 %v9945_v34, %v5996_v11  ;;  %v5997_v36 = vadd.f32 %v5832_v28, %v4796_v51  ;;  %v5834_v50 = vpop.f32.mrb[147].mxu0  ;;  %v10282_v28 = vld [vmem:[#allocation30_spill] sm:$0xff] }
 0x431   : > { %v6183_v3 = vmax.f32 %v6093_v16, 0.0  ;;  %v6094_v14 = vadd.f32 %v9945_v34, %v5997_v36 }
 0x433   : > { %6273 = vst [vmem:[#allocation2 + $0x200] sm:$0xff] %v6183_v3  ;;  %v6184_v17 = vmax.f32 %v6094_v14, 0.0 }
 0x434   : > { %v4644_v40 = vpop.f32.mrb[148].mxu1  ;;  %v5837_v31 = vpop.f32.mrb[148].mxu0 }
 0x435   : > { %v4799_v12 = vadd.f32 %v4644_v40, %v10277_v41  ;;  %v5998_v8 = vadd.f32 %v5837_v31, %v4797_v27  ;;  %v4646_v62 = vpop.f32.mrb[149].mxu1  ;;  %v5839_v19 = vpop.f32.mrb[149].mxu0  ;;  %6274 = vst [vmem:[#allocation2 + $0x208] sm:$0xff] %v6184_v17  ;;  %v6524_v20 = vld [vmem:[#allocation2 + $0x1f0] ss:$2 sm:$0xff] }
 0x436   : > { %v4647_v56 = vpop.f32.mrb[150].mxu1  ;;  %v5840_v6 = vpop.f32.mrb[150].mxu0  ;;  %v6530_v3 = vld [vmem:[#allocation2 + $0x1f1] ss:$2 sm:$0xff] }
 0x437   : > { %v6095_v22 = vadd.f32 %v9945_v34, %v5998_v8  ;;  %v4800_v38 = vadd.f32 %v4647_v56, %v10278_v44  ;;  %v5999_v42 = vadd.f32 %v5840_v6, %v4798_v48  ;;  %v5842_v7 = vpop.f32.mrb[151].mxu0  ;;  %v4649_v0 = vpop.f32.mrb[151].mxu1  ;;  %v6546_v8 = vmax.f32 %v6524_v20, %v6530_v3  ;;  %v10288_v3 = vld [vmem:[#allocation36_spill] sm:$0xff] }
 0x438   : > { %v10283_v0 = vld [vmem:[#allocation31_spill] sm:$0xff] }
 0x439   : > { %v6185_v60 = vmax.f32 %v6095_v22, 0.0  ;;  %v6096_v30 = vadd.f32 %v9945_v34, %v5999_v42 }
 0x43a   : > { %v6526_v14 = vld [vmem:[#allocation2 + $0x200] ss:$2 sm:$0xf]  ;;  %v6532_v17 = vld [vmem:[#allocation2 + $0x201] ss:$2 sm:$0xf] }
 0x43b   : > { %6275 = vst [vmem:[#allocation2 + $0x210] sm:$0xff] %v6185_v60  ;;  %v6186_v47 = vmax.f32 %v6096_v30, 0.0  ;;  %v6547_v22 = vmax.f32 %v6526_v14, %v6532_v17 }
 0x43c   : > { %v4652_v26 = vpop.f32.mrb[152].mxu1  ;;  %v5845_v23 = vpop.f32.mrb[152].mxu0 }
 0x43d   : > { %v4801_v43 = vadd.f32 %v4652_v26, %v10279_v46  ;;  %v6000_v5 = vadd.f32 %v5845_v23, %v4799_v12  ;;  %v4654_v2 = vpop.f32.mrb[153].mxu1  ;;  %v5847_v29 = vpop.f32.mrb[153].mxu0  ;;  %6276 = vst [vmem:[#allocation2 + $0x218] sm:$0xff] %v6186_v47 }
 0x43e   : > { %v4655_v37 = vpop.f32.mrb[154].mxu1  ;;  %v5848_v39 = vpop.f32.mrb[154].mxu0  ;;  %v10284_v2 = vld [vmem:[#allocation32_spill] sm:$0xff] }
 0x43f   : > { %v6097_v63 = vadd.f32 %v9945_v34, %v6000_v5  ;;  %v4802_v4 = vadd.f32 %v4655_v37, %v10280_v33  ;;  %v6001_v32 = vadd.f32 %v5848_v39, %v4800_v38  ;;  %v5850_v53 = vpop.f32.mrb[155].mxu0  ;;  %v4657_v61 = vpop.f32.mrb[155].mxu1 }
 0x440   : > { %v10285_v61 = vld [vmem:[#allocation33_spill] sm:$0xff] }
 0x441   : > { %v6187_v58 = vmax.f32 %v6097_v63, 0.0  ;;  %v6098_v24 = vadd.f32 %v9945_v34, %v6001_v32 }
 0x442   : > { %v6534_v51 = vld [vmem:[#allocation2 + $0x208] ss:$2 sm:$0xff]  ;;  %v6540_v13 = vld [vmem:[#allocation2 + $0x209] ss:$2 sm:$0xff] }
 0x443   : > { %v6548_v59 = vmax.f32 %v6534_v51, %v6540_v13  ;;  %6277 = vst [vmem:[#allocation2 + $0x220] sm:$0xff] %v6187_v58  ;;  %v6188_v10 = vmax.f32 %v6098_v24, 0.0 }
 0x444   : > { %v4660_v18 = vpop.f32.mrb[156].mxu1  ;;  %v5853_v54 = vpop.f32.mrb[156].mxu0 }
 0x445   : > { %v6551_v35 = vmax.f32 %v6545_v9, %v6548_v59  ;;  %6278 = vst [vmem:[#allocation2 + $0x228] sm:$0xff] %v6188_v10  ;;  %v4803_v27 = vadd.f32 %v4660_v18, %v10281_v25  ;;  %v6002_v52 = vadd.f32 %v5853_v54, %v4801_v43  ;;  %v4662_v15 = vpop.f32.mrb[157].mxu1  ;;  %v5855_v11 = vpop.f32.mrb[157].mxu0  ;;  %v10286_v9 = vld [vmem:[#allocation34_spill] sm:$0xff] }
 0x446   : > { %v4663_v55 = vpop.f32.mrb[158].mxu1  ;;  %v5856_v57 = vpop.f32.mrb[158].mxu0 }
 0x447   : > { %7570 = vst.msk [vmem:[%s9806_s7 + $0x90] sm:$0xff] %vm6331_vm1, %v6551_v35  ;;  %v6099_v48 = vadd.f32 %v9945_v34, %v6002_v52  ;;  %v4804_v49 = vadd.f32 %v4663_v55, %v10282_v28  ;;  %v6003_v16 = vadd.f32 %v5856_v57, %v4802_v4  ;;  %v5858_v36 = vpop.f32.mrb[159].mxu0  ;;  %v4665_v50 = vpop.f32.mrb[159].mxu1  ;;  %v10287_v57 = vld [vmem:[#allocation35_spill] sm:$0xff] }
 0x449   : > { %v6189_v40 = vmax.f32 %v6099_v48, 0.0  ;;  %v6100_v31 = vadd.f32 %v9945_v34, %v6003_v16 }
 0x44a   : > { %v6536_v41 = vld [vmem:[#allocation2 + $0x218] ss:$2 sm:$0xff]  ;;  %v6542_v12 = vld [vmem:[#allocation2 + $0x219] ss:$2 sm:$0xff] }
 0x44b   : > { %v6549_v62 = vmax.f32 %v6536_v41, %v6542_v12  ;;  %6279 = vst [vmem:[#allocation2 + $0x230] sm:$0xff] %v6189_v40  ;;  %v6190_v19 = vmax.f32 %v6100_v31, 0.0 }
 0x44c   : > { %v6538_v56 = vld [vmem:[#allocation2 + $0x228] ss:$2 sm:$0xf]  ;;  %v6544_v6 = vld [vmem:[#allocation2 + $0x229] ss:$2 sm:$0xf] }
 0x44d   : > { %v6552_v44 = vmax.f32 %v6546_v8, %v6549_v62  ;;  %v6550_v38 = vmax.f32 %v6538_v56, %v6544_v6  ;;  %6280 = vst [vmem:[#allocation2 + $0x238] sm:$0xff] %v6190_v19  ;;  %v4668_v42 = vpop.f32.mrb[160].mxu1  ;;  %v5861_v7 = vpop.f32.mrb[160].mxu0  ;;  %v10289_v56 = vld [vmem:[#allocation37_spill] sm:$0xff] }
 0x44e   : > { %v4805_v60 = vadd.f32 %v4668_v42, %v10283_v0  ;;  %v6004_v30 = vadd.f32 %v5861_v7, %v4803_v27  ;;  %v4670_v47 = vpop.f32.mrb[161].mxu1  ;;  %v5863_v26 = vpop.f32.mrb[161].mxu0 }
 0x44f   : > { %7571 = vst.msk [vmem:[%s9806_s7 + $0x98] sm:$0xff] %vm6331_vm1, %v6552_v44  ;;  %v6553_v23 = vmax.f32 %v6547_v22, %v6550_v38  ;;  %v4671_v46 = vpop.f32.mrb[162].mxu1  ;;  %v5864_v43 = vpop.f32.mrb[162].mxu0 }
 0x450   : > { %v6101_v5 = vadd.f32 %v9945_v34, %v6004_v30  ;;  %v4806_v29 = vadd.f32 %v4671_v46, %v10284_v2  ;;  %v6005_v37 = vadd.f32 %v5864_v43, %v4804_v49  ;;  %v5866_v39 = vpop.f32.mrb[163].mxu0  ;;  %v4673_v63 = vpop.f32.mrb[163].mxu1  ;;  %v10068_v2 = vld [vmem:[%s10118_s2] ss:$0 sm:$0xff] }
 0x451   : > { %7572 = vst.msk [vmem:[%s9806_s7 + $0xa0] sm:$0x3] %vm6334_vm2, %v6553_v23 }
 0x452   : > { %v6191_v33 = vmax.f32 %v6101_v5, 0.0  ;;  %v6102_v4 = vadd.f32 %v9945_v34, %v6005_v37 }
 0x454   : > { %6281 = vst [vmem:[#allocation2 + $0x240] sm:$0xff] %v6191_v33  ;;  %v6192_v32 = vmax.f32 %v6102_v4, 0.0  ;;  %v4676_v53 = vpop.f32.mrb[164].mxu1  ;;  %v5869_v45 = vpop.f32.mrb[164].mxu0  ;;  %v6559_v46 = vld [vmem:[#allocation2 + $0x230] ss:$2 sm:$0xff] }
 0x455   : > { %v4807_v1 = vadd.f32 %v4676_v53, %v10285_v61  ;;  %v4678_v58 = vpop.f32.mrb[165].mxu1  ;;  %v6006_v24 = vadd.f32 %v5869_v45, %v4805_v60  ;;  %v5871_v51 = vpop.f32.mrb[165].mxu0  ;;  %v10290_v60 = vld [vmem:[#allocation38_spill] sm:$0xff]  ;;  %v6565_v43 = vld [vmem:[#allocation2 + $0x231] ss:$2 sm:$0xff] }
 0x456   : > { %6282 = vst [vmem:[#allocation2 + $0x248] sm:$0xff] %v6192_v32  ;;  %v4679_v13 = vpop.f32.mrb[166].mxu1  ;;  %v5872_v10 = vpop.f32.mrb[166].mxu0  ;;  %v6582_v63 = vmax.f32 %v6559_v46, %v6565_v43  ;;  %v10291_v61 = vld [vmem:[#allocation39_spill] sm:$0xff] }
 0x457   : > { %v4808_v59 = vadd.f32 %v4679_v13, %v10286_v9  ;;  %v4681_v18 = vpop.f32.mrb[167].mxu1  ;;  %v6103_v54 = vadd.f32 %v9945_v34, %v6006_v24  ;;  %v6007_v35 = vadd.f32 %v5872_v10, %v4806_v29  ;;  %v5874_v25 = vpop.f32.mrb[167].mxu0  ;;  %v10292_v10 = vld [vmem:[#allocation40_spill] sm:$0xff] }
 0x459   : > { %v6193_v27 = vmax.f32 %v6103_v54, 0.0  ;;  %v6104_v52 = vadd.f32 %v9945_v34, %v6007_v35 }
 0x45b   : > { %6283 = vst [vmem:[#allocation2 + $0x250] sm:$0xff] %v6193_v27  ;;  %v6194_v15 = vmax.f32 %v6104_v52, 0.0 }
 0x45c   : > { %v4684_v11 = vpop.f32.mrb[168].mxu1  ;;  %v5877_v55 = vpop.f32.mrb[168].mxu0 }
 0x45d   : > { %v4809_v20 = vadd.f32 %v4684_v11, %v10287_v57  ;;  %v6008_v48 = vadd.f32 %v5877_v55, %v4807_v1  ;;  %v4686_v28 = vpop.f32.mrb[169].mxu1  ;;  %v5879_v49 = vpop.f32.mrb[169].mxu0  ;;  %6284 = vst [vmem:[#allocation2 + $0x258] sm:$0xff] %v6194_v15  ;;  %v6561_v9 = vld [vmem:[#allocation2 + $0x240] ss:$2 sm:$0xff] }
 0x45e   : > { %v4687_v16 = vpop.f32.mrb[170].mxu1  ;;  %v5880_v36 = vpop.f32.mrb[170].mxu0  ;;  %v6567_v27 = vld [vmem:[#allocation2 + $0x241] ss:$2 sm:$0xff] }
 0x45f   : > { %v6105_v50 = vadd.f32 %v9945_v34, %v6008_v48  ;;  %v4810_v14 = vadd.f32 %v4687_v16, %v10288_v3  ;;  %v6009_v17 = vadd.f32 %v5880_v36, %v4808_v59  ;;  %v5882_v40 = vpop.f32.mrb[171].mxu0  ;;  %v4689_v31 = vpop.f32.mrb[171].mxu1  ;;  %v6583_v48 = vmax.f32 %v6561_v9, %v6567_v27 }
 0x460   : > { %v10293_v31 = vld [vmem:[#allocation41_spill] sm:$0xff] }
 0x461   : > { %v6195_v41 = vmax.f32 %v6105_v50, 0.0  ;;  %v6106_v12 = vadd.f32 %v9945_v34, %v6009_v17 }
 0x462   : > { %v6563_v52 = vld [vmem:[#allocation2 + $0x250] ss:$2 sm:$0xf]  ;;  %v6569_v15 = vld [vmem:[#allocation2 + $0x251] ss:$2 sm:$0xf] }
 0x463   : > { %6285 = vst [vmem:[#allocation2 + $0x260] sm:$0xff] %v6195_v41  ;;  %v6196_v8 = vmax.f32 %v6106_v12, 0.0  ;;  %v6584_v50 = vmax.f32 %v6563_v52, %v6569_v15 }
 0x464   : > { %v4692_v62 = vpop.f32.mrb[172].mxu1  ;;  %v5885_v19 = vpop.f32.mrb[172].mxu0 }
 0x465   : > { %v4811_v6 = vadd.f32 %v4692_v62, %v10289_v56  ;;  %v6010_v22 = vadd.f32 %v5885_v19, %v4809_v20  ;;  %v4694_v44 = vpop.f32.mrb[173].mxu1  ;;  %v5887_v38 = vpop.f32.mrb[173].mxu0  ;;  %6286 = vst [vmem:[#allocation2 + $0x268] sm:$0xff] %v6196_v8 }
 0x466   : > { %v4695_v42 = vpop.f32.mrb[174].mxu1  ;;  %v5888_v7 = vpop.f32.mrb[174].mxu0  ;;  %v10294_v44 = vld [vmem:[#allocation42_spill] sm:$0xff] }
 0x467   : > { %v6107_v0 = vadd.f32 %v9945_v34, %v6010_v22  ;;  %v4812_v30 = vadd.f32 %v4695_v42, %v10290_v60  ;;  %v6011_v47 = vadd.f32 %v5888_v7, %v4810_v14  ;;  %v5890_v26 = vpop.f32.mrb[175].mxu0  ;;  %v4697_v23 = vpop.f32.mrb[175].mxu1 }
 0x469   : > { %v6197_v5 = vmax.f32 %v6107_v0, 0.0  ;;  %v6108_v29 = vadd.f32 %v10068_v2, %v6011_v47 }
 0x46a   : > { %v6571_v37 = vld [vmem:[#allocation2 + $0x258] ss:$2 sm:$0xff]  ;;  %v6577_v39 = vld [vmem:[#allocation2 + $0x259] ss:$2 sm:$0xff] }
 0x46b   : > { %v6585_v34 = vmax.f32 %v6571_v37, %v6577_v39  ;;  %6287 = vst [vmem:[#allocation2 + $0x270] sm:$0xff] %v6197_v5  ;;  %v6198_v33 = vmax.f32 %v6108_v29, 0.0  ;;  %v10295_v39 = vld [vmem:[#allocation43_spill] sm:$0xff] }
 0x46c   : > { %v4700_v4 = vpop.f32.mrb[176].mxu1  ;;  %v5893_v32 = vpop.f32.mrb[176].mxu0 }
 0x46d   : > { %v6588_v53 = vmax.f32 %v6582_v63, %v6585_v34  ;;  %6288 = vst [vmem:[#allocation2 + $0x278] sm:$0xff] %v6198_v33  ;;  %v4813_v1 = vadd.f32 %v4700_v4, %v10291_v61  ;;  %v6012_v45 = vadd.f32 %v5893_v32, %v4811_v6  ;;  %v4702_v58 = vpop.f32.mrb[177].mxu1  ;;  %v5895_v24 = vpop.f32.mrb[177].mxu0 }
 0x46e   : > { %v4703_v51 = vpop.f32.mrb[178].mxu1  ;;  %v5896_v13 = vpop.f32.mrb[178].mxu0  ;;  %v10296_v24 = vld [vmem:[#allocation44_spill] sm:$0xff] }
 0x46f   : > { %7573 = vst.msk [vmem:[%s9806_s7 + $0xa8] sm:$0xff] %vm6331_vm1, %v6588_v53  ;;  %v6109_v59 = vadd.f32 %v10068_v2, %v6012_v45  ;;  %v4814_v18 = vadd.f32 %v4703_v51, %v10292_v10  ;;  %v6013_v54 = vadd.f32 %v5896_v13, %v4812_v30  ;;  %v5898_v35 = vpop.f32.mrb[179].mxu0  ;;  %v4705_v25 = vpop.f32.mrb[179].mxu1 }
 0x470   : > { %v10297_v35 = vld [vmem:[#allocation47_spill] sm:$0xff] }
 0x471   : > { %v6199_v11 = vmax.f32 %v6109_v59, 0.0  ;;  %v6110_v55 = vadd.f32 %v10068_v2, %v6013_v54 }
 0x472   : > { %v6573_v57 = vld [vmem:[#allocation2 + $0x268] ss:$2 sm:$0xff]  ;;  %v6579_v20 = vld [vmem:[#allocation2 + $0x269] ss:$2 sm:$0xff] }
 0x473   : > { %v6586_v28 = vmax.f32 %v6573_v57, %v6579_v20  ;;  %6289 = vst [vmem:[#allocation2 + $0x280] sm:$0xff] %v6199_v11  ;;  %v6200_v49 = vmax.f32 %v6110_v55, 0.0 }
 0x474   : > { %v6575_v16 = vld [vmem:[#allocation2 + $0x278] ss:$2 sm:$0xf]  ;;  %v6581_v36 = vld [vmem:[#allocation2 + $0x279] ss:$2 sm:$0xf] }
 0x475   : > { %v6589_v3 = vmax.f32 %v6583_v48, %v6586_v28  ;;  %v6587_v14 = vmax.f32 %v6575_v16, %v6581_v36  ;;  %6290 = vst [vmem:[#allocation2 + $0x288] sm:$0xff] %v6200_v49  ;;  %v4708_v17 = vpop.f32.mrb[180].mxu1  ;;  %v5901_v40 = vpop.f32.mrb[180].mxu0 }
 0x476   : > { %v4815_v41 = vadd.f32 %v4708_v17, %v10293_v31  ;;  %v6014_v12 = vadd.f32 %v5901_v40, %v4813_v1  ;;  %v4710_v8 = vpop.f32.mrb[181].mxu1  ;;  %v5903_v62 = vpop.f32.mrb[181].mxu0 }
 0x477   : > { %7574 = vst.msk [vmem:[%s9806_s7 + $0xb0] sm:$0xff] %vm6331_vm1, %v6589_v3  ;;  %v6590_v19 = vmax.f32 %v6584_v50, %v6587_v14  ;;  %v4711_v56 = vpop.f32.mrb[182].mxu1  ;;  %v5904_v6 = vpop.f32.mrb[182].mxu0 }
 0x478   : > { %v6111_v22 = vadd.f32 %v10068_v2, %v6014_v12  ;;  %v4816_v38 = vadd.f32 %v4711_v56, %v10294_v44  ;;  %v6015_v42 = vadd.f32 %v5904_v6, %v4814_v18  ;;  %v5906_v7 = vpop.f32.mrb[183].mxu0  ;;  %v4713_v0 = vpop.f32.mrb[183].mxu1 }
 0x479   : > { %7575 = vst.msk [vmem:[%s9806_s7 + $0xb8] sm:$0x3] %vm6334_vm2, %v6590_v19 }
 0x47a   : > { %v6201_v60 = vmax.f32 %v6111_v22, 0.0  ;;  %v6112_v30 = vadd.f32 %v10068_v2, %v6015_v42 }
 0x47c   : > { %6291 = vst [vmem:[#allocation2 + $0x290] sm:$0xff] %v6201_v60  ;;  %v6202_v47 = vmax.f32 %v6112_v30, 0.0  ;;  %v4716_v26 = vpop.f32.mrb[184].mxu1  ;;  %v5909_v46 = vpop.f32.mrb[184].mxu0  ;;  %v6596_v3 = vld [vmem:[#allocation2 + $0x280] ss:$2 sm:$0xff] }
 0x47d   : > { %v4817_v23 = vadd.f32 %v4716_v26, %v9714_v21  ;;  %v4718_v43 = vpop.f32.mrb[185].mxu1  ;;  %v6016_v5 = vadd.f32 %v5909_v46, %v4815_v41  ;;  %v5911_v29 = vpop.f32.mrb[185].mxu0  ;;  %v6602_v14 = vld [vmem:[#allocation2 + $0x281] ss:$2 sm:$0xff] }
 0x47e   : > { %6292 = vst [vmem:[#allocation2 + $0x298] sm:$0xff] %v6202_v47  ;;  %v4719_v37 = vpop.f32.mrb[186].mxu1  ;;  %v5912_v34 = vpop.f32.mrb[186].mxu0  ;;  %v6619_v12 = vmax.f32 %v6596_v3, %v6602_v14 }
 0x47f   : > { %v4818_v63 = vadd.f32 %v4719_v37, %v10295_v39  ;;  %v4721_v33 = vpop.f32.mrb[187].mxu1  ;;  %v6113_v4 = vadd.f32 %v10068_v2, %v6016_v5  ;;  %v6017_v32 = vadd.f32 %v5912_v34, %v4816_v38  ;;  %v5914_v53 = vpop.f32.mrb[187].mxu0 }
 0x481   : > { %v6203_v61 = vmax.f32 %v6113_v4, 0.0  ;;  %v6114_v1 = vadd.f32 %v10068_v2, %v6017_v32 }
 0x483   : > { %6293 = vst [vmem:[#allocation2 + $0x2a0] sm:$0xff] %v6203_v61  ;;  %v6204_v45 = vmax.f32 %v6114_v1, 0.0 }
 0x484   : > { %v4724_v21 = vpop.f32.mrb[188].mxu1  ;;  %v5917_v58 = vpop.f32.mrb[188].mxu0 }
 0x485   : > { %v4819_v51 = vadd.f32 %v4724_v21, %v10296_v24  ;;  %v6018_v13 = vadd.f32 %v5917_v58, %v4817_v23  ;;  %v4726_v9 = vpop.f32.mrb[189].mxu1  ;;  %v5919_v59 = vpop.f32.mrb[189].mxu0  ;;  %6294 = vst [vmem:[#allocation2 + $0x2a8] sm:$0xff] %v6204_v45  ;;  %v6598_v56 = vld [vmem:[#allocation2 + $0x290] ss:$2 sm:$0xff] }
 0x486   : > { %v4727_v10 = vpop.f32.mrb[190].mxu1  ;;  %v5920_v18 = vpop.f32.mrb[190].mxu0  ;;  %v6604_v6 = vld [vmem:[#allocation2 + $0x291] ss:$2 sm:$0xff] }
 0x487   : > { %v6115_v54 = vadd.f32 %v10068_v2, %v6018_v13  ;;  %v4820_v25 = vadd.f32 %v4727_v10, %v10297_v35  ;;  %v6019_v27 = vadd.f32 %v5920_v18, %v4818_v63  ;;  %v5922_v52 = vpop.f32.mrb[191].mxu0  ;;  %v4729_v15 = vpop.f32.mrb[191].mxu1  ;;  %v6620_v7 = vmax.f32 %v6598_v56, %v6604_v6 }
 0x489   : > { %v6205_v11 = vmax.f32 %v6115_v54, 0.0  ;;  %v6116_v55 = vadd.f32 %v10068_v2, %v6019_v27 }
 0x48a   : > { %v6600_v22 = vld [vmem:[#allocation2 + $0x2a0] ss:$2 sm:$0xf]  ;;  %v6606_v44 = vld [vmem:[#allocation2 + $0x2a1] ss:$2 sm:$0xf] }
 0x48b   : > { %6295 = vst [vmem:[#allocation2 + $0x2b0] sm:$0xff] %v6205_v11  ;;  %v6206_v57 = vmax.f32 %v6116_v55, 0.0  ;;  %v6621_v30 = vmax.f32 %v6600_v22, %v6606_v44 }
 0x48c   : > { %v5925_v20 = vpop.f32.mrb[192].mxu0 }
 0x48d   : > { %v6020_v48 = vadd.f32 %v5925_v20, %v4819_v51  ;;  %v5927_v28 = vpop.f32.mrb[193].mxu0  ;;  %6296 = vst [vmem:[#allocation2 + $0x2b8] sm:$0xff] %v6206_v57 }
 0x48e   : > { %v5928_v49 = vpop.f32.mrb[194].mxu0 }
 0x48f   : > { %v6117_v16 = vadd.f32 %v10068_v2, %v6020_v48  ;;  %v6021_v36 = vadd.f32 %v5928_v49, %v4820_v25  ;;  %v5930_v50 = vpop.f32.mrb[195].mxu0 }
 0x491   : > { %v6207_v17 = vmax.f32 %v6117_v16, 0.0  ;;  %v6118_v40 = vadd.f32 %v10068_v2, %v6021_v36 }
 0x492   : > { %v6608_v31 = vld [vmem:[#allocation2 + $0x2a8] ss:$2 sm:$0xff]  ;;  %v6614_v41 = vld [vmem:[#allocation2 + $0x2a9] ss:$2 sm:$0xff] }
 0x493   : > { %v6622_v8 = vmax.f32 %v6608_v31, %v6614_v41  ;;  %6297 = vst [vmem:[#allocation2 + $0x2c0] sm:$0xff] %v6207_v17  ;;  %v6208_v62 = vmax.f32 %v6118_v40, 0.0 }
 0x495   : > { %v6625_v19 = vmax.f32 %v6619_v12, %v6622_v8  ;;  %6298 = vst [vmem:[#allocation2 + $0x2c8] sm:$0xff] %v6208_v62 }
 0x497   : > { %7576 = vst.msk [vmem:[%s9806_s7 + $0xc0] sm:$0xff] %vm6331_vm1, %v6625_v19 }
 0x49a   : > { %v6610_v38 = vld [vmem:[#allocation2 + $0x2b8] ss:$2 sm:$0xff]  ;;  %v6616_v42 = vld [vmem:[#allocation2 + $0x2b9] ss:$2 sm:$0xff] }
 0x49b   : > { %v6623_v2 = vmax.f32 %v6610_v38, %v6616_v42 }
 0x49c   : > { %v6612_v0 = vld [vmem:[#allocation2 + $0x2c8] ss:$2 sm:$0xf]  ;;  %v6618_v60 = vld [vmem:[#allocation2 + $0x2c9] ss:$2 sm:$0xf] }
 0x49d   : > { %v6626_v47 = vmax.f32 %v6620_v7, %v6623_v2  ;;  %v6624_v26 = vmax.f32 %v6612_v0, %v6618_v60 }
 0x49f   : > { %7577 = vst.msk [vmem:[%s9806_s7 + $0xc8] sm:$0xff] %vm6331_vm1, %v6626_v47  ;;  %v6627_v23 = vmax.f32 %v6621_v30, %v6624_v26 }
 0x4a1   : > { %7578 = vst.msk [vmem:[%s9806_s7 + $0xd0] sm:$0x3] %vm6334_vm2, %v6627_v23 }
 0x4a2 PF: > { %s13_s16 = sadd.s32 1, %s8415_s16   ;;  %s10298_s12 = smov %s8407_s14 }
 0x4a3   : > { %p10_p7 = scmp.ge.s32.totalorder %s13_s16, 6   ;;  %s10299_s13 = smov %s8411_s15 }
 0x4a4   : > { %s10300_s14 = smov %s10303_s17  ;;  %s10301_s15 = smov %s10307_s18 }
 0x4a5   :  { %12 = sbr.rel (!%p10_p7) target bundleno = 3 (0x3), region = 186 }

</bundles_post_ra>
